<compile_context>
chip_gen: v5e
topology: v5e:2x2
jax: 0.10.0
libtpu: 0.0.40
codegen_flags: <defaults>
</compile_context>

<pallas_src>
import functools

import jax
import jax.numpy as jnp
from jax import lax
from jax.experimental import pallas as pl
from jax.experimental.pallas import tpu as pltpu


def _round_up(n, m):
    return (n + m - 1) // m * m


def _fused_kernel(x_ref,
                  w1_ref, s1_ref, b1_ref,
                  w2_ref, s2_ref, b2_ref,
                  wd_ref, sd_ref, bd_ref,
                  w3_ref, s3_ref, b3_ref,
                  o_ref,
                  *, matmul_dtype):
    BB, H, W, Cin = x_ref.shape
    CpI = w1_ref.shape[0]          # lane-padded input-channel width
    CpM = w1_ref.shape[1]          # lane-padded mid-channel width
    CpO = w3_ref.shape[1]          # lane-padded output-channel width
    M = BB * H * W

    # Whole batch-block as one (M, C) matrix: batch folded into the MXU M axis.
    # Channel padding to the lane-dense width happens here (cheap VPU pad in
    # VMEM) instead of in HBM, keeping input HBM traffic at native Cin width.
    x = x_ref[...]
    xp = jnp.pad(x, ((0, 0), (0, 0), (0, 0), (0, CpI - Cin)))
    xf = xp.reshape(M, CpI).astype(matmul_dtype)

    # ---- conv1 (1x1) + bn1 + relu -------------------------------------------
    y1 = jnp.dot(xf, w1_ref[...].astype(matmul_dtype),
                 preferred_element_type=jnp.float32)
    y1 = jnp.maximum(y1 * s1_ref[...] + b1_ref[...], 0.0)

    # ---- conv2 (3x3, pad=1) + bn2 as ONE im2col matmul ------------------------
    y1v = y1.reshape(BB, H, W, CpM)
    y1p = jnp.pad(y1v, ((0, 0), (1, 1), (1, 1), (0, 0)))
    # (BB, H, W, 9*CpM): 9 shifted views concatenated along the lane axis;
    # (dy, dx) ordering matches the (3, 3, CpM, CpM) -> (9*CpM, CpM) weight reshape.
    patches = jnp.concatenate(
        [y1p[:, dy:dy + H, dx:dx + W, :] for dy in range(3) for dx in range(3)],
        axis=-1)
    patches = patches.reshape(M, 9 * CpM).astype(matmul_dtype)
    y2 = jnp.dot(patches, w2_ref[...].astype(matmul_dtype),
                 preferred_element_type=jnp.float32)
    y2 = y2 * s2_ref[...] + b2_ref[...]

    # ---- downsample (1x1) + bn_downsample -------------------------------------
    res = jnp.dot(xf, wd_ref[...].astype(matmul_dtype),
                  preferred_element_type=jnp.float32)
    res = res * sd_ref[...] + bd_ref[...]

    # ---- residual add + relu ---------------------------------------------------
    y = jnp.maximum(y2 + res, 0.0)

    # ---- final 1x1 conv + bn + relu --------------------------------------------
    y3 = jnp.dot(y.astype(matmul_dtype), w3_ref[...].astype(matmul_dtype),
                 preferred_element_type=jnp.float32)
    y3 = jnp.maximum(y3 * s3_ref[...] + b3_ref[...], 0.0)

    # Lane-dense store: last dim is CpO (multiple of 128) -> unmasked vst.
    o_ref[...] = y3.reshape(BB, H, W, CpO).astype(o_ref.dtype)


def my_module_forward(x, params, *, batch_block=None,
                      matmul_dtype=jnp.float32):
    """x: (B, H, W, Cin) float32 NHWC.  Returns (B, H, W, 2*Cout)."""
    B, H, W, Cin = x.shape
    Cout = params["w1"].shape[1]
    Cout2 = params["w3"].shape[1]

    # Lane-dense (multiple-of-128) channel widths used for compute and weights.
    CpI = _round_up(Cin, 128)
    CpM = _round_up(Cout, 128)
    CpO = _round_up(Cout2, 128)

    # Fold several images into one grid step (whole batch when small).
    BB = batch_block if batch_block is not None else min(B, 8)
    Bp = _round_up(B, BB)

    def pad_to(a, shape):
        pads = [(0, t - s) for s, t in zip(a.shape, shape)]
        return jnp.pad(a.astype(jnp.float32), pads)

    # Only the batch dim of x is padded (to a multiple of the batch block);
    # channel padding to 128 lanes happens inside the kernel in VMEM.
    xb = x if Bp == B else jnp.pad(x, ((0, Bp - B), (0, 0), (0, 0), (0, 0)))

    w1 = pad_to(params["w1"], (CpI, CpM))
    wd = pad_to(params["wd"], (CpI, CpM))
    # (3, 3, Cout_in, Cout_out) HWIO  ->  (9*CpM, CpM) im2col weight
    w2 = pad_to(params["w2"], (3, 3, CpM, CpM)).reshape(9 * CpM, CpM)
    w3 = pad_to(params["w3"], (CpM, CpO))

    s1 = pad_to(params["s1"], (1, CpM)); b1 = pad_to(params["b1"], (1, CpM))
    s2 = pad_to(params["s2"], (1, CpM)); b2 = pad_to(params["b2"], (1, CpM))
    sd = pad_to(params["sd"], (1, CpM)); bd = pad_to(params["bd"], (1, CpM))
    s3 = pad_to(params["s3"], (1, CpO)); b3 = pad_to(params["b3"], (1, CpO))

    weights = [w1, s1, b1, w2, s2, b2, wd, sd, bd, w3, s3, b3]

    def full_spec(a):
        # Whole array as one block; constant index_map -> stays resident in VMEM.
        return pl.BlockSpec(a.shape, lambda b, nd=a.ndim: (0,) * nd)

    # Advisory cost estimate for XLA scheduling around the custom call.
    M = Bp * H * W
    flops = 2 * M * (CpI * CpM + 9 * CpM * CpM + CpI * CpM + CpM * CpO)
    bytes_accessed = 4 * (xb.size + Bp * H * W * CpO
                          + sum(w.size for w in weights))
    cost = pl.CostEstimate(flops=flops, transcendentals=0,
                           bytes_accessed=bytes_accessed)

    kernel = functools.partial(_fused_kernel, matmul_dtype=matmul_dtype)

    out = pl.pallas_call(
        kernel,
        out_shape=jax.ShapeDtypeStruct((Bp, H, W, CpO), x.dtype),
        grid_spec=pltpu.PrefetchScalarGridSpec(
            num_scalar_prefetch=0,
            grid=(Bp // BB,),
            # x block: last two dims equal the full array dims (W, Cin) so the
            # (8,128) divisibility constraint does not apply.
            in_specs=[pl.BlockSpec((BB, H, W, Cin), lambda b: (b, 0, 0, 0))]
                     + [full_spec(w) for w in weights],
            out_specs=pl.BlockSpec((BB, H, W, CpO), lambda b: (b, 0, 0, 0)),
        ),
        compiler_params=pltpu.CompilerParams(
            dimension_semantics=("parallel",),
            vmem_limit_bytes=32 * 1024 * 1024),
        cost_estimate=cost,
    )(xb, *weights)

    # Strip batch/channel padding (plain-JAX slice outside the kernel).
    return out[:B, :, :, :Cout2]


def _fold_bn(gamma, beta, mean, var, eps=1e-5):
    scale = gamma / jnp.sqrt(var + eps)
    bias = beta - mean * scale
    return scale.reshape(1, -1), bias.reshape(1, -1)


def make_params(key, in_channels, out_channels):
    """Deterministic synthetic parameters matching the PyTorch module shapes."""
    ks = jax.random.split(key, 16)
    Cin, Cout = in_channels, out_channels

    def bn(k, c):
        k1, k2, k3, k4 = jax.random.split(k, 4)
        gamma = jax.random.uniform(k1, (c,), jnp.float32, 0.5, 1.5)
        beta = jax.random.normal(k2, (c,), jnp.float32) * 0.1
        mean = jax.random.normal(k3, (c,), jnp.float32) * 0.1
        var = jax.random.uniform(k4, (c,), jnp.float32, 0.5, 1.5)
        return _fold_bn(gamma, beta, mean, var)

    # PyTorch-layout conv weights, then transposed to matmul / HWIO layout.
    w1 = jax.random.normal(ks[0], (Cout, Cin, 1, 1), jnp.float32) * 0.2
    w2 = jax.random.normal(ks[1], (Cout, Cout, 3, 3), jnp.float32) * 0.1
    wd = jax.random.normal(ks[2], (Cout, Cin, 1, 1), jnp.float32) * 0.2
    w3 = jax.random.normal(ks[3], (2 * Cout, Cout, 1, 1), jnp.float32) * 0.2

    s1, b1 = bn(ks[4], Cout)
    s2, b2 = bn(ks[5], Cout)
    sd, bd = bn(ks[6], Cout)
    s3, b3 = bn(ks[7], 2 * Cout)

    params = {
        "w1": jnp.transpose(w1[:, :, 0, 0], (1, 0)),        # (Cin, Cout)
        "s1": s1, "b1": b1,
        "w2": jnp.transpose(w2, (2, 3, 1, 0)),               # (3,3,Cin,Cout) HWIO
        "s2": s2, "b2": b2,
        "wd": jnp.transpose(wd[:, :, 0, 0], (1, 0)),
        "sd": sd, "bd": bd,
        "w3": jnp.transpose(w3[:, :, 0, 0], (1, 0)),         # (Cout, 2*Cout)
        "s3": s3, "b3": b3,
    }
    return params


def reference_forward(x, params):
    """Plain-JAX reference (NHWC) for correctness checking."""
    def conv1x1(a, w):
        return jnp.einsum("bhwc,cd->bhwd", a, w)

    def conv3x3(a, w):
        return lax.conv_general_dilated(
            a, w, window_strides=(1, 1), padding="SAME",
            dimension_numbers=("NHWC", "HWIO", "NHWC"))

    def affine(a, s, b):
        return a * s.reshape(1, 1, 1, -1) + b.reshape(1, 1, 1, -1)

    y1 = jnp.maximum(affine(conv1x1(x, params["w1"]), params["s1"], params["b1"]), 0.0)
    y2 = affine(conv3x3(y1, params["w2"]), params["s2"], params["b2"])
    res = affine(conv1x1(x, params["wd"]), params["sd"], params["bd"])
    y = jnp.maximum(y2 + res, 0.0)
    y3 = jnp.maximum(affine(conv1x1(y, params["w3"]), params["s3"], params["b3"]), 0.0)
    return y3


if __name__ == "__main__":
    key = jax.random.PRNGKey(0)
    k_x, k_p = jax.random.split(key)

    B, H, W = 2, 16, 16
    in_channels, out_channels = 4, 8

    # NHWC input (equivalent PyTorch input would be NCHW (B, Cin, H, W)).
    x = jax.random.normal(k_x, (B, H, W, in_channels), jnp.float32)
    params = make_params(k_p, in_channels, out_channels)

    out = jax.block_until_ready(my_module_forward(x, params))
    ref = jax.block_until_ready(reference_forward(x, params))

    assert out.shape == (B, H, W, 2 * out_channels)
    assert jnp.allclose(out, ref, atol=1e-4, rtol=1e-4), "mismatch vs reference"

    print("KERNEL_OK")
</pallas_src>

<mosaic_0001>
module attributes {stable_mosaic.version = 11 : i64} {
  func.func @_fused_kernel(%arg0: i32, %arg1: memref<2x16x16x4xf32, #tpu.memory_space<vmem>>, %arg2: memref<128x128xf32, #tpu.memory_space<vmem>>, %arg3: memref<1x128xf32, #tpu.memory_space<vmem>>, %arg4: memref<1x128xf32, #tpu.memory_space<vmem>>, %arg5: memref<1152x128xf32, #tpu.memory_space<vmem>>, %arg6: memref<1x128xf32, #tpu.memory_space<vmem>>, %arg7: memref<1x128xf32, #tpu.memory_space<vmem>>, %arg8: memref<128x128xf32, #tpu.memory_space<vmem>>, %arg9: memref<1x128xf32, #tpu.memory_space<vmem>>, %arg10: memref<1x128xf32, #tpu.memory_space<vmem>>, %arg11: memref<128x128xf32, #tpu.memory_space<vmem>>, %arg12: memref<1x128xf32, #tpu.memory_space<vmem>>, %arg13: memref<1x128xf32, #tpu.memory_space<vmem>>, %arg14: memref<2x16x16x128xf32, #tpu.memory_space<vmem>>) attributes {dimension_semantics = [#tpu.dimension_semantics<parallel>], iteration_bounds = array<i64: 1>, scalar_prefetch = 0 : i64, scratch_operands = 0 : i64, tpu.core_type = #tpu.core_type<tc>, window_params = [{transform_indices = @transform_0, window_bounds = array<i64: 2, 16, 16, 4>}, {pipeline_mode = #tpu.pipeline_mode<synchronous>, transform_indices = @transform_1, window_bounds = array<i64: 128, 128>}, {pipeline_mode = #tpu.pipeline_mode<synchronous>, transform_indices = @transform_2, window_bounds = array<i64: 1, 128>}, {pipeline_mode = #tpu.pipeline_mode<synchronous>, transform_indices = @transform_3, window_bounds = array<i64: 1, 128>}, {pipeline_mode = #tpu.pipeline_mode<synchronous>, transform_indices = @transform_4, window_bounds = array<i64: 1152, 128>}, {pipeline_mode = #tpu.pipeline_mode<synchronous>, transform_indices = @transform_5, window_bounds = array<i64: 1, 128>}, {pipeline_mode = #tpu.pipeline_mode<synchronous>, transform_indices = @transform_6, window_bounds = array<i64: 1, 128>}, {pipeline_mode = #tpu.pipeline_mode<synchronous>, transform_indices = @transform_7, window_bounds = array<i64: 128, 128>}, {pipeline_mode = #tpu.pipeline_mode<synchronous>, transform_indices = @transform_8, window_bounds = array<i64: 1, 128>}, {pipeline_mode = #tpu.pipeline_mode<synchronous>, transform_indices = @transform_9, window_bounds = array<i64: 1, 128>}, {pipeline_mode = #tpu.pipeline_mode<synchronous>, transform_indices = @transform_10, window_bounds = array<i64: 128, 128>}, {pipeline_mode = #tpu.pipeline_mode<synchronous>, transform_indices = @transform_11, window_bounds = array<i64: 1, 128>}, {pipeline_mode = #tpu.pipeline_mode<synchronous>, transform_indices = @transform_12, window_bounds = array<i64: 1, 128>}, {transform_indices = @transform_13, window_bounds = array<i64: 2, 16, 16, 128>}]} {
    %c0 = arith.constant 0 : index
    %c0_0 = arith.constant 0 : index
    %c0_1 = arith.constant 0 : index
    %c0_2 = arith.constant 0 : index
    %0 = vector.load %arg1[%c0, %c0_0, %c0_1, %c0_2] : memref<2x16x16x4xf32, #tpu.memory_space<vmem>>, vector<2x16x16x4xf32>
    %c0_i32 = arith.constant 0 : i32
    %1 = arith.sitofp %c0_i32 : i32 to f32
    %2 = vector.broadcast %1 : f32 to vector<2x16x16x124xf32>
    %3 = tpu.concatenate %0, %2 in 3 : vector<2x16x16x4xf32>, vector<2x16x16x124xf32> -> vector<2x16x16x128xf32>
    %4 = vector.shape_cast %3 : vector<2x16x16x128xf32> to vector<512x128xf32>
    %c0_3 = arith.constant 0 : index
    %c0_4 = arith.constant 0 : index
    %5 = vector.load %arg2[%c0_3, %c0_4] : memref<128x128xf32, #tpu.memory_space<vmem>>, vector<128x128xf32>
    %cst = arith.constant dense<0.000000e+00> : vector<512x128xf32>
    %6 = tpu.matmul %4, %5, %cst {dimension_numbers = #tpu.dot_dimension_numbers<[1], [0], [0], [1], [0, 0, 1, 1], [], []>} : vector<512x128xf32>, vector<128x128xf32>, vector<512x128xf32> -> vector<512x128xf32>
    %c0_5 = arith.constant 0 : index
    %c0_6 = arith.constant 0 : index
    %7 = vector.load %arg3[%c0_5, %c0_6] : memref<1x128xf32, #tpu.memory_space<vmem>>, vector<1x128xf32>
    %8 = vector.broadcast %7 : vector<1x128xf32> to vector<512x128xf32>
    %9 = arith.mulf %6, %8 : vector<512x128xf32>
    %c0_7 = arith.constant 0 : index
    %c0_8 = arith.constant 0 : index
    %10 = vector.load %arg4[%c0_7, %c0_8] : memref<1x128xf32, #tpu.memory_space<vmem>>, vector<1x128xf32>
    %11 = vector.broadcast %10 : vector<1x128xf32> to vector<512x128xf32>
    %12 = arith.addf %9, %11 : vector<512x128xf32>
    %cst_9 = arith.constant 0.000000e+00 : f32
    %13 = vector.broadcast %cst_9 : f32 to vector<512x128xf32>
    %14 = arith.maximumf %12, %13 : vector<512x128xf32>
    %15 = vector.shape_cast %14 : vector<512x128xf32> to vector<2x16x16x128xf32>
    %c0_i32_10 = arith.constant 0 : i32
    %16 = arith.sitofp %c0_i32_10 : i32 to f32
    %17 = vector.broadcast %16 : f32 to vector<2x1x16x128xf32>
    %18 = tpu.concatenate %17, %15 in 1 : vector<2x1x16x128xf32>, vector<2x16x16x128xf32> -> vector<2x17x16x128xf32>
    %19 = vector.broadcast %16 : f32 to vector<2x1x16x128xf32>
    %20 = tpu.concatenate %18, %19 in 1 : vector<2x17x16x128xf32>, vector<2x1x16x128xf32> -> vector<2x18x16x128xf32>
    %21 = vector.broadcast %16 : f32 to vector<2x18x1x128xf32>
    %22 = tpu.concatenate %21, %20 in 2 : vector<2x18x1x128xf32>, vector<2x18x16x128xf32> -> vector<2x18x17x128xf32>
    %23 = vector.broadcast %16 : f32 to vector<2x18x1x128xf32>
    %24 = tpu.concatenate %22, %23 in 2 : vector<2x18x17x128xf32>, vector<2x18x1x128xf32> -> vector<2x18x18x128xf32>
    %25 = vector.extract_strided_slice %24 {offsets = [0, 0, 0, 0], sizes = [2, 16, 16, 128], strides = [1, 1, 1, 1]} : vector<2x18x18x128xf32> to vector<2x16x16x128xf32>
    %26 = vector.extract_strided_slice %24 {offsets = [0, 0, 1, 0], sizes = [2, 16, 16, 128], strides = [1, 1, 1, 1]} : vector<2x18x18x128xf32> to vector<2x16x16x128xf32>
    %27 = vector.extract_strided_slice %24 {offsets = [0, 0, 2, 0], sizes = [2, 16, 16, 128], strides = [1, 1, 1, 1]} : vector<2x18x18x128xf32> to vector<2x16x16x128xf32>
    %28 = vector.extract_strided_slice %24 {offsets = [0, 1, 0, 0], sizes = [2, 16, 16, 128], strides = [1, 1, 1, 1]} : vector<2x18x18x128xf32> to vector<2x16x16x128xf32>
    %29 = vector.extract_strided_slice %24 {offsets = [0, 1, 1, 0], sizes = [2, 16, 16, 128], strides = [1, 1, 1, 1]} : vector<2x18x18x128xf32> to vector<2x16x16x128xf32>
    %30 = vector.extract_strided_slice %24 {offsets = [0, 1, 2, 0], sizes = [2, 16, 16, 128], strides = [1, 1, 1, 1]} : vector<2x18x18x128xf32> to vector<2x16x16x128xf32>
    %31 = vector.extract_strided_slice %24 {offsets = [0, 2, 0, 0], sizes = [2, 16, 16, 128], strides = [1, 1, 1, 1]} : vector<2x18x18x128xf32> to vector<2x16x16x128xf32>
    %32 = vector.extract_strided_slice %24 {offsets = [0, 2, 1, 0], sizes = [2, 16, 16, 128], strides = [1, 1, 1, 1]} : vector<2x18x18x128xf32> to vector<2x16x16x128xf32>
    %33 = vector.extract_strided_slice %24 {offsets = [0, 2, 2, 0], sizes = [2, 16, 16, 128], strides = [1, 1, 1, 1]} : vector<2x18x18x128xf32> to vector<2x16x16x128xf32>
    %34 = tpu.concatenate %25, %26, %27, %28, %29, %30, %31, %32, %33 in 3 : vector<2x16x16x128xf32>, vector<2x16x16x128xf32>, vector<2x16x16x128xf32>, vector<2x16x16x128xf32>, vector<2x16x16x128xf32>, vector<2x16x16x128xf32>, vector<2x16x16x128xf32>, vector<2x16x16x128xf32>, vector<2x16x16x128xf32> -> vector<2x16x16x1152xf32>
    %35 = vector.shape_cast %34 : vector<2x16x16x1152xf32> to vector<512x1152xf32>
    %c0_11 = arith.constant 0 : index
    %c0_12 = arith.constant 0 : index
    %36 = vector.load %arg5[%c0_11, %c0_12] : memref<1152x128xf32, #tpu.memory_space<vmem>>, vector<1152x128xf32>
    %cst_13 = arith.constant dense<0.000000e+00> : vector<512x128xf32>
    %37 = tpu.matmul %35, %36, %cst_13 {dimension_numbers = #tpu.dot_dimension_numbers<[1], [0], [0], [1], [0, 0, 1, 1], [], []>} : vector<512x1152xf32>, vector<1152x128xf32>, vector<512x128xf32> -> vector<512x128xf32>
    %c0_14 = arith.constant 0 : index
    %c0_15 = arith.constant 0 : index
    %38 = vector.load %arg6[%c0_14, %c0_15] : memref<1x128xf32, #tpu.memory_space<vmem>>, vector<1x128xf32>
    %39 = vector.broadcast %38 : vector<1x128xf32> to vector<512x128xf32>
    %40 = arith.mulf %37, %39 : vector<512x128xf32>
    %c0_16 = arith.constant 0 : index
    %c0_17 = arith.constant 0 : index
    %41 = vector.load %arg7[%c0_16, %c0_17] : memref<1x128xf32, #tpu.memory_space<vmem>>, vector<1x128xf32>
    %42 = vector.broadcast %41 : vector<1x128xf32> to vector<512x128xf32>
    %43 = arith.addf %40, %42 : vector<512x128xf32>
    %c0_18 = arith.constant 0 : index
    %c0_19 = arith.constant 0 : index
    %44 = vector.load %arg8[%c0_18, %c0_19] : memref<128x128xf32, #tpu.memory_space<vmem>>, vector<128x128xf32>
    %cst_20 = arith.constant dense<0.000000e+00> : vector<512x128xf32>
    %45 = tpu.matmul %4, %44, %cst_20 {dimension_numbers = #tpu.dot_dimension_numbers<[1], [0], [0], [1], [0, 0, 1, 1], [], []>} : vector<512x128xf32>, vector<128x128xf32>, vector<512x128xf32> -> vector<512x128xf32>
    %c0_21 = arith.constant 0 : index
    %c0_22 = arith.constant 0 : index
    %46 = vector.load %arg9[%c0_21, %c0_22] : memref<1x128xf32, #tpu.memory_space<vmem>>, vector<1x128xf32>
    %47 = vector.broadcast %46 : vector<1x128xf32> to vector<512x128xf32>
    %48 = arith.mulf %45, %47 : vector<512x128xf32>
    %c0_23 = arith.constant 0 : index
    %c0_24 = arith.constant 0 : index
    %49 = vector.load %arg10[%c0_23, %c0_24] : memref<1x128xf32, #tpu.memory_space<vmem>>, vector<1x128xf32>
    %50 = vector.broadcast %49 : vector<1x128xf32> to vector<512x128xf32>
    %51 = arith.addf %48, %50 : vector<512x128xf32>
    %52 = arith.addf %43, %51 : vector<512x128xf32>
    %cst_25 = arith.constant 0.000000e+00 : f32
    %53 = vector.broadcast %cst_25 : f32 to vector<512x128xf32>
    %54 = arith.maximumf %52, %53 : vector<512x128xf32>
    %c0_26 = arith.constant 0 : index
    %c0_27 = arith.constant 0 : index
    %55 = vector.load %arg11[%c0_26, %c0_27] : memref<128x128xf32, #tpu.memory_space<vmem>>, vector<128x128xf32>
    %cst_28 = arith.constant dense<0.000000e+00> : vector<512x128xf32>
    %56 = tpu.matmul %54, %55, %cst_28 {dimension_numbers = #tpu.dot_dimension_numbers<[1], [0], [0], [1], [0, 0, 1, 1], [], []>} : vector<512x128xf32>, vector<128x128xf32>, vector<512x128xf32> -> vector<512x128xf32>
    %c0_29 = arith.constant 0 : index
    %c0_30 = arith.constant 0 : index
    %57 = vector.load %arg12[%c0_29, %c0_30] : memref<1x128xf32, #tpu.memory_space<vmem>>, vector<1x128xf32>
    %58 = vector.broadcast %57 : vector<1x128xf32> to vector<512x128xf32>
    %59 = arith.mulf %56, %58 : vector<512x128xf32>
    %c0_31 = arith.constant 0 : index
    %c0_32 = arith.constant 0 : index
    %60 = vector.load %arg13[%c0_31, %c0_32] : memref<1x128xf32, #tpu.memory_space<vmem>>, vector<1x128xf32>
    %61 = vector.broadcast %60 : vector<1x128xf32> to vector<512x128xf32>
    %62 = arith.addf %59, %61 : vector<512x128xf32>
    %cst_33 = arith.constant 0.000000e+00 : f32
    %63 = vector.broadcast %cst_33 : f32 to vector<512x128xf32>
    %64 = arith.maximumf %62, %63 : vector<512x128xf32>
    %65 = vector.shape_cast %64 : vector<512x128xf32> to vector<2x16x16x128xf32>
    %c0_34 = arith.constant 0 : index
    %c0_35 = arith.constant 0 : index
    %c0_36 = arith.constant 0 : index
    %c0_37 = arith.constant 0 : index
    %66 = vector.load %arg14[%c0_34, %c0_35, %c0_36, %c0_37] : memref<2x16x16x128xf32, #tpu.memory_space<vmem>>, vector<2x16x16x128xf32>
    tpu.vector_store %arg14[%c0_34, %c0_35, %c0_36, %c0_37], %65 {strides = array<i32>} : memref<2x16x16x128xf32, #tpu.memory_space<vmem>>, vector<2x16x16x128xf32>,
    return
  }
  func.func @transform_0(%arg0: i32) -> (i32, i32, i32, i32) {
    %c0_i32 = arith.constant 0 : i32
    %c0_i32_0 = arith.constant 0 : i32
    %c0_i32_1 = arith.constant 0 : i32
    %c0_i32_2 = arith.constant 0 : i32
    return %arg0, %c0_i32, %c0_i32_0, %c0_i32_1 : i32, i32, i32, i32
  }
  func.func @transform_1(%arg0: i32) -> (i32, i32) {
    %c0_i32 = arith.constant 0 : i32
    %c0_i32_0 = arith.constant 0 : i32
    %c0_i32_1 = arith.constant 0 : i32
    return %c0_i32, %c0_i32_0 : i32, i32
  }
  func.func @transform_2(%arg0: i32) -> (i32, i32) {
    %c0_i32 = arith.constant 0 : i32
    %c0_i32_0 = arith.constant 0 : i32
    %c0_i32_1 = arith.constant 0 : i32
    return %c0_i32, %c0_i32_0 : i32, i32
  }
  func.func @transform_3(%arg0: i32) -> (i32, i32) {
    %c0_i32 = arith.constant 0 : i32
    %c0_i32_0 = arith.constant 0 : i32
    %c0_i32_1 = arith.constant 0 : i32
    return %c0_i32, %c0_i32_0 : i32, i32
  }
  func.func @transform_4(%arg0: i32) -> (i32, i32) {
    %c0_i32 = arith.constant 0 : i32
    %c0_i32_0 = arith.constant 0 : i32
    %c0_i32_1 = arith.constant 0 : i32
    return %c0_i32, %c0_i32_0 : i32, i32
  }
  func.func @transform_5(%arg0: i32) -> (i32, i32) {
    %c0_i32 = arith.constant 0 : i32
    %c0_i32_0 = arith.constant 0 : i32
    %c0_i32_1 = arith.constant 0 : i32
    return %c0_i32, %c0_i32_0 : i32, i32
  }
  func.func @transform_6(%arg0: i32) -> (i32, i32) {
    %c0_i32 = arith.constant 0 : i32
    %c0_i32_0 = arith.constant 0 : i32
    %c0_i32_1 = arith.constant 0 : i32
    return %c0_i32, %c0_i32_0 : i32, i32
  }
  func.func @transform_7(%arg0: i32) -> (i32, i32) {
    %c0_i32 = arith.constant 0 : i32
    %c0_i32_0 = arith.constant 0 : i32
    %c0_i32_1 = arith.constant 0 : i32
    return %c0_i32, %c0_i32_0 : i32, i32
  }
  func.func @transform_8(%arg0: i32) -> (i32, i32) {
    %c0_i32 = arith.constant 0 : i32
    %c0_i32_0 = arith.constant 0 : i32
    %c0_i32_1 = arith.constant 0 : i32
    return %c0_i32, %c0_i32_0 : i32, i32
  }
  func.func @transform_9(%arg0: i32) -> (i32, i32) {
    %c0_i32 = arith.constant 0 : i32
    %c0_i32_0 = arith.constant 0 : i32
    %c0_i32_1 = arith.constant 0 : i32
    return %c0_i32, %c0_i32_0 : i32, i32
  }
  func.func @transform_10(%arg0: i32) -> (i32, i32) {
    %c0_i32 = arith.constant 0 : i32
    %c0_i32_0 = arith.constant 0 : i32
    %c0_i32_1 = arith.constant 0 : i32
    return %c0_i32, %c0_i32_0 : i32, i32
  }
  func.func @transform_11(%arg0: i32) -> (i32, i32) {
    %c0_i32 = arith.constant 0 : i32
    %c0_i32_0 = arith.constant 0 : i32
    %c0_i32_1 = arith.constant 0 : i32
    return %c0_i32, %c0_i32_0 : i32, i32
  }
  func.func @transform_12(%arg0: i32) -> (i32, i32) {
    %c0_i32 = arith.constant 0 : i32
    %c0_i32_0 = arith.constant 0 : i32
    %c0_i32_1 = arith.constant 0 : i32
    return %c0_i32, %c0_i32_0 : i32, i32
  }
  func.func @transform_13(%arg0: i32) -> (i32, i32, i32, i32) {
    %c0_i32 = arith.constant 0 : i32
    %c0_i32_0 = arith.constant 0 : i32
    %c0_i32_1 = arith.constant 0 : i32
    %c0_i32_2 = arith.constant 0 : i32
    return %arg0, %c0_i32, %c0_i32_0, %c0_i32_1 : i32, i32, i32, i32
  }
}

</mosaic_0001>

<bundles_post_ra>
// kernel: tpu_custom_call.1
= control target key start
LH: loop header
LB: loop body
LE: loop exit
PB: predicated region body
PF: predicated region fallthrough
CT: control target
= control target key end

     0   :  { %18 = vsyncpa [#allocation3], 0  ;;  %s8825_s0 = inlined_call_operand.vmem [shape: f32[2,16,16,4], index: 0, kind: input, shape index: {}]   ;;  %s8826_s1 = inlined_call_operand.vmem [shape: f32[128,128], index: 1, kind: input, shape index: {}]   ;;  %s8827_s2 = inlined_call_operand.vmem [shape: f32[1,128], index: 2, kind: input, shape index: {}]   ;;  %s8828_s3 = inlined_call_operand.vmem [shape: f32[1,128], index: 3, kind: input, shape index: {}]   ;;  %s8829_s4 = inlined_call_operand.hbm [shape: f32[1152,128], index: 4, kind: input, shape index: {}]   ;;  %s8830_s5 = inlined_call_operand.vmem [shape: f32[1,128], index: 5, kind: input, shape index: {}]   ;;  %s8831_s6 = inlined_call_operand.vmem [shape: f32[1,128], index: 6, kind: input, shape index: {}]   ;;  %s8832_s7 = inlined_call_operand.vmem [shape: f32[128,128], index: 7, kind: input, shape index: {}]   ;;  %s8833_s8 = inlined_call_operand.vmem [shape: f32[1,128], index: 8, kind: input, shape index: {}]   ;;  %s8834_s9 = inlined_call_operand.vmem [shape: f32[1,128], index: 9, kind: input, shape index: {}]   ;;  %s8835_s10 = inlined_call_operand.vmem [shape: f32[128,128], index: 10, kind: input, shape index: {}]   ;;  %s8836_s11 = inlined_call_operand.vmem [shape: f32[1,128], index: 11, kind: input, shape index: {}]   ;;  %s8837_s12 = inlined_call_operand.vmem [shape: f32[1,128], index: 12, kind: input, shape index: {}]   ;;  %s8838_s13 = inlined_call_operand.hbm [shape: f32[2,16,16,128], index: 13, kind: output, shape index: {}]  }
   0x1   :  { %19 = vsyncpa [#allocation4], 0  ;;  %s32_s27 = sshll.u32 %s8829_s4, 4  ;;  %s5096_s28 = smov [#allocation2]   ;;  %s33_s27 = int_to_ptr.hbm [resolvable:$true] %s32_s27 }
   0x2   :  { %s34_s29 = sshll.u32 %s5096_s28, 4  ;;  %s5097_s30 = smov 128   ;;  %s35_s29 = int_to_ptr.vmem [resolvable:$true] %s34_s29 }
   0x3   :  { %s5098_s14 = smov 8  }
   0x4   :  { %40 = dma.hbm_to_vmem [thread:$0]  %s33_s27, 18432, %s35_s29, [#allocation3], %s5097_s30, %s5097_s30, %s5098_s14  }
   0x5   :  { %5092 = dma.done.wait [#allocation3], 18432  }
   0x6   :  { %5093 = vsyncadd [#allocation3], 4294948864  ;;  %v205_v0 = vld [vmem:[%s8826_s1 + $0x78] sm:$0xff]  ;;  %v204_v1 = vld [vmem:[%s8826_s1 + $0x70] sm:$0xff]  ;;  %vm125_vm0 = vcmask 31744   ;;  %vm680_vm1 = vcmask 1040384  }
   0x7   :  { %206 = vmatpush.msra.mxu0 %v205_v0  ;;  %v203_v2 = vld [vmem:[%s8826_s1 + $0x68] sm:$0xff]  ;;  %v202_v3 = vld [vmem:[%s8826_s1 + $0x60] sm:$0xff]  ;;  %v201_v4 = vld [vmem:[%s8826_s1 + $0x58] sm:$0xff]  ;;  %v5099_v63 = vmov 0.0   ;;  %vm1005_vm3 = vcmask 1046528   ;;  %vm1223_vm4 = vcmask 1045504  }
   0x8   :  { %v200_v5 = vld [vmem:[%s8826_s1 + $0x50] sm:$0xff]  ;;  %v199_v6 = vld [vmem:[%s8826_s1 + $0x48] sm:$0xff]  ;;  %v198_v7 = vld [vmem:[%s8826_s1 + $0x40] sm:$0xff]  ;;  %v5269_v0 = vrot.slane %v5099_v63, 7 }
   0x9   :  { %207 = vmatpush.msra.mxu0 %v204_v1  ;;  %v197_v8 = vld [vmem:[%s8826_s1 + $0x38] sm:$0xff]  ;;  %v196_v9 = vld [vmem:[%s8826_s1 + $0x30] sm:$0xff]  ;;  %v195_v10 = vld [vmem:[%s8826_s1 + $0x28] sm:$0xff] }
   0xa   :  { %v194_v11 = vld [vmem:[%s8826_s1 + $0x20] sm:$0xff]  ;;  %v193_v12 = vld [vmem:[%s8826_s1 + $0x18] sm:$0xff]  ;;  %v192_v13 = vld [vmem:[%s8826_s1 + $0x10] sm:$0xff]  ;;  %9128 = vst [vmem:[#allocation8_spill] sm:$0xff] %v5269_v0 }
   0xb   :  { %208 = vmatpush.msra.mxu0 %v203_v2  ;;  %v191_v14 = vld [vmem:[%s8826_s1 + $0x8] sm:$0xff]  ;;  %v190_v15 = vld [vmem:[%s8826_s1] sm:$0xff]  ;;  %v63_v18 = vld [vmem:[%s8825_s0 + $0x10] sm:$0xff] }
   0xc   :  { %v61_v16 = vld [vmem:[%s8825_s0] sm:$0xff]  ;;  %v62_v17 = vld [vmem:[%s8825_s0 + $0x8] sm:$0xff]  ;;  %v64_v19 = vld [vmem:[%s8825_s0 + $0x18] sm:$0xff] }
   0xd   :  { %209 = vmatpush.msra.mxu0 %v202_v3  ;;  %v65_v20 = vld [vmem:[%s8825_s0 + $0x20] sm:$0xff]  ;;  %v66_v21 = vld [vmem:[%s8825_s0 + $0x28] sm:$0xff]  ;;  %v67_v22 = vld [vmem:[%s8825_s0 + $0x30] sm:$0xff] }
   0xe   :  { %v1488_v23 = vld [vmem:[#allocation2 + $0x78] sm:$0xff]  ;;  %v1487_v25 = vld [vmem:[#allocation2 + $0x70] sm:$0xff]  ;;  %v1486_v26 = vld [vmem:[#allocation2 + $0x68] sm:$0xff] }
   0xf   :  { %210 = vmatpush.msra.mxu0 %v201_v4  ;;  %1617 = vmatpush.msra.mxu1 %v1488_v23  ;;  %v68_v24 = vld [vmem:[%s8825_s0 + $0x38] sm:$0xff]  ;;  %v1485_v27 = vld [vmem:[#allocation2 + $0x60] sm:$0xff]  ;;  %v1483_v30 = vld [vmem:[#allocation2 + $0x50] sm:$0xff] }
  0x10   :  { %v1484_v28 = vld [vmem:[#allocation2 + $0x58] sm:$0xff]  ;;  %v69_v29 = vld [vmem:[%s8825_s0 + $0x40] sm:$0xff]  ;;  %v1482_v32 = vld [vmem:[#allocation2 + $0x48] sm:$0xff] }
  0x11   :  { %211 = vmatpush.msra.mxu0 %v200_v5  ;;  %1618 = vmatpush.msra.mxu1 %v1487_v25  ;;  %v1504_v31 = vld [vmem:[#allocation2 + $0xf8] sm:$0xff]  ;;  %v1503_v33 = vld [vmem:[#allocation2 + $0xf0] sm:$0xff]  ;;  %v1481_v35 = vld [vmem:[#allocation2 + $0x40] sm:$0xff]  ;;  %v910_v25 = vsel %vm680_vm1, %v5269_v0, 0.0 }
  0x12   :  { %1826 = vmatpush.msra.mxu2 %v1504_v31  ;;  %v1520_v34 = vld [vmem:[#allocation2 + $0x178] sm:$0xff]  ;;  %v1502_v36 = vld [vmem:[#allocation2 + $0xe8] sm:$0xff]  ;;  %v1519_v37 = vld [vmem:[#allocation2 + $0x170] sm:$0xff] }
  0x13   :  { %212 = vmatpush.msra.mxu0 %v199_v6  ;;  %1619 = vmatpush.msra.mxu1 %v1486_v26  ;;  %v1518_v38 = vld [vmem:[#allocation2 + $0x168] sm:$0xff]  ;;  %v1480_v39 = vld [vmem:[#allocation2 + $0x38] sm:$0xff]  ;;  %v1501_v40 = vld [vmem:[#allocation2 + $0xe0] sm:$0xff] }
  0x14   :  { %2035 = vmatpush.msra.mxu3 %v1520_v34  ;;  %1827 = vmatpush.msra.mxu2 %v1503_v33  ;;  %v70_v41 = vld [vmem:[%s8825_s0 + $0x48] sm:$0xff]  ;;  %v1479_v42 = vld [vmem:[#allocation2 + $0x30] sm:$0xff]  ;;  %v1500_v43 = vld [vmem:[#allocation2 + $0xd8] sm:$0xff] }
  0x15   :  { %213 = vmatpush.msra.mxu0 %v198_v7  ;;  %1620 = vmatpush.msra.mxu1 %v1485_v27  ;;  %v1517_v44 = vld [vmem:[#allocation2 + $0x160] sm:$0xff]  ;;  %v1478_v45 = vld [vmem:[#allocation2 + $0x28] sm:$0xff]  ;;  %v1499_v46 = vld [vmem:[#allocation2 + $0xd0] sm:$0xff]  ;;  %v1009_v27 = vrot.slane %v910_v25, 1 }
  0x16   :  { %2036 = vmatpush.msra.mxu3 %v1519_v37  ;;  %1828 = vmatpush.msra.mxu2 %v1502_v36  ;;  %v1516_v47 = vld [vmem:[#allocation2 + $0x158] sm:$0xff]  ;;  %v1477_v48 = vld [vmem:[#allocation2 + $0x20] sm:$0xff]  ;;  %v1498_v49 = vld [vmem:[#allocation2 + $0xc8] sm:$0xff] }
  0x17   :  { %214 = vmatpush.msra.mxu0 %v197_v8  ;;  %1621 = vmatpush.msra.mxu1 %v1484_v28  ;;  %v1515_v50 = vld [vmem:[#allocation2 + $0x150] sm:$0xff]  ;;  %v1476_v51 = vld [vmem:[#allocation2 + $0x18] sm:$0xff]  ;;  %v1497_v52 = vld [vmem:[#allocation2 + $0xc0] sm:$0xff] }
  0x18   :  { %2037 = vmatpush.msra.mxu3 %v1518_v38  ;;  %1829 = vmatpush.msra.mxu2 %v1501_v40  ;;  %v71_v53 = vld [vmem:[%s8825_s0 + $0x50] sm:$0xff]  ;;  %v1514_v54 = vld [vmem:[#allocation2 + $0x148] sm:$0xff]  ;;  %v1496_v56 = vld [vmem:[#allocation2 + $0xb8] sm:$0xff] }
  0x19   :  { %215 = vmatpush.msra.mxu0 %v196_v9  ;;  %1622 = vmatpush.msra.mxu1 %v1483_v30  ;;  %v1475_v55 = vld [vmem:[#allocation2 + $0x10] sm:$0xff]  ;;  %v1513_v57 = vld [vmem:[#allocation2 + $0x140] sm:$0xff]  ;;  %v1474_v58 = vld [vmem:[#allocation2 + $0x8] sm:$0xff] }
  0x1a   :  { %1830 = vmatpush.msra.mxu2 %v1500_v43  ;;  %2038 = vmatpush.msra.mxu3 %v1517_v44  ;;  %v1495_v59 = vld [vmem:[#allocation2 + $0xb0] sm:$0xff]  ;;  %v1512_v60 = vld [vmem:[#allocation2 + $0x138] sm:$0xff]  ;;  %v1473_v61 = vld [vmem:[#allocation2] sm:$0xff] }
  0x1b   :  { %216 = vmatpush.msra.mxu0 %v195_v10  ;;  %1623 = vmatpush.msra.mxu1 %v1482_v32  ;;  %v1494_v62 = vld [vmem:[#allocation2 + $0xa8] sm:$0xff]  ;;  %v1511_v1 = vld [vmem:[#allocation2 + $0x130] sm:$0xff]  ;;  %vm5272_vm2 = vmneg %vm680_vm1 }
  0x1c   :  { %1831 = vmatpush.msra.mxu2 %v1499_v46  ;;  %2039 = vmatpush.msra.mxu3 %v1516_v47  ;;  %v1493_v3 = vld [vmem:[#allocation2 + $0xa0] sm:$0xff]  ;;  %v72_v4 = vld [vmem:[%s8825_s0 + $0x58] sm:$0xff]  ;;  %v1510_v5 = vld [vmem:[#allocation2 + $0x128] sm:$0xff] }
  0x1d   :  { %217 = vmatpush.msra.mxu0 %v194_v11  ;;  %1624 = vmatpush.msra.mxu1 %v1481_v35  ;;  %v1492_v6 = vld [vmem:[#allocation2 + $0x98] sm:$0xff]  ;;  %v1509_v7 = vld [vmem:[#allocation2 + $0x120] sm:$0xff]  ;;  %v1491_v8 = vld [vmem:[#allocation2 + $0x90] sm:$0xff] }
  0x1e   :  { %1832 = vmatpush.msra.mxu2 %v1498_v49  ;;  %2040 = vmatpush.msra.mxu3 %v1515_v50  ;;  %v1508_v9 = vld [vmem:[#allocation2 + $0x118] sm:$0xff]  ;;  %v1490_v10 = vld [vmem:[#allocation2 + $0x88] sm:$0xff]  ;;  %v1507_v11 = vld [vmem:[#allocation2 + $0x110] sm:$0xff] }
  0x1f   :  { %218 = vmatpush.msra.mxu0 %v193_v12  ;;  %1625 = vmatpush.msra.mxu1 %v1480_v39  ;;  %v877_v12 = vsel %vm680_vm1, 0.0, %v5269_v0  ;;  %v1568_v23 = vld [vmem:[#allocation2 + $0x2f8] sm:$0xff]  ;;  %v74_v26 = vld [vmem:[%s8825_s0 + $0x68] sm:$0xff]  ;;  %v75_v32 = vld [vmem:[%s8825_s0 + $0x70] sm:$0xff] }
  0x20   :  { %1833 = vmatpush.msra.mxu2 %v1497_v52  ;;  %2041 = vmatpush.msra.mxu3 %v1514_v54  ;;  %v1552_v31 = vld [vmem:[#allocation2 + $0x278] sm:$0xff]  ;;  %v5325_v34 = vld [vmem:[%s8827_s2] ss:$0 sm:$0xff]  ;;  %v1535_v43 = vld [vmem:[#allocation2 + $0x1f0] sm:$0xff] }
  0x21   :  { %219 = vmatpush.msra.mxu0 %v192_v13  ;;  %1626 = vmatpush.msra.mxu1 %v1479_v42  ;;  %v73_v13 = vld [vmem:[%s8825_s0 + $0x60] sm:$0xff]  ;;  %v76_v33 = vld [vmem:[%s8825_s0 + $0x78] sm:$0xff]  ;;  %v1567_v42 = vld [vmem:[#allocation2 + $0x2f0] sm:$0xff] }
  0x22   :  { %1834 = vmatpush.msra.mxu2 %v1496_v56  ;;  %2042 = vmatpush.msra.mxu3 %v1513_v57  ;;  %v5330_v35 = vld [vmem:[%s8828_s3] ss:$0 sm:$0xff]  ;;  %v79_v52 = vld [vmem:[%s8825_s0 + $0x90] sm:$0xff] }
  0x23   :  { %220 = vmatpush.msra.mxu0 %v191_v14  ;;  %1627 = vmatpush.msra.mxu1 %v1478_v45  ;;  %v1006_v14 = vrot.slane %v877_v12, 1  ;;  %v77_v37 = vld [vmem:[%s8825_s0 + $0x80] sm:$0xff]  ;;  %v78_v45 = vld [vmem:[%s8825_s0 + $0x88] sm:$0xff] }
  0x24   :  { %1835 = vmatpush.msra.mxu2 %v1495_v59  ;;  %2043 = vmatpush.msra.mxu3 %v1512_v60 }
  0x25   :  { %221 = vmatpush.msra.mxu0 %v190_v15  ;;  %1628 = vmatpush.msra.mxu1 %v1477_v48  ;;  %v1007_v15 = vrot.slane %v5269_v0, 1 }
  0x26   :  { %4631 = vmatmul.msk.f32.vlgmr.msra.gmra.mxu0 %vm125_vm0, %v61_v16  ;;  %1836 = vmatpush.msra.mxu2 %v1494_v62  ;;  %v1489_v16 = vld [vmem:[#allocation2 + $0x80] sm:$0xff] }
  0x27   :  { %1629 = vmatpush.msra.mxu1 %v1476_v51  ;;  %2044 = vmatpush.msra.mxu3 %v1511_v1  ;;  %v5306_v28 = vsel %vm1005_vm3, %v1007_v15, %v1009_v27 }
  0x28   :  { %1837 = vmatpush.msra.mxu2 %v1493_v3  ;;  %9133 = vst [vmem:[#allocation11_spill] sm:$0xff] %v5306_v28 }
  0x29   :  { %1630 = vmatpush.msra.mxu1 %v1475_v55  ;;  %2045 = vmatpush.msra.mxu3 %v1510_v5  ;;  %v1551_v55 = vld [vmem:[#allocation2 + $0x270] sm:$0xff]  ;;  %v80_v5 = vld [vmem:[%s8825_s0 + $0x98] sm:$0xff] }
  0x2a   :  { %1838 = vmatpush.msra.mxu2 %v1492_v6 }
  0x2b   :  { %1631 = vmatpush.msra.mxu1 %v1474_v58  ;;  %2046 = vmatpush.msra.mxu3 %v1509_v7 }
  0x2c   :  { %1839 = vmatpush.msra.mxu2 %v1491_v8 }
  0x2d   :  { %1632 = vmatpush.msra.mxu1 %v1473_v61  ;;  %2047 = vmatpush.msra.mxu3 %v1508_v9 }
  0x2e   :  { %4632 = vmatmul.msk.f32.gmra.mxu0 %vm125_vm0, %v62_v17  ;;  %4696 = vmatmul.msk.f32.vlgmr.msra.gmra.mxu1 %vm5272_vm2, %v5269_v0  ;;  %v1506_v17 = vld [vmem:[#allocation2 + $0x108] sm:$0xff] }
  0x2f   :  { %1840 = vmatpush.msra.mxu2 %v1490_v10  ;;  %2048 = vmatpush.msra.mxu3 %v1507_v11 }
  0x30   :  { %2453 = vmatpush.msrb.mxu1 %v1552_v31 }
  0x31   :  { %1841 = vmatpush.msra.mxu2 %v1489_v16  ;;  %2049 = vmatpush.msra.mxu3 %v1506_v17  ;;  %v81_v16 = vld [vmem:[%s8825_s0 + $0xa0] sm:$0xff] }
  0x32   :  { %2454 = vmatpush.msrb.mxu1 %v1551_v55 }
  0x33   :  { %2662 = vmatpush.msrb.mxu2 %v1568_v23 }
  0x35   :  { %2663 = vmatpush.msrb.mxu2 %v1567_v42 }
  0x36   :  { %4633 = vmatmul.msk.f32.gmra.mxu0 %vm125_vm0, %v63_v18  ;;  %1636 = vmatmul.f32.gmra.mxu1 %v5269_v0  ;;  %v5291_v18 = vsel %vm1005_vm3, %v1006_v14, %v1007_v15 }
  0x37   :  { %9131 = vst [vmem:[#allocation9_spill] sm:$0xff] %v5291_v18  ;;  %1842 = vmatmul.f32.vlgmr.msra.gmra.mxu2 %v5291_v18 }
  0x3e   :  { %4634 = vmatmul.msk.f32.gmra.mxu0 %vm125_vm0, %v64_v19  ;;  %v1224_v19 = vrot.slane %v877_v12, 2 }
  0x3f   :  { %1845 = vmatmul.f32.gmra.mxu2 %v5306_v28 }
  0x46   :  { %4635 = vmatmul.msk.f32.gmra.mxu0 %vm125_vm0, %v65_v20  ;;  %v1225_v20 = vrot.slane %v5269_v0, 2 }
  0x4e   :  { %4636 = vmatmul.msk.f32.gmra.mxu0 %vm125_vm0, %v66_v21  ;;  %v1505_v21 = vld [vmem:[#allocation2 + $0x100] sm:$0xff] }
  0x4f   :  { %2050 = vmatpush.msra.mxu3 %v1505_v21 }
  0x56   :  { %4637 = vmatmul.msk.f32.gmra.mxu0 %vm125_vm0, %v67_v22  ;;  %v5297_v22 = vsel %vm1223_vm4, %v1224_v19, %v1225_v20 }
  0x57   :  { %9132 = vst [vmem:[#allocation10_spill] sm:$0xff] %v5297_v22  ;;  %2051 = vmatmul.f32.vlgmr.msra.gmra.mxu3 %v5297_v22 }
  0x5e   :  { %4638 = vmatmul.msk.f32.gmra.mxu0 %vm125_vm0, %v68_v24  ;;  %v1536_v24 = vld [vmem:[#allocation2 + $0x1f8] sm:$0xff] }
  0x5f   :  { %2244 = vmatpush.msrb.mxu0 %v1536_v24 }
  0x61   :  { %2245 = vmatpush.msrb.mxu0 %v1535_v43 }
  0x66   :  { %4639 = vmatmul.msk.f32.gmra.mxu0 %vm125_vm0, %v69_v29  ;;  %v1227_v29 = vrot.slane %v910_v25, 2 }
  0x68   :  { %v5311_v30 = vsel %vm1223_vm4, %v1225_v20, %v1227_v29 }
  0x69   :  { %9134 = vst [vmem:[#allocation12_spill] sm:$0xff] %v5311_v30  ;;  %2054 = vmatmul.f32.gmra.mxu3 %v5311_v30 }
  0x6e   :  { %4640 = vmatmul.msk.f32.gmra.mxu0 %vm125_vm0, %v70_v41 }
  0x76   :  { %4641 = vmatmul.msk.f32.gmra.mxu0 %vm125_vm0, %v71_v53 }
  0x7e   :  { %4642 = vmatmul.msk.f32.gmra.mxu0 %vm125_vm0, %v72_v4 }
  0x86   :  { %4643 = vmatmul.msk.f32.gmra.mxu0 %vm125_vm0, %v73_v13 }
  0x8e   :  { %4644 = vmatmul.msk.f32.gmra.mxu0 %vm125_vm0, %v74_v26 }
  0x96   :  { %4645 = vmatmul.msk.f32.gmra.mxu0 %vm125_vm0, %v75_v32 }
  0x9e   :  { %4646 = vmatmul.msk.f32.gmra.mxu0 %vm125_vm0, %v76_v33  ;;  %v1566_v33 = vld [vmem:[#allocation2 + $0x2e8] sm:$0xff] }
  0x9f   :  { %2664 = vmatpush.msrb.mxu2 %v1566_v33 }
  0xa3   :  { %v223_v36 = vpop.f32.mrf.mxu0 }
  0xa4   :  { %v419_v38 = vmul.f32 %v5325_v34, %v223_v36  ;;  %v1534_v36 = vld [vmem:[#allocation2 + $0x1e8] sm:$0xff] }
  0xa5   :  { %2246 = vmatpush.msrb.mxu0 %v1534_v36 }
  0xa6   :  { %v487_v39 = vadd.f32 %v5330_v35, %v419_v38  ;;  %4647 = vmatmul.msk.f32.gmra.mxu0 %vm125_vm0, %v77_v37  ;;  %v82_v38 = vld [vmem:[%s8825_s0 + $0xa8] sm:$0xff] }
  0xa8   :  { %v551_v40 = vmax.f32 %v487_v39, 0.0 }
  0xaa   :  { %v5338_v41 = vrot.slane %v551_v40, 7 }
  0xab   :  { %v226_v44 = vpop.f32.mrf.mxu0 }
  0xac   :  { %v420_v46 = vmul.f32 %v5325_v34, %v226_v44  ;;  %4698 = vmatmul.msk.f32.gmra.mxu1 %vm5272_vm2, %v5338_v41  ;;  %v878_v50 = vsel %vm680_vm1, 0.0, %v5338_v41 }
  0xad   :  { %v1011_v56 = vrot.slane %v878_v50, 1  ;;  %v1229_v58 = vrot.slane %v878_v50, 2  ;;  %v83_v50 = vld [vmem:[%s8825_s0 + $0xb0] sm:$0xff] }
  0xae   :  { %v488_v47 = vadd.f32 %v5330_v35, %v420_v46  ;;  %4648 = vmatmul.msk.f32.gmra.mxu0 %vm125_vm0, %v78_v45 }
  0xb0   :  { %v552_v48 = vmax.f32 %v488_v47, 0.0 }
  0xb2   :  { %v684_v49 = vrot.slane %v552_v48, 7 }
  0xb3   :  { %v229_v51 = vpop.f32.mrf.mxu0 }
  0xb4   :  { %v421_v53 = vmul.f32 %v5325_v34, %v229_v51  ;;  %v5357_v54 = vsel %vm680_vm1, %v5338_v41, %v684_v49  ;;  %v911_v1 = vsel %vm680_vm1, %v684_v49, 0.0 }
  0xb5   :  { %1642 = vmatmul.f32.gmra.mxu1 %v5357_v54  ;;  %v1012_v57 = vrot.slane %v5357_v54, 1  ;;  %v1230_v59 = vrot.slane %v5357_v54, 2  ;;  %v1014_v6 = vrot.slane %v911_v1, 1  ;;  %v1232_v7 = vrot.slane %v911_v1, 2 }
  0xb6   :  { %v489_v60 = vadd.f32 %v5330_v35, %v421_v53  ;;  %4649 = vmatmul.msk.f32.gmra.mxu0 %vm125_vm0, %v79_v52  ;;  %v1550_v53 = vld [vmem:[#allocation2 + $0x268] sm:$0xff] }
  0xb7   :  { %v5365_v61 = vsel %vm1005_vm3, %v1011_v56, %v1012_v57  ;;  %v5368_v62 = vsel %vm1223_vm4, %v1229_v58, %v1230_v59  ;;  %v5385_v10 = vsel %vm1005_vm3, %v1012_v57, %v1014_v6  ;;  %v5388_v11 = vsel %vm1223_vm4, %v1230_v59, %v1232_v7  ;;  %2455 = vmatpush.msrb.mxu1 %v1550_v53  ;;  %v84_v7 = vld [vmem:[%s8825_s0 + $0xb8] sm:$0xff] }
  0xb8   :  { %v553_v63 = vmax.f32 %v489_v60, 0.0  ;;  %1848 = vmatmul.f32.gmra.mxu2 %v5365_v61  ;;  %2057 = vmatmul.f32.gmra.mxu3 %v5368_v62 }
  0xba   :  { %v5373_v3 = vrot.slane %v553_v63, 7 }
  0xbb   :  { %v232_v4 = vpop.f32.mrf.mxu0 }
  0xbc   :  { %v422_v8 = vmul.f32 %v5325_v34, %v232_v4  ;;  %v879_v14 = vsel %vm680_vm1, 0.0, %v5373_v3 }
  0xbd   :  { %4700 = vmatmul.msk.f32.gmra.mxu1 %vm5272_vm2, %v5373_v3  ;;  %v1016_v20 = vrot.slane %v879_v14, 1  ;;  %v1234_v23 = vrot.slane %v879_v14, 2 }
  0xbe   :  { %v490_v9 = vadd.f32 %v5330_v35, %v422_v8  ;;  %4650 = vmatmul.msk.f32.gmra.mxu0 %vm125_vm0, %v80_v5 }
  0xc0   :  { %v554_v12 = vmax.f32 %v490_v9, 0.0  ;;  %1851 = vmatmul.f32.gmra.mxu2 %v5385_v10  ;;  %2060 = vmatmul.f32.gmra.mxu3 %v5388_v11 }
  0xc2   :  { %v687_v13 = vrot.slane %v554_v12, 7 }
  0xc3   :  { %v235_v15 = vpop.f32.mrf.mxu0 }
  0xc4   :  { %v423_v17 = vmul.f32 %v5325_v34, %v235_v15  ;;  %v5400_v19 = vsel %vm680_vm1, %v5373_v3, %v687_v13  ;;  %v912_v29 = vsel %vm680_vm1, %v687_v13, 0.0 }
  0xc5   :  { %1648 = vmatmul.f32.gmra.mxu1 %v5400_v19  ;;  %v1017_v21 = vrot.slane %v5400_v19, 1  ;;  %v1235_v24 = vrot.slane %v5400_v19, 2  ;;  %v1019_v39 = vrot.slane %v912_v29, 1  ;;  %v1237_v40 = vrot.slane %v912_v29, 2 }
  0xc6   :  { %v491_v25 = vadd.f32 %v5330_v35, %v423_v17  ;;  %4651 = vmatmul.msk.f32.gmra.mxu0 %vm125_vm0, %v81_v16 }
  0xc7   :  { %v5408_v26 = vsel %vm1005_vm3, %v1016_v20, %v1017_v21  ;;  %v5411_v27 = vsel %vm1223_vm4, %v1234_v23, %v1235_v24  ;;  %v5428_v44 = vsel %vm1005_vm3, %v1017_v21, %v1019_v39  ;;  %v5431_v45 = vsel %vm1223_vm4, %v1235_v24, %v1237_v40  ;;  %v85_v23 = vld [vmem:[%s8825_s0 + $0xc0] sm:$0xff] }
  0xc8   :  { %9135 = vst [vmem:[#allocation13_spill] sm:$0xff] %v5411_v27  ;;  %v555_v31 = vmax.f32 %v491_v25, 0.0  ;;  %1854 = vmatmul.f32.gmra.mxu2 %v5408_v26  ;;  %2063 = vmatmul.f32.gmra.mxu3 %v5411_v27 }
  0xc9   :  { %9136 = vst [vmem:[#allocation14_spill] sm:$0xff] %v5431_v45 }
  0xca   :  { %v5416_v32 = vrot.slane %v555_v31, 7 }
  0xcb   :  { %v238_v37 = vpop.f32.mrf.mxu0 }
  0xcc   :  { %v424_v42 = vmul.f32 %v5325_v34, %v238_v37  ;;  %v880_v48 = vsel %vm680_vm1, 0.0, %v5416_v32 }
  0xcd   :  { %4702 = vmatmul.msk.f32.gmra.mxu1 %vm5272_vm2, %v5416_v32  ;;  %v1021_v55 = vrot.slane %v880_v48, 1  ;;  %v1239_v57 = vrot.slane %v880_v48, 2 }
  0xce   :  { %v492_v43 = vadd.f32 %v5330_v35, %v424_v42  ;;  %4652 = vmatmul.msk.f32.gmra.mxu0 %vm125_vm0, %v82_v38 }
  0xd0   :  { %v556_v46 = vmax.f32 %v492_v43, 0.0  ;;  %1857 = vmatmul.f32.gmra.mxu2 %v5428_v44  ;;  %2066 = vmatmul.f32.gmra.mxu3 %v5431_v45 }
  0xd2   :  { %v690_v47 = vrot.slane %v556_v46, 7  ;;  %v1565_v46 = vld [vmem:[#allocation2 + $0x2e0] sm:$0xff] }
  0xd3   :  { %v241_v49 = vpop.f32.mrf.mxu0  ;;  %2665 = vmatpush.msrb.mxu2 %v1565_v46 }
  0xd4   :  { %v425_v51 = vmul.f32 %v5325_v34, %v241_v49  ;;  %v5443_v52 = vsel %vm680_vm1, %v5416_v32, %v690_v47  ;;  %v913_v1 = vsel %vm680_vm1, %v690_v47, 0.0  ;;  %v1533_v47 = vld [vmem:[#allocation2 + $0x1e0] sm:$0xff]  ;;  %v86_v49 = vld [vmem:[%s8825_s0 + $0xc8] sm:$0xff] }
  0xd5   :  { %1654 = vmatmul.f32.gmra.mxu1 %v5443_v52  ;;  %v1022_v56 = vrot.slane %v5443_v52, 1  ;;  %v1240_v58 = vrot.slane %v5443_v52, 2  ;;  %v1024_v8 = vrot.slane %v913_v1, 1  ;;  %v1242_v9 = vrot.slane %v913_v1, 2  ;;  %2247 = vmatpush.msrb.mxu0 %v1533_v47 }
  0xd6   :  { %v493_v59 = vadd.f32 %v5330_v35, %v425_v51  ;;  %4653 = vmatmul.msk.f32.gmra.mxu0 %vm125_vm0, %v83_v50 }
  0xd7   :  { %v5451_v60 = vsel %vm1005_vm3, %v1021_v55, %v1022_v56  ;;  %v5454_v63 = vsel %vm1223_vm4, %v1239_v57, %v1240_v58  ;;  %v5471_v14 = vsel %vm1005_vm3, %v1022_v56, %v1024_v8  ;;  %v5474_v15 = vsel %vm1223_vm4, %v1240_v58, %v1242_v9  ;;  %v1549_v9 = vld [vmem:[#allocation2 + $0x260] sm:$0xff] }
  0xd8   :  { %9137 = vst [vmem:[#allocation15_spill] sm:$0xff] %v5454_v63  ;;  %v557_v4 = vmax.f32 %v493_v59, 0.0  ;;  %1860 = vmatmul.f32.gmra.mxu2 %v5451_v60  ;;  %2069 = vmatmul.f32.gmra.mxu3 %v5454_v63 }
  0xd9   :  { %9138 = vst [vmem:[#allocation16_spill] sm:$0xff] %v5474_v15  ;;  %2456 = vmatpush.msrb.mxu1 %v1549_v9 }
  0xda   :  { %v5459_v5 = vrot.slane %v557_v4, 7 }
  0xdb   :  { %v244_v6 = vpop.f32.mrf.mxu0 }
  0xdc   :  { %v426_v12 = vmul.f32 %v5325_v34, %v244_v6  ;;  %v881_v20 = vsel %vm680_vm1, 0.0, %v5459_v5  ;;  %v87_v6 = vld [vmem:[%s8825_s0 + $0xd0] sm:$0xff] }
  0xdd   :  { %4704 = vmatmul.msk.f32.gmra.mxu1 %vm5272_vm2, %v5459_v5  ;;  %v1026_v29 = vrot.slane %v881_v20, 1  ;;  %v1244_v33 = vrot.slane %v881_v20, 2 }
  0xde   :  { %v494_v13 = vadd.f32 %v5330_v35, %v426_v12  ;;  %4654 = vmatmul.msk.f32.gmra.mxu0 %vm125_vm0, %v84_v7 }
  0xe0   :  { %v558_v16 = vmax.f32 %v494_v13, 0.0  ;;  %1863 = vmatmul.f32.gmra.mxu2 %v5471_v14  ;;  %2072 = vmatmul.f32.gmra.mxu3 %v5474_v15 }
  0xe2   :  { %v693_v17 = vrot.slane %v558_v16, 7 }
  0xe3   :  { %v247_v21 = vpop.f32.mrf.mxu0 }
  0xe4   :  { %v427_v24 = vmul.f32 %v5325_v34, %v247_v21  ;;  %v5486_v25 = vsel %vm680_vm1, %v5459_v5, %v693_v17  ;;  %v914_v40 = vsel %vm680_vm1, %v693_v17, 0.0 }
  0xe5   :  { %1660 = vmatmul.f32.gmra.mxu1 %v5486_v25  ;;  %v1027_v31 = vrot.slane %v5486_v25, 1  ;;  %v1245_v36 = vrot.slane %v5486_v25, 2  ;;  %v1029_v50 = vrot.slane %v914_v40, 1  ;;  %v1247_v51 = vrot.slane %v914_v40, 2 }
  0xe6   :  { %v495_v37 = vadd.f32 %v5330_v35, %v427_v24  ;;  %4655 = vmatmul.msk.f32.gmra.mxu0 %vm125_vm0, %v85_v23 }
  0xe7   :  { %v5494_v38 = vsel %vm1005_vm3, %v1026_v29, %v1027_v31  ;;  %v5497_v39 = vsel %vm1223_vm4, %v1244_v33, %v1245_v36  ;;  %v5514_v56 = vsel %vm1005_vm3, %v1027_v31, %v1029_v50  ;;  %v5517_v57 = vsel %vm1223_vm4, %v1245_v36, %v1247_v51  ;;  %v88_v36 = vld [vmem:[%s8825_s0 + $0xd8] sm:$0xff] }
  0xe8   :  { %9139 = vst [vmem:[#allocation17_spill] sm:$0xff] %v5497_v39  ;;  %v559_v42 = vmax.f32 %v495_v37, 0.0  ;;  %1866 = vmatmul.f32.gmra.mxu2 %v5494_v38  ;;  %2075 = vmatmul.f32.gmra.mxu3 %v5497_v39 }
  0xe9   :  { %9140 = vst [vmem:[#allocation18_spill] sm:$0xff] %v5517_v57 }
  0xea   :  { %v5502_v43 = vrot.slane %v559_v42, 7 }
  0xeb   :  { %v250_v48 = vpop.f32.mrf.mxu0 }
  0xec   :  { %v428_v53 = vmul.f32 %v5325_v34, %v250_v48  ;;  %v882_v1 = vsel %vm680_vm1, 0.0, %v5502_v43 }
  0xed   :  { %4706 = vmatmul.msk.f32.gmra.mxu1 %vm5272_vm2, %v5502_v43  ;;  %v1031_v12 = vrot.slane %v882_v1, 1  ;;  %v1249_v16 = vrot.slane %v882_v1, 2 }
  0xee   :  { %v496_v55 = vadd.f32 %v5330_v35, %v428_v53  ;;  %4656 = vmatmul.msk.f32.gmra.mxu0 %vm125_vm0, %v86_v49 }
  0xf0   :  { %v560_v58 = vmax.f32 %v496_v55, 0.0  ;;  %1869 = vmatmul.f32.gmra.mxu2 %v5514_v56  ;;  %2078 = vmatmul.f32.gmra.mxu3 %v5517_v57  ;;  %v89_v55 = vld [vmem:[%s8825_s0 + $0xe0] sm:$0xff] }
  0xf2   :  { %v696_v59 = vrot.slane %v560_v58, 7 }
  0xf3   :  { %v253_v4 = vpop.f32.mrf.mxu0 }
  0xf4   :  { %v429_v7 = vmul.f32 %v5325_v34, %v253_v4  ;;  %v5529_v8 = vsel %vm680_vm1, %v5502_v43, %v696_v59  ;;  %v915_v24 = vsel %vm680_vm1, %v696_v59, 0.0 }
  0xf5   :  { %1666 = vmatmul.f32.gmra.mxu1 %v5529_v8  ;;  %v1032_v13 = vrot.slane %v5529_v8, 1  ;;  %v1250_v17 = vrot.slane %v5529_v8, 2  ;;  %v1034_v37 = vrot.slane %v915_v24, 1  ;;  %v1252_v40 = vrot.slane %v915_v24, 2  ;;  %v1564_v24 = vld [vmem:[#allocation2 + $0x2d8] sm:$0xff] }
  0xf6   :  { %v497_v20 = vadd.f32 %v5330_v35, %v429_v7  ;;  %4657 = vmatmul.msk.f32.gmra.mxu0 %vm125_vm0, %v87_v6  ;;  %2666 = vmatpush.msrb.mxu2 %v1564_v24 }
  0xf7   :  { %v5537_v21 = vsel %vm1005_vm3, %v1031_v12, %v1032_v13  ;;  %v5540_v23 = vsel %vm1223_vm4, %v1249_v16, %v1250_v17  ;;  %v5557_v47 = vsel %vm1005_vm3, %v1032_v13, %v1034_v37  ;;  %v5560_v48 = vsel %vm1223_vm4, %v1250_v17, %v1252_v40 }
  0xf8   :  { %9141 = vst [vmem:[#allocation19_spill] sm:$0xff] %v5537_v21  ;;  %v561_v29 = vmax.f32 %v497_v20, 0.0  ;;  %1872 = vmatmul.f32.gmra.mxu2 %v5537_v21  ;;  %2081 = vmatmul.f32.gmra.mxu3 %v5540_v23 }
  0xf9   :  { %9142 = vst [vmem:[#allocation20_spill] sm:$0xff] %v5540_v23 }
  0xfa   :  { %v5545_v31 = vrot.slane %v561_v29, 7  ;;  %9143 = vst [vmem:[#allocation21_spill] sm:$0xff] %v5557_v47  ;;  %v1532_v29 = vld [vmem:[#allocation2 + $0x1d8] sm:$0xff] }
  0xfb   :  { %v256_v33 = vpop.f32.mrf.mxu0  ;;  %9144 = vst [vmem:[#allocation22_spill] sm:$0xff] %v5560_v48  ;;  %2248 = vmatpush.msrb.mxu0 %v1532_v29  ;;  %v5620_v29 = vpop.f32.mrf.mxu1 }
  0xfc   :  { %v430_v42 = vmul.f32 %v5325_v34, %v256_v33  ;;  %v883_v51 = vsel %vm680_vm1, 0.0, %v5545_v31  ;;  %9149 = vst [vmem:[#allocation27_spill] sm:$0xff] %v5620_v29 }
  0xfd   :  { %4708 = vmatmul.msk.f32.gmra.mxu1 %vm5272_vm2, %v5545_v31  ;;  %v1036_v1 = vrot.slane %v883_v51, 1  ;;  %v1254_v6 = vrot.slane %v883_v51, 2 }
  0xfe   :  { %v498_v46 = vadd.f32 %v5330_v35, %v430_v42  ;;  %4658 = vmatmul.msk.f32.gmra.mxu0 %vm125_vm0, %v88_v36  ;;  %v90_v36 = vld [vmem:[%s8825_s0 + $0xe8] sm:$0xff] }
 0x100   :  { %v562_v49 = vmax.f32 %v498_v46, 0.0  ;;  %1875 = vmatmul.f32.gmra.mxu2 %v5557_v47  ;;  %2084 = vmatmul.f32.gmra.mxu3 %v5560_v48 }
 0x102   :  { %v699_v50 = vrot.slane %v562_v49, 7 }
 0x103   :  { %v259_v53 = vpop.f32.mrf.mxu0 }
 0x104   :  { %v431_v58 = vmul.f32 %v5325_v34, %v259_v53  ;;  %v5572_v59 = vsel %vm680_vm1, %v5545_v31, %v699_v50  ;;  %v916_v16 = vsel %vm680_vm1, %v699_v50, 0.0 }
 0x105   :  { %1672 = vmatmul.f32.gmra.mxu1 %v5572_v59  ;;  %v1037_v4 = vrot.slane %v5572_v59, 1  ;;  %v1255_v7 = vrot.slane %v5572_v59, 2  ;;  %v1039_v37 = vrot.slane %v916_v16, 1  ;;  %v1257_v40 = vrot.slane %v916_v16, 2 }
 0x106   :  { %v499_v9 = vadd.f32 %v5330_v35, %v431_v58  ;;  %4659 = vmatmul.msk.f32.gmra.mxu0 %vm125_vm0, %v89_v55 }
 0x107   :  { %v5580_v12 = vsel %vm1005_vm3, %v1036_v1, %v1037_v4  ;;  %v5583_v13 = vsel %vm1223_vm4, %v1254_v6, %v1255_v7  ;;  %v5600_v49 = vsel %vm1005_vm3, %v1037_v4, %v1039_v37  ;;  %v5603_v50 = vsel %vm1223_vm4, %v1255_v7, %v1257_v40  ;;  %v91_v1 = vld [vmem:[%s8825_s0 + $0xf0] sm:$0xff]  ;;  %v1548_v7 = vld [vmem:[#allocation2 + $0x258] sm:$0xff] }
 0x108   :  { %9145 = vst [vmem:[#allocation23_spill] sm:$0xff] %v5580_v12  ;;  %v563_v17 = vmax.f32 %v499_v9, 0.0  ;;  %1878 = vmatmul.f32.gmra.mxu2 %v5580_v12  ;;  %2087 = vmatmul.f32.gmra.mxu3 %v5583_v13 }
 0x109   :  { %9146 = vst [vmem:[#allocation24_spill] sm:$0xff] %v5583_v13  ;;  %2457 = vmatpush.msrb.mxu1 %v1548_v7 }
 0x10a   :  { %v5588_v20 = vrot.slane %v563_v17, 7  ;;  %9147 = vst [vmem:[#allocation25_spill] sm:$0xff] %v5600_v49 }
 0x10b   :  { %v262_v33 = vpop.f32.mrf.mxu0  ;;  %9148 = vst [vmem:[#allocation26_spill] sm:$0xff] %v5603_v50 }
 0x10c   :  { %v432_v42 = vmul.f32 %v5325_v34, %v262_v33  ;;  %v884_v55 = vsel %vm680_vm1, 0.0, %v5588_v20 }
 0x10d   :  { %4710 = vmatmul.msk.f32.gmra.mxu1 %vm5272_vm2, %v5588_v20  ;;  %v1041_v9 = vrot.slane %v884_v55, 1  ;;  %v1259_v17 = vrot.slane %v884_v55, 2 }
 0x10e   :  { %v500_v46 = vadd.f32 %v5330_v35, %v432_v42  ;;  %4660 = vmatmul.msk.f32.gmra.mxu0 %vm125_vm0, %v90_v36 }
 0x110   :  { %v564_v51 = vmax.f32 %v500_v46, 0.0  ;;  %1881 = vmatmul.f32.gmra.mxu2 %v5600_v49  ;;  %2090 = vmatmul.f32.gmra.mxu3 %v5603_v50 }
 0x112   :  { %v702_v53 = vrot.slane %v564_v51, 7  ;;  %v1584_v51 = vld [vmem:[#allocation2 + $0x378] sm:$0xff] }
 0x113   :  { %v265_v58 = vpop.f32.mrf.mxu0  ;;  %2871 = vmatpush.msrb.mxu3 %v1584_v51 }
 0x114   :  { %v433_v4 = vmul.f32 %v5325_v34, %v265_v58  ;;  %v5615_v6 = vsel %vm680_vm1, %v5588_v20, %v702_v53  ;;  %v917_v40 = vsel %vm680_vm1, %v702_v53, 0.0  ;;  %v92_v58 = vld [vmem:[%s8825_s0 + $0xf8] sm:$0xff] }
 0x115   :  { %1678 = vmatmul.f32.gmra.mxu1 %v5615_v6  ;;  %v1042_v16 = vrot.slane %v5615_v6, 1  ;;  %v1260_v24 = vrot.slane %v5615_v6, 2 }
 0x116   :  { %v501_v33 = vadd.f32 %v5330_v35, %v433_v4  ;;  %4661 = vmatmul.msk.f32.gmra.mxu0 %vm125_vm0, %v91_v1  ;;  %v1044_v1 = vrot.slane %v917_v40, 1  ;;  %v1262_v4 = vrot.slane %v917_v40, 2 }
 0x117   :  { %v5625_v36 = vsel %vm1005_vm3, %v1041_v9, %v1042_v16  ;;  %v5628_v37 = vsel %vm1223_vm4, %v1259_v17, %v1260_v24 }
 0x118   :  { %9150 = vst [vmem:[#allocation28_spill] sm:$0xff] %v5625_v36  ;;  %v565_v42 = vmax.f32 %v501_v33, 0.0  ;;  %1884 = vmatmul.f32.gmra.mxu2 %v5625_v36  ;;  %2093 = vmatmul.f32.gmra.mxu3 %v5628_v37  ;;  %v5645_v9 = vsel %vm1005_vm3, %v1042_v16, %v1044_v1  ;;  %v5648_v17 = vsel %vm1223_vm4, %v1260_v24, %v1262_v4  ;;  %v5650_v33 = vpop.f32.mrf.mxu1  ;;  %v93_v16 = vld [vmem:[%s8825_s0 + $0x100] sm:$0xff] }
 0x119   :  { %9151 = vst [vmem:[#allocation29_spill] sm:$0xff] %v5628_v37 }
 0x11a   :  { %v5633_v46 = vrot.slane %v565_v42, 7  ;;  %9152 = vst [vmem:[#allocation30_spill] sm:$0xff] %v5645_v9 }
 0x11b   :  { %v268_v55 = vpop.f32.mrf.mxu0  ;;  %9153 = vst [vmem:[#allocation31_spill] sm:$0xff] %v5648_v17 }
 0x11c   :  { %v434_v7 = vmul.f32 %v5325_v34, %v268_v55  ;;  %9154 = vst [vmem:[#allocation32_spill] sm:$0xff] %v5650_v33  ;;  %v885_v51 = vsel %vm680_vm1, 0.0, %v5633_v46 }
 0x11d   :  { %4712 = vmatmul.msk.f32.gmra.mxu1 %vm5272_vm2, %v5633_v46  ;;  %v1046_v1 = vrot.slane %v885_v51, 1 }
 0x11e   :  { %v502_v53 = vadd.f32 %v5330_v35, %v434_v7  ;;  %4662 = vmatmul.msk.f32.gmra.mxu0 %vm125_vm0, %v92_v58  ;;  %v1264_v7 = vrot.slane %v885_v51, 2  ;;  %v5678_v51 = vpop.f32.mrf.mxu3 }
 0x11f   :  { %9157 = vst [vmem:[#allocation35_spill] sm:$0xff] %v5678_v51 }
 0x120   :  { %v566_v40 = vmax.f32 %v502_v53, 0.0  ;;  %1887 = vmatmul.f32.gmra.mxu2 %v5645_v9  ;;  %2096 = vmatmul.f32.gmra.mxu3 %v5648_v17  ;;  %v5680_v9 = vpop.f32.mrf.mxu2 }
 0x121   :  { %9158 = vst [vmem:[#allocation36_spill] sm:$0xff] %v5680_v9 }
 0x122   :  { %v705_v42 = vrot.slane %v566_v40, 7 }
 0x123   :  { %v271_v55 = vpop.f32.mrf.mxu0 }
 0x124   :  { %v435_v58 = vmul.f32 %v5325_v34, %v271_v55  ;;  %v5662_v24 = vsel %vm680_vm1, %v5633_v46, %v705_v42  ;;  %v918_v29 = vsel %vm680_vm1, %v705_v42, 0.0 }
 0x125   :  { %1684 = vmatmul.f32.gmra.mxu1 %v5662_v24  ;;  %v1047_v4 = vrot.slane %v5662_v24, 1  ;;  %v1265_v53 = vrot.slane %v5662_v24, 2  ;;  %v1049_v42 = vrot.slane %v918_v29, 1 }
 0x126   :  { %v503_v40 = vadd.f32 %v5330_v35, %v435_v58  ;;  %4663 = vmatmul.msk.f32.gmra.mxu0 %vm125_vm0, %v93_v16  ;;  %v1563_v16 = vld [vmem:[#allocation2 + $0x2d0] sm:$0xff] }
 0x127   :  { %v5670_v33 = vsel %vm1005_vm3, %v1046_v1, %v1047_v4  ;;  %v5673_v55 = vsel %vm1223_vm4, %v1264_v7, %v1265_v53  ;;  %v1531_v1 = vld [vmem:[#allocation2 + $0x1d0] sm:$0xff]  ;;  %v94_v7 = vld [vmem:[%s8825_s0 + $0x108] sm:$0xff]  ;;  %2667 = vmatpush.msrb.mxu2 %v1563_v16  ;;  %v5694_v51 = vsel %vm1005_vm3, %v1047_v4, %v1049_v42  ;;  %v5701_v16 = vpop.f32.mrf.mxu3 }
 0x128   :  { %9155 = vst [vmem:[#allocation33_spill] sm:$0xff] %v5670_v33  ;;  %v567_v17 = vmax.f32 %v503_v40, 0.0  ;;  %1890 = vmatmul.f32.gmra.mxu2 %v5670_v33  ;;  %2099 = vmatmul.f32.gmra.mxu3 %v5673_v55  ;;  %v1267_v40 = vrot.slane %v918_v29, 2  ;;  %v95_v4 = vld [vmem:[%s8825_s0 + $0x110] sm:$0xff] }
 0x129   :  { %9156 = vst [vmem:[#allocation34_spill] sm:$0xff] %v5673_v55  ;;  %v1640_v37 = vpop.f32.mrf.mxu1  ;;  %2249 = vmatpush.msrb.mxu0 %v1531_v1  ;;  %v5705_v1 = vpop.f32.mrf.mxu2 }
 0x12a   :  { %v5682_v58 = vrot.slane %v567_v17, 7  ;;  %9159 = vst [vmem:[#allocation37_spill] sm:$0xff] %v5694_v51  ;;  %v5697_v9 = vsel %vm1223_vm4, %v1265_v53, %v1267_v40 }
 0x12b   :  { %v274_v50 = vpop.f32.mrf.mxu0  ;;  %9160 = vst [vmem:[#allocation38_spill] sm:$0xff] %v5697_v9 }
 0x12c   :  { %v436_v55 = vmul.f32 %v5325_v34, %v274_v50  ;;  %9161 = vst [vmem:[#allocation39_spill] sm:$0xff] %v5701_v16 }
 0x12d   :  { %4714 = vmatmul.msk.f32.gmra.mxu1 %vm5272_vm2, %v5682_v58  ;;  %9162 = vst [vmem:[#allocation40_spill] sm:$0xff] %v5705_v1 }
 0x12e   :  { %v504_v17 = vadd.f32 %v5330_v35, %v436_v55  ;;  %4664 = vmatmul.msk.f32.gmra.mxu0 %vm125_vm0, %v94_v7  ;;  %v886_v55 = vsel %vm680_vm1, 0.0, %v5682_v58 }
 0x12f   :  { %v1051_v40 = vrot.slane %v886_v55, 1  ;;  %v1269_v16 = vrot.slane %v886_v55, 2 }
 0x130   :  { %v568_v33 = vmax.f32 %v504_v17, 0.0  ;;  %1893 = vmatmul.f32.gmra.mxu2 %v5694_v51  ;;  %2102 = vmatmul.f32.gmra.mxu3 %v5697_v9 }
 0x132   :  { %v708_v50 = vrot.slane %v568_v33, 7  ;;  %v1643_v29 = vpop.f32.mrf.mxu1  ;;  %v1547_v33 = vld [vmem:[#allocation2 + $0x250] sm:$0xff] }
 0x133   :  { %v277_v7 = vpop.f32.mrf.mxu0  ;;  %2458 = vmatpush.msrb.mxu1 %v1547_v33  ;;  %v96_v33 = vld [vmem:[%s8825_s0 + $0x118] sm:$0xff] }
 0x134   :  { %v437_v53 = vmul.f32 %v5325_v34, %v277_v7  ;;  %v5713_v42 = vsel %vm680_vm1, %v5682_v58, %v708_v50  ;;  %v919_v36 = vsel %vm680_vm1, %v708_v50, 0.0 }
 0x135   :  { %1690 = vmatmul.f32.gmra.mxu1 %v5713_v42  ;;  %v1052_v17 = vrot.slane %v5713_v42, 1  ;;  %v1270_v1 = vrot.slane %v5713_v42, 2 }
 0x136   :  { %v505_v9 = vadd.f32 %v5330_v35, %v437_v53  ;;  %4665 = vmatmul.msk.f32.gmra.mxu0 %vm125_vm0, %v95_v4  ;;  %v1583_v53 = vld [vmem:[#allocation2 + $0x370] sm:$0xff] }
 0x137   :  { %v5721_v7 = vsel %vm1005_vm3, %v1051_v40, %v1052_v17  ;;  %v5724_v51 = vsel %vm1223_vm4, %v1269_v16, %v1270_v1  ;;  %v1054_v40 = vrot.slane %v919_v36, 1  ;;  %v1272_v16 = vrot.slane %v919_v36, 2  ;;  %2872 = vmatpush.msrb.mxu3 %v1583_v53 }
 0x138   :  { %9163 = vst [vmem:[#allocation41_spill] sm:$0xff] %v5721_v7  ;;  %v569_v13 = vmax.f32 %v505_v9, 0.0  ;;  %1896 = vmatmul.f32.gmra.mxu2 %v5721_v7  ;;  %2105 = vmatmul.f32.gmra.mxu3 %v5724_v51 }
 0x139   :  { %9164 = vst [vmem:[#allocation42_spill] sm:$0xff] %v5724_v51  ;;  %v5743_v7 = vsel %vm1005_vm3, %v1052_v17, %v1054_v40  ;;  %v5746_v36 = vsel %vm1223_vm4, %v1270_v1, %v1272_v16  ;;  %v97_v17 = vld [vmem:[%s8825_s0 + $0x120] sm:$0xff] }
 0x13a   :  { %v5729_v55 = vrot.slane %v569_v13, 7  ;;  %v1646_v49 = vpop.f32.mrf.mxu1  ;;  %9166 = vst [vmem:[#allocation44_spill] sm:$0xff] %v5743_v7 }
 0x13b   :  { %v280_v48 = vpop.f32.mrf.mxu0  ;;  %v1849_v4 = vpop.f32.mrf.mxu2  ;;  %9167 = vst [vmem:[#allocation45_spill] sm:$0xff] %v5746_v36 }
 0x13c   :  { %v438_v50 = vmul.f32 %v5325_v34, %v280_v48  ;;  %v1850_v9 = vadd.f32 %v1849_v4, %v1640_v37  ;;  %v2058_v12 = vpop.f32.mrf.mxu3  ;;  %v887_v4 = vsel %vm680_vm1, 0.0, %v5729_v55 }
 0x13d   :  { %4716 = vmatmul.msk.f32.gmra.mxu1 %vm5272_vm2, %v5729_v55 }
 0x13e   :  { %v506_v13 = vadd.f32 %v5330_v35, %v438_v50  ;;  %v5739_v51 = vadd.f32 %v2058_v12, %v1850_v9  ;;  %4666 = vmatmul.msk.f32.gmra.mxu0 %vm125_vm0, %v96_v33  ;;  %v1056_v9 = vrot.slane %v887_v4, 1 }
 0x140   :  { %9165 = vst [vmem:[#allocation43_spill] sm:$0xff] %v5739_v51  ;;  %v570_v53 = vmax.f32 %v506_v13, 0.0  ;;  %1899 = vmatmul.f32.gmra.mxu2 %v5743_v7  ;;  %2108 = vmatmul.f32.gmra.mxu3 %v5746_v36 }
 0x142   :  { %v711_v48 = vrot.slane %v570_v53, 7  ;;  %v1649_v37 = vpop.f32.mrf.mxu1  ;;  %v1274_v53 = vrot.slane %v887_v4, 2 }
 0x143   :  { %v283_v12 = vpop.f32.mrf.mxu0  ;;  %v1852_v50 = vpop.f32.mrf.mxu2 }
 0x144   :  { %v439_v33 = vmul.f32 %v5325_v34, %v283_v12  ;;  %v1853_v1 = vadd.f32 %v1852_v50, %v1643_v29  ;;  %v2061_v40 = vpop.f32.mrf.mxu3  ;;  %v5758_v16 = vsel %vm680_vm1, %v5729_v55, %v711_v48  ;;  %v920_v50 = vsel %vm680_vm1, %v711_v48, 0.0 }
 0x145   :  { %1696 = vmatmul.f32.gmra.mxu1 %v5758_v16  ;;  %v1057_v13 = vrot.slane %v5758_v16, 1  ;;  %v1275_v51 = vrot.slane %v5758_v16, 2  ;;  %v1277_v47 = vrot.slane %v920_v50, 2 }
 0x146   :  { %v507_v36 = vadd.f32 %v5330_v35, %v439_v33  ;;  %v5764_v7 = vadd.f32 %v2061_v40, %v1853_v1  ;;  %4667 = vmatmul.msk.f32.gmra.mxu0 %vm125_vm0, %v97_v17  ;;  %v1562_v1 = vld [vmem:[#allocation2 + $0x2c8] sm:$0xff] }
 0x147   :  { %v5768_v29 = vsel %vm1005_vm3, %v1056_v9, %v1057_v13  ;;  %v5771_v12 = vsel %vm1223_vm4, %v1274_v53, %v1275_v51  ;;  %v1530_v40 = vld [vmem:[#allocation2 + $0x1c8] sm:$0xff]  ;;  %v1059_v53 = vrot.slane %v920_v50, 1  ;;  %2668 = vmatpush.msrb.mxu2 %v1562_v1  ;;  %v5793_v50 = vsel %vm1223_vm4, %v1275_v51, %v1277_v47 }
 0x148   :  { %9168 = vst [vmem:[#allocation46_spill] sm:$0xff] %v5764_v7  ;;  %v571_v23 = vmax.f32 %v507_v36, 0.0  ;;  %1902 = vmatmul.f32.gmra.mxu2 %v5768_v29  ;;  %2111 = vmatmul.f32.gmra.mxu3 %v5771_v12  ;;  %v98_v9 = vld [vmem:[%s8825_s0 + $0x128] sm:$0xff] }
 0x149   :  { %9169 = vst [vmem:[#allocation47_spill] sm:$0xff] %v5768_v29  ;;  %2250 = vmatpush.msrb.mxu0 %v1530_v40  ;;  %v5790_v57 = vsel %vm1005_vm3, %v1057_v13, %v1059_v53  ;;  %v99_v13 = vld [vmem:[%s8825_s0 + $0x130] sm:$0xff] }
 0x14a   :  { %9170 = vst [vmem:[#allocation48_spill] sm:$0xff] %v5771_v12  ;;  %v5776_v4 = vrot.slane %v571_v23, 7  ;;  %v1652_v33 = vpop.f32.mrf.mxu1 }
 0x14b   :  { %v286_v7 = vpop.f32.mrf.mxu0  ;;  %v1855_v17 = vpop.f32.mrf.mxu2  ;;  %9172 = vst [vmem:[#allocation50_spill] sm:$0xff] %v5790_v57 }
 0x14c   :  { %v440_v36 = vmul.f32 %v5325_v34, %v286_v7  ;;  %v1856_v48 = vadd.f32 %v1855_v17, %v1646_v49  ;;  %v2064_v29 = vpop.f32.mrf.mxu3  ;;  %9173 = vst [vmem:[#allocation51_spill] sm:$0xff] %v5793_v50  ;;  %v888_v40 = vsel %vm680_vm1, 0.0, %v5776_v4 }
 0x14d   :  { %4718 = vmatmul.msk.f32.gmra.mxu1 %vm5272_vm2, %v5776_v4 }
 0x14e   :  { %v508_v23 = vadd.f32 %v5330_v35, %v440_v36  ;;  %v5786_v12 = vadd.f32 %v2064_v29, %v1856_v48  ;;  %4668 = vmatmul.msk.f32.gmra.mxu0 %vm125_vm0, %v98_v9  ;;  %v1546_v36 = vld [vmem:[#allocation2 + $0x248] sm:$0xff]  ;;  %v1061_v48 = vrot.slane %v888_v40, 1 }
 0x14f   :  { %2459 = vmatpush.msrb.mxu1 %v1546_v36  ;;  %v100_v36 = vld [vmem:[%s8825_s0 + $0x138] sm:$0xff] }
 0x150   :  { %9171 = vst [vmem:[#allocation49_spill] sm:$0xff] %v5786_v12  ;;  %v572_v1 = vmax.f32 %v508_v23, 0.0  ;;  %1905 = vmatmul.f32.gmra.mxu2 %v5790_v57  ;;  %2114 = vmatmul.f32.gmra.mxu3 %v5793_v50 }
 0x152   :  { %v714_v49 = vrot.slane %v572_v1, 7  ;;  %v1655_v7 = vpop.f32.mrf.mxu1  ;;  %v1279_v1 = vrot.slane %v888_v40, 2 }
 0x153   :  { %v289_v29 = vpop.f32.mrf.mxu0  ;;  %v1858_v17 = vpop.f32.mrf.mxu2 }
 0x154   :  { %v441_v9 = vmul.f32 %v5325_v34, %v289_v29  ;;  %v1859_v47 = vadd.f32 %v1858_v17, %v1649_v37  ;;  %v2067_v51 = vpop.f32.mrf.mxu3  ;;  %v5805_v53 = vsel %vm680_vm1, %v5776_v4, %v714_v49  ;;  %v921_v17 = vsel %vm680_vm1, %v714_v49, 0.0 }
 0x155   :  { %1702 = vmatmul.f32.gmra.mxu1 %v5805_v53  ;;  %v1062_v23 = vrot.slane %v5805_v53, 1  ;;  %v1280_v12 = vrot.slane %v5805_v53, 2 }
 0x156   :  { %v509_v50 = vadd.f32 %v5330_v35, %v441_v9  ;;  %v5811_v57 = vadd.f32 %v2067_v51, %v1859_v47  ;;  %4669 = vmatmul.msk.f32.gmra.mxu0 %vm125_vm0, %v99_v13  ;;  %v1582_v47 = vld [vmem:[#allocation2 + $0x368] sm:$0xff] }
 0x157   :  { %v5815_v37 = vsel %vm1005_vm3, %v1061_v48, %v1062_v23  ;;  %v5818_v29 = vsel %vm1223_vm4, %v1279_v1, %v1280_v12  ;;  %v1064_v48 = vrot.slane %v921_v17, 1  ;;  %v1282_v1 = vrot.slane %v921_v17, 2  ;;  %2873 = vmatpush.msrb.mxu3 %v1582_v47 }
 0x158   :  { %9174 = vst [vmem:[#allocation52_spill] sm:$0xff] %v5811_v57  ;;  %v573_v21 = vmax.f32 %v509_v50, 0.0  ;;  %1908 = vmatmul.f32.gmra.mxu2 %v5815_v37  ;;  %2117 = vmatmul.f32.gmra.mxu3 %v5818_v29 }
 0x159   :  { %9175 = vst [vmem:[#allocation53_spill] sm:$0xff] %v5815_v37  ;;  %v5837_v37 = vsel %vm1005_vm3, %v1062_v23, %v1064_v48  ;;  %v5840_v17 = vsel %vm1223_vm4, %v1280_v12, %v1282_v1  ;;  %v101_v23 = vld [vmem:[%s8825_s0 + $0x140] sm:$0xff] }
 0x15a   :  { %9176 = vst [vmem:[#allocation54_spill] sm:$0xff] %v5818_v29  ;;  %v5823_v40 = vrot.slane %v573_v21, 7  ;;  %v1658_v9 = vpop.f32.mrf.mxu1 }
 0x15b   :  { %v292_v51 = vpop.f32.mrf.mxu0  ;;  %v1861_v13 = vpop.f32.mrf.mxu2  ;;  %9179 = vst [vmem:[#allocation57_spill] sm:$0xff] %v5837_v37 }
 0x15c   :  { %9177 = vst [vmem:[#allocation55_spill] sm:$0xff] %v5823_v40  ;;  %v442_v49 = vmul.f32 %v5325_v34, %v292_v51  ;;  %v1862_v50 = vadd.f32 %v1861_v13, %v1652_v33  ;;  %v2070_v57 = vpop.f32.mrf.mxu3  ;;  %v889_v13 = vsel %vm680_vm1, 0.0, %v5823_v40 }
 0x15d   :  { %4720 = vmatmul.msk.f32.gmra.mxu1 %vm5272_vm2, %v5823_v40  ;;  %9180 = vst [vmem:[#allocation58_spill] sm:$0xff] %v5840_v17 }
 0x15e   :  { %v510_v21 = vadd.f32 %v5330_v35, %v442_v49  ;;  %v5833_v29 = vadd.f32 %v2070_v57, %v1862_v50  ;;  %4670 = vmatmul.msk.f32.gmra.mxu0 %vm125_vm0, %v100_v36  ;;  %v1066_v50 = vrot.slane %v889_v13, 1 }
 0x160   :  { %9178 = vst [vmem:[#allocation56_spill] sm:$0xff] %v5833_v29  ;;  %v574_v47 = vmax.f32 %v510_v21, 0.0  ;;  %1911 = vmatmul.f32.gmra.mxu2 %v5837_v37  ;;  %2120 = vmatmul.f32.gmra.mxu3 %v5840_v17 }
 0x162   :  { %v717_v33 = vrot.slane %v574_v47, 7  ;;  %v1661_v51 = vpop.f32.mrf.mxu1  ;;  %v1284_v47 = vrot.slane %v889_v13, 2 }
 0x163   :  { %v295_v57 = vpop.f32.mrf.mxu0  ;;  %v1864_v49 = vpop.f32.mrf.mxu2 }
 0x164   :  { %v443_v36 = vmul.f32 %v5325_v34, %v295_v57  ;;  %v1865_v12 = vadd.f32 %v1864_v49, %v1655_v7  ;;  %v2073_v48 = vpop.f32.mrf.mxu3  ;;  %v5852_v1 = vsel %vm680_vm1, %v5823_v40, %v717_v33  ;;  %v922_v49 = vsel %vm680_vm1, %v717_v33, 0.0 }
 0x165   :  { %9181 = vst [vmem:[#allocation59_spill] sm:$0xff] %v5852_v1  ;;  %1708 = vmatmul.f32.gmra.mxu1 %v5852_v1  ;;  %v1067_v21 = vrot.slane %v5852_v1, 1  ;;  %v1285_v29 = vrot.slane %v5852_v1, 2  ;;  %v1287_v1 = vrot.slane %v922_v49, 2 }
 0x166   :  { %v511_v17 = vadd.f32 %v5330_v35, %v443_v36  ;;  %v5858_v37 = vadd.f32 %v2073_v48, %v1865_v12  ;;  %4671 = vmatmul.msk.f32.gmra.mxu0 %vm125_vm0, %v101_v23  ;;  %v1561_v12 = vld [vmem:[#allocation2 + $0x2c0] sm:$0xff] }
 0x167   :  { %v5862_v7 = vsel %vm1005_vm3, %v1066_v50, %v1067_v21  ;;  %v5865_v57 = vsel %vm1223_vm4, %v1284_v47, %v1285_v29  ;;  %v1529_v48 = vld [vmem:[#allocation2 + $0x1c0] sm:$0xff]  ;;  %v102_v50 = vld [vmem:[%s8825_s0 + $0x148] sm:$0xff]  ;;  %v1069_v47 = vrot.slane %v922_v49, 1  ;;  %2669 = vmatpush.msrb.mxu2 %v1561_v12  ;;  %v5887_v49 = vsel %vm1223_vm4, %v1285_v29, %v1287_v1 }
 0x168   :  { %9182 = vst [vmem:[#allocation60_spill] sm:$0xff] %v5858_v37  ;;  %v575_v39 = vmax.f32 %v511_v17, 0.0  ;;  %1914 = vmatmul.f32.gmra.mxu2 %v5862_v7  ;;  %2123 = vmatmul.f32.gmra.mxu3 %v5865_v57 }
 0x169   :  { %9183 = vst [vmem:[#allocation61_spill] sm:$0xff] %v5862_v7  ;;  %2251 = vmatpush.msrb.mxu0 %v1529_v48  ;;  %v5884_v40 = vsel %vm1005_vm3, %v1067_v21, %v1069_v47  ;;  %v103_v21 = vld [vmem:[%s8825_s0 + $0x150] sm:$0xff]  ;;  %v1545_v47 = vld [vmem:[#allocation2 + $0x240] sm:$0xff] }
 0x16a   :  { %9184 = vst [vmem:[#allocation62_spill] sm:$0xff] %v5865_v57  ;;  %v5870_v13 = vrot.slane %v575_v39, 7  ;;  %v1664_v36 = vpop.f32.mrf.mxu1  ;;  %2460 = vmatpush.msrb.mxu1 %v1545_v47  ;;  %v104_v47 = vld [vmem:[%s8825_s0 + $0x158] sm:$0xff] }
 0x16b   :  { %v298_v37 = vpop.f32.mrf.mxu0  ;;  %v1867_v23 = vpop.f32.mrf.mxu2  ;;  %9187 = vst [vmem:[#allocation65_spill] sm:$0xff] %v5884_v40 }
 0x16c   :  { %9185 = vst [vmem:[#allocation63_spill] sm:$0xff] %v5870_v13  ;;  %v444_v17 = vmul.f32 %v5325_v34, %v298_v37  ;;  %v1868_v33 = vadd.f32 %v1867_v23, %v1658_v9  ;;  %v2076_v7 = vpop.f32.mrf.mxu3 }
 0x16d   :  { %4722 = vmatmul.msk.f32.gmra.mxu1 %vm5272_vm2, %v5870_v13  ;;  %9188 = vst [vmem:[#allocation66_spill] sm:$0xff] %v5887_v49 }
 0x16e   :  { %v512_v39 = vadd.f32 %v5330_v35, %v444_v17  ;;  %v5880_v57 = vadd.f32 %v2076_v7, %v1868_v33  ;;  %4672 = vmatmul.msk.f32.gmra.mxu0 %vm125_vm0, %v102_v50  ;;  %v890_v35 = vsel %vm680_vm1, 0.0, %v5870_v13 }
 0x16f   :  { %v1071_v17 = vrot.slane %v890_v35, 1 }
 0x170   :  { %9186 = vst [vmem:[#allocation64_spill] sm:$0xff] %v5880_v57  ;;  %v576_v12 = vmax.f32 %v512_v39, 0.0  ;;  %1917 = vmatmul.f32.gmra.mxu2 %v5884_v40  ;;  %2126 = vmatmul.f32.gmra.mxu3 %v5887_v49  ;;  %v1289_v39 = vrot.slane %v890_v35, 2  ;;  %v5907_v57 = vld [vmem:[%s8828_s3] ss:$0 sm:$0xff] }
 0x172   :  { %v720_v37 = vrot.slane %v576_v12, 7  ;;  %v1667_v9 = vpop.f32.mrf.mxu1 }
 0x173   :  { %v301_v7 = vpop.f32.mrf.mxu0  ;;  %v1870_v48 = vpop.f32.mrf.mxu2 }
 0x174   :  { %v445_v23 = vmul.f32 %v5325_v34, %v301_v7  ;;  %v1871_v29 = vadd.f32 %v1870_v48, %v1661_v51  ;;  %v2079_v1 = vpop.f32.mrf.mxu3  ;;  %v5899_v50 = vsel %vm680_vm1, %v5870_v13, %v720_v37  ;;  %v923_v35 = vsel %vm680_vm1, %v720_v37, 0.0  ;;  %v5930_v37 = vld [vmem:[%s8827_s2] ss:$0 sm:$0xff] }
 0x175   :  { %9189 = vst [vmem:[#allocation67_spill] sm:$0xff] %v5899_v50  ;;  %1714 = vmatmul.f32.gmra.mxu1 %v5899_v50  ;;  %v1072_v33 = vrot.slane %v5899_v50, 1  ;;  %v1290_v12 = vrot.slane %v5899_v50, 2 }
 0x176   :  { %v513_v34 = vadd.f32 %v5907_v57, %v445_v23  ;;  %v5910_v51 = vadd.f32 %v2079_v1, %v1871_v29  ;;  %4673 = vmatmul.msk.f32.gmra.mxu0 %vm125_vm0, %v103_v21  ;;  %v1581_v29 = vld [vmem:[#allocation2 + $0x360] sm:$0xff] }
 0x177   :  { %v5914_v7 = vsel %vm1005_vm3, %v1071_v17, %v1072_v33  ;;  %v5917_v48 = vsel %vm1223_vm4, %v1289_v39, %v1290_v12  ;;  %v1074_v17 = vrot.slane %v923_v35, 1  ;;  %v1292_v39 = vrot.slane %v923_v35, 2  ;;  %2874 = vmatpush.msrb.mxu3 %v1581_v29 }
 0x178   :  { %9190 = vst [vmem:[#allocation68_spill] sm:$0xff] %v5910_v51  ;;  %v577_v49 = vmax.f32 %v513_v34, 0.0  ;;  %1920 = vmatmul.f32.gmra.mxu2 %v5914_v7  ;;  %2129 = vmatmul.f32.gmra.mxu3 %v5917_v48 }
 0x179   :  { %9191 = vst [vmem:[#allocation69_spill] sm:$0xff] %v5914_v7  ;;  %v5941_v35 = vsel %vm1005_vm3, %v1072_v33, %v1074_v17  ;;  %v5944_v29 = vsel %vm1223_vm4, %v1290_v12, %v1292_v39  ;;  %v105_v33 = vld [vmem:[%s8825_s0 + $0x160] sm:$0xff] }
 0x17a   :  { %9192 = vst [vmem:[#allocation70_spill] sm:$0xff] %v5917_v48  ;;  %v5922_v40 = vrot.slane %v577_v49, 7  ;;  %v1670_v23 = vpop.f32.mrf.mxu1 }
 0x17b   :  { %v304_v1 = vpop.f32.mrf.mxu0  ;;  %v1873_v21 = vpop.f32.mrf.mxu2  ;;  %9195 = vst [vmem:[#allocation73_spill] sm:$0xff] %v5941_v35 }
 0x17c   :  { %9193 = vst [vmem:[#allocation71_spill] sm:$0xff] %v5922_v40  ;;  %v446_v34 = vmul.f32 %v5930_v37, %v304_v1  ;;  %v1874_v49 = vadd.f32 %v1873_v21, %v1664_v36  ;;  %v2082_v51 = vpop.f32.mrf.mxu3  ;;  %v891_v21 = vsel %vm680_vm1, 0.0, %v5922_v40 }
 0x17d   :  { %4724 = vmatmul.msk.f32.gmra.mxu1 %vm5272_vm2, %v5922_v40  ;;  %9196 = vst [vmem:[#allocation74_spill] sm:$0xff] %v5944_v29 }
 0x17e   :  { %v514_v48 = vadd.f32 %v5907_v57, %v446_v34  ;;  %v5937_v7 = vadd.f32 %v2082_v51, %v1874_v49  ;;  %4674 = vmatmul.msk.f32.gmra.mxu0 %vm125_vm0, %v104_v47  ;;  %v1294_v49 = vrot.slane %v891_v21, 2 }
 0x180   :  { %9194 = vst [vmem:[#allocation72_spill] sm:$0xff] %v5937_v7  ;;  %v578_v50 = vmax.f32 %v514_v48, 0.0  ;;  %1923 = vmatmul.f32.gmra.mxu2 %v5941_v35  ;;  %2132 = vmatmul.f32.gmra.mxu3 %v5944_v29 }
 0x182   :  { %v723_v36 = vrot.slane %v578_v50, 7  ;;  %v1673_v1 = vpop.f32.mrf.mxu1  ;;  %v1076_v50 = vrot.slane %v891_v21, 1 }
 0x183   :  { %v307_v51 = vpop.f32.mrf.mxu0  ;;  %v1876_v34 = vpop.f32.mrf.mxu2 }
 0x184   :  { %v447_v47 = vmul.f32 %v5930_v37, %v307_v51  ;;  %v1877_v12 = vadd.f32 %v1876_v34, %v1667_v9  ;;  %v2085_v17 = vpop.f32.mrf.mxu3  ;;  %v5956_v48 = vsel %vm680_vm1, %v5922_v40, %v723_v36  ;;  %v924_v34 = vsel %vm680_vm1, %v723_v36, 0.0 }
 0x185   :  { %9197 = vst [vmem:[#allocation75_spill] sm:$0xff] %v5956_v48  ;;  %1720 = vmatmul.f32.gmra.mxu1 %v5956_v48  ;;  %v1077_v39 = vrot.slane %v5956_v48, 1  ;;  %v1295_v7 = vrot.slane %v5956_v48, 2  ;;  %v1297_v48 = vrot.slane %v924_v34, 2 }
 0x186   :  { %v515_v29 = vadd.f32 %v5907_v57, %v447_v47  ;;  %v5962_v35 = vadd.f32 %v2085_v17, %v1877_v12  ;;  %4675 = vmatmul.msk.f32.gmra.mxu0 %vm125_vm0, %v105_v33  ;;  %v1560_v12 = vld [vmem:[#allocation2 + $0x2b8] sm:$0xff] }
 0x187   :  { %v5966_v9 = vsel %vm1005_vm3, %v1076_v50, %v1077_v39  ;;  %v5969_v51 = vsel %vm1223_vm4, %v1294_v49, %v1295_v7  ;;  %v1528_v17 = vld [vmem:[#allocation2 + $0x1b8] sm:$0xff]  ;;  %v106_v50 = vld [vmem:[%s8825_s0 + $0x168] sm:$0xff]  ;;  %v1079_v49 = vrot.slane %v924_v34, 1  ;;  %2670 = vmatpush.msrb.mxu2 %v1560_v12  ;;  %v5991_v34 = vsel %vm1223_vm4, %v1295_v7, %v1297_v48 }
 0x188   :  { %9198 = vst [vmem:[#allocation76_spill] sm:$0xff] %v5962_v35  ;;  %v579_v40 = vmax.f32 %v515_v29, 0.0  ;;  %1926 = vmatmul.f32.gmra.mxu2 %v5966_v9  ;;  %2135 = vmatmul.f32.gmra.mxu3 %v5969_v51 }
 0x189   :  { %9199 = vst [vmem:[#allocation77_spill] sm:$0xff] %v5966_v9  ;;  %2252 = vmatpush.msrb.mxu0 %v1528_v17  ;;  %v5988_v13 = vsel %vm1005_vm3, %v1077_v39, %v1079_v49  ;;  %v107_v39 = vld [vmem:[%s8825_s0 + $0x170] sm:$0xff]  ;;  %v1544_v49 = vld [vmem:[#allocation2 + $0x238] sm:$0xff] }
 0x18a   :  { %9200 = vst [vmem:[#allocation78_spill] sm:$0xff] %v5969_v51  ;;  %v5974_v21 = vrot.slane %v579_v40, 7  ;;  %v1676_v47 = vpop.f32.mrf.mxu1  ;;  %2461 = vmatpush.msrb.mxu1 %v1544_v49 }
 0x18b   :  { %v310_v35 = vpop.f32.mrf.mxu0  ;;  %v1879_v33 = vpop.f32.mrf.mxu2  ;;  %9202 = vst [vmem:[#allocation80_spill] sm:$0xff] %v5988_v13 }
 0x18c   :  { %v448_v29 = vmul.f32 %v5930_v37, %v310_v35  ;;  %v1880_v36 = vadd.f32 %v1879_v33, %v1670_v23  ;;  %v2088_v9 = vpop.f32.mrf.mxu3  ;;  %9203 = vst [vmem:[#allocation81_spill] sm:$0xff] %v5991_v34  ;;  %v892_v17 = vsel %vm680_vm1, 0.0, %v5974_v21 }
 0x18d   :  { %4726 = vmatmul.msk.f32.gmra.mxu1 %vm5272_vm2, %v5974_v21 }
 0x18e   :  { %v516_v40 = vadd.f32 %v5907_v57, %v448_v29  ;;  %v5984_v51 = vadd.f32 %v2088_v9, %v1880_v36  ;;  %4676 = vmatmul.msk.f32.gmra.mxu0 %vm125_vm0, %v106_v50  ;;  %v1081_v29 = vrot.slane %v892_v17, 1 }
 0x190   :  { %9201 = vst [vmem:[#allocation79_spill] sm:$0xff] %v5984_v51  ;;  %v580_v12 = vmax.f32 %v516_v40, 0.0  ;;  %1929 = vmatmul.f32.gmra.mxu2 %v5988_v13  ;;  %2138 = vmatmul.f32.gmra.mxu3 %v5991_v34  ;;  %v1299_v40 = vrot.slane %v892_v17, 2  ;;  %v1580_v13 = vld [vmem:[#allocation2 + $0x358] sm:$0xff] }
 0x191   :  { %2875 = vmatpush.msrb.mxu3 %v1580_v13 }
 0x192   :  { %v726_v23 = vrot.slane %v580_v12, 7  ;;  %v1679_v35 = vpop.f32.mrf.mxu1 }
 0x193   :  { %v5997_v9 = vpop.f32.mrf.mxu0  ;;  %v1882_v33 = vpop.f32.mrf.mxu2 }
 0x194   :  { %v1883_v50 = vadd.f32 %v1882_v33, %v1673_v1  ;;  %v2091_v7 = vpop.f32.mrf.mxu3  ;;  %v6004_v48 = vsel %vm680_vm1, %v5974_v21, %v726_v23  ;;  %v925_v34 = vsel %vm680_vm1, %v726_v23, 0.0 }
 0x195   :  { %9204 = vst [vmem:[#allocation82_spill] sm:$0xff] %v6004_v48  ;;  %1726 = vmatmul.f32.gmra.mxu1 %v6004_v48  ;;  %v1082_v36 = vrot.slane %v6004_v48, 1  ;;  %v1300_v12 = vrot.slane %v6004_v48, 2  ;;  %v1302_v49 = vrot.slane %v925_v34, 2 }
 0x196   :  { %v6009_v51 = vadd.f32 %v2091_v7, %v1883_v50  ;;  %4677 = vmatmul.msk.f32.gmra.mxu0 %vm125_vm0, %v107_v39  ;;  %v108_v39 = vld [vmem:[%s8825_s0 + $0x178] sm:$0xff]  ;;  %v1084_v7 = vrot.slane %v925_v34, 1 }
 0x197   :  { %v6013_v1 = vsel %vm1005_vm3, %v1081_v29, %v1082_v36  ;;  %v6016_v33 = vsel %vm1223_vm4, %v1299_v40, %v1300_v12 }
 0x198   :  { %9205 = vst [vmem:[#allocation83_spill] sm:$0xff] %v6009_v51  ;;  %1932 = vmatmul.f32.gmra.mxu2 %v6013_v1  ;;  %2141 = vmatmul.f32.gmra.mxu3 %v6016_v33  ;;  %v6033_v51 = vsel %vm1005_vm3, %v1082_v36, %v1084_v7 }
 0x199   :  { %9206 = vst [vmem:[#allocation84_spill] sm:$0xff] %v6013_v1 }
 0x19a   :  { %9207 = vst [vmem:[#allocation85_spill] sm:$0xff] %v6016_v33  ;;  %v1682_v17 = vpop.f32.mrf.mxu1  ;;  %v6036_v33 = vsel %vm1223_vm4, %v1300_v12, %v1302_v49 }
 0x19b   :  { %v6021_v48 = vpop.f32.mrf.mxu0  ;;  %v1885_v50 = vpop.f32.mrf.mxu2  ;;  %9209 = vst [vmem:[#allocation87_spill] sm:$0xff] %v6033_v51 }
 0x19c   :  { %v1886_v29 = vadd.f32 %v1885_v50, %v1676_v47  ;;  %v2094_v40 = vpop.f32.mrf.mxu3  ;;  %9210 = vst [vmem:[#allocation88_spill] sm:$0xff] %v6036_v33  ;;  %v109_v50 = vld [vmem:[%s8825_s0 + $0x180] sm:$0xff] }
 0x19d   :  { %4728 = vmatmul.msk.f32.gmra.mxu1 %vm5272_vm2, %v5269_v0 }
 0x19e   :  { %v6029_v23 = vadd.f32 %v2094_v40, %v1886_v29  ;;  %4678 = vmatmul.msk.f32.gmra.mxu0 %vm125_vm0, %v108_v39 }
 0x1a0   :  { %9208 = vst [vmem:[#allocation86_spill] sm:$0xff] %v6029_v23  ;;  %1935 = vmatmul.f32.gmra.mxu2 %v6033_v51  ;;  %2144 = vmatmul.f32.gmra.mxu3 %v6036_v33  ;;  %v1559_v33 = vld [vmem:[#allocation2 + $0x2b0] sm:$0xff] }
 0x1a1   :  { %2671 = vmatpush.msrb.mxu2 %v1559_v33 }
 0x1a2   :  { %v1685_v13 = vpop.f32.mrf.mxu1 }
 0x1a3   :  { %v319_v47 = vpop.f32.mrf.mxu0  ;;  %v1888_v34 = vpop.f32.mrf.mxu2 }
 0x1a4   :  { %v451_v29 = vmul.f32 %v5930_v37, %v319_v47  ;;  %v1889_v39 = vadd.f32 %v1888_v34, %v1679_v35  ;;  %v2097_v40 = vpop.f32.mrf.mxu3  ;;  %v1527_v47 = vld [vmem:[#allocation2 + $0x1b0] sm:$0xff] }
 0x1a5   :  { %1732 = vmatmul.f32.gmra.mxu1 %v5269_v0  ;;  %2253 = vmatpush.msrb.mxu0 %v1527_v47 }
 0x1a6   :  { %v519_v36 = vadd.f32 %v5907_v57, %v451_v29  ;;  %v6046_v12 = vadd.f32 %v2097_v40, %v1889_v39  ;;  %4679 = vmatmul.msk.f32.gmra.mxu0 %vm125_vm0, %v109_v50  ;;  %v110_v29 = vld [vmem:[%s8825_s0 + $0x188] sm:$0xff] }
 0x1a8   :  { %9211 = vst [vmem:[#allocation89_spill] sm:$0xff] %v6046_v12  ;;  %v583_v7 = vmax.f32 %v519_v36, 0.0  ;;  %1938 = vmatmul.f32.gmra.mxu2 %v5291_v18  ;;  %2147 = vmatmul.f32.gmra.mxu3 %v5297_v22 }
 0x1aa   :  { %v6051_v49 = vrot.slane %v583_v7, 7  ;;  %v1688_v23 = vpop.f32.mrf.mxu1 }
 0x1ab   :  { %v322_v35 = vpop.f32.mrf.mxu0  ;;  %v1891_v34 = vpop.f32.mrf.mxu2 }
 0x1ac   :  { %v452_v50 = vmul.f32 %v5930_v37, %v322_v35  ;;  %v1892_v39 = vadd.f32 %v1891_v34, %v1682_v17  ;;  %v2100_v40 = vpop.f32.mrf.mxu3  ;;  %v894_v17 = vsel %vm680_vm1, 0.0, %v6051_v49 }
 0x1ad   :  { %4730 = vmatmul.msk.f32.gmra.mxu1 %vm5272_vm2, %v6051_v49  ;;  %v1304_v18 = vrot.slane %v894_v17, 2 }
 0x1ae   :  { %v520_v36 = vadd.f32 %v5907_v57, %v452_v50  ;;  %v6061_v7 = vadd.f32 %v2100_v40, %v1892_v39  ;;  %4680 = vmatmul.msk.f32.gmra.mxu0 %vm125_vm0, %v110_v29  ;;  %v111_v50 = vld [vmem:[%s8825_s0 + $0x190] sm:$0xff] }
 0x1b0   :  { %9212 = vst [vmem:[#allocation90_spill] sm:$0xff] %v6061_v7  ;;  %v584_v22 = vmax.f32 %v520_v36, 0.0  ;;  %1941 = vmatmul.f32.gmra.mxu2 %v5306_v28  ;;  %2150 = vmatmul.f32.gmra.mxu3 %v5311_v30  ;;  %v1543_v30 = vld [vmem:[#allocation2 + $0x230] sm:$0xff] }
 0x1b1   :  { %2462 = vmatpush.msrb.mxu1 %v1543_v30  ;;  %v112_v30 = vld [vmem:[%s8825_s0 + $0x198] sm:$0xff] }
 0x1b2   :  { %v732_v33 = vrot.slane %v584_v22, 7  ;;  %v1691_v47 = vpop.f32.mrf.mxu1  ;;  %v1086_v22 = vrot.slane %v894_v17, 1 }
 0x1b3   :  { %v325_v35 = vpop.f32.mrf.mxu0  ;;  %v1894_v34 = vpop.f32.mrf.mxu2 }
 0x1b4   :  { %v453_v39 = vmul.f32 %v5930_v37, %v325_v35  ;;  %v1895_v40 = vadd.f32 %v1894_v34, %v1685_v13  ;;  %v2103_v29 = vpop.f32.mrf.mxu3  ;;  %v6074_v36 = vsel %vm680_vm1, %v6051_v49, %v732_v33  ;;  %v927_v34 = vsel %vm680_vm1, %v732_v33, 0.0 }
 0x1b5   :  { %9213 = vst [vmem:[#allocation91_spill] sm:$0xff] %v6074_v36  ;;  %1738 = vmatmul.f32.gmra.mxu1 %v6074_v36  ;;  %v1087_v28 = vrot.slane %v6074_v36, 1  ;;  %v1305_v7 = vrot.slane %v6074_v36, 2 }
 0x1b6   :  { %v521_v12 = vadd.f32 %v5907_v57, %v453_v39  ;;  %v6080_v0 = vadd.f32 %v2103_v29, %v1895_v40  ;;  %4681 = vmatmul.msk.f32.gmra.mxu0 %vm125_vm0, %v111_v50  ;;  %v1579_v40 = vld [vmem:[#allocation2 + $0x350] sm:$0xff] }
 0x1b7   :  { %v6084_v13 = vsel %vm1005_vm3, %v1086_v22, %v1087_v28  ;;  %v6087_v35 = vsel %vm1223_vm4, %v1304_v18, %v1305_v7  ;;  %v1089_v22 = vrot.slane %v927_v34, 1  ;;  %v1307_v18 = vrot.slane %v927_v34, 2  ;;  %2876 = vmatpush.msrb.mxu3 %v1579_v40 }
 0x1b8   :  { %9214 = vst [vmem:[#allocation92_spill] sm:$0xff] %v6080_v0  ;;  %v585_v51 = vmax.f32 %v521_v12, 0.0  ;;  %1944 = vmatmul.f32.gmra.mxu2 %v6084_v13  ;;  %2153 = vmatmul.f32.gmra.mxu3 %v6087_v35 }
 0x1b9   :  { %9215 = vst [vmem:[#allocation93_spill] sm:$0xff] %v6084_v13  ;;  %v6106_v13 = vsel %vm1005_vm3, %v1087_v28, %v1089_v22  ;;  %v6109_v34 = vsel %vm1223_vm4, %v1305_v7, %v1307_v18  ;;  %v113_v28 = vld [vmem:[%s8825_s0 + $0x1a0] sm:$0xff] }
 0x1ba   :  { %9216 = vst [vmem:[#allocation94_spill] sm:$0xff] %v6087_v35  ;;  %v6092_v17 = vrot.slane %v585_v51, 7  ;;  %v1694_v39 = vpop.f32.mrf.mxu1 }
 0x1bb   :  { %v328_v29 = vpop.f32.mrf.mxu0  ;;  %v1897_v50 = vpop.f32.mrf.mxu2  ;;  %9219 = vst [vmem:[#allocation97_spill] sm:$0xff] %v6106_v13 }
 0x1bc   :  { %9217 = vst [vmem:[#allocation95_spill] sm:$0xff] %v6092_v17  ;;  %v454_v33 = vmul.f32 %v5930_v37, %v328_v29  ;;  %v1898_v12 = vadd.f32 %v1897_v50, %v1688_v23  ;;  %v2106_v0 = vpop.f32.mrf.mxu3  ;;  %v895_v50 = vsel %vm680_vm1, 0.0, %v6092_v17 }
 0x1bd   :  { %4732 = vmatmul.msk.f32.gmra.mxu1 %vm5272_vm2, %v6092_v17  ;;  %9220 = vst [vmem:[#allocation98_spill] sm:$0xff] %v6109_v34 }
 0x1be   :  { %v522_v51 = vadd.f32 %v5907_v57, %v454_v33  ;;  %v6102_v35 = vadd.f32 %v2106_v0, %v1898_v12  ;;  %4682 = vmatmul.msk.f32.gmra.mxu0 %vm125_vm0, %v112_v30  ;;  %v1091_v12 = vrot.slane %v895_v50, 1 }
 0x1c0   :  { %9218 = vst [vmem:[#allocation96_spill] sm:$0xff] %v6102_v35  ;;  %v586_v40 = vmax.f32 %v522_v51, 0.0  ;;  %1947 = vmatmul.f32.gmra.mxu2 %v6106_v13  ;;  %2156 = vmatmul.f32.gmra.mxu3 %v6109_v34 }
 0x1c2   :  { %v735_v23 = vrot.slane %v586_v40, 7  ;;  %v1697_v29 = vpop.f32.mrf.mxu1  ;;  %v1309_v40 = vrot.slane %v895_v50, 2 }
 0x1c3   :  { %v331_v0 = vpop.f32.mrf.mxu0  ;;  %v1900_v33 = vpop.f32.mrf.mxu2 }
 0x1c4   :  { %v455_v30 = vmul.f32 %v5930_v37, %v331_v0  ;;  %v1901_v7 = vadd.f32 %v1900_v33, %v1691_v47  ;;  %v2109_v22 = vpop.f32.mrf.mxu3  ;;  %v6121_v18 = vsel %vm680_vm1, %v6092_v17, %v735_v23  ;;  %v928_v33 = vsel %vm680_vm1, %v735_v23, 0.0 }
 0x1c5   :  { %9221 = vst [vmem:[#allocation99_spill] sm:$0xff] %v6121_v18  ;;  %1744 = vmatmul.f32.gmra.mxu1 %v6121_v18  ;;  %v1092_v51 = vrot.slane %v6121_v18, 1  ;;  %v1310_v35 = vrot.slane %v6121_v18, 2  ;;  %v1312_v18 = vrot.slane %v928_v33, 2 }
 0x1c6   :  { %v523_v34 = vadd.f32 %v5907_v57, %v455_v30  ;;  %v6127_v13 = vadd.f32 %v2109_v22, %v1901_v7  ;;  %4683 = vmatmul.msk.f32.gmra.mxu0 %vm125_vm0, %v113_v28  ;;  %v1558_v7 = vld [vmem:[#allocation2 + $0x2a8] sm:$0xff] }
 0x1c7   :  { %v6131_v47 = vsel %vm1005_vm3, %v1091_v12, %v1092_v51  ;;  %v6134_v0 = vsel %vm1223_vm4, %v1309_v40, %v1310_v35  ;;  %v1526_v22 = vld [vmem:[#allocation2 + $0x1a8] sm:$0xff]  ;;  %v1094_v40 = vrot.slane %v928_v33, 1  ;;  %2672 = vmatpush.msrb.mxu2 %v1558_v7  ;;  %v6156_v33 = vsel %vm1223_vm4, %v1310_v35, %v1312_v18 }
 0x1c8   :  { %9222 = vst [vmem:[#allocation100_spill] sm:$0xff] %v6127_v13  ;;  %v587_v1 = vmax.f32 %v523_v34, 0.0  ;;  %1950 = vmatmul.f32.gmra.mxu2 %v6131_v47  ;;  %2159 = vmatmul.f32.gmra.mxu3 %v6134_v0  ;;  %v114_v12 = vld [vmem:[%s8825_s0 + $0x1a8] sm:$0xff] }
 0x1c9   :  { %9223 = vst [vmem:[#allocation101_spill] sm:$0xff] %v6131_v47  ;;  %2254 = vmatpush.msrb.mxu0 %v1526_v22  ;;  %v6153_v17 = vsel %vm1005_vm3, %v1092_v51, %v1094_v40  ;;  %v115_v51 = vld [vmem:[%s8825_s0 + $0x1b0] sm:$0xff] }
 0x1ca   :  { %9224 = vst [vmem:[#allocation102_spill] sm:$0xff] %v6134_v0  ;;  %v6139_v50 = vrot.slane %v587_v1, 7  ;;  %v1700_v30 = vpop.f32.mrf.mxu1 }
 0x1cb   :  { %v334_v13 = vpop.f32.mrf.mxu0  ;;  %v1903_v28 = vpop.f32.mrf.mxu2  ;;  %9227 = vst [vmem:[#allocation105_spill] sm:$0xff] %v6153_v17 }
 0x1cc   :  { %9225 = vst [vmem:[#allocation103_spill] sm:$0xff] %v6139_v50  ;;  %v456_v34 = vmul.f32 %v5930_v37, %v334_v13  ;;  %v1904_v23 = vadd.f32 %v1903_v28, %v1694_v39  ;;  %v2112_v47 = vpop.f32.mrf.mxu3  ;;  %v896_v22 = vsel %vm680_vm1, 0.0, %v6139_v50 }
 0x1cd   :  { %4734 = vmatmul.msk.f32.gmra.mxu1 %vm5272_vm2, %v6139_v50  ;;  %9228 = vst [vmem:[#allocation106_spill] sm:$0xff] %v6156_v33 }
 0x1ce   :  { %v524_v1 = vadd.f32 %v5907_v57, %v456_v34  ;;  %v6149_v0 = vadd.f32 %v2112_v47, %v1904_v23  ;;  %4684 = vmatmul.msk.f32.gmra.mxu0 %vm125_vm0, %v114_v12  ;;  %v1542_v34 = vld [vmem:[#allocation2 + $0x228] sm:$0xff]  ;;  %v1096_v23 = vrot.slane %v896_v22, 1 }
 0x1cf   :  { %2463 = vmatpush.msrb.mxu1 %v1542_v34  ;;  %v116_v34 = vld [vmem:[%s8825_s0 + $0x1b8] sm:$0xff] }
 0x1d0   :  { %9226 = vst [vmem:[#allocation104_spill] sm:$0xff] %v6149_v0  ;;  %v588_v7 = vmax.f32 %v524_v1, 0.0  ;;  %1953 = vmatmul.f32.gmra.mxu2 %v6153_v17  ;;  %2162 = vmatmul.f32.gmra.mxu3 %v6156_v33 }
 0x1d2   :  { %v738_v13 = vrot.slane %v588_v7, 7  ;;  %v1703_v39 = vpop.f32.mrf.mxu1  ;;  %v1314_v7 = vrot.slane %v896_v22, 2 }
 0x1d3   :  { %v337_v47 = vpop.f32.mrf.mxu0  ;;  %v1906_v28 = vpop.f32.mrf.mxu2 }
 0x1d4   :  { %v457_v12 = vmul.f32 %v5930_v37, %v337_v47  ;;  %v1907_v35 = vadd.f32 %v1906_v28, %v1697_v29  ;;  %v2115_v18 = vpop.f32.mrf.mxu3  ;;  %v6168_v40 = vsel %vm680_vm1, %v6139_v50, %v738_v13  ;;  %v929_v28 = vsel %vm680_vm1, %v738_v13, 0.0 }
 0x1d5   :  { %9229 = vst [vmem:[#allocation107_spill] sm:$0xff] %v6168_v40  ;;  %1750 = vmatmul.f32.gmra.mxu1 %v6168_v40  ;;  %v1097_v1 = vrot.slane %v6168_v40, 1  ;;  %v1315_v0 = vrot.slane %v6168_v40, 2 }
 0x1d6   :  { %v525_v33 = vadd.f32 %v5907_v57, %v457_v12  ;;  %v6174_v17 = vadd.f32 %v2115_v18, %v1907_v35  ;;  %4685 = vmatmul.msk.f32.gmra.mxu0 %vm125_vm0, %v115_v51  ;;  %v1578_v35 = vld [vmem:[#allocation2 + $0x348] sm:$0xff] }
 0x1d7   :  { %v6178_v29 = vsel %vm1005_vm3, %v1096_v23, %v1097_v1  ;;  %v6181_v47 = vsel %vm1223_vm4, %v1314_v7, %v1315_v0  ;;  %v1099_v23 = vrot.slane %v929_v28, 1  ;;  %v1317_v7 = vrot.slane %v929_v28, 2  ;;  %2877 = vmatpush.msrb.mxu3 %v1578_v35 }
 0x1d8   :  { %9230 = vst [vmem:[#allocation108_spill] sm:$0xff] %v6174_v17  ;;  %v589_v50 = vmax.f32 %v525_v33, 0.0  ;;  %1956 = vmatmul.f32.gmra.mxu2 %v6178_v29  ;;  %2165 = vmatmul.f32.gmra.mxu3 %v6181_v47 }
 0x1d9   :  { %9231 = vst [vmem:[#allocation109_spill] sm:$0xff] %v6178_v29  ;;  %v6200_v29 = vsel %vm1005_vm3, %v1097_v1, %v1099_v23  ;;  %v6203_v28 = vsel %vm1223_vm4, %v1315_v0, %v1317_v7  ;;  %v117_v1 = vld [vmem:[%s8825_s0 + $0x1c0] sm:$0xff] }
 0x1da   :  { %9232 = vst [vmem:[#allocation110_spill] sm:$0xff] %v6181_v47  ;;  %v6186_v22 = vrot.slane %v589_v50, 7  ;;  %v1706_v12 = vpop.f32.mrf.mxu1 }
 0x1db   :  { %v340_v18 = vpop.f32.mrf.mxu0  ;;  %v1909_v51 = vpop.f32.mrf.mxu2  ;;  %9235 = vst [vmem:[#allocation113_spill] sm:$0xff] %v6200_v29 }
 0x1dc   :  { %9233 = vst [vmem:[#allocation111_spill] sm:$0xff] %v6186_v22  ;;  %v458_v13 = vmul.f32 %v5930_v37, %v340_v18  ;;  %v1910_v33 = vadd.f32 %v1909_v51, %v1700_v30  ;;  %v2118_v17 = vpop.f32.mrf.mxu3  ;;  %v897_v51 = vsel %vm680_vm1, 0.0, %v6186_v22 }
 0x1dd   :  { %4736 = vmatmul.msk.f32.gmra.mxu1 %vm5272_vm2, %v6186_v22  ;;  %9236 = vst [vmem:[#allocation114_spill] sm:$0xff] %v6203_v28 }
 0x1de   :  { %v526_v50 = vadd.f32 %v5907_v57, %v458_v13  ;;  %v6196_v47 = vadd.f32 %v2118_v17, %v1910_v33  ;;  %4686 = vmatmul.msk.f32.gmra.mxu0 %vm125_vm0, %v116_v34  ;;  %v1101_v33 = vrot.slane %v897_v51, 1 }
 0x1e0   :  { %9234 = vst [vmem:[#allocation112_spill] sm:$0xff] %v6196_v47  ;;  %v590_v35 = vmax.f32 %v526_v50, 0.0  ;;  %1959 = vmatmul.f32.gmra.mxu2 %v6200_v29  ;;  %2168 = vmatmul.f32.gmra.mxu3 %v6203_v28 }
 0x1e2   :  { %v741_v30 = vrot.slane %v590_v35, 7  ;;  %v1709_v18 = vpop.f32.mrf.mxu1  ;;  %v1319_v35 = vrot.slane %v897_v51, 2 }
 0x1e3   :  { %v343_v17 = vpop.f32.mrf.mxu0  ;;  %v1912_v13 = vpop.f32.mrf.mxu2 }
 0x1e4   :  { %v459_v34 = vmul.f32 %v5930_v37, %v343_v17  ;;  %v1913_v0 = vadd.f32 %v1912_v13, %v1703_v39  ;;  %v2121_v23 = vpop.f32.mrf.mxu3  ;;  %v6215_v7 = vsel %vm680_vm1, %v6186_v22, %v741_v30  ;;  %v930_v13 = vsel %vm680_vm1, %v741_v30, 0.0 }
 0x1e5   :  { %9237 = vst [vmem:[#allocation115_spill] sm:$0xff] %v6215_v7  ;;  %1756 = vmatmul.f32.gmra.mxu1 %v6215_v7  ;;  %v1102_v50 = vrot.slane %v6215_v7, 1  ;;  %v1320_v47 = vrot.slane %v6215_v7, 2  ;;  %v1322_v7 = vrot.slane %v930_v13, 2 }
 0x1e6   :  { %v527_v28 = vadd.f32 %v5907_v57, %v459_v34  ;;  %v6221_v29 = vadd.f32 %v2121_v23, %v1913_v0  ;;  %4687 = vmatmul.msk.f32.gmra.mxu0 %vm125_vm0, %v117_v1  ;;  %v1557_v0 = vld [vmem:[#allocation2 + $0x2a0] sm:$0xff] }
 0x1e7   :  { %v6225_v39 = vsel %vm1005_vm3, %v1101_v33, %v1102_v50  ;;  %v6228_v17 = vsel %vm1223_vm4, %v1319_v35, %v1320_v47  ;;  %v1525_v23 = vld [vmem:[#allocation2 + $0x1a0] sm:$0xff]  ;;  %v118_v33 = vld [vmem:[%s8825_s0 + $0x1c8] sm:$0xff]  ;;  %v1104_v35 = vrot.slane %v930_v13, 1  ;;  %2673 = vmatpush.msrb.mxu2 %v1557_v0  ;;  %v6250_v13 = vsel %vm1223_vm4, %v1320_v47, %v1322_v7 }
 0x1e8   :  { %9238 = vst [vmem:[#allocation116_spill] sm:$0xff] %v6221_v29  ;;  %v591_v22 = vmax.f32 %v527_v28, 0.0  ;;  %1962 = vmatmul.f32.gmra.mxu2 %v6225_v39  ;;  %2171 = vmatmul.f32.gmra.mxu3 %v6228_v17 }
 0x1e9   :  { %9239 = vst [vmem:[#allocation117_spill] sm:$0xff] %v6225_v39  ;;  %2255 = vmatpush.msrb.mxu0 %v1525_v23  ;;  %v6247_v40 = vsel %vm1005_vm3, %v1102_v50, %v1104_v35  ;;  %v119_v50 = vld [vmem:[%s8825_s0 + $0x1d0] sm:$0xff] }
 0x1ea   :  { %9240 = vst [vmem:[#allocation118_spill] sm:$0xff] %v6228_v17  ;;  %v6233_v51 = vrot.slane %v591_v22, 7  ;;  %v1712_v34 = vpop.f32.mrf.mxu1 }
 0x1eb   :  { %v346_v29 = vpop.f32.mrf.mxu0  ;;  %v1915_v1 = vpop.f32.mrf.mxu2  ;;  %9243 = vst [vmem:[#allocation121_spill] sm:$0xff] %v6247_v40 }
 0x1ec   :  { %9241 = vst [vmem:[#allocation119_spill] sm:$0xff] %v6233_v51  ;;  %v460_v28 = vmul.f32 %v5930_v37, %v346_v29  ;;  %v1916_v30 = vadd.f32 %v1915_v1, %v1706_v12  ;;  %v2124_v39 = vpop.f32.mrf.mxu3  ;;  %v898_v23 = vsel %vm680_vm1, 0.0, %v6233_v51 }
 0x1ed   :  { %4738 = vmatmul.msk.f32.gmra.mxu1 %vm5272_vm2, %v6233_v51  ;;  %9244 = vst [vmem:[#allocation122_spill] sm:$0xff] %v6250_v13 }
 0x1ee   :  { %v528_v22 = vadd.f32 %v5907_v57, %v460_v28  ;;  %v6243_v17 = vadd.f32 %v2124_v39, %v1916_v30  ;;  %4688 = vmatmul.msk.f32.gmra.mxu0 %vm125_vm0, %v118_v33  ;;  %v1541_v28 = vld [vmem:[#allocation2 + $0x220] sm:$0xff]  ;;  %v1106_v30 = vrot.slane %v898_v23, 1 }
 0x1ef   :  { %2464 = vmatpush.msrb.mxu1 %v1541_v28  ;;  %v120_v28 = vld [vmem:[%s8825_s0 + $0x1d8] sm:$0xff] }
 0x1f0   :  { %9242 = vst [vmem:[#allocation120_spill] sm:$0xff] %v6243_v17  ;;  %v592_v0 = vmax.f32 %v528_v22, 0.0  ;;  %1965 = vmatmul.f32.gmra.mxu2 %v6247_v40  ;;  %2174 = vmatmul.f32.gmra.mxu3 %v6250_v13 }
 0x1f2   :  { %v744_v29 = vrot.slane %v592_v0, 7  ;;  %v1715_v12 = vpop.f32.mrf.mxu1  ;;  %v1324_v0 = vrot.slane %v898_v23, 2 }
 0x1f3   :  { %v349_v39 = vpop.f32.mrf.mxu0  ;;  %v1918_v1 = vpop.f32.mrf.mxu2 }
 0x1f4   :  { %v461_v33 = vmul.f32 %v5930_v37, %v349_v39  ;;  %v1919_v47 = vadd.f32 %v1918_v1, %v1709_v18  ;;  %v2127_v7 = vpop.f32.mrf.mxu3  ;;  %v6262_v35 = vsel %vm680_vm1, %v6233_v51, %v744_v29  ;;  %v931_v1 = vsel %vm680_vm1, %v744_v29, 0.0 }
 0x1f5   :  { %9245 = vst [vmem:[#allocation123_spill] sm:$0xff] %v6262_v35  ;;  %1762 = vmatmul.f32.gmra.mxu1 %v6262_v35  ;;  %v1107_v22 = vrot.slane %v6262_v35, 1  ;;  %v1325_v17 = vrot.slane %v6262_v35, 2  ;;  %v1521_v35 = vld [vmem:[#allocation2 + $0x180] sm:$0xff] }
 0x1f6   :  { %v529_v13 = vadd.f32 %v5907_v57, %v461_v33  ;;  %v6268_v40 = vadd.f32 %v2127_v7, %v1919_v47  ;;  %4689 = vmatmul.msk.f32.gmra.mxu0 %vm125_vm0, %v119_v50  ;;  %v1577_v47 = vld [vmem:[#allocation2 + $0x340] sm:$0xff] }
 0x1f7   :  { %v6272_v18 = vsel %vm1005_vm3, %v1106_v30, %v1107_v22  ;;  %v6275_v39 = vsel %vm1223_vm4, %v1324_v0, %v1325_v17  ;;  %v1109_v30 = vrot.slane %v931_v1, 1  ;;  %v1327_v0 = vrot.slane %v931_v1, 2  ;;  %2878 = vmatpush.msrb.mxu3 %v1577_v47  ;;  %v1524_v47 = vld [vmem:[#allocation2 + $0x198] sm:$0xff] }
 0x1f8   :  { %9246 = vst [vmem:[#allocation124_spill] sm:$0xff] %v6268_v40  ;;  %v593_v51 = vmax.f32 %v529_v13, 0.0  ;;  %1968 = vmatmul.f32.gmra.mxu2 %v6272_v18  ;;  %2177 = vmatmul.f32.gmra.mxu3 %v6275_v39 }
 0x1f9   :  { %9247 = vst [vmem:[#allocation125_spill] sm:$0xff] %v6272_v18  ;;  %v6294_v18 = vsel %vm1005_vm3, %v1107_v22, %v1109_v30  ;;  %v6297_v1 = vsel %vm1223_vm4, %v1325_v17, %v1327_v0  ;;  %2256 = vmatpush.msrb.mxu0 %v1524_v47  ;;  %v121_v17 = vld [vmem:[%s8825_s0 + $0x1e0] sm:$0xff]  ;;  %v1522_v22 = vld [vmem:[#allocation2 + $0x188] sm:$0xff] }
 0x1fa   :  { %9248 = vst [vmem:[#allocation126_spill] sm:$0xff] %v6275_v39  ;;  %v6280_v23 = vrot.slane %v593_v51, 7  ;;  %v1718_v33 = vpop.f32.mrf.mxu1 }
 0x1fb   :  { %v352_v7 = vpop.f32.mrf.mxu0  ;;  %v1921_v50 = vpop.f32.mrf.mxu2  ;;  %9250 = vst [vmem:[#allocation128_spill] sm:$0xff] %v6294_v18 }
 0x1fc   :  { %v462_v29 = vmul.f32 %v5930_v37, %v352_v7  ;;  %v1922_v13 = vadd.f32 %v1921_v50, %v1712_v34  ;;  %v2130_v40 = vpop.f32.mrf.mxu3  ;;  %9251 = vst [vmem:[#allocation129_spill] sm:$0xff] %v6297_v1  ;;  %v1523_v34 = vld [vmem:[#allocation2 + $0x190] sm:$0xff] }
 0x1fd   :  { %4740 = vmatmul.msk.f32.gmra.mxu1 %vm5272_vm2, %v6280_v23  ;;  %2257 = vmatpush.msrb.mxu0 %v1523_v34 }
 0x1fe   :  { %v530_v51 = vadd.f32 %v5907_v57, %v462_v29  ;;  %v6290_v39 = vadd.f32 %v2130_v40, %v1922_v13  ;;  %4690 = vmatmul.msk.f32.gmra.mxu0 %vm125_vm0, %v120_v28  ;;  %v899_v40 = vsel %vm680_vm1, 0.0, %v6280_v23 }
 0x1ff   :  { %2258 = vmatpush.msrb.mxu0 %v1522_v22 }
 0x200   :  { %9249 = vst [vmem:[#allocation127_spill] sm:$0xff] %v6290_v39  ;;  %v594_v7 = vmax.f32 %v530_v51, 0.0  ;;  %1971 = vmatmul.f32.gmra.mxu2 %v6294_v18  ;;  %2180 = vmatmul.f32.gmra.mxu3 %v6297_v1  ;;  %v1329_v1 = vrot.slane %v899_v40, 2 }
 0x201   :  { %2259 = vmatpush.msrb.mxu0 %v1521_v35 }
 0x202   :  { %v747_v50 = vrot.slane %v594_v7, 7  ;;  %v1721_v29 = vpop.f32.mrf.mxu1  ;;  %v1111_v7 = vrot.slane %v899_v40, 1 }
 0x203   :  { %v355_v28 = vpop.f32.mrf.mxu0  ;;  %v1924_v13 = vpop.f32.mrf.mxu2 }
 0x204   :  { %v463_v30 = vmul.f32 %v5930_v37, %v355_v28  ;;  %v1925_v0 = vadd.f32 %v1924_v13, %v1715_v12  ;;  %v2133_v51 = vpop.f32.mrf.mxu3  ;;  %v6309_v47 = vsel %vm680_vm1, %v6280_v23, %v747_v50  ;;  %v932_v13 = vsel %vm680_vm1, %v747_v50, 0.0 }
 0x205   :  { %9252 = vst [vmem:[#allocation130_spill] sm:$0xff] %v6309_v47  ;;  %1768 = vmatmul.f32.gmra.mxu1 %v6309_v47  ;;  %v1112_v39 = vrot.slane %v6309_v47, 1  ;;  %v1330_v18 = vrot.slane %v6309_v47, 2 }
 0x206   :  { %v531_v34 = vadd.f32 %v5907_v57, %v463_v30  ;;  %v6315_v36 = vadd.f32 %v2133_v51, %v1925_v0  ;;  %4691 = vmatmul.msk.f32.gmra.mxu0 %vm125_vm0, %v121_v17  ;;  %v1556_v0 = vld [vmem:[#allocation2 + $0x298] sm:$0xff] }
 0x207   :  { %v6319_v12 = vsel %vm1005_vm3, %v1111_v7, %v1112_v39  ;;  %v6322_v28 = vsel %vm1223_vm4, %v1329_v1, %v1330_v18  ;;  %v122_v7 = vld [vmem:[%s8825_s0 + $0x1e8] sm:$0xff]  ;;  %v1114_v1 = vrot.slane %v932_v13, 1  ;;  %2674 = vmatpush.msrb.mxu2 %v1556_v0 }
 0x208   :  { %9253 = vst [vmem:[#allocation131_spill] sm:$0xff] %v6315_v36  ;;  %v595_v40 = vmax.f32 %v531_v34, 0.0  ;;  %1974 = vmatmul.f32.gmra.mxu2 %v6319_v12  ;;  %2183 = vmatmul.f32.gmra.mxu3 %v6322_v28  ;;  %v1332_v36 = vrot.slane %v932_v13, 2 }
 0x209   :  { %9254 = vst [vmem:[#allocation132_spill] sm:$0xff] %v6319_v12  ;;  %v6341_v12 = vsel %vm1005_vm3, %v1112_v39, %v1114_v1  ;;  %v123_v39 = vld [vmem:[%s8825_s0 + $0x1f0] sm:$0xff] }
 0x20a   :  { %9255 = vst [vmem:[#allocation133_spill] sm:$0xff] %v6322_v28  ;;  %v6327_v22 = vrot.slane %v595_v40, 7  ;;  %v1724_v30 = vpop.f32.mrf.mxu1  ;;  %v6344_v13 = vsel %vm1223_vm4, %v1330_v18, %v1332_v36 }
 0x20b   :  { %v358_v51 = vpop.f32.mrf.mxu0  ;;  %v1927_v17 = vpop.f32.mrf.mxu2  ;;  %9258 = vst [vmem:[#allocation136_spill] sm:$0xff] %v6341_v12 }
 0x20c   :  { %9256 = vst [vmem:[#allocation134_spill] sm:$0xff] %v6327_v22  ;;  %v464_v35 = vmul.f32 %v5930_v37, %v358_v51  ;;  %v1928_v50 = vadd.f32 %v1927_v17, %v1718_v33  ;;  %v2136_v34 = vpop.f32.mrf.mxu3  ;;  %v900_v17 = vsel %vm680_vm1, 0.0, %v6327_v22 }
 0x20d   :  { %4742 = vmatmul.msk.f32.gmra.mxu1 %vm5272_vm2, %v6327_v22  ;;  %9259 = vst [vmem:[#allocation137_spill] sm:$0xff] %v6344_v13 }
 0x20e   :  { %v532_v40 = vadd.f32 %v5907_v57, %v464_v35  ;;  %v6337_v28 = vadd.f32 %v2136_v34, %v1928_v50  ;;  %4692 = vmatmul.msk.f32.gmra.mxu0 %vm125_vm0, %v122_v7  ;;  %v1540_v34 = vld [vmem:[#allocation2 + $0x218] sm:$0xff] }
 0x20f   :  { %2465 = vmatpush.msrb.mxu1 %v1540_v34  ;;  %v124_v34 = vld [vmem:[%s8825_s0 + $0x1f8] sm:$0xff] }
 0x210   :  { %9257 = vst [vmem:[#allocation135_spill] sm:$0xff] %v6337_v28  ;;  %v596_v0 = vmax.f32 %v532_v40, 0.0  ;;  %1977 = vmatmul.f32.gmra.mxu2 %v6341_v12  ;;  %2186 = vmatmul.f32.gmra.mxu3 %v6344_v13  ;;  %v1116_v40 = vrot.slane %v900_v17, 1  ;;  %v1334_v28 = vrot.slane %v900_v17, 2 }
 0x212   :  { %v750_v33 = vrot.slane %v596_v0, 7  ;;  %v1727_v51 = vpop.f32.mrf.mxu1 }
 0x213   :  { %v361_v35 = vpop.f32.mrf.mxu0  ;;  %v1930_v50 = vpop.f32.mrf.mxu2 }
 0x214   :  { %v465_v7 = vmul.f32 %v5930_v37, %v361_v35  ;;  %v1931_v36 = vadd.f32 %v1930_v50, %v1721_v29  ;;  %v2139_v18 = vpop.f32.mrf.mxu3  ;;  %v6356_v1 = vsel %vm680_vm1, %v6327_v22, %v750_v33  ;;  %v933_v50 = vsel %vm680_vm1, %v750_v33, 0.0 }
 0x215   :  { %1774 = vmatmul.f32.gmra.mxu1 %v6356_v1  ;;  %v1117_v0 = vrot.slane %v6356_v1, 1  ;;  %v1335_v13 = vrot.slane %v6356_v1, 2 }
 0x216   :  { %v533_v12 = vadd.f32 %v5907_v57, %v465_v7  ;;  %v6362_v47 = vadd.f32 %v2139_v18, %v1931_v36  ;;  %4693 = vmatmul.msk.f32.gmra.mxu0 %vm125_vm0, %v123_v39  ;;  %v1576_v36 = vld [vmem:[#allocation2 + $0x338] sm:$0xff] }
 0x217   :  { %v6366_v29 = vsel %vm1005_vm3, %v1116_v40, %v1117_v0  ;;  %v6369_v35 = vsel %vm1223_vm4, %v1334_v28, %v1335_v13  ;;  %v1119_v40 = vrot.slane %v933_v50, 1  ;;  %v1337_v28 = vrot.slane %v933_v50, 2  ;;  %2879 = vmatpush.msrb.mxu3 %v1576_v36 }
 0x218   :  { %9260 = vst [vmem:[#allocation138_spill] sm:$0xff] %v6362_v47  ;;  %v597_v22 = vmax.f32 %v533_v12, 0.0  ;;  %1980 = vmatmul.f32.gmra.mxu2 %v6366_v29  ;;  %2189 = vmatmul.f32.gmra.mxu3 %v6369_v35 }
 0x219   :  { %9261 = vst [vmem:[#allocation139_spill] sm:$0xff] %v6366_v29  ;;  %v6388_v29 = vsel %vm1005_vm3, %v1117_v0, %v1119_v40  ;;  %v6391_v50 = vsel %vm1223_vm4, %v1335_v13, %v1337_v28 }
 0x21a   :  { %9262 = vst [vmem:[#allocation140_spill] sm:$0xff] %v6369_v35  ;;  %v6374_v17 = vrot.slane %v597_v22, 7  ;;  %v1730_v7 = vpop.f32.mrf.mxu1 }
 0x21b   :  { %v364_v18 = vpop.f32.mrf.mxu0  ;;  %v1933_v39 = vpop.f32.mrf.mxu2  ;;  %9264 = vst [vmem:[#allocation142_spill] sm:$0xff] %v6388_v29 }
 0x21c   :  { %v466_v33 = vmul.f32 %v5930_v37, %v364_v18  ;;  %v1934_v12 = vadd.f32 %v1933_v39, %v1724_v30  ;;  %v2142_v47 = vpop.f32.mrf.mxu3  ;;  %9265 = vst [vmem:[#allocation143_spill] sm:$0xff] %v6391_v50  ;;  %v901_v39 = vsel %vm680_vm1, 0.0, %v6374_v17 }
 0x21d   :  { %4744 = vmatmul.msk.f32.gmra.mxu1 %vm5272_vm2, %v6374_v17  ;;  %v1121_v40 = vrot.slane %v901_v39, 1 }
 0x21e   :  { %v534_v22 = vadd.f32 %v5907_v57, %v466_v33  ;;  %v6384_v35 = vadd.f32 %v2142_v47, %v1934_v12  ;;  %4694 = vmatmul.msk.f32.gmra.mxu0 %vm125_vm0, %v124_v34 }
 0x220   :  { %9263 = vst [vmem:[#allocation141_spill] sm:$0xff] %v6384_v35  ;;  %v598_v36 = vmax.f32 %v534_v22, 0.0  ;;  %1983 = vmatmul.f32.gmra.mxu2 %v6388_v29  ;;  %2192 = vmatmul.f32.gmra.mxu3 %v6391_v50  ;;  %v1339_v22 = vrot.slane %v901_v39, 2 }
 0x222   :  { %v753_v30 = vrot.slane %v598_v36, 7  ;;  %v1733_v18 = vpop.f32.mrf.mxu1 }
 0x223   :  { %v367_v47 = vpop.f32.mrf.mxu0  ;;  %v1936_v33 = vpop.f32.mrf.mxu2 }
 0x224   :  { %v467_v34 = vmul.f32 %v5930_v37, %v367_v47  ;;  %v1937_v12 = vadd.f32 %v1936_v33, %v1727_v51  ;;  %v2145_v0 = vpop.f32.mrf.mxu3  ;;  %v6400_v13 = vsel %vm680_vm1, %v6374_v17, %v753_v30  ;;  %v934_v33 = vsel %vm680_vm1, %v753_v30, 0.0 }
 0x225   :  { %9266 = vst [vmem:[#allocation144_spill] sm:$0xff] %v6400_v13  ;;  %1780 = vmatmul.f32.gmra.mxu1 %v6400_v13  ;;  %v1122_v28 = vrot.slane %v6400_v13, 1  ;;  %v1340_v36 = vrot.slane %v6400_v13, 2 }
 0x226   :  { %v535_v35 = vadd.f32 %v5907_v57, %v467_v34  ;;  %v6406_v50 = vadd.f32 %v2145_v0, %v1937_v12  ;;  %4760 = vmatmul.msk.f32.vlgmr.msrb.gmra.mxu0 %vm5272_vm2, %v5338_v41  ;;  %v1555_v34 = vld [vmem:[#allocation2 + $0x290] sm:$0xff]  ;;  %v1124_v41 = vrot.slane %v934_v33, 1 }
 0x227   :  { %v6412_v51 = vsel %vm1005_vm3, %v1121_v40, %v1122_v28  ;;  %v6415_v47 = vsel %vm1223_vm4, %v1339_v22, %v1340_v36  ;;  %2675 = vmatpush.msrb.mxu2 %v1555_v34 }
 0x228   :  { %9267 = vst [vmem:[#allocation145_spill] sm:$0xff] %v6406_v50  ;;  %v599_v29 = vmax.f32 %v535_v35, 0.0  ;;  %1986 = vmatmul.f32.gmra.mxu2 %v6412_v51  ;;  %2195 = vmatmul.f32.gmra.mxu3 %v6415_v47  ;;  %v1342_v50 = vrot.slane %v934_v33, 2  ;;  %v6436_v33 = vsel %vm1005_vm3, %v1122_v28, %v1124_v41 }
 0x229   :  { %9268 = vst [vmem:[#allocation146_spill] sm:$0xff] %v6412_v51 }
 0x22a   :  { %9269 = vst [vmem:[#allocation147_spill] sm:$0xff] %v6415_v47  ;;  %v6420_v57 = vrot.slane %v599_v29, 7  ;;  %v1736_v39 = vpop.f32.mrf.mxu1  ;;  %v6429_v29 = vld [vmem:[%s8828_s3] ss:$0 sm:$0xff] }
 0x22b   :  { %v370_v12 = vpop.f32.mrf.mxu0  ;;  %v1939_v0 = vpop.f32.mrf.mxu2  ;;  %9272 = vst [vmem:[#allocation150_spill] sm:$0xff] %v6436_v33 }
 0x22c   :  { %9270 = vst [vmem:[#allocation148_spill] sm:$0xff] %v6420_v57  ;;  %v468_v40 = vmul.f32 %v5930_v37, %v370_v12  ;;  %v1940_v22 = vadd.f32 %v1939_v0, %v1730_v7  ;;  %v2148_v13 = vpop.f32.mrf.mxu3  ;;  %v6439_v37 = vsel %vm1223_vm4, %v1340_v36, %v1342_v50  ;;  %v902_v0 = vsel %vm680_vm1, 0.0, %v6420_v57 }
 0x22d   :  { %4746 = vmatmul.msk.f32.gmra.mxu1 %vm5272_vm2, %v6420_v57  ;;  %9273 = vst [vmem:[#allocation151_spill] sm:$0xff] %v6439_v37 }
 0x22e   :  { %v536_v35 = vadd.f32 %v6429_v29, %v468_v40  ;;  %v6432_v30 = vadd.f32 %v2148_v13, %v1940_v22  ;;  %2263 = vmatmul.f32.gmra.mxu0 %v5357_v54  ;;  %v6448_v54 = vld [vmem:[%s8827_s2] ss:$0 sm:$0xff]  ;;  %v1539_v22 = vld [vmem:[#allocation2 + $0x210] sm:$0xff] }
 0x22f   :  { %2466 = vmatpush.msrb.mxu1 %v1539_v22 }
 0x230   :  { %9271 = vst [vmem:[#allocation149_spill] sm:$0xff] %v6432_v30  ;;  %v600_v7 = vmax.f32 %v536_v35, 0.0  ;;  %1989 = vmatmul.f32.gmra.mxu2 %v6436_v33  ;;  %2198 = vmatmul.f32.gmra.mxu3 %v6439_v37  ;;  %v1126_v35 = vrot.slane %v902_v0, 1  ;;  %v1344_v30 = vrot.slane %v902_v0, 2 }
 0x232   :  { %v756_v34 = vrot.slane %v600_v7, 7  ;;  %v1739_v12 = vpop.f32.mrf.mxu1 }
 0x233   :  { %v373_v13 = vpop.f32.mrf.mxu0  ;;  %v1942_v40 = vpop.f32.mrf.mxu2 }
 0x234   :  { %v469_v50 = vmul.f32 %v6448_v54, %v373_v13  ;;  %v1943_v28 = vadd.f32 %v1942_v40, %v1733_v18  ;;  %v2151_v36 = vpop.f32.mrf.mxu3  ;;  %v6453_v41 = vsel %vm680_vm1, %v6420_v57, %v756_v34  ;;  %v935_v40 = vsel %vm680_vm1, %v756_v34, 0.0 }
 0x235   :  { %9274 = vst [vmem:[#allocation152_spill] sm:$0xff] %v6453_v41  ;;  %1786 = vmatmul.f32.gmra.mxu1 %v6453_v41  ;;  %v1127_v7 = vrot.slane %v6453_v41, 1  ;;  %v1345_v37 = vrot.slane %v6453_v41, 2  ;;  %v1129_v22 = vrot.slane %v935_v40, 1  ;;  %v1347_v41 = vrot.slane %v935_v40, 2 }
 0x236   :  { %v537_v47 = vadd.f32 %v6429_v29, %v469_v50  ;;  %v6459_v33 = vadd.f32 %v2151_v36, %v1943_v28  ;;  %4762 = vmatmul.msk.f32.gmra.mxu0 %vm5272_vm2, %v5373_v3  ;;  %v1575_v36 = vld [vmem:[#allocation2 + $0x330] sm:$0xff] }
 0x237   :  { %v6465_v18 = vsel %vm1005_vm3, %v1126_v35, %v1127_v7  ;;  %v6468_v13 = vsel %vm1223_vm4, %v1344_v30, %v1345_v37  ;;  %2880 = vmatpush.msrb.mxu3 %v1575_v36  ;;  %v6487_v40 = vsel %vm1223_vm4, %v1345_v37, %v1347_v41 }
 0x238   :  { %9275 = vst [vmem:[#allocation153_spill] sm:$0xff] %v6459_v33  ;;  %v601_v0 = vmax.f32 %v537_v47, 0.0  ;;  %1992 = vmatmul.f32.gmra.mxu2 %v6465_v18  ;;  %2201 = vmatmul.f32.gmra.mxu3 %v6468_v13 }
 0x239   :  { %9276 = vst [vmem:[#allocation154_spill] sm:$0xff] %v6465_v18 }
 0x23a   :  { %9277 = vst [vmem:[#allocation155_spill] sm:$0xff] %v6468_v13  ;;  %v6473_v50 = vrot.slane %v601_v0, 7  ;;  %v1742_v28 = vpop.f32.mrf.mxu1  ;;  %v6484_v0 = vsel %vm1005_vm3, %v1127_v7, %v1129_v22 }
 0x23b   :  { %v376_v33 = vpop.f32.mrf.mxu0  ;;  %v1945_v51 = vpop.f32.mrf.mxu2  ;;  %9280 = vst [vmem:[#allocation158_spill] sm:$0xff] %v6484_v0 }
 0x23c   :  { %9278 = vst [vmem:[#allocation156_spill] sm:$0xff] %v6473_v50  ;;  %v470_v35 = vmul.f32 %v6448_v54, %v376_v33  ;;  %v1946_v30 = vadd.f32 %v1945_v51, %v1736_v39  ;;  %v2154_v57 = vpop.f32.mrf.mxu3  ;;  %v903_v33 = vsel %vm680_vm1, 0.0, %v6473_v50 }
 0x23d   :  { %4748 = vmatmul.msk.f32.gmra.mxu1 %vm5272_vm2, %v6473_v50  ;;  %9281 = vst [vmem:[#allocation159_spill] sm:$0xff] %v6487_v40  ;;  %v1131_v41 = vrot.slane %v903_v33, 1 }
 0x23e   :  { %v538_v47 = vadd.f32 %v6429_v29, %v470_v35  ;;  %v6480_v34 = vadd.f32 %v2154_v57, %v1946_v30  ;;  %2269 = vmatmul.f32.gmra.mxu0 %v5400_v19 }
 0x240   :  { %9279 = vst [vmem:[#allocation157_spill] sm:$0xff] %v6480_v34  ;;  %v602_v36 = vmax.f32 %v538_v47, 0.0  ;;  %1995 = vmatmul.f32.gmra.mxu2 %v6484_v0  ;;  %2204 = vmatmul.f32.gmra.mxu3 %v6487_v40  ;;  %v1349_v47 = vrot.slane %v903_v33, 2 }
 0x242   :  { %v759_v51 = vrot.slane %v602_v36, 7  ;;  %v1745_v39 = vpop.f32.mrf.mxu1 }
 0x243   :  { %v379_v57 = vpop.f32.mrf.mxu0  ;;  %v1948_v35 = vpop.f32.mrf.mxu2 }
 0x244   :  { %v471_v30 = vmul.f32 %v6448_v54, %v379_v57  ;;  %v1949_v34 = vadd.f32 %v1948_v35, %v1739_v12  ;;  %v2157_v7 = vpop.f32.mrf.mxu3  ;;  %v6496_v37 = vsel %vm680_vm1, %v6473_v50, %v759_v51  ;;  %v936_v35 = vsel %vm680_vm1, %v759_v51, 0.0 }
 0x245   :  { %9282 = vst [vmem:[#allocation160_spill] sm:$0xff] %v6496_v37  ;;  %1792 = vmatmul.f32.gmra.mxu1 %v6496_v37  ;;  %v1132_v22 = vrot.slane %v6496_v37, 1  ;;  %v1350_v36 = vrot.slane %v6496_v37, 2  ;;  %v1134_v18 = vrot.slane %v936_v35, 1  ;;  %v1352_v37 = vrot.slane %v936_v35, 2 }
 0x246   :  { %v539_v40 = vadd.f32 %v6429_v29, %v471_v30  ;;  %v6502_v13 = vadd.f32 %v2157_v7, %v1949_v34  ;;  %4764 = vmatmul.msk.f32.gmra.mxu0 %vm5272_vm2, %v5416_v32  ;;  %v1554_v30 = vld [vmem:[#allocation2 + $0x288] sm:$0xff] }
 0x247   :  { %v6508_v12 = vsel %vm1005_vm3, %v1131_v41, %v1132_v22  ;;  %v6511_v57 = vsel %vm1223_vm4, %v1349_v47, %v1350_v36  ;;  %2676 = vmatpush.msrb.mxu2 %v1554_v30  ;;  %v6530_v35 = vsel %vm1223_vm4, %v1350_v36, %v1352_v37 }
 0x248   :  { %9283 = vst [vmem:[#allocation161_spill] sm:$0xff] %v6502_v13  ;;  %v603_v0 = vmax.f32 %v539_v40, 0.0  ;;  %1998 = vmatmul.f32.gmra.mxu2 %v6508_v12  ;;  %2207 = vmatmul.f32.gmra.mxu3 %v6511_v57 }
 0x249   :  { %9284 = vst [vmem:[#allocation162_spill] sm:$0xff] %v6508_v12 }
 0x24a   :  { %9285 = vst [vmem:[#allocation163_spill] sm:$0xff] %v6511_v57  ;;  %v6516_v33 = vrot.slane %v603_v0, 7  ;;  %v1748_v34 = vpop.f32.mrf.mxu1  ;;  %v6527_v0 = vsel %vm1005_vm3, %v1132_v22, %v1134_v18  ;;  %v1538_v22 = vld [vmem:[#allocation2 + $0x208] sm:$0xff] }
 0x24b   :  { %v382_v7 = vpop.f32.mrf.mxu0  ;;  %v1951_v13 = vpop.f32.mrf.mxu2  ;;  %9288 = vst [vmem:[#allocation166_spill] sm:$0xff] %v6527_v0  ;;  %2467 = vmatpush.msrb.mxu1 %v1538_v22 }
 0x24c   :  { %9286 = vst [vmem:[#allocation164_spill] sm:$0xff] %v6516_v33  ;;  %v472_v41 = vmul.f32 %v6448_v54, %v382_v7  ;;  %v1952_v47 = vadd.f32 %v1951_v13, %v1742_v28  ;;  %v2160_v50 = vpop.f32.mrf.mxu3  ;;  %v904_v7 = vsel %vm680_vm1, 0.0, %v6516_v33 }
 0x24d   :  { %4750 = vmatmul.msk.f32.gmra.mxu1 %vm5272_vm2, %v6516_v33  ;;  %9289 = vst [vmem:[#allocation167_spill] sm:$0xff] %v6530_v35  ;;  %v1136_v36 = vrot.slane %v904_v7, 1 }
 0x24e   :  { %v540_v40 = vadd.f32 %v6429_v29, %v472_v41  ;;  %v6523_v51 = vadd.f32 %v2160_v50, %v1952_v47  ;;  %2275 = vmatmul.f32.gmra.mxu0 %v5443_v52 }
 0x250   :  { %9287 = vst [vmem:[#allocation165_spill] sm:$0xff] %v6523_v51  ;;  %v604_v30 = vmax.f32 %v540_v40, 0.0  ;;  %2001 = vmatmul.f32.gmra.mxu2 %v6527_v0  ;;  %2210 = vmatmul.f32.gmra.mxu3 %v6530_v35 }
 0x252   :  { %v762_v13 = vrot.slane %v604_v30, 7  ;;  %v1751_v28 = vpop.f32.mrf.mxu1  ;;  %v1354_v30 = vrot.slane %v904_v7, 2 }
 0x253   :  { %v385_v50 = vpop.f32.mrf.mxu0  ;;  %v1954_v41 = vpop.f32.mrf.mxu2 }
 0x254   :  { %v473_v47 = vmul.f32 %v6448_v54, %v385_v50  ;;  %v1955_v51 = vadd.f32 %v1954_v41, %v1745_v39  ;;  %v2163_v18 = vpop.f32.mrf.mxu3  ;;  %v6539_v37 = vsel %vm680_vm1, %v6516_v33, %v762_v13  ;;  %v937_v41 = vsel %vm680_vm1, %v762_v13, 0.0 }
 0x255   :  { %9290 = vst [vmem:[#allocation168_spill] sm:$0xff] %v6539_v37  ;;  %1798 = vmatmul.f32.gmra.mxu1 %v6539_v37  ;;  %v1137_v40 = vrot.slane %v6539_v37, 1  ;;  %v1355_v35 = vrot.slane %v6539_v37, 2  ;;  %v1139_v22 = vrot.slane %v937_v41, 1  ;;  %v1357_v37 = vrot.slane %v937_v41, 2 }
 0x256   :  { %v541_v57 = vadd.f32 %v6429_v29, %v473_v47  ;;  %v6545_v0 = vadd.f32 %v2163_v18, %v1955_v51  ;;  %4766 = vmatmul.msk.f32.gmra.mxu0 %vm5272_vm2, %v5459_v5  ;;  %v1574_v18 = vld [vmem:[#allocation2 + $0x328] sm:$0xff] }
 0x257   :  { %v6551_v39 = vsel %vm1005_vm3, %v1136_v36, %v1137_v40  ;;  %v6554_v50 = vsel %vm1223_vm4, %v1354_v30, %v1355_v35  ;;  %2881 = vmatpush.msrb.mxu3 %v1574_v18  ;;  %v6573_v41 = vsel %vm1223_vm4, %v1355_v35, %v1357_v37 }
 0x258   :  { %9291 = vst [vmem:[#allocation169_spill] sm:$0xff] %v6545_v0  ;;  %v605_v7 = vmax.f32 %v541_v57, 0.0  ;;  %2004 = vmatmul.f32.gmra.mxu2 %v6551_v39  ;;  %2213 = vmatmul.f32.gmra.mxu3 %v6554_v50 }
 0x259   :  { %9292 = vst [vmem:[#allocation170_spill] sm:$0xff] %v6551_v39 }
 0x25a   :  { %9293 = vst [vmem:[#allocation171_spill] sm:$0xff] %v6554_v50  ;;  %v6559_v51 = vrot.slane %v605_v7, 7  ;;  %v1754_v47 = vpop.f32.mrf.mxu1  ;;  %v6570_v7 = vsel %vm1005_vm3, %v1137_v40, %v1139_v22 }
 0x25b   :  { %v388_v0 = vpop.f32.mrf.mxu0  ;;  %v1957_v12 = vpop.f32.mrf.mxu2  ;;  %9296 = vst [vmem:[#allocation174_spill] sm:$0xff] %v6570_v7 }
 0x25c   :  { %9294 = vst [vmem:[#allocation172_spill] sm:$0xff] %v6559_v51  ;;  %v474_v36 = vmul.f32 %v6448_v54, %v388_v0  ;;  %v1958_v30 = vadd.f32 %v1957_v12, %v1748_v34  ;;  %v2166_v33 = vpop.f32.mrf.mxu3  ;;  %v905_v0 = vsel %vm680_vm1, 0.0, %v6559_v51 }
 0x25d   :  { %4752 = vmatmul.msk.f32.gmra.mxu1 %vm5272_vm2, %v6559_v51  ;;  %9297 = vst [vmem:[#allocation175_spill] sm:$0xff] %v6573_v41  ;;  %v1141_v37 = vrot.slane %v905_v0, 1 }
 0x25e   :  { %v542_v57 = vadd.f32 %v6429_v29, %v474_v36  ;;  %v6566_v13 = vadd.f32 %v2166_v33, %v1958_v30  ;;  %2281 = vmatmul.f32.gmra.mxu0 %v5486_v25 }
 0x260   :  { %9295 = vst [vmem:[#allocation173_spill] sm:$0xff] %v6566_v13  ;;  %v606_v18 = vmax.f32 %v542_v57, 0.0  ;;  %2007 = vmatmul.f32.gmra.mxu2 %v6570_v7  ;;  %2216 = vmatmul.f32.gmra.mxu3 %v6573_v41  ;;  %v1359_v57 = vrot.slane %v905_v0, 2 }
 0x262   :  { %v765_v12 = vrot.slane %v606_v18, 7  ;;  %v1757_v34 = vpop.f32.mrf.mxu1 }
 0x263   :  { %v391_v33 = vpop.f32.mrf.mxu0  ;;  %v1960_v36 = vpop.f32.mrf.mxu2 }
 0x264   :  { %v475_v30 = vmul.f32 %v6448_v54, %v391_v33  ;;  %v1961_v13 = vadd.f32 %v1960_v36, %v1751_v28  ;;  %v2169_v40 = vpop.f32.mrf.mxu3  ;;  %v6582_v35 = vsel %vm680_vm1, %v6559_v51, %v765_v12  ;;  %v938_v36 = vsel %vm680_vm1, %v765_v12, 0.0 }
 0x265   :  { %9298 = vst [vmem:[#allocation176_spill] sm:$0xff] %v6582_v35  ;;  %1804 = vmatmul.f32.gmra.mxu1 %v6582_v35  ;;  %v1142_v22 = vrot.slane %v6582_v35, 1  ;;  %v1360_v18 = vrot.slane %v6582_v35, 2  ;;  %v1144_v39 = vrot.slane %v938_v36, 1  ;;  %v1362_v35 = vrot.slane %v938_v36, 2 }
 0x266   :  { %v543_v41 = vadd.f32 %v6429_v29, %v475_v30  ;;  %v6588_v50 = vadd.f32 %v2169_v40, %v1961_v13  ;;  %4768 = vmatmul.msk.f32.gmra.mxu0 %vm5272_vm2, %v5502_v43  ;;  %v1553_v30 = vld [vmem:[#allocation2 + $0x280] sm:$0xff] }
 0x267   :  { %v6594_v28 = vsel %vm1005_vm3, %v1141_v37, %v1142_v22  ;;  %v6597_v33 = vsel %vm1223_vm4, %v1359_v57, %v1360_v18  ;;  %2677 = vmatpush.msrb.mxu2 %v1553_v30  ;;  %v6616_v36 = vsel %vm1223_vm4, %v1360_v18, %v1362_v35 }
 0x268   :  { %9299 = vst [vmem:[#allocation177_spill] sm:$0xff] %v6588_v50  ;;  %v607_v7 = vmax.f32 %v543_v41, 0.0  ;;  %2010 = vmatmul.f32.gmra.mxu2 %v6594_v28  ;;  %2219 = vmatmul.f32.gmra.mxu3 %v6597_v33 }
 0x269   :  { %9300 = vst [vmem:[#allocation178_spill] sm:$0xff] %v6594_v28 }
 0x26a   :  { %9301 = vst [vmem:[#allocation179_spill] sm:$0xff] %v6597_v33  ;;  %v6602_v0 = vrot.slane %v607_v7, 7  ;;  %v1760_v13 = vpop.f32.mrf.mxu1  ;;  %v6613_v7 = vsel %vm1005_vm3, %v1142_v22, %v1144_v39  ;;  %v1537_v22 = vld [vmem:[#allocation2 + $0x200] sm:$0xff] }
 0x26b   :  { %v394_v40 = vpop.f32.mrf.mxu0  ;;  %v1963_v50 = vpop.f32.mrf.mxu2  ;;  %9304 = vst [vmem:[#allocation182_spill] sm:$0xff] %v6613_v7  ;;  %2468 = vmatpush.msrb.mxu1 %v1537_v22 }
 0x26c   :  { %9302 = vst [vmem:[#allocation180_spill] sm:$0xff] %v6602_v0  ;;  %v476_v37 = vmul.f32 %v6448_v54, %v394_v40  ;;  %v1964_v57 = vadd.f32 %v1963_v50, %v1754_v47  ;;  %v2172_v51 = vpop.f32.mrf.mxu3  ;;  %v906_v40 = vsel %vm680_vm1, 0.0, %v6602_v0 }
 0x26d   :  { %4754 = vmatmul.msk.f32.gmra.mxu1 %vm5272_vm2, %v6602_v0  ;;  %9305 = vst [vmem:[#allocation183_spill] sm:$0xff] %v6616_v36  ;;  %v1146_v18 = vrot.slane %v906_v40, 1 }
 0x26e   :  { %v544_v41 = vadd.f32 %v6429_v29, %v476_v37  ;;  %v6609_v12 = vadd.f32 %v2172_v51, %v1964_v57  ;;  %2287 = vmatmul.f32.gmra.mxu0 %v5529_v8 }
 0x270   :  { %9303 = vst [vmem:[#allocation181_spill] sm:$0xff] %v6609_v12  ;;  %v608_v30 = vmax.f32 %v544_v41, 0.0  ;;  %2013 = vmatmul.f32.gmra.mxu2 %v6613_v7  ;;  %2222 = vmatmul.f32.gmra.mxu3 %v6616_v36 }
 0x272   :  { %v768_v50 = vrot.slane %v608_v30, 7  ;;  %v1763_v47 = vpop.f32.mrf.mxu1  ;;  %v1364_v30 = vrot.slane %v906_v40, 2 }
 0x273   :  { %v397_v51 = vpop.f32.mrf.mxu0  ;;  %v1966_v37 = vpop.f32.mrf.mxu2 }
 0x274   :  { %v477_v57 = vmul.f32 %v6448_v54, %v397_v51  ;;  %v1967_v12 = vadd.f32 %v1966_v37, %v1757_v34  ;;  %v2175_v39 = vpop.f32.mrf.mxu3  ;;  %v6625_v35 = vsel %vm680_vm1, %v6602_v0, %v768_v50  ;;  %v939_v37 = vsel %vm680_vm1, %v768_v50, 0.0 }
 0x275   :  { %9306 = vst [vmem:[#allocation184_spill] sm:$0xff] %v6625_v35  ;;  %1810 = vmatmul.f32.gmra.mxu1 %v6625_v35  ;;  %v1147_v41 = vrot.slane %v6625_v35, 1  ;;  %v1365_v36 = vrot.slane %v6625_v35, 2  ;;  %v1149_v22 = vrot.slane %v939_v37, 1  ;;  %v1367_v35 = vrot.slane %v939_v37, 2 }
 0x276   :  { %v545_v33 = vadd.f32 %v6429_v29, %v477_v57  ;;  %v6631_v7 = vadd.f32 %v2175_v39, %v1967_v12  ;;  %4770 = vmatmul.msk.f32.gmra.mxu0 %vm5272_vm2, %v5545_v31  ;;  %v1573_v39 = vld [vmem:[#allocation2 + $0x320] sm:$0xff] }
 0x277   :  { %v6637_v34 = vsel %vm1005_vm3, %v1146_v18, %v1147_v41  ;;  %v6640_v51 = vsel %vm1223_vm4, %v1364_v30, %v1365_v36  ;;  %2882 = vmatpush.msrb.mxu3 %v1573_v39  ;;  %v6659_v37 = vsel %vm1223_vm4, %v1365_v36, %v1367_v35 }
 0x278   :  { %9307 = vst [vmem:[#allocation185_spill] sm:$0xff] %v6631_v7  ;;  %v609_v40 = vmax.f32 %v545_v33, 0.0  ;;  %2016 = vmatmul.f32.gmra.mxu2 %v6637_v34  ;;  %2225 = vmatmul.f32.gmra.mxu3 %v6640_v51 }
 0x279   :  { %9308 = vst [vmem:[#allocation186_spill] sm:$0xff] %v6637_v34 }
 0x27a   :  { %9309 = vst [vmem:[#allocation187_spill] sm:$0xff] %v6640_v51  ;;  %v6645_v12 = vrot.slane %v609_v40, 7  ;;  %v1766_v57 = vpop.f32.mrf.mxu1  ;;  %v6656_v40 = vsel %vm1005_vm3, %v1147_v41, %v1149_v22  ;;  %v1570_v51 = vld [vmem:[#allocation2 + $0x308] sm:$0xff] }
 0x27b   :  { %v400_v7 = vpop.f32.mrf.mxu0  ;;  %v1969_v28 = vpop.f32.mrf.mxu2  ;;  %9311 = vst [vmem:[#allocation189_spill] sm:$0xff] %v6656_v40 }
 0x27c   :  { %v478_v18 = vmul.f32 %v6448_v54, %v400_v7  ;;  %v1970_v30 = vadd.f32 %v1969_v28, %v1760_v13  ;;  %v2178_v0 = vpop.f32.mrf.mxu3  ;;  %9312 = vst [vmem:[#allocation190_spill] sm:$0xff] %v6659_v37  ;;  %v1572_v28 = vld [vmem:[#allocation2 + $0x318] sm:$0xff] }
 0x27d   :  { %4756 = vmatmul.msk.f32.gmra.mxu1 %vm5272_vm2, %v6645_v12  ;;  %2883 = vmatpush.msrb.mxu3 %v1572_v28 }
 0x27e   :  { %v546_v33 = vadd.f32 %v6429_v29, %v478_v18  ;;  %v6652_v50 = vadd.f32 %v2178_v0, %v1970_v30  ;;  %2293 = vmatmul.f32.gmra.mxu0 %v5572_v59  ;;  %v907_v0 = vsel %vm680_vm1, 0.0, %v6645_v12 }
 0x280   :  { %9310 = vst [vmem:[#allocation188_spill] sm:$0xff] %v6652_v50  ;;  %v610_v39 = vmax.f32 %v546_v33, 0.0  ;;  %2019 = vmatmul.f32.gmra.mxu2 %v6656_v40  ;;  %2228 = vmatmul.f32.gmra.mxu3 %v6659_v37  ;;  %v1571_v50 = vld [vmem:[#allocation2 + $0x310] sm:$0xff]  ;;  %v1151_v33 = vrot.slane %v907_v0, 1  ;;  %v1369_v37 = vrot.slane %v907_v0, 2 }
 0x281   :  { %2884 = vmatpush.msrb.mxu3 %v1571_v50 }
 0x282   :  { %v771_v13 = vrot.slane %v610_v39, 7  ;;  %v1769_v7 = vpop.f32.mrf.mxu1 }
 0x283   :  { %v403_v18 = vpop.f32.mrf.mxu0  ;;  %v1972_v30 = vpop.f32.mrf.mxu2  ;;  %2885 = vmatpush.msrb.mxu3 %v1570_v51 }
 0x284   :  { %v479_v41 = vmul.f32 %v6448_v54, %v403_v18  ;;  %v1973_v22 = vadd.f32 %v1972_v30, %v1763_v47  ;;  %v2181_v36 = vpop.f32.mrf.mxu3  ;;  %v6668_v35 = vsel %vm680_vm1, %v6645_v12, %v771_v13  ;;  %v1569_v47 = vld [vmem:[#allocation2 + $0x300] sm:$0xff]  ;;  %v940_v0 = vsel %vm680_vm1, %v771_v13, 0.0 }
 0x285   :  { %9313 = vst [vmem:[#allocation191_spill] sm:$0xff] %v6668_v35  ;;  %1816 = vmatmul.f32.gmra.mxu1 %v6668_v35  ;;  %v1152_v39 = vrot.slane %v6668_v35, 1  ;;  %v1370_v28 = vrot.slane %v6668_v35, 2  ;;  %2886 = vmatpush.msrb.mxu3 %v1569_v47  ;;  %v1372_v35 = vrot.slane %v940_v0, 2 }
 0x286   :  { %v547_v40 = vadd.f32 %v6429_v29, %v479_v41  ;;  %v6674_v34 = vadd.f32 %v2181_v36, %v1973_v22  ;;  %4772 = vmatmul.msk.f32.gmra.mxu0 %vm5272_vm2, %v5588_v20  ;;  %v3649_v41 = vld [vmem:[%s8832_s7 + $0x78] sm:$0xff] }
 0x287   :  { %v6680_v50 = vsel %vm1005_vm3, %v1151_v33, %v1152_v39  ;;  %v6683_v18 = vsel %vm1223_vm4, %v1369_v37, %v1370_v28  ;;  %3650 = vmatpush.msra.mxu2 %v3649_v41  ;;  %v1600_v36 = vld [vmem:[#allocation2 + $0x3f8] sm:$0xff] }
 0x288   :  { %9314 = vst [vmem:[#allocation192_spill] sm:$0xff] %v6674_v34  ;;  %v611_v30 = vmax.f32 %v547_v40, 0.0  ;;  %2022 = vmatmul.f32.gmra.mxu2 %v6680_v50  ;;  %2231 = vmatmul.f32.gmra.mxu3 %v6683_v18  ;;  %v1154_v34 = vrot.slane %v940_v0, 1  ;;  %v6705_v0 = vsel %vm1223_vm4, %v1370_v28, %v1372_v35 }
 0x289   :  { %9315 = vst [vmem:[#allocation193_spill] sm:$0xff] %v6680_v50  ;;  %3080 = vmatpush.msra.mxu0 %v1600_v36 }
 0x28a   :  { %9316 = vst [vmem:[#allocation194_spill] sm:$0xff] %v6683_v18  ;;  %v6691_v51 = vrot.slane %v611_v30, 7  ;;  %v1772_v22 = vpop.f32.mrf.mxu1  ;;  %v1616_v30 = vld [vmem:[#allocation2 + $0x478] sm:$0xff]  ;;  %v6702_v18 = vsel %vm1005_vm3, %v1152_v39, %v1154_v34 }
 0x28b   :  { %v406_v33 = vpop.f32.mrf.mxu0  ;;  %v1975_v37 = vpop.f32.mrf.mxu2  ;;  %9318 = vst [vmem:[#allocation196_spill] sm:$0xff] %v6702_v18  ;;  %3289 = vmatpush.msra.mxu1 %v1616_v30 }
 0x28c   :  { %v480_v40 = vmul.f32 %v6448_v54, %v406_v33  ;;  %v1976_v13 = vadd.f32 %v1975_v37, %v1766_v57  ;;  %v2184_v50 = vpop.f32.mrf.mxu3  ;;  %9319 = vst [vmem:[#allocation197_spill] sm:$0xff] %v6705_v0 }
 0x28d   :  { %4758 = vmatmul.msk.f32.gmra.mxu1 %vm5272_vm2, %v6691_v51 }
 0x28e   :  { %v548_v47 = vadd.f32 %v6429_v29, %v480_v40  ;;  %v6698_v41 = vadd.f32 %v2184_v50, %v1976_v13  ;;  %2299 = vmatmul.f32.gmra.mxu0 %v5615_v6  ;;  %v908_v50 = vsel %vm680_vm1, 0.0, %v6691_v51 }
 0x28f   :  { %v1156_v39 = vrot.slane %v908_v50, 1 }
 0x290   :  { %9317 = vst [vmem:[#allocation195_spill] sm:$0xff] %v6698_v41  ;;  %v612_v57 = vmax.f32 %v548_v47, 0.0  ;;  %2025 = vmatmul.f32.gmra.mxu2 %v6702_v18  ;;  %2234 = vmatmul.f32.gmra.mxu3 %v6705_v0  ;;  %v1374_v47 = vrot.slane %v908_v50, 2 }
 0x292   :  { %v774_v36 = vrot.slane %v612_v57, 7  ;;  %v1775_v33 = vpop.f32.mrf.mxu1 }
 0x293   :  { %v6711_v37 = vpop.f32.mrf.mxu0  ;;  %v1978_v40 = vpop.f32.mrf.mxu2 }
 0x294   :  { %v1979_v13 = vadd.f32 %v1978_v40, %v1769_v7  ;;  %v2187_v34 = vpop.f32.mrf.mxu3  ;;  %v6715_v35 = vsel %vm680_vm1, %v6691_v51, %v774_v36  ;;  %v941_v41 = vsel %vm680_vm1, %v774_v36, 0.0 }
 0x295   :  { %9320 = vst [vmem:[#allocation198_spill] sm:$0xff] %v6715_v35  ;;  %1822 = vmatmul.f32.gmra.mxu1 %v6715_v35  ;;  %v1157_v28 = vrot.slane %v6715_v35, 1  ;;  %v1375_v30 = vrot.slane %v6715_v35, 2 }
 0x296   :  { %v6720_v57 = vadd.f32 %v2187_v34, %v1979_v13  ;;  %4774 = vmatmul.msk.f32.gmra.mxu0 %vm5272_vm2, %v5633_v46  ;;  %v1159_v34 = vrot.slane %v941_v41, 1 }
 0x297   :  { %v6726_v7 = vsel %vm1005_vm3, %v1156_v39, %v1157_v28  ;;  %v6729_v40 = vsel %vm1223_vm4, %v1374_v47, %v1375_v30 }
 0x298   :  { %9321 = vst [vmem:[#allocation199_spill] sm:$0xff] %v6720_v57  ;;  %2028 = vmatmul.f32.gmra.mxu2 %v6726_v7  ;;  %2237 = vmatmul.f32.gmra.mxu3 %v6729_v40  ;;  %v1377_v57 = vrot.slane %v941_v41, 2  ;;  %v6741_v36 = vsel %vm1005_vm3, %v1157_v28, %v1159_v34  ;;  %v1599_v28 = vld [vmem:[#allocation2 + $0x3f0] sm:$0xff] }
 0x299   :  { %9322 = vst [vmem:[#allocation200_spill] sm:$0xff] %v6726_v7  ;;  %3081 = vmatpush.msra.mxu0 %v1599_v28 }
 0x29a   :  { %9323 = vst [vmem:[#allocation201_spill] sm:$0xff] %v6729_v40  ;;  %v1778_v50 = vpop.f32.mrf.mxu1  ;;  %v6744_v47 = vsel %vm1223_vm4, %v1375_v30, %v1377_v57 }
 0x29b   :  { %v6734_v0 = vpop.f32.mrf.mxu0  ;;  %v1981_v13 = vpop.f32.mrf.mxu2  ;;  %9325 = vst [vmem:[#allocation203_spill] sm:$0xff] %v6741_v36 }
 0x29c   :  { %v1982_v18 = vadd.f32 %v1981_v13, %v1772_v22  ;;  %v2190_v35 = vpop.f32.mrf.mxu3  ;;  %9326 = vst [vmem:[#allocation204_spill] sm:$0xff] %v6744_v47 }
 0x29d   :  { %2469 = vmatmul.f32.vlgmr.msrb.gmra.mxu1 %v5365_v61 }
 0x29e   :  { %v6737_v39 = vadd.f32 %v2190_v35, %v1982_v18  ;;  %2305 = vmatmul.f32.gmra.mxu0 %v5662_v24  ;;  %v3648_v35 = vld [vmem:[%s8832_s7 + $0x70] sm:$0xff] }
 0x29f   :  { %3651 = vmatpush.msra.mxu2 %v3648_v35 }
 0x2a0   :  { %9324 = vst [vmem:[#allocation202_spill] sm:$0xff] %v6737_v39  ;;  %2031 = vmatmul.f32.gmra.mxu2 %v6741_v36  ;;  %2240 = vmatmul.f32.gmra.mxu3 %v6744_v47 }
 0x2a2   :  { %v1781_v40 = vpop.f32.mrf.mxu1 }
 0x2a3   :  { %v1984_v41 = vpop.f32.mrf.mxu2  ;;  %v6748_v22 = vpop.f32.mrf.mxu0 }
 0x2a4   :  { %v1985_v13 = vadd.f32 %v1984_v41, %v1775_v33  ;;  %v2193_v61 = vpop.f32.mrf.mxu3 }
 0x2a5   :  { %2472 = vmatmul.f32.gmra.mxu1 %v5385_v10 }
 0x2a6   :  { %v6751_v18 = vadd.f32 %v2193_v61, %v1985_v13  ;;  %4776 = vmatmul.msk.f32.gmra.mxu0 %vm5272_vm2, %v5682_v58 }
 0x2a8   :  { %9327 = vst [vmem:[#allocation205_spill] sm:$0xff] %v6751_v18  ;;  %2678 = vmatmul.f32.vlgmr.msrb.gmra.mxu2 %v5368_v62  ;;  %4824 = vmatmul.msk.f32.vlgmr.msrb.gmra.mxu3 %vm5272_vm2, %v5373_v3  ;;  %v1615_v3 = vld [vmem:[#allocation2 + $0x470] sm:$0xff] }
 0x2a9   :  { %3290 = vmatpush.msra.mxu1 %v1615_v3  ;;  %v9347_v18 = vld [vmem:[#allocation22_spill] sm:$0xff] }
 0x2aa   :  { %v1784_v33 = vpop.f32.mrf.mxu1 }
 0x2ab   :  { %v1987_v10 = vpop.f32.mrf.mxu2  ;;  %v6763_v30 = vpop.f32.mrf.mxu0 }
 0x2ac   :  { %v1988_v57 = vadd.f32 %v1987_v10, %v1778_v50  ;;  %v2196_v34 = vpop.f32.mrf.mxu3 }
 0x2ad   :  { %2475 = vmatmul.f32.gmra.mxu1 %v5408_v26 }
 0x2ae   :  { %v6766_v62 = vadd.f32 %v2196_v34, %v1988_v57  ;;  %2311 = vmatmul.f32.gmra.mxu0 %v5713_v42 }
 0x2b0   :  { %9328 = vst [vmem:[#allocation206_spill] sm:$0xff] %v6766_v62  ;;  %2681 = vmatmul.f32.gmra.mxu2 %v5388_v11  ;;  %2890 = vmatmul.f32.gmra.mxu3 %v5400_v19 }
 0x2b2   :  { %v1787_v41 = vpop.f32.mrf.mxu1 }
 0x2b3   :  { %v1990_v13 = vpop.f32.mrf.mxu2  ;;  %v6771_v61 = vpop.f32.mrf.mxu0 }
 0x2b4   :  { %v1991_v35 = vadd.f32 %v1990_v13, %v1781_v40  ;;  %v2199_v28 = vpop.f32.mrf.mxu3 }
 0x2b5   :  { %2478 = vmatmul.f32.gmra.mxu1 %v5428_v44 }
 0x2b6   :  { %v6774_v50 = vadd.f32 %v2199_v28, %v1991_v35  ;;  %4778 = vmatmul.msk.f32.gmra.mxu0 %vm5272_vm2, %v5729_v55 }
 0x2b8   :  { %9329 = vst [vmem:[#allocation207_spill] sm:$0xff] %v6774_v50  ;;  %2684 = vmatmul.f32.gmra.mxu2 %v5411_v27  ;;  %4826 = vmatmul.msk.f32.gmra.mxu3 %vm5272_vm2, %v5416_v32 }
 0x2ba   :  { %v1790_v11 = vpop.f32.mrf.mxu1 }
 0x2bb   :  { %v1993_v19 = vpop.f32.mrf.mxu2  ;;  %v6783_v10 = vpop.f32.mrf.mxu0 }
 0x2bc   :  { %v1994_v40 = vadd.f32 %v1993_v19, %v1784_v33  ;;  %v2202_v57 = vpop.f32.mrf.mxu3  ;;  %v1598_v19 = vld [vmem:[#allocation2 + $0x3e8] sm:$0xff] }
 0x2bd   :  { %2481 = vmatmul.f32.gmra.mxu1 %v5451_v60  ;;  %3082 = vmatpush.msra.mxu0 %v1598_v19 }
 0x2be   :  { %v6786_v34 = vadd.f32 %v2202_v57, %v1994_v40  ;;  %2317 = vmatmul.f32.gmra.mxu0 %v5758_v16 }
 0x2c0   :  { %9330 = vst [vmem:[#allocation208_spill] sm:$0xff] %v6786_v34  ;;  %2687 = vmatmul.f32.gmra.mxu2 %v5431_v45  ;;  %2896 = vmatmul.f32.gmra.mxu3 %v5443_v52  ;;  %v3647_v52 = vld [vmem:[%s8832_s7 + $0x68] sm:$0xff] }
 0x2c1   :  { %3652 = vmatpush.msra.mxu2 %v3647_v52  ;;  %v9340_v45 = vld [vmem:[#allocation21_spill] sm:$0xff] }
 0x2c2   :  { %v1793_v3 = vpop.f32.mrf.mxu1 }
 0x2c3   :  { %v1996_v13 = vpop.f32.mrf.mxu2  ;;  %v6791_v35 = vpop.f32.mrf.mxu0 }
 0x2c4   :  { %v1997_v32 = vadd.f32 %v1996_v13, %v1787_v41  ;;  %v2205_v28 = vpop.f32.mrf.mxu3 }
 0x2c5   :  { %2484 = vmatmul.f32.gmra.mxu1 %v5471_v14 }
 0x2c6   :  { %v6794_v33 = vadd.f32 %v2205_v28, %v1997_v32  ;;  %4780 = vmatmul.msk.f32.gmra.mxu0 %vm5272_vm2, %v5776_v4 }
 0x2c8   :  { %9331 = vst [vmem:[#allocation209_spill] sm:$0xff] %v6794_v33  ;;  %2690 = vmatmul.f32.gmra.mxu2 %v5454_v63  ;;  %4828 = vmatmul.msk.f32.gmra.mxu3 %vm5272_vm2, %v5459_v5  ;;  %v1614_v5 = vld [vmem:[#allocation2 + $0x468] sm:$0xff] }
 0x2c9   :  { %3291 = vmatpush.msra.mxu1 %v1614_v5 }
 0x2ca   :  { %v1796_v41 = vpop.f32.mrf.mxu1 }
 0x2cb   :  { %v1999_v40 = vpop.f32.mrf.mxu2  ;;  %v6806_v57 = vpop.f32.mrf.mxu0 }
 0x2cc   :  { %v2000_v13 = vadd.f32 %v1999_v40, %v1790_v11  ;;  %v2208_v32 = vpop.f32.mrf.mxu3  ;;  %v9334_v40 = vld [vmem:[#allocation55_spill] sm:$0xff] }
 0x2cd   :  { %2487 = vmatmul.f32.gmra.mxu1 %v5494_v38 }
 0x2ce   :  { %v6809_v28 = vadd.f32 %v2208_v32, %v2000_v13  ;;  %2323 = vmatmul.f32.gmra.mxu0 %v5805_v53  ;;  %v9335_v13 = vld [vmem:[#allocation17_spill] sm:$0xff] }
 0x2d0   :  { %9332 = vst [vmem:[#allocation210_spill] sm:$0xff] %v6809_v28  ;;  %2693 = vmatmul.f32.gmra.mxu2 %v5474_v15  ;;  %2902 = vmatmul.f32.gmra.mxu3 %v5486_v25  ;;  %v9336_v28 = vld [vmem:[#allocation19_spill] sm:$0xff] }
 0x2d2   :  { %v1799_v52 = vpop.f32.mrf.mxu1 }
 0x2d3   :  { %v2002_v33 = vpop.f32.mrf.mxu2  ;;  %v6814_v34 = vpop.f32.mrf.mxu0 }
 0x2d4   :  { %v2003_v50 = vadd.f32 %v2002_v33, %v1793_v3  ;;  %v2211_v19 = vpop.f32.mrf.mxu3 }
 0x2d5   :  { %2490 = vmatmul.f32.gmra.mxu1 %v5514_v56 }
 0x2d6   :  { %v6817_v11 = vadd.f32 %v2211_v19, %v2003_v50  ;;  %4782 = vmatmul.msk.f32.gmra.mxu0 %vm5272_vm2, %v9334_v40  ;;  %v9338_v19 = vld [vmem:[#allocation59_spill] sm:$0xff] }
 0x2d8   :  { %9333 = vst [vmem:[#allocation211_spill] sm:$0xff] %v6817_v11  ;;  %2696 = vmatmul.f32.gmra.mxu2 %v9335_v13  ;;  %4830 = vmatmul.msk.f32.gmra.mxu3 %vm5272_vm2, %v5502_v43  ;;  %v9339_v11 = vld [vmem:[#allocation18_spill] sm:$0xff] }
 0x2da   :  { %v1802_v25 = vpop.f32.mrf.mxu1 }
 0x2db   :  { %v2005_v32 = vpop.f32.mrf.mxu2  ;;  %v6826_v5 = vpop.f32.mrf.mxu0 }
 0x2dc   :  { %v2006_v3 = vadd.f32 %v2005_v32, %v1796_v41  ;;  %v2214_v33 = vpop.f32.mrf.mxu3  ;;  %v9342_v32 = vld [vmem:[#allocation63_spill] sm:$0xff] }
 0x2dd   :  { %2493 = vmatmul.f32.gmra.mxu1 %v9336_v28 }
 0x2de   :  { %v6829_v50 = vadd.f32 %v2214_v33, %v2006_v3  ;;  %2329 = vmatmul.f32.gmra.mxu0 %v9338_v19  ;;  %v9343_v3 = vld [vmem:[#allocation20_spill] sm:$0xff] }
 0x2e0   :  { %9337 = vst [vmem:[#allocation55_spill] sm:$0xff] %v6829_v50  ;;  %2699 = vmatmul.f32.gmra.mxu2 %v9339_v11  ;;  %2908 = vmatmul.f32.gmra.mxu3 %v5529_v8  ;;  %v3646_v8 = vld [vmem:[%s8832_s7 + $0x60] sm:$0xff]  ;;  %v9344_v50 = vld [vmem:[#allocation23_spill] sm:$0xff] }
 0x2e1   :  { %3653 = vmatpush.msra.mxu2 %v3646_v8  ;;  %v9346_v11 = vld [vmem:[#allocation67_spill] sm:$0xff] }
 0x2e2   :  { %v1805_v13 = vpop.f32.mrf.mxu1 }
 0x2e3   :  { %v2008_v15 = vpop.f32.mrf.mxu2  ;;  %v6834_v63 = vpop.f32.mrf.mxu0 }
 0x2e4   :  { %v2009_v43 = vadd.f32 %v2008_v15, %v1799_v52  ;;  %v2217_v62 = vpop.f32.mrf.mxu3  ;;  %v1597_v52 = vld [vmem:[#allocation2 + $0x3e0] sm:$0xff] }
 0x2e5   :  { %2496 = vmatmul.f32.gmra.mxu1 %v9340_v45  ;;  %3083 = vmatpush.msra.mxu0 %v1597_v52  ;;  %v9372_v45 = vld [vmem:[#allocation35_spill] sm:$0xff] }
 0x2e6   :  { %v6837_v41 = vadd.f32 %v2217_v62, %v2009_v43  ;;  %4784 = vmatmul.msk.f32.gmra.mxu0 %vm5272_vm2, %v9342_v32 }
 0x2e8   :  { %9341 = vst [vmem:[#allocation19_spill] sm:$0xff] %v6837_v41  ;;  %2702 = vmatmul.f32.gmra.mxu2 %v9343_v3  ;;  %4832 = vmatmul.msk.f32.gmra.mxu3 %vm5272_vm2, %v5545_v31  ;;  %v1613_v31 = vld [vmem:[#allocation2 + $0x460] sm:$0xff] }
 0x2e9   :  { %3292 = vmatpush.msra.mxu1 %v1613_v31 }
 0x2ea   :  { %v1808_v15 = vpop.f32.mrf.mxu1 }
 0x2eb   :  { %v2011_v33 = vpop.f32.mrf.mxu2  ;;  %v6849_v62 = vpop.f32.mrf.mxu0 }
 0x2ec   :  { %v2012_v43 = vadd.f32 %v2011_v33, %v1802_v25  ;;  %v2220_v41 = vpop.f32.mrf.mxu3  ;;  %v9348_v25 = vld [vmem:[#allocation25_spill] sm:$0xff] }
 0x2ed   :  { %2499 = vmatmul.f32.gmra.mxu1 %v9344_v50  ;;  %v9356_v50 = vld [vmem:[#allocation30_spill] sm:$0xff] }
 0x2ee   :  { %v6852_v3 = vadd.f32 %v2220_v41, %v2012_v43  ;;  %2335 = vmatmul.f32.gmra.mxu0 %v9346_v11  ;;  %v9350_v41 = vld [vmem:[#allocation71_spill] sm:$0xff]  ;;  %v9351_v43 = vld [vmem:[#allocation24_spill] sm:$0xff] }
 0x2f0   :  { %9345 = vst [vmem:[#allocation59_spill] sm:$0xff] %v6852_v3  ;;  %2705 = vmatmul.f32.gmra.mxu2 %v9347_v18  ;;  %2914 = vmatmul.f32.gmra.mxu3 %v5572_v59  ;;  %v9352_v18 = vld [vmem:[#allocation28_spill] sm:$0xff] }
 0x2f2   :  { %v1811_v8 = vpop.f32.mrf.mxu1 }
 0x2f3   :  { %v2014_v27 = vpop.f32.mrf.mxu2  ;;  %v6857_v39 = vpop.f32.mrf.mxu0 }
 0x2f4   :  { %v2015_v47 = vadd.f32 %v2014_v27, %v1805_v13  ;;  %v2223_v52 = vpop.f32.mrf.mxu3 }
 0x2f5   :  { %2502 = vmatmul.f32.gmra.mxu1 %v9348_v25 }
 0x2f6   :  { %v6860_v33 = vadd.f32 %v2223_v52, %v2015_v47  ;;  %4786 = vmatmul.msk.f32.gmra.mxu0 %vm5272_vm2, %v9350_v41  ;;  %v9354_v52 = vld [vmem:[#allocation75_spill] sm:$0xff] }
 0x2f8   :  { %9349 = vst [vmem:[#allocation63_spill] sm:$0xff] %v6860_v33  ;;  %2708 = vmatmul.f32.gmra.mxu2 %v9351_v43  ;;  %4834 = vmatmul.msk.f32.gmra.mxu3 %vm5272_vm2, %v5588_v20  ;;  %v9355_v33 = vld [vmem:[#allocation26_spill] sm:$0xff] }
 0x2fa   :  { %v1814_v59 = vpop.f32.mrf.mxu1 }
 0x2fb   :  { %v2017_v31 = vpop.f32.mrf.mxu2  ;;  %v6869_v3 = vpop.f32.mrf.mxu0 }
 0x2fc   :  { %v2018_v27 = vadd.f32 %v2017_v31, %v1808_v15  ;;  %v2226_v13 = vpop.f32.mrf.mxu3  ;;  %v449_v31 = vmul.f32 %v6448_v54, %v5997_v9 }
 0x2fd   :  { %2505 = vmatmul.f32.gmra.mxu1 %v9352_v18  ;;  %v9362_v18 = vld [vmem:[#allocation31_spill] sm:$0xff] }
 0x2fe   :  { %v6872_v47 = vadd.f32 %v2226_v13, %v2018_v27  ;;  %2341 = vmatmul.f32.gmra.mxu0 %v9354_v52  ;;  %v9358_v27 = vld [vmem:[#allocation29_spill] sm:$0xff]  ;;  %v1596_v13 = vld [vmem:[#allocation2 + $0x3d8] sm:$0xff] }
 0x2ff   :  { %3084 = vmatpush.msra.mxu0 %v1596_v13 }
 0x300   :  { %9353 = vst [vmem:[#allocation67_spill] sm:$0xff] %v6872_v47  ;;  %2711 = vmatmul.f32.gmra.mxu2 %v9355_v33  ;;  %2920 = vmatmul.f32.gmra.mxu3 %v5615_v6  ;;  %v3645_v6 = vld [vmem:[%s8832_s7 + $0x58] sm:$0xff]  ;;  %v450_v47 = vmul.f32 %v6448_v54, %v6021_v48  ;;  %v9361_v33 = vld [vmem:[#allocation82_spill] sm:$0xff] }
 0x301   :  { %3654 = vmatpush.msra.mxu2 %v3645_v6  ;;  %v1612_v6 = vld [vmem:[#allocation2 + $0x458] sm:$0xff] }
 0x302   :  { %v1817_v43 = vpop.f32.mrf.mxu1  ;;  %3293 = vmatpush.msra.mxu1 %v1612_v6 }
 0x303   :  { %v2020_v36 = vpop.f32.mrf.mxu2  ;;  %v6877_v7 = vpop.f32.mrf.mxu0 }
 0x304   :  { %v2021_v20 = vadd.f32 %v2020_v36, %v1811_v8  ;;  %v2229_v25 = vpop.f32.mrf.mxu3 }
 0x305   :  { %2508 = vmatmul.f32.gmra.mxu1 %v9356_v50 }
 0x306   :  { %v6880_v15 = vadd.f32 %v2229_v25, %v2021_v20  ;;  %4788 = vmatmul.msk.f32.gmra.mxu0 %vm5272_vm2, %v5974_v21  ;;  %v517_v20 = vadd.f32 %v6429_v29, %v449_v31 }
 0x308   :  { %9357 = vst [vmem:[#allocation71_spill] sm:$0xff] %v6880_v15  ;;  %2714 = vmatmul.f32.gmra.mxu2 %v9358_v27  ;;  %4836 = vmatmul.msk.f32.gmra.mxu3 %vm5272_vm2, %v5633_v46  ;;  %v9359_v27 = vld [vmem:[#allocation33_spill] sm:$0xff]  ;;  %v581_v50 = vmax.f32 %v517_v20, 0.0 }
 0x30a   :  { %v1820_v36 = vpop.f32.mrf.mxu1  ;;  %v6908_v48 = vrot.slane %v581_v50, 7 }
 0x30b   :  { %v2023_v8 = vpop.f32.mrf.mxu2  ;;  %v6894_v25 = vpop.f32.mrf.mxu0 }
 0x30c   :  { %v2024_v15 = vadd.f32 %v2023_v8, %v1814_v59  ;;  %v2232_v9 = vpop.f32.mrf.mxu3  ;;  %v518_v59 = vadd.f32 %v6429_v29, %v450_v47  ;;  %v9365_v29 = vld [vmem:[#allocation34_spill] sm:$0xff] }
 0x30d   :  { %2511 = vmatmul.f32.gmra.mxu1 %v9359_v27 }
 0x30e   :  { %v6900_v46 = vadd.f32 %v2232_v9, %v2024_v15  ;;  %2347 = vmatmul.f32.gmra.mxu0 %v9361_v33  ;;  %v582_v9 = vmax.f32 %v518_v59, 0.0 }
 0x310   :  { %9360 = vst [vmem:[#allocation75_spill] sm:$0xff] %v6900_v46  ;;  %2717 = vmatmul.f32.gmra.mxu2 %v9362_v18  ;;  %2926 = vmatmul.f32.gmra.mxu3 %v5662_v24  ;;  %v9363_v46 = vld [vmem:[#allocation37_spill] sm:$0xff]  ;;  %v4138_v24 = vld [vmem:[%s8835_s10 + $0x78] sm:$0xff]  ;;  %v6923_v50 = vrot.slane %v582_v9, 7 }
 0x311   :  { %4139 = vmatpush.msra.mxu3 %v4138_v24  ;;  %v9369_v9 = vld [vmem:[#allocation27_spill] sm:$0xff]  ;;  %v9370_v24 = vld [vmem:[#allocation36_spill] sm:$0xff] }
 0x312   :  { %v1823_v31 = vpop.f32.mrf.mxu1 }
 0x313   :  { %v2026_v8 = vpop.f32.mrf.mxu2  ;;  %v6906_v13 = vpop.f32.mrf.mxu0 }
 0x314   :  { %v2027_v54 = vadd.f32 %v2026_v8, %v1817_v43  ;;  %v2235_v15 = vpop.f32.mrf.mxu3  ;;  %v9366_v8 = vld [vmem:[#allocation41_spill] sm:$0xff] }
 0x315   :  { %2514 = vmatmul.f32.gmra.mxu1 %v9363_v46  ;;  %v9371_v46 = vld [vmem:[#allocation44_spill] sm:$0xff] }
 0x316   :  { %v6911_v27 = vadd.f32 %v2235_v15, %v2027_v54  ;;  %4790 = vmatmul.msk.f32.gmra.mxu0 %vm5272_vm2, %v6908_v48  ;;  %v6931_v54 = vsel %vm680_vm1, %v6908_v48, %v6923_v50 }
 0x318   :  { %9364 = vst [vmem:[#allocation82_spill] sm:$0xff] %v6911_v27  ;;  %2720 = vmatmul.f32.gmra.mxu2 %v9365_v29  ;;  %4838 = vmatmul.msk.f32.gmra.mxu3 %vm5272_vm2, %v5682_v58  ;;  %v9368_v58 = vld [vmem:[#allocation38_spill] sm:$0xff]  ;;  %v1844_v27 = vadd.f32 %v9370_v24, %v9369_v9 }
 0x31a   :  { %v2470_v43 = vpop.f32.mrf.mxu1 }
 0x31b   :  { %v2029_v47 = vpop.f32.mrf.mxu2  ;;  %v6925_v20 = vpop.f32.mrf.mxu0 }
 0x31c   :  { %v2030_v6 = vadd.f32 %v2029_v47, %v1820_v36  ;;  %v2238_v59 = vpop.f32.mrf.mxu3 }
 0x31d   :  { %2517 = vmatmul.f32.gmra.mxu1 %v9366_v8 }
 0x31e   :  { %v6933_v15 = vadd.f32 %v2238_v59, %v2030_v6  ;;  %2353 = vmatmul.f32.gmra.mxu0 %v6931_v54  ;;  %v2053_v6 = vadd.f32 %v9372_v45, %v1844_v27  ;;  %v9375_v45 = vld [vmem:[#allocation32_spill] sm:$0xff] }
 0x320   :  { %9367 = vst [vmem:[#allocation212_spill] sm:$0xff] %v6933_v15  ;;  %2723 = vmatmul.f32.gmra.mxu2 %v9368_v58  ;;  %2932 = vmatmul.f32.gmra.mxu3 %v5713_v42  ;;  %v2262_v42 = vadd.f32 %v6748_v22, %v2053_v6  ;;  %v9374_v15 = vld [vmem:[#allocation42_spill] sm:$0xff] }
 0x321   :  { %v1595_v22 = vld [vmem:[#allocation2 + $0x3d0] sm:$0xff] }
 0x322   :  { %v2473_v36 = vpop.f32.mrf.mxu1  ;;  %3085 = vmatpush.msra.mxu0 %v1595_v22 }
 0x323   :  { %v2032_v47 = vpop.f32.mrf.mxu2  ;;  %v6940_v29 = vpop.f32.mrf.mxu0 }
 0x324   :  { %v2033_v18 = vadd.f32 %v2032_v47, %v1823_v31  ;;  %v2241_v8 = vpop.f32.mrf.mxu3  ;;  %v3644_v31 = vld [vmem:[%s8832_s7 + $0x50] sm:$0xff] }
 0x325   :  { %2520 = vmatmul.f32.gmra.mxu1 %v9371_v46  ;;  %3655 = vmatpush.msra.mxu2 %v3644_v31  ;;  %v9380_v46 = vld [vmem:[#allocation91_spill] sm:$0xff]  ;;  %v1611_v31 = vld [vmem:[#allocation2 + $0x450] sm:$0xff] }
 0x326   :  { %v6944_v59 = vadd.f32 %v2241_v8, %v2033_v18  ;;  %4792 = vmatmul.msk.f32.gmra.mxu0 %vm5272_vm2, %v6051_v49  ;;  %v9376_v18 = vld [vmem:[#allocation40_spill] sm:$0xff]  ;;  %v2471_v8 = vadd.f32 %v2470_v43, %v2262_v42  ;;  %3294 = vmatpush.msra.mxu1 %v1611_v31  ;;  %v9381_v42 = vld [vmem:[#allocation45_spill] sm:$0xff] }
 0x327   :  { %v1847_v27 = vadd.f32 %v9376_v18, %v9375_v45 }
 0x328   :  { %9373 = vst [vmem:[#allocation27_spill] sm:$0xff] %v6944_v59  ;;  %2726 = vmatmul.f32.gmra.mxu2 %v9374_v15  ;;  %4840 = vmatmul.msk.f32.gmra.mxu3 %vm5272_vm2, %v5729_v55  ;;  %v9377_v59 = vld [vmem:[#allocation47_spill] sm:$0xff] }
 0x329   :  { %v9378_v55 = vld [vmem:[#allocation39_spill] sm:$0xff] }
 0x32a   :  { %v2476_v9 = vpop.f32.mrf.mxu1  ;;  %v2056_v15 = vadd.f32 %v9378_v55, %v1847_v27  ;;  %v9382_v27 = vld [vmem:[#allocation50_spill] sm:$0xff] }
 0x32b   :  { %v6959_v24 = vpop.f32.mrf.mxu0  ;;  %v2679_v49 = vpop.f32.mrf.mxu2 }
 0x32c   :  { %v2680_v47 = vadd.f32 %v2679_v49, %v2471_v8  ;;  %v2888_v6 = vpop.f32.mrf.mxu3  ;;  %v2265_v43 = vadd.f32 %v6763_v30, %v2056_v15  ;;  %v4137_v30 = vld [vmem:[%s8835_s10 + $0x70] sm:$0xff] }
 0x32d   :  { %2523 = vmatmul.f32.gmra.mxu1 %v9377_v59  ;;  %4140 = vmatpush.msra.mxu3 %v4137_v30  ;;  %v9389_v30 = vld [vmem:[#allocation99_spill] sm:$0xff] }
 0x32e   :  { %v6963_v58 = vadd.f32 %v2888_v6, %v2680_v47  ;;  %2359 = vmatmul.f32.gmra.mxu0 %v9380_v46  ;;  %v2474_v45 = vadd.f32 %v2473_v36, %v2265_v43  ;;  %v9384_v46 = vld [vmem:[#allocation95_spill] sm:$0xff]  ;;  %v9386_v36 = vld [vmem:[#allocation48_spill] sm:$0xff] }
 0x330   :  { %9379 = vst [vmem:[#allocation36_spill] sm:$0xff] %v6963_v58  ;;  %2729 = vmatmul.f32.gmra.mxu2 %v9381_v42  ;;  %2938 = vmatmul.f32.gmra.mxu3 %v5758_v16  ;;  %v9385_v16 = vld [vmem:[#allocation43_spill] sm:$0xff] }
 0x331   :  { %v2268_v15 = vadd.f32 %v6771_v61, %v9385_v16  ;;  %v9390_v61 = vld [vmem:[#allocation46_spill] sm:$0xff] }
 0x332   :  { %v2479_v18 = vpop.f32.mrf.mxu1  ;;  %v2271_v16 = vadd.f32 %v6783_v10, %v9390_v61  ;;  %v9395_v10 = vld [vmem:[#allocation49_spill] sm:$0xff] }
 0x333   :  { %v6969_v8 = vpop.f32.mrf.mxu0  ;;  %v2682_v49 = vpop.f32.mrf.mxu2  ;;  %v2274_v61 = vadd.f32 %v6791_v35, %v9395_v10  ;;  %v9397_v35 = vld [vmem:[#allocation61_spill] sm:$0xff] }
 0x334   :  { %v2683_v22 = vadd.f32 %v2682_v49, %v2474_v45  ;;  %v2891_v59 = vpop.f32.mrf.mxu3  ;;  %v9387_v49 = vld [vmem:[#allocation53_spill] sm:$0xff] }
 0x335   :  { %2526 = vmatmul.f32.gmra.mxu1 %v9382_v27 }
 0x336   :  { %v6972_v47 = vadd.f32 %v2891_v59, %v2683_v22  ;;  %4794 = vmatmul.msk.f32.gmra.mxu0 %vm5272_vm2, %v9384_v46  ;;  %v2477_v59 = vadd.f32 %v2476_v9, %v2268_v15 }
 0x338   :  { %9383 = vst [vmem:[#allocation35_spill] sm:$0xff] %v6972_v47  ;;  %2732 = vmatmul.f32.gmra.mxu2 %v9386_v36  ;;  %4842 = vmatmul.msk.f32.gmra.mxu3 %vm5272_vm2, %v5776_v4  ;;  %v9391_v47 = vld [vmem:[#allocation51_spill] sm:$0xff]  ;;  %v2480_v4 = vadd.f32 %v2479_v18, %v2271_v16  ;;  %v9392_v36 = vld [vmem:[#allocation57_spill] sm:$0xff] }
 0x33a   :  { %v2482_v6 = vpop.f32.mrf.mxu1 }
 0x33b   :  { %v6986_v55 = vpop.f32.mrf.mxu0  ;;  %v2685_v31 = vpop.f32.mrf.mxu2 }
 0x33c   :  { %v2686_v43 = vadd.f32 %v2685_v31, %v2477_v59  ;;  %v2894_v45 = vpop.f32.mrf.mxu3 }
 0x33d   :  { %2529 = vmatmul.f32.gmra.mxu1 %v9387_v49 }
 0x33e   :  { %v6989_v22 = vadd.f32 %v2894_v45, %v2686_v43  ;;  %2365 = vmatmul.f32.gmra.mxu0 %v9389_v30  ;;  %v9394_v45 = vld [vmem:[#allocation103_spill] sm:$0xff] }
 0x340   :  { %9388 = vst [vmem:[#allocation32_spill] sm:$0xff] %v6989_v22  ;;  %2735 = vmatmul.f32.gmra.mxu2 %v9391_v47  ;;  %2944 = vmatmul.f32.gmra.mxu3 %v5805_v53  ;;  %v9396_v22 = vld [vmem:[#allocation54_spill] sm:$0xff]  ;;  %v3643_v53 = vld [vmem:[%s8832_s7 + $0x48] sm:$0xff]  ;;  %v9400_v47 = vld [vmem:[#allocation52_spill] sm:$0xff] }
 0x341   :  { %3656 = vmatpush.msra.mxu2 %v3643_v53  ;;  %v2277_v53 = vadd.f32 %v6806_v57, %v9400_v47  ;;  %v4136_v57 = vld [vmem:[%s8835_s10 + $0x68] sm:$0xff] }
 0x342   :  { %v2485_v9 = vpop.f32.mrf.mxu1  ;;  %4141 = vmatpush.msra.mxu3 %v4136_v57  ;;  %v9409_v57 = vld [vmem:[#allocation115_spill] sm:$0xff] }
 0x343   :  { %v6996_v15 = vpop.f32.mrf.mxu0  ;;  %v2688_v58 = vpop.f32.mrf.mxu2 }
 0x344   :  { %v2689_v59 = vadd.f32 %v2688_v58, %v2480_v4  ;;  %v2897_v31 = vpop.f32.mrf.mxu3  ;;  %v2483_v58 = vadd.f32 %v2482_v6, %v2274_v61  ;;  %v9401_v6 = vld [vmem:[#allocation58_spill] sm:$0xff]  ;;  %v2486_v61 = vadd.f32 %v2485_v9, %v2277_v53 }
 0x345   :  { %2532 = vmatmul.f32.gmra.mxu1 %v9392_v36  ;;  %v9406_v9 = vld [vmem:[#allocation62_spill] sm:$0xff]  ;;  %v9412_v36 = vld [vmem:[#allocation73_spill] sm:$0xff] }
 0x346   :  { %v6999_v43 = vadd.f32 %v2897_v31, %v2689_v59  ;;  %4796 = vmatmul.msk.f32.gmra.mxu0 %vm5272_vm2, %v9394_v45  ;;  %v1594_v59 = vld [vmem:[#allocation2 + $0x3c8] sm:$0xff] }
 0x347   :  { %3086 = vmatpush.msra.mxu0 %v1594_v59 }
 0x348   :  { %9393 = vst [vmem:[#allocation40_spill] sm:$0xff] %v6999_v43  ;;  %2738 = vmatmul.f32.gmra.mxu2 %v9396_v22  ;;  %4844 = vmatmul.msk.f32.gmra.mxu3 %vm5272_vm2, %v9334_v40  ;;  %v9399_v22 = vld [vmem:[#allocation107_spill] sm:$0xff]  ;;  %v1610_v40 = vld [vmem:[#allocation2 + $0x448] sm:$0xff] }
 0x349   :  { %3295 = vmatpush.msra.mxu1 %v1610_v40 }
 0x34a   :  { %v2488_v18 = vpop.f32.mrf.mxu1 }
 0x34b   :  { %v7013_v16 = vpop.f32.mrf.mxu0  ;;  %v2691_v4 = vpop.f32.mrf.mxu2 }
 0x34c   :  { %v2692_v31 = vadd.f32 %v2691_v4, %v2483_v58  ;;  %v2900_v43 = vpop.f32.mrf.mxu3 }
 0x34d   :  { %2535 = vmatmul.f32.gmra.mxu1 %v9397_v35 }
 0x34e   :  { %v7016_v10 = vadd.f32 %v2900_v43, %v2692_v31  ;;  %2371 = vmatmul.f32.gmra.mxu0 %v9399_v22  ;;  %v9402_v43 = vld [vmem:[#allocation65_spill] sm:$0xff] }
 0x350   :  { %9398 = vst [vmem:[#allocation39_spill] sm:$0xff] %v7016_v10  ;;  %2741 = vmatmul.f32.gmra.mxu2 %v9401_v6  ;;  %2950 = vmatmul.f32.gmra.mxu3 %v9338_v19  ;;  %v9404_v10 = vld [vmem:[#allocation111_spill] sm:$0xff]  ;;  %v9405_v19 = vld [vmem:[#allocation56_spill] sm:$0xff] }
 0x351   :  { %v2280_v47 = vadd.f32 %v6814_v34, %v9405_v19  ;;  %v9410_v34 = vld [vmem:[#allocation60_spill] sm:$0xff] }
 0x352   :  { %v2491_v42 = vpop.f32.mrf.mxu1  ;;  %v2283_v19 = vadd.f32 %v6826_v5, %v9410_v34  ;;  %v9415_v5 = vld [vmem:[#allocation64_spill] sm:$0xff] }
 0x353   :  { %v7023_v58 = vpop.f32.mrf.mxu0  ;;  %v2694_v4 = vpop.f32.mrf.mxu2  ;;  %v2286_v34 = vadd.f32 %v6834_v63, %v9415_v5  ;;  %v9417_v63 = vld [vmem:[#allocation77_spill] sm:$0xff] }
 0x354   :  { %v2695_v59 = vadd.f32 %v2694_v4, %v2486_v61  ;;  %v2903_v35 = vpop.f32.mrf.mxu3 }
 0x355   :  { %2538 = vmatmul.f32.gmra.mxu1 %v9402_v43 }
 0x356   :  { %v7026_v31 = vadd.f32 %v2903_v35, %v2695_v59  ;;  %4798 = vmatmul.msk.f32.gmra.mxu0 %vm5272_vm2, %v9404_v10  ;;  %v2489_v35 = vadd.f32 %v2488_v18, %v2280_v47 }
 0x358   :  { %9403 = vst [vmem:[#allocation91_spill] sm:$0xff] %v7026_v31  ;;  %2744 = vmatmul.f32.gmra.mxu2 %v9406_v9  ;;  %4846 = vmatmul.msk.f32.gmra.mxu3 %vm5272_vm2, %v9342_v32  ;;  %v9407_v31 = vld [vmem:[#allocation69_spill] sm:$0xff]  ;;  %v9411_v9 = vld [vmem:[#allocation66_spill] sm:$0xff]  ;;  %v2492_v32 = vadd.f32 %v2491_v42, %v2283_v19 }
 0x35a   :  { %v2494_v40 = vpop.f32.mrf.mxu1 }
 0x35b   :  { %v7040_v53 = vpop.f32.mrf.mxu0  ;;  %v2697_v61 = vpop.f32.mrf.mxu2  ;;  %v2495_v42 = vadd.f32 %v2494_v40, %v2286_v34  ;;  %v9421_v40 = vld [vmem:[#allocation74_spill] sm:$0xff] }
 0x35c   :  { %v2698_v4 = vadd.f32 %v2697_v61, %v2489_v35  ;;  %v2906_v59 = vpop.f32.mrf.mxu3 }
 0x35d   :  { %2541 = vmatmul.f32.gmra.mxu1 %v9407_v31 }
 0x35e   :  { %v7043_v6 = vadd.f32 %v2906_v59, %v2698_v4  ;;  %2377 = vmatmul.f32.gmra.mxu0 %v9409_v57  ;;  %v9414_v59 = vld [vmem:[#allocation119_spill] sm:$0xff] }
 0x360   :  { %9408 = vst [vmem:[#allocation50_spill] sm:$0xff] %v7043_v6  ;;  %2747 = vmatmul.f32.gmra.mxu2 %v9411_v9  ;;  %2956 = vmatmul.f32.gmra.mxu3 %v9346_v11  ;;  %v9416_v6 = vld [vmem:[#allocation70_spill] sm:$0xff]  ;;  %v3642_v11 = vld [vmem:[%s8832_s7 + $0x40] sm:$0xff] }
 0x361   :  { %3657 = vmatpush.msra.mxu2 %v3642_v11  ;;  %v9420_v9 = vld [vmem:[#allocation68_spill] sm:$0xff] }
 0x362   :  { %v2497_v18 = vpop.f32.mrf.mxu1  ;;  %v2289_v11 = vadd.f32 %v6849_v62, %v9420_v9  ;;  %v4135_v62 = vld [vmem:[%s8835_s10 + $0x60] sm:$0xff] }
 0x363   :  { %v7050_v47 = vpop.f32.mrf.mxu0  ;;  %v2700_v43 = vpop.f32.mrf.mxu2  ;;  %4142 = vmatpush.msra.mxu3 %v4135_v62  ;;  %v9428_v62 = vld [vmem:[#allocation130_spill] sm:$0xff] }
 0x364   :  { %v2701_v35 = vadd.f32 %v2700_v43, %v2492_v32  ;;  %v2909_v61 = vpop.f32.mrf.mxu3  ;;  %v2498_v34 = vadd.f32 %v2497_v18, %v2289_v11  ;;  %v9425_v18 = vld [vmem:[#allocation78_spill] sm:$0xff] }
 0x365   :  { %2544 = vmatmul.f32.gmra.mxu1 %v9412_v36 }
 0x366   :  { %v7053_v4 = vadd.f32 %v2909_v61, %v2701_v35  ;;  %4800 = vmatmul.msk.f32.gmra.mxu0 %vm5272_vm2, %v9414_v59  ;;  %v1593_v35 = vld [vmem:[#allocation2 + $0x3c0] sm:$0xff] }
 0x367   :  { %3087 = vmatpush.msra.mxu0 %v1593_v35 }
 0x368   :  { %9413 = vst [vmem:[#allocation95_spill] sm:$0xff] %v7053_v4  ;;  %2750 = vmatmul.f32.gmra.mxu2 %v9416_v6  ;;  %4848 = vmatmul.msk.f32.gmra.mxu3 %vm5272_vm2, %v9350_v41  ;;  %v9419_v6 = vld [vmem:[#allocation123_spill] sm:$0xff]  ;;  %v1609_v41 = vld [vmem:[#allocation2 + $0x440] sm:$0xff] }
 0x369   :  { %3296 = vmatpush.msra.mxu1 %v1609_v41 }
 0x36a   :  { %v2500_v43 = vpop.f32.mrf.mxu1 }
 0x36b   :  { %v7067_v19 = vpop.f32.mrf.mxu0  ;;  %v2703_v32 = vpop.f32.mrf.mxu2 }
 0x36c   :  { %v2704_v61 = vadd.f32 %v2703_v32, %v2495_v42  ;;  %v2912_v4 = vpop.f32.mrf.mxu3 }
 0x36d   :  { %2547 = vmatmul.f32.gmra.mxu1 %v9417_v63 }
 0x36e   :  { %v7070_v5 = vadd.f32 %v2912_v4, %v2704_v61  ;;  %2383 = vmatmul.f32.gmra.mxu0 %v9419_v6  ;;  %v9422_v4 = vld [vmem:[#allocation80_spill] sm:$0xff] }
 0x370   :  { %9418 = vst [vmem:[#allocation43_spill] sm:$0xff] %v7070_v5  ;;  %2753 = vmatmul.f32.gmra.mxu2 %v9421_v40  ;;  %2962 = vmatmul.f32.gmra.mxu3 %v9354_v52  ;;  %v9424_v52 = vld [vmem:[#allocation72_spill] sm:$0xff] }
 0x371   :  { %v2292_v9 = vadd.f32 %v6857_v39, %v9424_v52  ;;  %v9429_v39 = vld [vmem:[#allocation76_spill] sm:$0xff] }
 0x372   :  { %v2503_v36 = vpop.f32.mrf.mxu1  ;;  %v2295_v52 = vadd.f32 %v6869_v3, %v9429_v39  ;;  %v893_v3 = vsel %vm680_vm1, 0.0, %v6908_v48  ;;  %v9434_v39 = vld [vmem:[#allocation79_spill] sm:$0xff] }
 0x373   :  { %v7077_v42 = vpop.f32.mrf.mxu0  ;;  %v2706_v32 = vpop.f32.mrf.mxu2 }
 0x374   :  { %v2707_v35 = vadd.f32 %v2706_v32, %v2498_v34  ;;  %v2915_v63 = vpop.f32.mrf.mxu3 }
 0x375   :  { %2550 = vmatmul.f32.gmra.mxu1 %v9422_v4  ;;  %v9431_v4 = vld [vmem:[#allocation87_spill] sm:$0xff] }
 0x376   :  { %v7080_v61 = vadd.f32 %v2915_v63, %v2707_v35  ;;  %4802 = vmatmul.msk.f32.gmra.mxu0 %vm5272_vm2, %v6280_v23  ;;  %v2501_v63 = vadd.f32 %v2500_v43, %v2292_v9 }
 0x378   :  { %9423 = vst [vmem:[#allocation53_spill] sm:$0xff] %v7080_v61  ;;  %2756 = vmatmul.f32.gmra.mxu2 %v9425_v18  ;;  %4850 = vmatmul.msk.f32.gmra.mxu3 %vm5272_vm2, %v5974_v21  ;;  %v9426_v61 = vld [vmem:[#allocation84_spill] sm:$0xff]  ;;  %v9430_v18 = vld [vmem:[#allocation81_spill] sm:$0xff]  ;;  %v2504_v21 = vadd.f32 %v2503_v36, %v2295_v52  ;;  %v3641_v52 = vld [vmem:[%s8832_s7 + $0x38] sm:$0xff] }
 0x379   :  { %v9435_v36 = vld [vmem:[#allocation85_spill] sm:$0xff]  ;;  %3658 = vmatpush.msra.mxu2 %v3641_v52 }
 0x37a   :  { %v2506_v41 = vpop.f32.mrf.mxu1 }
 0x37b   :  { %v7094_v11 = vpop.f32.mrf.mxu0  ;;  %v2709_v34 = vpop.f32.mrf.mxu2 }
 0x37c   :  { %v2710_v32 = vadd.f32 %v2709_v34, %v2501_v63  ;;  %v2918_v35 = vpop.f32.mrf.mxu3 }
 0x37d   :  { %2553 = vmatmul.f32.gmra.mxu1 %v9426_v61 }
 0x37e   :  { %v7097_v5 = vadd.f32 %v2918_v35, %v2710_v32  ;;  %2389 = vmatmul.f32.gmra.mxu0 %v9428_v62  ;;  %v9433_v35 = vld [vmem:[#allocation134_spill] sm:$0xff] }
 0x380   :  { %9427 = vst [vmem:[#allocation99_spill] sm:$0xff] %v7097_v5  ;;  %2759 = vmatmul.f32.gmra.mxu2 %v9430_v18  ;;  %2968 = vmatmul.f32.gmra.mxu3 %v9361_v33  ;;  %v2298_v33 = vadd.f32 %v6877_v7, %v9434_v39  ;;  %v1592_v7 = vld [vmem:[#allocation2 + $0x3b8] sm:$0xff] }
 0x381   :  { %3088 = vmatpush.msra.mxu0 %v1592_v7 }
 0x382   :  { %v2509_v43 = vpop.f32.mrf.mxu1 }
 0x383   :  { %v7104_v9 = vpop.f32.mrf.mxu0  ;;  %v2712_v40 = vpop.f32.mrf.mxu2 }
 0x384   :  { %v2713_v63 = vadd.f32 %v2712_v40, %v2504_v21  ;;  %v2921_v34 = vpop.f32.mrf.mxu3  ;;  %v1446_v40 = vrot.slane %v6931_v54, 1  ;;  %v2507_v21 = vadd.f32 %v2506_v41, %v2298_v33  ;;  %v1608_v41 = vld [vmem:[#allocation2 + $0x438] sm:$0xff] }
 0x385   :  { %2556 = vmatmul.f32.gmra.mxu1 %v9431_v4  ;;  %v9438_v33 = vld [vmem:[#allocation83_spill] sm:$0xff] }
 0x386   :  { %v7107_v32 = vadd.f32 %v2921_v34, %v2713_v63  ;;  %4804 = vmatmul.msk.f32.gmra.mxu0 %vm5272_vm2, %v9433_v35  ;;  %v1445_v34 = vrot.slane %v893_v3, 1  ;;  %3297 = vmatpush.msra.mxu1 %v1608_v41  ;;  %v2301_v52 = vadd.f32 %v6894_v25, %v9438_v33  ;;  %v1459_v25 = vrot.slane %v893_v3, 2  ;;  %v9443_v33 = vld [vmem:[#allocation86_spill] sm:$0xff]  ;;  %v9444_v3 = vld [vmem:[#allocation8_spill] sm:$0xff] }
 0x388   :  { %9432 = vst [vmem:[#allocation46_spill] sm:$0xff] %v7107_v32  ;;  %2762 = vmatmul.f32.gmra.mxu2 %v9435_v36  ;;  %4852 = vmatmul.msk.f32.gmra.mxu3 %vm5272_vm2, %v6908_v48  ;;  %v7127_v18 = vsel %vm1005_vm3, %v1445_v34, %v1446_v40  ;;  %v926_v48 = vsel %vm680_vm1, %v6923_v50, 0.0  ;;  %v2510_v34 = vadd.f32 %v2509_v43, %v2301_v52  ;;  %v4134_v43 = vld [vmem:[%s8835_s10 + $0x58] sm:$0xff] }
 0x389   :  { %9436 = vst [vmem:[#allocation103_spill] sm:$0xff] %v7127_v18  ;;  %4143 = vmatpush.msra.mxu3 %v4134_v43 }
 0x38a   :  { %v2512_v63 = vpop.f32.mrf.mxu1 }
 0x38b   :  { %v7124_v32 = vpop.f32.mrf.mxu0  ;;  %v2715_v5 = vpop.f32.mrf.mxu2 }
 0x38c   :  { %v2716_v39 = vadd.f32 %v2715_v5, %v2507_v21  ;;  %v2924_v36 = vpop.f32.mrf.mxu3  ;;  %v9439_v5 = vld [vmem:[#allocation88_spill] sm:$0xff]  ;;  %v1448_v21 = vrot.slane %v926_v48, 1 }
 0x38d   :  { %2559 = vmatmul.f32.gmra.mxu1 %v7127_v18 }
 0x38e   :  { %v7132_v4 = vadd.f32 %v2924_v36, %v2716_v39  ;;  %2395 = vmatmul.f32.gmra.mxu0 %v6356_v1  ;;  %v1460_v36 = vrot.slane %v6931_v54, 2  ;;  %v7143_v18 = vsel %vm1005_vm3, %v1446_v40, %v1448_v21  ;;  %v2304_v40 = vadd.f32 %v6906_v13, %v9443_v33  ;;  %v9449_v33 = vld [vmem:[#allocation89_spill] sm:$0xff] }
 0x38f   :  { %9440 = vst [vmem:[#allocation107_spill] sm:$0xff] %v7143_v18 }
 0x390   :  { %9437 = vst [vmem:[#allocation49_spill] sm:$0xff] %v7132_v4  ;;  %2765 = vmatmul.f32.gmra.mxu2 %v9439_v5  ;;  %2974 = vmatmul.f32.gmra.mxu3 %v6931_v54  ;;  %v7155_v54 = vsel %vm1223_vm4, %v1459_v25, %v1460_v36  ;;  %v9445_v25 = vld [vmem:[#allocation93_spill] sm:$0xff]  ;;  %v9447_v5 = vld [vmem:[#allocation144_spill] sm:$0xff] }
 0x391   :  { %9442 = vst [vmem:[#allocation111_spill] sm:$0xff] %v7155_v54 }
 0x392   :  { %v2515_v7 = vpop.f32.mrf.mxu1 }
 0x393   :  { %v7139_v61 = vpop.f32.mrf.mxu0  ;;  %v2718_v50 = vpop.f32.mrf.mxu2 }
 0x394   :  { %v2719_v39 = vadd.f32 %v2718_v50, %v2510_v34  ;;  %v2927_v4 = vpop.f32.mrf.mxu3  ;;  %v1462_v50 = vrot.slane %v926_v48, 2 }
 0x395   :  { %2562 = vmatmul.f32.gmra.mxu1 %v7143_v18  ;;  %v9470_v18 = vld [vmem:[#allocation113_spill] sm:$0xff] }
 0x396   :  { %v7146_v41 = vadd.f32 %v2927_v4, %v2719_v39  ;;  %4806 = vmatmul.msk.f32.gmra.mxu0 %vm5272_vm2, %v6374_v17  ;;  %v2513_v4 = vadd.f32 %v2512_v63, %v2304_v40  ;;  %v7170_v13 = vsel %vm1223_vm4, %v1460_v36, %v1462_v50  ;;  %v9452_v36 = vld [vmem:[#allocation148_spill] sm:$0xff] }
 0x397   :  { %9448 = vst [vmem:[#allocation69_spill] sm:$0xff] %v7170_v13 }
 0x398   :  { %9441 = vst [vmem:[#allocation52_spill] sm:$0xff] %v7146_v41  ;;  %2768 = vmatmul.f32.gmra.mxu2 %v7155_v54  ;;  %4854 = vmatmul.msk.f32.gmra.mxu3 %vm5272_vm2, %v9444_v3  ;;  %v2307_v54 = vadd.f32 %v6925_v20, %v9449_v33  ;;  %v9453_v20 = vld [vmem:[#allocation90_spill] sm:$0xff] }
 0x399   :  { %v2310_v50 = vadd.f32 %v6940_v29, %v9453_v20  ;;  %v9454_v33 = vld [vmem:[#allocation94_spill] sm:$0xff]  ;;  %v9455_v29 = vld [vmem:[#allocation101_spill] sm:$0xff] }
 0x39a   :  { %v2518_v52 = vpop.f32.mrf.mxu1  ;;  %v2516_v63 = vadd.f32 %v2515_v7, %v2307_v54  ;;  %v3640_v7 = vld [vmem:[%s8832_s7 + $0x30] sm:$0xff] }
 0x39b   :  { %v7163_v21 = vpop.f32.mrf.mxu0  ;;  %v2721_v34 = vpop.f32.mrf.mxu2  ;;  %3659 = vmatpush.msra.mxu2 %v3640_v7  ;;  %v2519_v54 = vadd.f32 %v2518_v52, %v2310_v50  ;;  %v9459_v52 = vld [vmem:[#allocation98_spill] sm:$0xff] }
 0x39c   :  { %v2722_v39 = vadd.f32 %v2721_v34, %v2513_v4  ;;  %v2930_v41 = vpop.f32.mrf.mxu3 }
 0x39d   :  { %2565 = vmatmul.f32.gmra.mxu1 %v9445_v25 }
 0x39e   :  { %v7166_v43 = vadd.f32 %v2930_v41, %v2722_v39  ;;  %2401 = vmatmul.f32.gmra.mxu0 %v9447_v5  ;;  %v9450_v39 = vld [vmem:[#allocation97_spill] sm:$0xff] }
 0x3a0   :  { %9446 = vst [vmem:[#allocation56_spill] sm:$0xff] %v7166_v43  ;;  %2771 = vmatmul.f32.gmra.mxu2 %v7170_v13  ;;  %2980 = vmatmul.f32.gmra.mxu3 %v9444_v3  ;;  %v9458_v43 = vld [vmem:[#allocation92_spill] sm:$0xff] }
 0x3a1   :  { %v2313_v7 = vadd.f32 %v6959_v24, %v9458_v43  ;;  %v4133_v24 = vld [vmem:[%s8835_s10 + $0x50] sm:$0xff] }
 0x3a2   :  { %v2521_v48 = vpop.f32.mrf.mxu1  ;;  %4144 = vmatpush.msra.mxu3 %v4133_v24  ;;  %v9467_v24 = vld [vmem:[#allocation160_spill] sm:$0xff] }
 0x3a3   :  { %v7176_v40 = vpop.f32.mrf.mxu0  ;;  %v2724_v4 = vpop.f32.mrf.mxu2  ;;  %v2522_v50 = vadd.f32 %v2521_v48, %v2313_v7  ;;  %v9464_v48 = vld [vmem:[#allocation102_spill] sm:$0xff] }
 0x3a4   :  { %v2725_v34 = vadd.f32 %v2724_v4, %v2516_v63  ;;  %v2933_v41 = vpop.f32.mrf.mxu3 }
 0x3a5   :  { %2568 = vmatmul.f32.gmra.mxu1 %v9450_v39 }
 0x3a6   :  { %v7179_v25 = vadd.f32 %v2933_v41, %v2725_v34  ;;  %4808 = vmatmul.msk.f32.gmra.mxu0 %vm5272_vm2, %v9452_v36  ;;  %v1591_v41 = vld [vmem:[#allocation2 + $0x3b0] sm:$0xff] }
 0x3a7   :  { %3089 = vmatpush.msra.mxu0 %v1591_v41 }
 0x3a8   :  { %9451 = vst [vmem:[#allocation115_spill] sm:$0xff] %v7179_v25  ;;  %2774 = vmatmul.f32.gmra.mxu2 %v9454_v33  ;;  %4856 = vmatmul.msk.f32.gmra.mxu3 %vm5272_vm2, %v9384_v46  ;;  %v9457_v33 = vld [vmem:[#allocation152_spill] sm:$0xff]  ;;  %v1607_v46 = vld [vmem:[#allocation2 + $0x430] sm:$0xff] }
 0x3a9   :  { %3298 = vmatpush.msra.mxu1 %v1607_v46 }
 0x3aa   :  { %v2524_v63 = vpop.f32.mrf.mxu1 }
 0x3ab   :  { %v7193_v4 = vpop.f32.mrf.mxu0  ;;  %v2727_v34 = vpop.f32.mrf.mxu2 }
 0x3ac   :  { %v2728_v39 = vadd.f32 %v2727_v34, %v2519_v54  ;;  %v2936_v25 = vpop.f32.mrf.mxu3 }
 0x3ad   :  { %2571 = vmatmul.f32.gmra.mxu1 %v9455_v29 }
 0x3ae   :  { %v7196_v20 = vadd.f32 %v2936_v25, %v2728_v39  ;;  %2407 = vmatmul.f32.gmra.mxu0 %v9457_v33  ;;  %v9460_v25 = vld [vmem:[#allocation105_spill] sm:$0xff] }
 0x3b0   :  { %9456 = vst [vmem:[#allocation60_spill] sm:$0xff] %v7196_v20  ;;  %2777 = vmatmul.f32.gmra.mxu2 %v9459_v52  ;;  %2986 = vmatmul.f32.gmra.mxu3 %v9389_v30  ;;  %v9462_v20 = vld [vmem:[#allocation156_spill] sm:$0xff] }
 0x3b1   :  { %v9463_v30 = vld [vmem:[#allocation96_spill] sm:$0xff] }
 0x3b2   :  { %v2527_v13 = vpop.f32.mrf.mxu1  ;;  %v2316_v43 = vadd.f32 %v6969_v8, %v9463_v30  ;;  %v9468_v8 = vld [vmem:[#allocation100_spill] sm:$0xff] }
 0x3b3   :  { %v7203_v54 = vpop.f32.mrf.mxu0  ;;  %v2730_v34 = vpop.f32.mrf.mxu2  ;;  %v2319_v30 = vadd.f32 %v6986_v55, %v9468_v8  ;;  %v9473_v55 = vld [vmem:[#allocation104_spill] sm:$0xff] }
 0x3b4   :  { %v2731_v41 = vadd.f32 %v2730_v34, %v2522_v50  ;;  %v2939_v29 = vpop.f32.mrf.mxu3  ;;  %v2322_v8 = vadd.f32 %v6996_v15, %v9473_v55  ;;  %v9475_v15 = vld [vmem:[#allocation117_spill] sm:$0xff] }
 0x3b5   :  { %2574 = vmatmul.f32.gmra.mxu1 %v9460_v25 }
 0x3b6   :  { %v7206_v39 = vadd.f32 %v2939_v29, %v2731_v41  ;;  %4810 = vmatmul.msk.f32.gmra.mxu0 %vm5272_vm2, %v9462_v20  ;;  %v2525_v29 = vadd.f32 %v2524_v63, %v2316_v43  ;;  %v9465_v41 = vld [vmem:[#allocation109_spill] sm:$0xff] }
 0x3b8   :  { %9461 = vst [vmem:[#allocation119_spill] sm:$0xff] %v7206_v39  ;;  %2780 = vmatmul.f32.gmra.mxu2 %v9464_v48  ;;  %4858 = vmatmul.msk.f32.gmra.mxu3 %vm5272_vm2, %v9394_v45  ;;  %v9469_v48 = vld [vmem:[#allocation106_spill] sm:$0xff]  ;;  %v2528_v45 = vadd.f32 %v2527_v13, %v2319_v30 }
 0x3ba   :  { %v2530_v46 = vpop.f32.mrf.mxu1 }
 0x3bb   :  { %v7220_v7 = vpop.f32.mrf.mxu0  ;;  %v2733_v52 = vpop.f32.mrf.mxu2  ;;  %v2531_v13 = vadd.f32 %v2530_v46, %v2322_v8  ;;  %v9479_v46 = vld [vmem:[#allocation114_spill] sm:$0xff] }
 0x3bc   :  { %v2734_v50 = vadd.f32 %v2733_v52, %v2525_v29  ;;  %v2942_v34 = vpop.f32.mrf.mxu3 }
 0x3bd   :  { %2577 = vmatmul.f32.gmra.mxu1 %v9465_v41  ;;  %v9490_v41 = vld [vmem:[#allocation128_spill] sm:$0xff] }
 0x3be   :  { %v7223_v39 = vadd.f32 %v2942_v34, %v2734_v50  ;;  %2413 = vmatmul.f32.gmra.mxu0 %v9467_v24  ;;  %v9472_v34 = vld [vmem:[#allocation164_spill] sm:$0xff] }
 0x3c0   :  { %9466 = vst [vmem:[#allocation64_spill] sm:$0xff] %v7223_v39  ;;  %2783 = vmatmul.f32.gmra.mxu2 %v9469_v48  ;;  %2992 = vmatmul.f32.gmra.mxu3 %v9399_v22  ;;  %v9474_v39 = vld [vmem:[#allocation110_spill] sm:$0xff]  ;;  %v3639_v22 = vld [vmem:[%s8832_s7 + $0x28] sm:$0xff]  ;;  %v9478_v48 = vld [vmem:[#allocation108_spill] sm:$0xff] }
 0x3c1   :  { %3660 = vmatpush.msra.mxu2 %v3639_v22  ;;  %v2325_v22 = vadd.f32 %v7013_v16, %v9478_v48  ;;  %v4132_v16 = vld [vmem:[%s8835_s10 + $0x48] sm:$0xff] }
 0x3c2   :  { %v2533_v63 = vpop.f32.mrf.mxu1  ;;  %4145 = vmatpush.msra.mxu3 %v4132_v16  ;;  %v9487_v16 = vld [vmem:[#allocation176_spill] sm:$0xff] }
 0x3c3   :  { %v7230_v43 = vpop.f32.mrf.mxu0  ;;  %v2736_v25 = vpop.f32.mrf.mxu2  ;;  %v2534_v8 = vadd.f32 %v2533_v63, %v2325_v22  ;;  %v9484_v63 = vld [vmem:[#allocation118_spill] sm:$0xff] }
 0x3c4   :  { %v2737_v29 = vadd.f32 %v2736_v25, %v2528_v45  ;;  %v2945_v52 = vpop.f32.mrf.mxu3 }
 0x3c5   :  { %2580 = vmatmul.f32.gmra.mxu1 %v9470_v18 }
 0x3c6   :  { %v7233_v50 = vadd.f32 %v2945_v52, %v2737_v29  ;;  %4812 = vmatmul.msk.f32.gmra.mxu0 %vm5272_vm2, %v9472_v34  ;;  %v1590_v29 = vld [vmem:[#allocation2 + $0x3a8] sm:$0xff] }
 0x3c7   :  { %3090 = vmatpush.msra.mxu0 %v1590_v29 }
 0x3c8   :  { %9471 = vst [vmem:[#allocation123_spill] sm:$0xff] %v7233_v50  ;;  %2786 = vmatmul.f32.gmra.mxu2 %v9474_v39  ;;  %4860 = vmatmul.msk.f32.gmra.mxu3 %vm5272_vm2, %v9404_v10  ;;  %v9477_v39 = vld [vmem:[#allocation168_spill] sm:$0xff]  ;;  %v1606_v10 = vld [vmem:[#allocation2 + $0x428] sm:$0xff] }
 0x3c9   :  { %3299 = vmatpush.msra.mxu1 %v1606_v10 }
 0x3ca   :  { %v2536_v25 = vpop.f32.mrf.mxu1 }
 0x3cb   :  { %v7247_v30 = vpop.f32.mrf.mxu0  ;;  %v2739_v45 = vpop.f32.mrf.mxu2 }
 0x3cc   :  { %v2740_v52 = vadd.f32 %v2739_v45, %v2531_v13  ;;  %v2948_v50 = vpop.f32.mrf.mxu3 }
 0x3cd   :  { %2583 = vmatmul.f32.gmra.mxu1 %v9475_v15 }
 0x3ce   :  { %v7250_v55 = vadd.f32 %v2948_v50, %v2740_v52  ;;  %2419 = vmatmul.f32.gmra.mxu0 %v9477_v39  ;;  %v9480_v50 = vld [vmem:[#allocation121_spill] sm:$0xff] }
 0x3d0   :  { %9476 = vst [vmem:[#allocation68_spill] sm:$0xff] %v7250_v55  ;;  %2789 = vmatmul.f32.gmra.mxu2 %v9479_v46  ;;  %2998 = vmatmul.f32.gmra.mxu3 %v9409_v57  ;;  %v9482_v55 = vld [vmem:[#allocation172_spill] sm:$0xff] }
 0x3d1   :  { %v9483_v57 = vld [vmem:[#allocation112_spill] sm:$0xff] }
 0x3d2   :  { %v2539_v18 = vpop.f32.mrf.mxu1  ;;  %v2328_v48 = vadd.f32 %v7023_v58, %v9483_v57  ;;  %v9488_v58 = vld [vmem:[#allocation116_spill] sm:$0xff] }
 0x3d3   :  { %v7257_v13 = vpop.f32.mrf.mxu0  ;;  %v2742_v45 = vpop.f32.mrf.mxu2  ;;  %v2331_v57 = vadd.f32 %v7040_v53, %v9488_v58  ;;  %v9493_v53 = vld [vmem:[#allocation120_spill] sm:$0xff] }
 0x3d4   :  { %v2743_v29 = vadd.f32 %v2742_v45, %v2534_v8  ;;  %v2951_v15 = vpop.f32.mrf.mxu3  ;;  %v2334_v58 = vadd.f32 %v7050_v47, %v9493_v53  ;;  %v9495_v47 = vld [vmem:[#allocation132_spill] sm:$0xff] }
 0x3d5   :  { %2586 = vmatmul.f32.gmra.mxu1 %v9480_v50 }
 0x3d6   :  { %v7260_v52 = vadd.f32 %v2951_v15, %v2743_v29  ;;  %4814 = vmatmul.msk.f32.gmra.mxu0 %vm5272_vm2, %v9482_v55  ;;  %v2537_v15 = vadd.f32 %v2536_v25, %v2328_v48 }
 0x3d8   :  { %9481 = vst [vmem:[#allocation72_spill] sm:$0xff] %v7260_v52  ;;  %2792 = vmatmul.f32.gmra.mxu2 %v9484_v63  ;;  %4862 = vmatmul.msk.f32.gmra.mxu3 %vm5272_vm2, %v9414_v59  ;;  %v9485_v52 = vld [vmem:[#allocation125_spill] sm:$0xff]  ;;  %v9489_v63 = vld [vmem:[#allocation122_spill] sm:$0xff]  ;;  %v2540_v59 = vadd.f32 %v2539_v18, %v2331_v57 }
 0x3da   :  { %v2542_v10 = vpop.f32.mrf.mxu1 }
 0x3db   :  { %v7274_v22 = vpop.f32.mrf.mxu0  ;;  %v2745_v8 = vpop.f32.mrf.mxu2  ;;  %v2543_v18 = vadd.f32 %v2542_v10, %v2334_v58  ;;  %v9499_v10 = vld [vmem:[#allocation129_spill] sm:$0xff] }
 0x3dc   :  { %v2746_v45 = vadd.f32 %v2745_v8, %v2537_v15  ;;  %v2954_v29 = vpop.f32.mrf.mxu3 }
 0x3dd   :  { %2589 = vmatmul.f32.gmra.mxu1 %v9485_v52 }
 0x3de   :  { %v7277_v46 = vadd.f32 %v2954_v29, %v2746_v45  ;;  %2425 = vmatmul.f32.gmra.mxu0 %v9487_v16  ;;  %v9492_v29 = vld [vmem:[#allocation180_spill] sm:$0xff] }
 0x3e0   :  { %9486 = vst [vmem:[#allocation130_spill] sm:$0xff] %v7277_v46  ;;  %2795 = vmatmul.f32.gmra.mxu2 %v9489_v63  ;;  %3004 = vmatmul.f32.gmra.mxu3 %v9419_v6  ;;  %v9494_v46 = vld [vmem:[#allocation126_spill] sm:$0xff]  ;;  %v3638_v6 = vld [vmem:[%s8832_s7 + $0x20] sm:$0xff] }
 0x3e1   :  { %3661 = vmatpush.msra.mxu2 %v3638_v6  ;;  %v9498_v63 = vld [vmem:[#allocation124_spill] sm:$0xff] }
 0x3e2   :  { %v2545_v25 = vpop.f32.mrf.mxu1  ;;  %v2337_v6 = vadd.f32 %v7067_v19, %v9498_v63  ;;  %v4131_v19 = vld [vmem:[%s8835_s10 + $0x40] sm:$0xff] }
 0x3e3   :  { %v7284_v48 = vpop.f32.mrf.mxu0  ;;  %v2748_v50 = vpop.f32.mrf.mxu2  ;;  %4146 = vmatpush.msra.mxu3 %v4131_v19  ;;  %v9506_v19 = vld [vmem:[#allocation191_spill] sm:$0xff] }
 0x3e4   :  { %v2749_v15 = vadd.f32 %v2748_v50, %v2540_v59  ;;  %v2957_v8 = vpop.f32.mrf.mxu3  ;;  %v2546_v58 = vadd.f32 %v2545_v25, %v2337_v6  ;;  %v9503_v25 = vld [vmem:[#allocation133_spill] sm:$0xff] }
 0x3e5   :  { %2592 = vmatmul.f32.gmra.mxu1 %v9490_v41 }
 0x3e6   :  { %v7287_v45 = vadd.f32 %v2957_v8, %v2749_v15  ;;  %4816 = vmatmul.msk.f32.gmra.mxu0 %vm5272_vm2, %v9492_v29  ;;  %v1589_v15 = vld [vmem:[#allocation2 + $0x3a0] sm:$0xff] }
 0x3e7   :  { %3091 = vmatpush.msra.mxu0 %v1589_v15 }
 0x3e8   :  { %9491 = vst [vmem:[#allocation76_spill] sm:$0xff] %v7287_v45  ;;  %2798 = vmatmul.f32.gmra.mxu2 %v9494_v46  ;;  %4864 = vmatmul.msk.f32.gmra.mxu3 %vm5272_vm2, %v6280_v23  ;;  %v9497_v46 = vld [vmem:[#allocation184_spill] sm:$0xff] }
 0x3e9   :  { %v1605_v23 = vld [vmem:[#allocation2 + $0x420] sm:$0xff] }
 0x3ea   :  { %v2548_v50 = vpop.f32.mrf.mxu1  ;;  %3300 = vmatpush.msra.mxu1 %v1605_v23 }
 0x3eb   :  { %v7301_v57 = vpop.f32.mrf.mxu0  ;;  %v2751_v59 = vpop.f32.mrf.mxu2 }
 0x3ec   :  { %v2752_v8 = vadd.f32 %v2751_v59, %v2543_v18  ;;  %v2960_v45 = vpop.f32.mrf.mxu3 }
 0x3ed   :  { %2595 = vmatmul.f32.gmra.mxu1 %v9495_v47 }
 0x3ee   :  { %v7304_v53 = vadd.f32 %v2960_v45, %v2752_v8  ;;  %2431 = vmatmul.f32.gmra.mxu0 %v9497_v46  ;;  %v9500_v45 = vld [vmem:[#allocation136_spill] sm:$0xff] }
 0x3f0   :  { %9496 = vst [vmem:[#allocation134_spill] sm:$0xff] %v7304_v53  ;;  %2801 = vmatmul.f32.gmra.mxu2 %v9499_v10  ;;  %3010 = vmatmul.f32.gmra.mxu3 %v9428_v62  ;;  %v9502_v62 = vld [vmem:[#allocation127_spill] sm:$0xff]  ;;  %v9508_v10 = vld [vmem:[#allocation137_spill] sm:$0xff] }
 0x3f1   :  { %v2340_v63 = vadd.f32 %v7077_v42, %v9502_v62  ;;  %v1588_v42 = vld [vmem:[#allocation2 + $0x398] sm:$0xff] }
 0x3f2   :  { %v2551_v41 = vpop.f32.mrf.mxu1  ;;  %3092 = vmatpush.msra.mxu0 %v1588_v42  ;;  %v9507_v62 = vld [vmem:[#allocation131_spill] sm:$0xff]  ;;  %v1585_v42 = vld [vmem:[#allocation2 + $0x380] sm:$0xff] }
 0x3f3   :  { %v7311_v18 = vpop.f32.mrf.mxu0  ;;  %v2754_v59 = vpop.f32.mrf.mxu2 }
 0x3f4   :  { %v2755_v15 = vadd.f32 %v2754_v59, %v2546_v58  ;;  %v2963_v47 = vpop.f32.mrf.mxu3 }
 0x3f5   :  { %2598 = vmatmul.f32.gmra.mxu1 %v9500_v45 }
 0x3f6   :  { %v7314_v8 = vadd.f32 %v2963_v47, %v2755_v15  ;;  %4818 = vmatmul.msk.f32.gmra.mxu0 %vm5272_vm2, %v6645_v12  ;;  %v2549_v47 = vadd.f32 %v2548_v50, %v2340_v63 }
 0x3f8   :  { %9501 = vst [vmem:[#allocation79_spill] sm:$0xff] %v7314_v8  ;;  %2804 = vmatmul.f32.gmra.mxu2 %v9503_v25  ;;  %4866 = vmatmul.msk.f32.gmra.mxu3 %vm5272_vm2, %v9433_v35  ;;  %v9504_v8 = vld [vmem:[#allocation139_spill] sm:$0xff]  ;;  %v2343_v25 = vadd.f32 %v7094_v11, %v9507_v62  ;;  %v1587_v35 = vld [vmem:[#allocation2 + $0x390] sm:$0xff]  ;;  %v9512_v62 = vld [vmem:[#allocation140_spill] sm:$0xff] }
 0x3f9   :  { %3093 = vmatpush.msra.mxu0 %v1587_v35 }
 0x3fa   :  { %v2554_v23 = vpop.f32.mrf.mxu1  ;;  %v2552_v50 = vadd.f32 %v2551_v41, %v2343_v25  ;;  %v9511_v41 = vld [vmem:[#allocation135_spill] sm:$0xff] }
 0x3fb   :  { %v7328_v6 = vpop.f32.mrf.mxu0  ;;  %v2757_v58 = vpop.f32.mrf.mxu2  ;;  %v2346_v25 = vadd.f32 %v7104_v9, %v9511_v41 }
 0x3fc   :  { %v2758_v59 = vadd.f32 %v2757_v58, %v2549_v47  ;;  %v2966_v15 = vpop.f32.mrf.mxu3 }
 0x3fd   :  { %2601 = vmatmul.f32.gmra.mxu1 %v9504_v8  ;;  %v9509_v8 = vld [vmem:[#allocation142_spill] sm:$0xff]  ;;  %v2555_v35 = vadd.f32 %v2554_v23, %v2346_v25  ;;  %v1604_v23 = vld [vmem:[#allocation2 + $0x418] sm:$0xff] }
 0x3fe   :  { %v7331_v53 = vadd.f32 %v2966_v15, %v2758_v59  ;;  %2437 = vmatmul.f32.gmra.mxu0 %v9506_v19  ;;  %v1586_v59 = vld [vmem:[#allocation2 + $0x388] sm:$0xff]  ;;  %3301 = vmatpush.msra.mxu1 %v1604_v23  ;;  %v9518_v23 = vld [vmem:[#allocation150_spill] sm:$0xff] }
 0x3ff   :  { %3094 = vmatpush.msra.mxu0 %v1586_v59 }
 0x400   :  { %9505 = vst [vmem:[#allocation83_spill] sm:$0xff] %v7331_v53  ;;  %2807 = vmatmul.f32.gmra.mxu2 %v9508_v10  ;;  %3016 = vmatmul.f32.gmra.mxu3 %v6356_v1  ;;  %v4968_v1 = vld [vmem:[%s8827_s2] ss:$0 sm:$0xff] }
 0x401   :  { %3095 = vmatpush.msra.mxu0 %v1585_v42  ;;  %v481_v11 = vmul.f32 %v4968_v1, %v6711_v37  ;;  %v4969_v37 = vld [vmem:[%s8828_s3] ss:$0 sm:$0xff]  ;;  %v482_v41 = vmul.f32 %v4968_v1, %v6734_v0 }
 0x402   :  { %v2557_v63 = vpop.f32.mrf.mxu1 }
 0x403   :  { %v7338_v47 = vpop.f32.mrf.mxu0  ;;  %v2760_v58 = vpop.f32.mrf.mxu2  ;;  %v549_v9 = vadd.f32 %v4969_v37, %v481_v11  ;;  %v550_v11 = vadd.f32 %v4969_v37, %v482_v41 }
 0x404   :  { %v2761_v15 = vadd.f32 %v2760_v58, %v2552_v50  ;;  %v2969_v53 = vpop.f32.mrf.mxu3 }
 0x405   :  { %2604 = vmatmul.f32.gmra.mxu1 %v9509_v8  ;;  %v613_v25 = vmax.f32 %v549_v9, 0.0  ;;  %v9517_v8 = vld [vmem:[#allocation143_spill] sm:$0xff] }
 0x406   :  { %v7341_v45 = vadd.f32 %v2969_v53, %v2761_v15  ;;  %4820 = vmatmul.msk.f32.gmra.mxu0 %vm5272_vm2, %v6691_v51  ;;  %v3637_v53 = vld [vmem:[%s8832_s7 + $0x18] sm:$0xff] }
 0x407   :  { %3662 = vmatpush.msra.mxu2 %v3637_v53  ;;  %v9516_v53 = vld [vmem:[#allocation138_spill] sm:$0xff] }
 0x408   :  { %9510 = vst [vmem:[#allocation86_spill] sm:$0xff] %v7341_v45  ;;  %2810 = vmatmul.f32.gmra.mxu2 %v9512_v62  ;;  %4868 = vmatmul.msk.f32.gmra.mxu3 %vm5272_vm2, %v6374_v17  ;;  %v9513_v17 = vld [vmem:[#allocation146_spill] sm:$0xff]  ;;  %v2349_v10 = vadd.f32 %v7124_v32, %v9516_v53  ;;  %v4130_v32 = vld [vmem:[%s8835_s10 + $0x38] sm:$0xff] }
 0x409   :  { %v9515_v62 = vld [vmem:[#allocation198_spill] sm:$0xff]  ;;  %4147 = vmatpush.msra.mxu3 %v4130_v32 }
 0x40a   :  { %v2560_v50 = vpop.f32.mrf.mxu1 }
 0x40b   :  { %v7359_v58 = vpop.f32.mrf.mxu0  ;;  %v2763_v59 = vpop.f32.mrf.mxu2 }
 0x40c   :  { %v2764_v15 = vadd.f32 %v2763_v59, %v2555_v35  ;;  %v2972_v42 = vpop.f32.mrf.mxu3  ;;  %v2558_v35 = vadd.f32 %v2557_v63, %v2349_v10  ;;  %v9521_v63 = vld [vmem:[#allocation147_spill] sm:$0xff] }
 0x40d   :  { %2607 = vmatmul.f32.gmra.mxu1 %v9513_v17  ;;  %v614_v17 = vmax.f32 %v550_v11, 0.0 }
 0x40e   :  { %v7366_v45 = vadd.f32 %v2972_v42, %v2764_v15  ;;  %2443 = vmatmul.f32.gmra.mxu0 %v9515_v62  ;;  %v7375_v15 = vrot.slane %v613_v25, 7 }
 0x410   :  { %9514 = vst [vmem:[#allocation8_spill] sm:$0xff] %v7366_v45  ;;  %2813 = vmatmul.f32.gmra.mxu2 %v9517_v8  ;;  %3022 = vmatmul.f32.gmra.mxu3 %v9447_v5  ;;  %v9520_v5 = vld [vmem:[#allocation141_spill] sm:$0xff] }
 0x411   :  { %v2352_v10 = vadd.f32 %v7139_v61, %v9520_v5 }
 0x412   :  { %v2563_v59 = vpop.f32.mrf.mxu1 }
 0x413   :  { %v7373_v0 = vpop.f32.mrf.mxu0  ;;  %v2766_v1 = vpop.f32.mrf.mxu2  ;;  %v2561_v37 = vadd.f32 %v2560_v50, %v2352_v10 }
 0x414   :  { %v2767_v42 = vadd.f32 %v2766_v1, %v2558_v35  ;;  %v2975_v45 = vpop.f32.mrf.mxu3  ;;  %v9522_v1 = vld [vmem:[#allocation154_spill] sm:$0xff] }
 0x415   :  { %2610 = vmatmul.f32.gmra.mxu1 %v9518_v23 }
 0x416   :  { %v7378_v9 = vadd.f32 %v2975_v45, %v2767_v42  ;;  %4822 = vmatmul.msk.f32.gmra.mxu0 %vm5272_vm2, %v7375_v15  ;;  %v7392_v45 = vrot.slane %v614_v17, 7  ;;  %v9525_v17 = vld [vmem:[#allocation151_spill] sm:$0xff] }
 0x418   :  { %9519 = vst [vmem:[#allocation93_spill] sm:$0xff] %v7378_v9  ;;  %2816 = vmatmul.f32.gmra.mxu2 %v9521_v63  ;;  %4870 = vmatmul.msk.f32.gmra.mxu3 %vm5272_vm2, %v9452_v36  ;;  %v7400_v61 = vsel %vm680_vm1, %v7375_v15, %v7392_v45  ;;  %v9524_v36 = vld [vmem:[#allocation145_spill] sm:$0xff]  ;;  %v9526_v63 = vld [vmem:[#allocation158_spill] sm:$0xff] }
 0x419   :  { %v2355_v50 = vadd.f32 %v7163_v21, %v9524_v36  ;;  %v9529_v36 = vld [vmem:[#allocation155_spill] sm:$0xff] }
 0x41a   :  { %v2566_v41 = vpop.f32.mrf.mxu1 }
 0x41b   :  { %v7394_v25 = vpop.f32.mrf.mxu0  ;;  %v2769_v53 = vpop.f32.mrf.mxu2  ;;  %v2564_v32 = vadd.f32 %v2563_v59, %v2355_v50 }
 0x41c   :  { %v2770_v11 = vadd.f32 %v2769_v53, %v2561_v37  ;;  %v2978_v35 = vpop.f32.mrf.mxu3 }
 0x41d   :  { %2613 = vmatmul.f32.gmra.mxu1 %v9522_v1 }
 0x41e   :  { %v7402_v42 = vadd.f32 %v2978_v35, %v2770_v11  ;;  %2449 = vmatmul.f32.gmra.mxu0 %v7400_v61  ;;  %v9528_v35 = vld [vmem:[#allocation149_spill] sm:$0xff] }
 0x41f   :  { %v2358_v21 = vadd.f32 %v7176_v40, %v9528_v35  ;;  %v1603_v35 = vld [vmem:[#allocation2 + $0x410] sm:$0xff] }
 0x420   :  { %9523 = vst [vmem:[#allocation144_spill] sm:$0xff] %v7402_v42  ;;  %2819 = vmatmul.f32.gmra.mxu2 %v9525_v17  ;;  %3028 = vmatmul.f32.gmra.mxu3 %v9457_v33  ;;  %v3636_v33 = vld [vmem:[%s8832_s7 + $0x10] sm:$0xff]  ;;  %v9533_v42 = vld [vmem:[#allocation159_spill] sm:$0xff] }
 0x421   :  { %3663 = vmatpush.msra.mxu2 %v3636_v33  ;;  %v2567_v59 = vadd.f32 %v2566_v41, %v2358_v21  ;;  %3302 = vmatpush.msra.mxu1 %v1603_v35 }
 0x422   :  { %v2569_v5 = vpop.f32.mrf.mxu1 }
 0x423   :  { %v7409_v10 = vpop.f32.mrf.mxu0  ;;  %v2772_v37 = vpop.f32.mrf.mxu2 }
 0x424   :  { %v2773_v53 = vadd.f32 %v2772_v37, %v2564_v32  ;;  %v2981_v9 = vpop.f32.mrf.mxu3 }
 0x425   :  { %2616 = vmatmul.f32.gmra.mxu1 %v9526_v63 }
 0x426   :  { %v7412_v11 = vadd.f32 %v2981_v9, %v2773_v53  ;;  %3096 = vmatmul.f32.vlgmr.msra.gmra.mxu0 %v5408_v26  ;;  %v9530_v53 = vld [vmem:[#allocation162_spill] sm:$0xff] }
 0x428   :  { %9527 = vst [vmem:[#allocation89_spill] sm:$0xff] %v7412_v11  ;;  %2822 = vmatmul.f32.gmra.mxu2 %v9529_v36  ;;  %4872 = vmatmul.msk.f32.gmra.mxu3 %vm5272_vm2, %v9462_v20  ;;  %v9532_v20 = vld [vmem:[#allocation153_spill] sm:$0xff] }
 0x429   :  { %v2361_v11 = vadd.f32 %v7193_v4, %v9532_v20  ;;  %v9536_v4 = vld [vmem:[#allocation157_spill] sm:$0xff] }
 0x42a   :  { %v2572_v50 = vpop.f32.mrf.mxu1 }
 0x42b   :  { %v7424_v9 = vpop.f32.mrf.mxu0  ;;  %v2775_v32 = vpop.f32.mrf.mxu2  ;;  %v2570_v41 = vadd.f32 %v2569_v5, %v2361_v11  ;;  %v9537_v5 = vld [vmem:[#allocation163_spill] sm:$0xff] }
 0x42c   :  { %v2776_v26 = vadd.f32 %v2775_v32, %v2567_v59  ;;  %v2984_v37 = vpop.f32.mrf.mxu3 }
 0x42d   :  { %2619 = vmatmul.f32.gmra.mxu1 %v9530_v53 }
 0x42e   :  { %v7427_v40 = vadd.f32 %v2984_v37, %v2776_v26  ;;  %3099 = vmatmul.f32.gmra.mxu0 %v5428_v44  ;;  %v9534_v26 = vld [vmem:[#allocation166_spill] sm:$0xff] }
 0x42f   :  { %v4129_v44 = vld [vmem:[%s8835_s10 + $0x30] sm:$0xff] }
 0x430   :  { %9531 = vst [vmem:[#allocation97_spill] sm:$0xff] %v7427_v40  ;;  %2825 = vmatmul.f32.gmra.mxu2 %v9533_v42  ;;  %3034 = vmatmul.f32.gmra.mxu3 %v9467_v24  ;;  %v2364_v24 = vadd.f32 %v7203_v54, %v9536_v4  ;;  %v9540_v54 = vld [vmem:[#allocation161_spill] sm:$0xff]  ;;  %v9541_v4 = vld [vmem:[#allocation167_spill] sm:$0xff]  ;;  %v9542_v40 = vld [vmem:[#allocation174_spill] sm:$0xff] }
 0x431   :  { %4148 = vmatpush.msra.mxu3 %v4129_v44  ;;  %v2367_v44 = vadd.f32 %v7220_v7, %v9540_v54 }
 0x432   :  { %v2575_v21 = vpop.f32.mrf.mxu1  ;;  %v2573_v11 = vadd.f32 %v2572_v50, %v2364_v24 }
 0x433   :  { %v7434_v33 = vpop.f32.mrf.mxu0  ;;  %v2778_v59 = vpop.f32.mrf.mxu2 }
 0x434   :  { %v2779_v32 = vadd.f32 %v2778_v59, %v2570_v41  ;;  %v2987_v36 = vpop.f32.mrf.mxu3  ;;  %v9538_v59 = vld [vmem:[#allocation170_spill] sm:$0xff] }
 0x435   :  { %2622 = vmatmul.f32.gmra.mxu1 %v9534_v26 }
 0x436   :  { %v7437_v37 = vadd.f32 %v2987_v36, %v2779_v32  ;;  %3102 = vmatmul.f32.gmra.mxu0 %v5451_v60 }
 0x438   :  { %9535 = vst [vmem:[#allocation148_spill] sm:$0xff] %v7437_v37  ;;  %2828 = vmatmul.f32.gmra.mxu2 %v9537_v5  ;;  %4874 = vmatmul.msk.f32.gmra.mxu3 %vm5272_vm2, %v9472_v34  ;;  %v2576_v34 = vadd.f32 %v2575_v21, %v2367_v44 }
 0x43a   :  { %v2578_v35 = vpop.f32.mrf.mxu1 }
 0x43b   :  { %v7449_v36 = vpop.f32.mrf.mxu0  ;;  %v2781_v20 = vpop.f32.mrf.mxu2 }
 0x43c   :  { %v2782_v60 = vadd.f32 %v2781_v20, %v2573_v11  ;;  %v2990_v41 = vpop.f32.mrf.mxu3 }
 0x43d   :  { %2625 = vmatmul.f32.gmra.mxu1 %v9538_v59 }
 0x43e   :  { %v7452_v32 = vadd.f32 %v2990_v41, %v2782_v60  ;;  %3105 = vmatmul.f32.gmra.mxu0 %v5471_v14  ;;  %v9544_v14 = vld [vmem:[#allocation165_spill] sm:$0xff]  ;;  %v9545_v41 = vld [vmem:[#allocation171_spill] sm:$0xff] }
 0x43f   :  { %v2370_v7 = vadd.f32 %v7230_v43, %v9544_v14 }
 0x440   :  { %9539 = vst [vmem:[#allocation90_spill] sm:$0xff] %v7452_v32  ;;  %2831 = vmatmul.f32.gmra.mxu2 %v9541_v4  ;;  %3040 = vmatmul.f32.gmra.mxu3 %v9477_v39  ;;  %v3635_v39 = vld [vmem:[%s8832_s7 + $0x8] sm:$0xff] }
 0x441   :  { %3664 = vmatpush.msra.mxu2 %v3635_v39  ;;  %v2579_v21 = vadd.f32 %v2578_v35, %v2370_v7 }
 0x442   :  { %v2581_v50 = vpop.f32.mrf.mxu1 }
 0x443   :  { %v7459_v24 = vpop.f32.mrf.mxu0  ;;  %v2784_v37 = vpop.f32.mrf.mxu2 }
 0x444   :  { %v2785_v11 = vadd.f32 %v2784_v37, %v2576_v34  ;;  %v2993_v20 = vpop.f32.mrf.mxu3 }
 0x445   :  { %2628 = vmatmul.f32.gmra.mxu1 %v9542_v40 }
 0x446   :  { %v7462_v60 = vadd.f32 %v2993_v20, %v2785_v11  ;;  %3108 = vmatmul.f32.gmra.mxu0 %v5494_v38  ;;  %v9546_v11 = vld [vmem:[#allocation178_spill] sm:$0xff]  ;;  %v1602_v20 = vld [vmem:[#allocation2 + $0x408] sm:$0xff] }
 0x447   :  { %3303 = vmatpush.msra.mxu1 %v1602_v20 }
 0x448   :  { %9543 = vst [vmem:[#allocation94_spill] sm:$0xff] %v7462_v60  ;;  %2834 = vmatmul.f32.gmra.mxu2 %v9545_v41  ;;  %4876 = vmatmul.msk.f32.gmra.mxu3 %vm5272_vm2, %v9482_v55  ;;  %v9548_v55 = vld [vmem:[#allocation169_spill] sm:$0xff]  ;;  %v9549_v60 = vld [vmem:[#allocation175_spill] sm:$0xff] }
 0x449   :  { %v2373_v14 = vadd.f32 %v7247_v30, %v9548_v55  ;;  %v9552_v30 = vld [vmem:[#allocation173_spill] sm:$0xff] }
 0x44a   :  { %v2584_v37 = vpop.f32.mrf.mxu1 }
 0x44b   :  { %v7474_v54 = vpop.f32.mrf.mxu0  ;;  %v2787_v44 = vpop.f32.mrf.mxu2  ;;  %v2582_v35 = vadd.f32 %v2581_v50, %v2373_v14  ;;  %v9553_v50 = vld [vmem:[#allocation179_spill] sm:$0xff] }
 0x44c   :  { %v2788_v38 = vadd.f32 %v2787_v44, %v2579_v21  ;;  %v2996_v34 = vpop.f32.mrf.mxu3 }
 0x44d   :  { %2631 = vmatmul.f32.gmra.mxu1 %v9546_v11 }
 0x44e   :  { %v7477_v43 = vadd.f32 %v2996_v34, %v2788_v38  ;;  %3111 = vmatmul.f32.gmra.mxu0 %v5514_v56  ;;  %v9550_v38 = vld [vmem:[#allocation182_spill] sm:$0xff]  ;;  %v4128_v56 = vld [vmem:[%s8835_s10 + $0x28] sm:$0xff] }
 0x44f   :  { %4149 = vmatpush.msra.mxu3 %v4128_v56  ;;  %v9556_v56 = vld [vmem:[#allocation21_spill] sm:$0xff] }
 0x450   :  { %9547 = vst [vmem:[#allocation152_spill] sm:$0xff] %v7477_v43  ;;  %2837 = vmatmul.f32.gmra.mxu2 %v9549_v60  ;;  %3046 = vmatmul.f32.gmra.mxu3 %v9487_v16  ;;  %v2376_v16 = vadd.f32 %v7257_v13, %v9552_v30  ;;  %v9557_v13 = vld [vmem:[#allocation177_spill] sm:$0xff] }
 0x451   :  { %v2379_v30 = vadd.f32 %v7274_v22, %v9557_v13  ;;  %v9563_v13 = vld [vmem:[#allocation187_spill] sm:$0xff] }
 0x452   :  { %v2587_v7 = vpop.f32.mrf.mxu1  ;;  %v2585_v20 = vadd.f32 %v2584_v37, %v2376_v16 }
 0x453   :  { %v7484_v39 = vpop.f32.mrf.mxu0  ;;  %v2790_v21 = vpop.f32.mrf.mxu2 }
 0x454   :  { %v2791_v44 = vadd.f32 %v2790_v21, %v2582_v35  ;;  %v2999_v32 = vpop.f32.mrf.mxu3  ;;  %v9554_v21 = vld [vmem:[#allocation186_spill] sm:$0xff] }
 0x455   :  { %2634 = vmatmul.f32.gmra.mxu1 %v9550_v38 }
 0x456   :  { %v7487_v34 = vadd.f32 %v2999_v32, %v2791_v44  ;;  %3114 = vmatmul.f32.gmra.mxu0 %v9336_v28 }
 0x458   :  { %9551 = vst [vmem:[#allocation92_spill] sm:$0xff] %v7487_v34  ;;  %2840 = vmatmul.f32.gmra.mxu2 %v9553_v50  ;;  %4878 = vmatmul.msk.f32.gmra.mxu3 %vm5272_vm2, %v9492_v29  ;;  %v9558_v34 = vld [vmem:[#allocation183_spill] sm:$0xff]  ;;  %v2588_v29 = vadd.f32 %v2587_v7, %v2379_v30  ;;  %v9559_v50 = vld [vmem:[#allocation189_spill] sm:$0xff] }
 0x45a   :  { %v2590_v55 = vpop.f32.mrf.mxu1 }
 0x45b   :  { %v7499_v32 = vpop.f32.mrf.mxu0  ;;  %v2793_v14 = vpop.f32.mrf.mxu2 }
 0x45c   :  { %v2794_v28 = vadd.f32 %v2793_v14, %v2585_v20  ;;  %v3002_v35 = vpop.f32.mrf.mxu3 }
 0x45d   :  { %2637 = vmatmul.f32.gmra.mxu1 %v9554_v21 }
 0x45e   :  { %v7502_v44 = vadd.f32 %v3002_v35, %v2794_v28  ;;  %3117 = vmatmul.f32.gmra.mxu0 %v9556_v56  ;;  %v9561_v35 = vld [vmem:[#allocation23_spill] sm:$0xff]  ;;  %v9562_v56 = vld [vmem:[#allocation181_spill] sm:$0xff] }
 0x45f   :  { %v2382_v22 = vadd.f32 %v7284_v48, %v9562_v56  ;;  %v9566_v48 = vld [vmem:[#allocation25_spill] sm:$0xff] }
 0x460   :  { %9555 = vst [vmem:[#allocation98_spill] sm:$0xff] %v7502_v44  ;;  %2843 = vmatmul.f32.gmra.mxu2 %v9558_v34  ;;  %3052 = vmatmul.f32.gmra.mxu3 %v9497_v46  ;;  %v3634_v46 = vld [vmem:[%s8832_s7] sm:$0xff]  ;;  %v9567_v56 = vld [vmem:[#allocation185_spill] sm:$0xff]  ;;  %s4618_s7 = sshll.u32 %s8838_s13, 4  ;;  %s4619_s7 = int_to_ptr.hbm [resolvable:$true] %s4618_s7 }
 0x461   :  { %3665 = vmatpush.msra.mxu2 %v3634_v46 }
 0x462   :  { %v2593_v37 = vpop.f32.mrf.mxu1 }
 0x463   :  { %v7509_v16 = vpop.f32.mrf.mxu0  ;;  %v2796_v43 = vpop.f32.mrf.mxu2 }
 0x464   :  { %v2797_v20 = vadd.f32 %v2796_v43, %v2588_v29  ;;  %v3005_v14 = vpop.f32.mrf.mxu3  ;;  %v2591_v43 = vadd.f32 %v2590_v55, %v2382_v22 }
 0x465   :  { %2640 = vmatmul.f32.gmra.mxu1 %v9559_v50 }
 0x466   :  { %v7512_v28 = vadd.f32 %v3005_v14, %v2797_v20  ;;  %3120 = vmatmul.f32.gmra.mxu0 %v9561_v35  ;;  %v9565_v14 = vld [vmem:[#allocation193_spill] sm:$0xff]  ;;  %v1601_v35 = vld [vmem:[#allocation2 + $0x400] sm:$0xff] }
 0x467   :  { %3304 = vmatpush.msra.mxu1 %v1601_v35 }
 0x468   :  { %9560 = vst [vmem:[#allocation156_spill] sm:$0xff] %v7512_v28  ;;  %2846 = vmatmul.f32.gmra.mxu2 %v9563_v13  ;;  %4880 = vmatmul.msk.f32.gmra.mxu3 %vm5272_vm2, %v6645_v12  ;;  %v2385_v12 = vadd.f32 %v7301_v57, %v9567_v56  ;;  %v9568_v28 = vld [vmem:[#allocation190_spill] sm:$0xff]  ;;  %v9572_v57 = vld [vmem:[#allocation188_spill] sm:$0xff] }
 0x469   :  { %v2388_v35 = vadd.f32 %v7311_v18, %v9572_v57  ;;  %v9578_v57 = vld [vmem:[#allocation197_spill] sm:$0xff] }
 0x46a   :  { %v2596_v7 = vpop.f32.mrf.mxu1  ;;  %v2594_v55 = vadd.f32 %v2593_v37, %v2385_v12 }
 0x46b   :  { %v7524_v30 = vpop.f32.mrf.mxu0  ;;  %v2799_v29 = vpop.f32.mrf.mxu2 }
 0x46c   :  { %v7526_v20 = vadd.f32 %v2799_v29, %v2591_v43  ;;  %v9570_v29 = vld [vmem:[#allocation196_spill] sm:$0xff] }
 0x46d   :  { %2643 = vmatmul.f32.gmra.mxu1 %v9565_v14 }
 0x46e   :  { %9564 = vst [vmem:[#allocation96_spill] sm:$0xff] %v7526_v20  ;;  %3123 = vmatmul.f32.gmra.mxu0 %v9566_v48  ;;  %v9571_v20 = vld [vmem:[#allocation28_spill] sm:$0xff] }
 0x46f   :  { %v4127_v48 = vld [vmem:[%s8835_s10 + $0x20] sm:$0xff] }
 0x470   :  { %2849 = vmatmul.f32.gmra.mxu2 %v9568_v28  ;;  %3058 = vmatmul.f32.gmra.mxu3 %v9506_v19  ;;  %v9573_v19 = vld [vmem:[#allocation194_spill] sm:$0xff] }
 0x471   :  { %4150 = vmatpush.msra.mxu3 %v4127_v48  ;;  %v9577_v48 = vld [vmem:[#allocation192_spill] sm:$0xff] }
 0x472   :  { %v2599_v22 = vpop.f32.mrf.mxu1  ;;  %v2391_v18 = vadd.f32 %v7328_v6, %v9577_v48  ;;  %v9583_v48 = vld [vmem:[#allocation201_spill] sm:$0xff] }
 0x473   :  { %v7534_v46 = vpop.f32.mrf.mxu0  ;;  %v2802_v44 = vpop.f32.mrf.mxu2 }
 0x474   :  { %v7536_v43 = vadd.f32 %v2802_v44, %v2594_v55  ;;  %v2597_v44 = vadd.f32 %v2596_v7, %v2388_v35  ;;  %v9575_v55 = vld [vmem:[#allocation200_spill] sm:$0xff] }
 0x475   :  { %2646 = vmatmul.f32.gmra.mxu1 %v9570_v29 }
 0x476   :  { %9569 = vst [vmem:[#allocation160_spill] sm:$0xff] %v7536_v43  ;;  %3126 = vmatmul.f32.gmra.mxu0 %v9571_v20  ;;  %v9576_v43 = vld [vmem:[#allocation30_spill] sm:$0xff] }
 0x478   :  { %2852 = vmatmul.f32.gmra.mxu2 %v9573_v19  ;;  %4882 = vmatmul.msk.f32.gmra.mxu3 %vm5272_vm2, %v6691_v51  ;;  %v2600_v19 = vadd.f32 %v2599_v22, %v2391_v18  ;;  %v1451_v22 = vrot.slane %v7400_v61, 1 }
 0x47a   :  { %v2602_v37 = vpop.f32.mrf.mxu1 }
 0x47b   :  { %v7549_v56 = vpop.f32.mrf.mxu0  ;;  %v2805_v12 = vpop.f32.mrf.mxu2 }
 0x47c   :  { %v7551_v20 = vadd.f32 %v2805_v12, %v2597_v44  ;;  %v9580_v44 = vld [vmem:[#allocation203_spill] sm:$0xff]  ;;  %v909_v12 = vsel %vm680_vm1, 0.0, %v7375_v15 }
 0x47d   :  { %2649 = vmatmul.f32.gmra.mxu1 %v9575_v55  ;;  %v1464_v13 = vrot.slane %v909_v12, 2 }
 0x47e   :  { %9574 = vst [vmem:[#allocation100_spill] sm:$0xff] %v7551_v20  ;;  %3129 = vmatmul.f32.gmra.mxu0 %v9576_v43  ;;  %v9581_v43 = vld [vmem:[#allocation33_spill] sm:$0xff]  ;;  %v9582_v20 = vld [vmem:[#allocation195_spill] sm:$0xff] }
 0x47f   :  { %v2394_v6 = vadd.f32 %v7338_v47, %v9582_v20  ;;  %v942_v47 = vsel %vm680_vm1, %v7392_v45, 0.0  ;;  %v9585_v20 = vld [vmem:[#allocation37_spill] sm:$0xff]  ;;  %v1465_v45 = vrot.slane %v7400_v61, 2 }
 0x480   :  { %2855 = vmatmul.f32.gmra.mxu2 %v9578_v57  ;;  %3064 = vmatmul.f32.gmra.mxu3 %v9515_v62  ;;  %v1450_v62 = vrot.slane %v909_v12, 1  ;;  %v9591_v12 = vld [vmem:[#allocation202_spill] sm:$0xff] }
 0x482   :  { %v2605_v51 = vpop.f32.mrf.mxu1 }
 0x483   :  { %v7559_v7 = vpop.f32.mrf.mxu0  ;;  %v2808_v35 = vpop.f32.mrf.mxu2 }
 0x484   :  { %v7561_v28 = vadd.f32 %v2808_v35, %v2600_v19  ;;  %v2603_v19 = vadd.f32 %v2602_v37, %v2394_v6  ;;  %v9587_v37 = vld [vmem:[#allocation204_spill] sm:$0xff]  ;;  %v1453_v6 = vrot.slane %v942_v47, 1 }
 0x485   :  { %2652 = vmatmul.f32.gmra.mxu1 %v9580_v44 }
 0x486   :  { %9579 = vst [vmem:[#allocation164_spill] sm:$0xff] %v7561_v28  ;;  %3132 = vmatmul.f32.gmra.mxu0 %v9581_v43  ;;  %v7579_v43 = vsel %vm1005_vm3, %v1450_v62, %v1451_v22 }
 0x488   :  { %2858 = vmatmul.f32.gmra.mxu2 %v9583_v48  ;;  %4884 = vmatmul.msk.f32.gmra.mxu3 %vm5272_vm2, %v7375_v15  ;;  %v9586_v15 = vld [vmem:[#allocation199_spill] sm:$0xff] }
 0x489   :  { %v2397_v48 = vadd.f32 %v7359_v58, %v9586_v15  ;;  %v9589_v58 = vld [vmem:[#allocation41_spill] sm:$0xff] }
 0x48a   :  { %v2608_v18 = vpop.f32.mrf.mxu1 }
 0x48b   :  { %v7574_v35 = vpop.f32.mrf.mxu0  ;;  %v2811_v28 = vpop.f32.mrf.mxu2 }
 0x48c   :  { %v7576_v57 = vadd.f32 %v2811_v28, %v2603_v19  ;;  %v2606_v28 = vadd.f32 %v2605_v51, %v2397_v48  ;;  %v4126_v51 = vld [vmem:[%s8835_s10 + $0x18] sm:$0xff]  ;;  %v7603_v48 = vsel %vm1223_vm4, %v1464_v13, %v1465_v45  ;;  %v9593_v13 = vld [vmem:[#allocation13_spill] sm:$0xff] }
 0x48d   :  { %2655 = vmatmul.f32.gmra.mxu1 %v7579_v43  ;;  %9590 = vst [vmem:[#allocation108_spill] sm:$0xff] %v7603_v48  ;;  %4151 = vmatpush.msra.mxu3 %v4126_v51  ;;  %v9594_v51 = vld [vmem:[#allocation44_spill] sm:$0xff] }
 0x48e   :  { %9584 = vst [vmem:[#allocation104_spill] sm:$0xff] %v7576_v57  ;;  %3135 = vmatmul.f32.gmra.mxu0 %v9585_v20  ;;  %v7595_v20 = vsel %vm1005_vm3, %v1451_v22, %v1453_v6 }
 0x490   :  { %2861 = vmatmul.f32.gmra.mxu2 %v9587_v37  ;;  %3070 = vmatmul.f32.gmra.mxu3 %v7400_v61  ;;  %v2400_v61 = vadd.f32 %v7373_v0, %v9591_v12  ;;  %v9596_v12 = vld [vmem:[#allocation205_spill] sm:$0xff]  ;;  %v9674_v37 = vld [vmem:[#allocation32_spill] sm:$0xff] }
 0x492   :  { %v2611_v19 = vpop.f32.mrf.mxu1  ;;  %v2609_v22 = vadd.f32 %v2608_v18, %v2400_v61 }
 0x493   :  { %v7589_v57 = vpop.f32.mrf.mxu0  ;;  %v2814_v62 = vpop.f32.mrf.mxu2 }
 0x494   :  { %v7592_v34 = vadd.f32 %v2814_v62, %v2606_v28  ;;  %v1467_v62 = vrot.slane %v942_v47, 2 }
 0x495   :  { %2658 = vmatmul.f32.gmra.mxu1 %v7595_v20 }
 0x496   :  { %9588 = vst [vmem:[#allocation168_spill] sm:$0xff] %v7592_v34  ;;  %3138 = vmatmul.f32.gmra.mxu0 %v9589_v58  ;;  %v7618_v0 = vsel %vm1223_vm4, %v1465_v45, %v1467_v62  ;;  %v2403_v34 = vadd.f32 %v7394_v25, %v9596_v12  ;;  %v9600_v45 = vld [vmem:[#allocation206_spill] sm:$0xff]  ;;  %v4970_v25 = vld [vmem:[%s8825_s0] sm:$0xff] }
 0x497   :  { %9595 = vst [vmem:[#allocation112_spill] sm:$0xff] %v7618_v0  ;;  %v2406_v62 = vadd.f32 %v7409_v10, %v9600_v45 }
 0x498   :  { %2864 = vmatmul.f32.gmra.mxu2 %v7603_v48  ;;  %4886 = vmatmul.msk.f32.gmra.mxu3 %vm5272_vm2, %v9444_v3  ;;  %v2612_v2 = vadd.f32 %v2611_v19, %v2403_v34 }
 0x49a   :  { %v2614_v15 = vpop.f32.mrf.mxu1 }
 0x49b   :  { %v7611_v6 = vpop.f32.mrf.mxu0  ;;  %v2817_v28 = vpop.f32.mrf.mxu2 }
 0x49c   :  { %v7613_v58 = vadd.f32 %v2817_v28, %v2609_v22  ;;  %v9598_v28 = vld [vmem:[#allocation14_spill] sm:$0xff] }
 0x49d   :  { %3305 = vmatmul.f32.vlgmr.msra.gmra.mxu1 %v9593_v13  ;;  %v9599_v13 = vld [vmem:[#allocation47_spill] sm:$0xff] }
 0x49e   :  { %9592 = vst [vmem:[#allocation172_spill] sm:$0xff] %v7613_v58  ;;  %3141 = vmatmul.f32.gmra.mxu0 %v9594_v51 }
 0x4a0   :  { %2867 = vmatmul.f32.gmra.mxu2 %v7618_v0  ;;  %3076 = vmatmul.f32.gmra.mxu3 %v9444_v3  ;;  %v2615_v3 = vadd.f32 %v2614_v15, %v2406_v62 }
 0x4a2   :  { %v2617_v18 = vpop.f32.mrf.mxu1 }
 0x4a3   :  { %v2820_v61 = vpop.f32.mrf.mxu2  ;;  %v7624_v47 = vpop.f32.mrf.mxu0 }
 0x4a4   :  { %v7626_v22 = vadd.f32 %v2820_v61, %v2612_v2  ;;  %v9602_v2 = vld [vmem:[#allocation15_spill] sm:$0xff] }
 0x4a5   :  { %3308 = vmatmul.f32.gmra.mxu1 %v9598_v28  ;;  %v9603_v61 = vld [vmem:[#allocation207_spill] sm:$0xff]  ;;  %v4971_v28 = vld [vmem:[%s8825_s0 + $0x8] sm:$0xff] }
 0x4a6   :  { %9597 = vst [vmem:[#allocation125_spill] sm:$0xff] %v7626_v22  ;;  %3144 = vmatmul.f32.gmra.mxu0 %v9599_v13  ;;  %v2409_v10 = vadd.f32 %v7424_v9, %v9603_v61  ;;  %v9606_v9 = vld [vmem:[#allocation208_spill] sm:$0xff] }
 0x4a8   :  { %4887 = vmatmul.msk.f32.vlgmr.msra.gmra.mxu2 %vm125_vm0, %v4970_v25  ;;  %v2618_v15 = vadd.f32 %v2617_v18, %v2409_v10  ;;  %v4972_v18 = vld [vmem:[%s8825_s0 + $0x10] sm:$0xff] }
 0x4aa   :  { %v2620_v34 = vpop.f32.mrf.mxu1 }
 0x4ab   :  { %v2823_v19 = vpop.f32.mrf.mxu2  ;;  %v7636_v51 = vpop.f32.mrf.mxu0 }
 0x4ac   :  { %v7638_v12 = vadd.f32 %v2823_v19, %v2615_v3  ;;  %v9605_v3 = vld [vmem:[#allocation16_spill] sm:$0xff]  ;;  %v2412_v19 = vadd.f32 %v7434_v33, %v9606_v9 }
 0x4ad   :  { %3311 = vmatmul.f32.gmra.mxu1 %v9602_v2 }
 0x4ae   :  { %9601 = vst [vmem:[#allocation176_spill] sm:$0xff] %v7638_v12  ;;  %3147 = vmatmul.f32.gmra.mxu0 %v9382_v27  ;;  %v4125_v27 = vld [vmem:[%s8835_s10 + $0x10] sm:$0xff]  ;;  %v2621_v2 = vadd.f32 %v2620_v34, %v2412_v19 }
 0x4af   :  { %4152 = vmatpush.msra.mxu3 %v4125_v27  ;;  %v4973_v27 = vld [vmem:[%s8825_s0 + $0x18] sm:$0xff] }
 0x4b0   :  { %4888 = vmatmul.msk.f32.gmra.mxu2 %vm125_vm0, %v4971_v28 }
 0x4b2   :  { %v2623_v13 = vpop.f32.mrf.mxu1 }
 0x4b3   :  { %v2826_v45 = vpop.f32.mrf.mxu2  ;;  %v7648_v62 = vpop.f32.mrf.mxu0 }
 0x4b4   :  { %v7650_v25 = vadd.f32 %v2826_v45, %v2618_v15  ;;  %v9608_v15 = vld [vmem:[#allocation17_spill] sm:$0xff] }
 0x4b5   :  { %3314 = vmatmul.f32.gmra.mxu1 %v9605_v3  ;;  %v9609_v45 = vld [vmem:[#allocation57_spill] sm:$0xff] }
 0x4b6   :  { %9604 = vst [vmem:[#allocation116_spill] sm:$0xff] %v7650_v25  ;;  %3150 = vmatmul.f32.gmra.mxu0 %v9387_v49  ;;  %v9610_v3 = vld [vmem:[#allocation209_spill] sm:$0xff] }
 0x4b7   :  { %v2415_v33 = vadd.f32 %v7449_v36, %v9610_v3  ;;  %v4974_v3 = vld [vmem:[%s8825_s0 + $0x20] sm:$0xff] }
 0x4b8   :  { %4889 = vmatmul.msk.f32.gmra.mxu2 %vm125_vm0, %v4972_v18 }
 0x4b9   :  { %v2624_v34 = vadd.f32 %v2623_v13, %v2415_v33  ;;  %v7687_v13 = vpop.f32.mrf.mxu3 }
 0x4ba   :  { %v2626_v61 = vpop.f32.mrf.mxu1 }
 0x4bb   :  { %v2829_v10 = vpop.f32.mrf.mxu2  ;;  %v7663_v28 = vpop.f32.mrf.mxu0 }
 0x4bc   :  { %v7665_v49 = vadd.f32 %v2829_v10, %v2621_v2  ;;  %v9612_v10 = vld [vmem:[#allocation18_spill] sm:$0xff] }
 0x4bd   :  { %3317 = vmatmul.f32.gmra.mxu1 %v9608_v15  ;;  %v9613_v15 = vld [vmem:[#allocation61_spill] sm:$0xff] }
 0x4be   :  { %9607 = vst [vmem:[#allocation180_spill] sm:$0xff] %v7665_v49  ;;  %3153 = vmatmul.f32.gmra.mxu0 %v9609_v45  ;;  %v9614_v45 = vld [vmem:[#allocation210_spill] sm:$0xff] }
 0x4bf   :  { %v2418_v36 = vadd.f32 %v7459_v24, %v9614_v45  ;;  %v9618_v24 = vld [vmem:[#allocation211_spill] sm:$0xff] }
 0x4c0   :  { %4890 = vmatmul.msk.f32.gmra.mxu2 %vm125_vm0, %v4973_v27  ;;  %v2421_v45 = vadd.f32 %v7474_v54, %v9618_v24  ;;  %v4124_v54 = vld [vmem:[%s8835_s10 + $0x8] sm:$0xff] }
 0x4c1   :  { %v2627_v33 = vadd.f32 %v2626_v61, %v2418_v36  ;;  %4153 = vmatpush.msra.mxu3 %v4124_v54 }
 0x4c2   :  { %v2629_v9 = vpop.f32.mrf.mxu1 }
 0x4c3   :  { %v2832_v19 = vpop.f32.mrf.mxu2  ;;  %v7675_v18 = vpop.f32.mrf.mxu0  ;;  %v2630_v61 = vadd.f32 %v2629_v9, %v2421_v45 }
 0x4c4   :  { %v7677_v2 = vadd.f32 %v2832_v19, %v2624_v34 }
 0x4c5   :  { %3320 = vmatmul.f32.gmra.mxu1 %v9612_v10  ;;  %v9616_v10 = vld [vmem:[#allocation20_spill] sm:$0xff] }
 0x4c6   :  { %9611 = vst [vmem:[#allocation120_spill] sm:$0xff] %v7677_v2  ;;  %3156 = vmatmul.f32.gmra.mxu0 %v9613_v15  ;;  %v9617_v15 = vld [vmem:[#allocation65_spill] sm:$0xff] }
 0x4c8   :  { %4891 = vmatmul.msk.f32.gmra.mxu2 %vm125_vm0, %v4974_v3  ;;  %v4975_v3 = vld [vmem:[%s8825_s0 + $0x28] sm:$0xff] }
 0x4ca   :  { %v2632_v27 = vpop.f32.mrf.mxu1 }
 0x4cb   :  { %v2835_v49 = vpop.f32.mrf.mxu2  ;;  %v7689_v34 = vpop.f32.mrf.mxu0 }
 0x4cc   :  { %v7691_v19 = vadd.f32 %v2835_v49, %v2627_v33  ;;  %v7705_v33 = vpop.f32.mrf.mxu3 }
 0x4cd   :  { %3323 = vmatmul.f32.gmra.mxu1 %v9616_v10  ;;  %v9620_v10 = vld [vmem:[#allocation22_spill] sm:$0xff] }
 0x4ce   :  { %9615 = vst [vmem:[#allocation184_spill] sm:$0xff] %v7691_v19  ;;  %3159 = vmatmul.f32.gmra.mxu0 %v9617_v15  ;;  %v9621_v15 = vld [vmem:[#allocation55_spill] sm:$0xff] }
 0x4cf   :  { %v2424_v9 = vadd.f32 %v7484_v39, %v9621_v15  ;;  %v9626_v39 = vld [vmem:[#allocation19_spill] sm:$0xff] }
 0x4d0   :  { %4892 = vmatmul.msk.f32.gmra.mxu2 %vm125_vm0, %v4975_v3  ;;  %v2427_v15 = vadd.f32 %v7499_v32, %v9626_v39  ;;  %v4978_v32 = vld [vmem:[%s8825_s0 + $0x40] sm:$0xff] }
 0x4d1   :  { %v2633_v24 = vadd.f32 %v2632_v27, %v2424_v9 }
 0x4d2   :  { %v2635_v36 = vpop.f32.mrf.mxu1 }
 0x4d3   :  { %v2838_v2 = vpop.f32.mrf.mxu2  ;;  %v7703_v49 = vpop.f32.mrf.mxu0  ;;  %v2636_v27 = vadd.f32 %v2635_v36, %v2427_v15 }
 0x4d4   :  { %v7701_v25 = vadd.f32 %v2838_v2, %v2630_v61  ;;  %v4976_v2 = vld [vmem:[%s8825_s0 + $0x30] sm:$0xff]  ;;  %v7724_v54 = vpop.f32.mrf.mxu3 }
 0x4d5   :  { %3326 = vmatmul.f32.gmra.mxu1 %v9620_v10  ;;  %9625 = vst [vmem:[#allocation191_spill] sm:$0xff] %v7724_v54 }
 0x4d6   :  { %9619 = vst [vmem:[#allocation124_spill] sm:$0xff] %v7701_v25  ;;  %3162 = vmatmul.f32.gmra.mxu0 %v9407_v31  ;;  %v9623_v31 = vld [vmem:[#allocation24_spill] sm:$0xff]  ;;  %v9624_v25 = vld [vmem:[#allocation73_spill] sm:$0xff] }
 0x4d8   :  { %4893 = vmatmul.msk.f32.gmra.mxu2 %vm125_vm0, %v4976_v2  ;;  %v4977_v2 = vld [vmem:[%s8825_s0 + $0x38] sm:$0xff] }
 0x4da   :  { %v2638_v45 = vpop.f32.mrf.mxu1 }
 0x4db   :  { %v2841_v3 = vpop.f32.mrf.mxu2  ;;  %v7721_v10 = vpop.f32.mrf.mxu0 }
 0x4dc   :  { %v7718_v61 = vadd.f32 %v2841_v3, %v2633_v24  ;;  %v7744_v36 = vpop.f32.mrf.mxu3 }
 0x4dd   :  { %3329 = vmatmul.f32.gmra.mxu1 %v9623_v31  ;;  %v9628_v31 = vld [vmem:[#allocation26_spill] sm:$0xff]  ;;  %9631 = vst [vmem:[#allocation135_spill] sm:$0xff] %v7744_v36 }
 0x4de   :  { %9622 = vst [vmem:[#allocation127_spill] sm:$0xff] %v7718_v61  ;;  %3165 = vmatmul.f32.gmra.mxu0 %v9624_v25  ;;  %v9629_v61 = vld [vmem:[#allocation77_spill] sm:$0xff]  ;;  %v9630_v25 = vld [vmem:[#allocation59_spill] sm:$0xff] }
 0x4df   :  { %v2430_v19 = vadd.f32 %v7509_v16, %v9630_v25  ;;  %v9635_v16 = vld [vmem:[#allocation63_spill] sm:$0xff]  ;;  %v4979_v25 = vld [vmem:[%s8825_s0 + $0x48] sm:$0xff] }
 0x4e0   :  { %4894 = vmatmul.msk.f32.gmra.mxu2 %vm125_vm0, %v4977_v2 }
 0x4e1   :  { %v2639_v39 = vadd.f32 %v2638_v45, %v2430_v19 }
 0x4e2   :  { %v2641_v9 = vpop.f32.mrf.mxu1 }
 0x4e3   :  { %v2844_v24 = vpop.f32.mrf.mxu2  ;;  %v7738_v12 = vpop.f32.mrf.mxu0 }
 0x4e4   :  { %v7732_v3 = vadd.f32 %v2844_v24, %v2636_v27  ;;  %v9633_v24 = vld [vmem:[#allocation29_spill] sm:$0xff]  ;;  %v7758_v45 = vpop.f32.mrf.mxu3 }
 0x4e5   :  { %3332 = vmatmul.f32.gmra.mxu1 %v9628_v31  ;;  %v2433_v31 = vadd.f32 %v7524_v30, %v9635_v16  ;;  %9636 = vst [vmem:[#allocation138_spill] sm:$0xff] %v7758_v45  ;;  %v4123_v30 = vld [vmem:[%s8835_s10] sm:$0xff]  ;;  %v9640_v16 = vld [vmem:[#allocation67_spill] sm:$0xff]  ;;  %v9672_v45 = vld [vmem:[#allocation105_spill] sm:$0xff] }
 0x4e6   :  { %9627 = vst [vmem:[#allocation131_spill] sm:$0xff] %v7732_v3  ;;  %3168 = vmatmul.f32.gmra.mxu0 %v9629_v61  ;;  %v9634_v61 = vld [vmem:[#allocation80_spill] sm:$0xff]  ;;  %4154 = vmatpush.msra.mxu3 %v4123_v30  ;;  %v9644_v30 = vld [vmem:[#allocation87_spill] sm:$0xff] }
 0x4e8   :  { %4895 = vmatmul.msk.f32.gmra.mxu2 %vm125_vm0, %v4978_v32  ;;  %v2642_v32 = vadd.f32 %v2641_v9, %v2433_v31  ;;  %v2436_v9 = vadd.f32 %v7534_v46, %v9640_v16  ;;  %v4980_v31 = vld [vmem:[%s8825_s0 + $0x50] sm:$0xff]  ;;  %v9645_v46 = vld [vmem:[#allocation71_spill] sm:$0xff] }
 0x4e9   :  { %v2439_v16 = vadd.f32 %v7549_v56, %v9645_v46  ;;  %v9650_v56 = vld [vmem:[#allocation75_spill] sm:$0xff] }
 0x4ea   :  { %v2644_v15 = vpop.f32.mrf.mxu1  ;;  %v2442_v46 = vadd.f32 %v7559_v7, %v9650_v56  ;;  %v4983_v7 = vld [vmem:[%s8825_s0 + $0x68] sm:$0xff] }
 0x4eb   :  { %v2847_v2 = vpop.f32.mrf.mxu2  ;;  %v7756_v3 = vpop.f32.mrf.mxu0 }
 0x4ec   :  { %v7746_v27 = vadd.f32 %v2847_v2, %v2639_v39 }
 0x4ed   :  { %3335 = vmatmul.f32.gmra.mxu1 %v9633_v24  ;;  %v9638_v24 = vld [vmem:[#allocation31_spill] sm:$0xff] }
 0x4ee   :  { %9632 = vst [vmem:[#allocation198_spill] sm:$0xff] %v7746_v27  ;;  %3171 = vmatmul.f32.gmra.mxu0 %v9634_v61  ;;  %v9639_v61 = vld [vmem:[#allocation84_spill] sm:$0xff]  ;;  %v9643_v27 = vld [vmem:[#allocation34_spill] sm:$0xff] }
 0x4f0   :  { %4896 = vmatmul.msk.f32.gmra.mxu2 %vm125_vm0, %v4979_v25  ;;  %v2645_v25 = vadd.f32 %v2644_v15, %v2436_v9 }
 0x4f2   :  { %v2647_v19 = vpop.f32.mrf.mxu1 }
 0x4f3   :  { %v2850_v39 = vpop.f32.mrf.mxu2  ;;  %v2648_v15 = vadd.f32 %v2647_v19, %v2439_v16 }
 0x4f4   :  { %v7760_v2 = vadd.f32 %v2850_v39, %v2642_v32 }
 0x4f5   :  { %3338 = vmatmul.f32.gmra.mxu1 %v9638_v24  ;;  %v7773_v24 = vpop.f32.mrf.mxu0 }
 0x4f6   :  { %9637 = vst [vmem:[#allocation143_spill] sm:$0xff] %v7760_v2  ;;  %3174 = vmatmul.f32.gmra.mxu0 %v9639_v61  ;;  %v7777_v2 = vpop.f32.mrf.mxu3 }
 0x4f7   :  { %9642 = vst [vmem:[#allocation141_spill] sm:$0xff] %v7777_v2  ;;  %v9668_v2 = vld [vmem:[#allocation51_spill] sm:$0xff] }
 0x4f8   :  { %4897 = vmatmul.msk.f32.gmra.mxu2 %vm125_vm0, %v4980_v31  ;;  %v4981_v31 = vld [vmem:[%s8825_s0 + $0x58] sm:$0xff] }
 0x4fa   :  { %v2650_v32 = vpop.f32.mrf.mxu1 }
 0x4fb   :  { %v2853_v39 = vpop.f32.mrf.mxu2  ;;  %v2651_v19 = vadd.f32 %v2650_v32, %v2442_v46 }
 0x4fc   :  { %v7775_v61 = vadd.f32 %v2853_v39, %v2645_v25  ;;  %v9647_v39 = vld [vmem:[#allocation38_spill] sm:$0xff] }
 0x4fd   :  { %3341 = vmatmul.f32.gmra.mxu1 %v9643_v27  ;;  %v9648_v27 = vld [vmem:[#allocation103_spill] sm:$0xff] }
 0x4fe   :  { %9641 = vst [vmem:[#allocation150_spill] sm:$0xff] %v7775_v61  ;;  %3177 = vmatmul.f32.gmra.mxu0 %v9644_v30  ;;  %v7790_v61 = vpop.f32.mrf.mxu0  ;;  %v7793_v30 = vpop.f32.mrf.mxu3 }
 0x4ff   :  { %9649 = vst [vmem:[#allocation145_spill] sm:$0xff] %v7793_v30 }
 0x500   :  { %4898 = vmatmul.msk.f32.gmra.mxu2 %vm125_vm0, %v4981_v31  ;;  %v4982_v31 = vld [vmem:[%s8825_s0 + $0x60] sm:$0xff] }
 0x502   :  { %v2653_v9 = vpop.f32.mrf.mxu1 }
 0x503   :  { %v2856_v22 = vpop.f32.mrf.mxu2 }
 0x504   :  { %v7787_v25 = vadd.f32 %v2856_v22, %v2648_v15 }
 0x505   :  { %3344 = vmatmul.f32.gmra.mxu1 %v9647_v39  ;;  %v9652_v39 = vld [vmem:[#allocation42_spill] sm:$0xff] }
 0x506   :  { %9646 = vst [vmem:[#allocation154_spill] sm:$0xff] %v7787_v25  ;;  %3180 = vmatmul.f32.gmra.mxu0 %v9648_v27  ;;  %v9653_v25 = vld [vmem:[#allocation107_spill] sm:$0xff]  ;;  %v9654_v27 = vld [vmem:[#allocation82_spill] sm:$0xff]  ;;  %v7807_v58 = vpop.f32.mrf.mxu0  ;;  %v7813_v32 = vpop.f32.mrf.mxu3 }
 0x507   :  { %v2445_v30 = vadd.f32 %v7574_v35, %v9654_v27  ;;  %9655 = vst [vmem:[#allocation158_spill] sm:$0xff] %v7813_v32  ;;  %v9659_v35 = vld [vmem:[#allocation212_spill] sm:$0xff]  ;;  %v4984_v27 = vld [vmem:[%s8825_s0 + $0x70] sm:$0xff] }
 0x508   :  { %4899 = vmatmul.msk.f32.gmra.mxu2 %vm125_vm0, %v4982_v31 }
 0x509   :  { %v2654_v56 = vadd.f32 %v2653_v9, %v2445_v30 }
 0x50a   :  { %v2656_v22 = vpop.f32.mrf.mxu1 }
 0x50b   :  { %v2859_v16 = vpop.f32.mrf.mxu2 }
 0x50c   :  { %v7801_v15 = vadd.f32 %v2859_v16, %v2651_v19  ;;  %v9657_v16 = vld [vmem:[#allocation45_spill] sm:$0xff] }
 0x50d   :  { %3347 = vmatmul.f32.gmra.mxu1 %v9652_v39  ;;  %v2448_v39 = vadd.f32 %v7589_v57, %v9659_v35  ;;  %v9664_v57 = vld [vmem:[#allocation27_spill] sm:$0xff] }
 0x50e   :  { %9651 = vst [vmem:[#allocation151_spill] sm:$0xff] %v7801_v15  ;;  %3183 = vmatmul.f32.gmra.mxu0 %v9653_v25  ;;  %v9658_v25 = vld [vmem:[#allocation9_spill] sm:$0xff]  ;;  %v7825_v15 = vpop.f32.mrf.mxu0  ;;  %v7827_v30 = vpop.f32.mrf.mxu3  ;;  %v2451_v35 = vadd.f32 %v7611_v6, %v9664_v57  ;;  %v7851_v57 = vld [vmem:[%s8830_s5] ss:$0 sm:$0xff] }
 0x50f   :  { %9660 = vst [vmem:[#allocation162_spill] sm:$0xff] %v7827_v30  ;;  %v9665_v30 = vld [vmem:[#allocation36_spill] sm:$0xff] }
 0x510   :  { %4900 = vmatmul.msk.f32.gmra.mxu2 %vm125_vm0, %v4983_v7  ;;  %v2657_v7 = vadd.f32 %v2656_v22, %v2448_v39 }
 0x512   :  { %v2659_v46 = vpop.f32.mrf.mxu1 }
 0x513   :  { %v2862_v31 = vpop.f32.mrf.mxu2  ;;  %v2660_v22 = vadd.f32 %v2659_v46, %v2451_v35  ;;  %v9669_v46 = vld [vmem:[#allocation101_spill] sm:$0xff]  ;;  %v7872_v35 = vld [vmem:[%s8834_s9] ss:$0 sm:$0xff] }
 0x514   :  { %v7815_v19 = vadd.f32 %v2862_v31, %v2654_v56 }
 0x515   :  { %3350 = vmatmul.f32.gmra.mxu1 %v9657_v16  ;;  %v9662_v16 = vld [vmem:[#allocation48_spill] sm:$0xff] }
 0x516   :  { %9656 = vst [vmem:[#allocation149_spill] sm:$0xff] %v7815_v19  ;;  %3186 = vmatmul.f32.gmra.mxu0 %v9658_v25  ;;  %v9663_v19 = vld [vmem:[#allocation11_spill] sm:$0xff] }
 0x518   :  { %4901 = vmatmul.msk.f32.gmra.mxu2 %vm125_vm0, %v4984_v27  ;;  %v4985_v27 = vld [vmem:[%s8825_s0 + $0x78] sm:$0xff] }
 0x51a   :  { %v3306_v9 = vpop.f32.mrf.mxu1 }
 0x51b   :  { %v2865_v56 = vpop.f32.mrf.mxu2 }
 0x51c   :  { %v7829_v31 = vadd.f32 %v2865_v56, %v2657_v7  ;;  %v3098_v7 = vadd.f32 %v7624_v47, %v9665_v30  ;;  %v7841_v56 = vpop.f32.mrf.mxu0  ;;  %v4986_v47 = vld [vmem:[%s8825_s0 + $0x80] sm:$0xff] }
 0x51d   :  { %3353 = vmatmul.f32.gmra.mxu1 %v9662_v16 }
 0x51e   :  { %9661 = vst [vmem:[#allocation153_spill] sm:$0xff] %v7829_v31  ;;  %3189 = vmatmul.f32.gmra.mxu0 %v9663_v19  ;;  %v7845_v31 = vpop.f32.mrf.mxu3  ;;  %v3307_v6 = vadd.f32 %v3306_v9, %v3098_v7  ;;  %v7867_v9 = vld [vmem:[%s8831_s6] ss:$0 sm:$0xff] }
 0x51f   :  { %9667 = vst [vmem:[#allocation166_spill] sm:$0xff] %v7845_v31 }
 0x520   :  { %4902 = vmatmul.msk.f32.gmra.mxu2 %vm125_vm0, %v4985_v27 }
 0x522   :  { %v3309_v39 = vpop.f32.mrf.mxu1 }
 0x523   :  { %v2868_v32 = vpop.f32.mrf.mxu2 }
 0x524   :  { %v7843_v16 = vadd.f32 %v2868_v32, %v2660_v22  ;;  %v7861_v32 = vld [vmem:[%s8833_s8] ss:$0 sm:$0xff]  ;;  %v9670_v22 = vld [vmem:[#allocation35_spill] sm:$0xff] }
 0x525   :  { %3356 = vmatmul.f32.gmra.mxu1 %v9668_v2  ;;  %v3502_v2 = vmul.f32 %v7851_v57, %v3307_v6  ;;  %v3101_v7 = vadd.f32 %v7636_v51, %v9670_v22  ;;  %v4987_v51 = vld [vmem:[%s8825_s0 + $0x88] sm:$0xff] }
 0x526   :  { %9666 = vst [vmem:[#allocation159_spill] sm:$0xff] %v7843_v16  ;;  %3192 = vmatmul.f32.gmra.mxu0 %v9669_v46  ;;  %v7879_v16 = vpop.f32.mrf.mxu0  ;;  %v7883_v48 = vpop.f32.mrf.mxu3 }
 0x527   :  { %v3570_v6 = vadd.f32 %v7867_v9, %v3502_v2  ;;  %v3310_v31 = vadd.f32 %v3309_v39, %v3101_v7  ;;  %9673 = vst [vmem:[#allocation157_spill] sm:$0xff] %v7883_v48  ;;  %v3104_v39 = vadd.f32 %v7648_v62, %v9674_v37  ;;  %v9676_v48 = vld [vmem:[#allocation109_spill] sm:$0xff] }
 0x528   :  { %4903 = vmatmul.msk.f32.gmra.mxu2 %vm125_vm0, %v4986_v47  ;;  %v9671_v47 = vld [vmem:[#allocation54_spill] sm:$0xff] }
 0x52a   :  { %v3312_v30 = vpop.f32.mrf.mxu1 }
 0x52b   :  { %v3667_v27 = vpop.f32.mrf.mxu2 }
 0x52c   :  { %v3863_v46 = vmul.f32 %v7861_v32, %v3667_v27  ;;  %v3503_v27 = vmul.f32 %v7851_v57, %v3310_v31 }
 0x52d   :  { %3359 = vmatmul.f32.gmra.mxu1 %v9671_v47 }
 0x52e   :  { %v3931_v0 = vadd.f32 %v7872_v35, %v3863_v46  ;;  %3195 = vmatmul.f32.gmra.mxu0 %v9672_v45  ;;  %v9675_v45 = vld [vmem:[#allocation58_spill] sm:$0xff]  ;;  %v3313_v46 = vadd.f32 %v3312_v30, %v3104_v39  ;;  %v7903_v62 = vpop.f32.mrf.mxu3 }
 0x530   :  { %v3995_v36 = vadd.f32 %v3931_v0, %v3570_v6  ;;  %4904 = vmatmul.msk.f32.gmra.mxu2 %vm125_vm0, %v4987_v51  ;;  %v3571_v0 = vadd.f32 %v7867_v9, %v3503_v27  ;;  %v7897_v51 = vpop.f32.mrf.mxu0  ;;  %v3504_v31 = vmul.f32 %v7851_v57, %v3313_v46  ;;  %v4989_v46 = vld [vmem:[%s8825_s0 + $0x98] sm:$0xff] }
 0x532   :  { %v4059_v22 = vmax.f32 %v3995_v36, 0.0  ;;  %v3315_v2 = vpop.f32.mrf.mxu1  ;;  %v4988_v36 = vld [vmem:[%s8825_s0 + $0x90] sm:$0xff] }
 0x533   :  { %v3670_v47 = vpop.f32.mrf.mxu2 }
 0x534   :  { %v3864_v7 = vmul.f32 %v7861_v32, %v3670_v47  ;;  %4155 = vmatmul.f32.vlgmr.msra.gmra.mxu3 %v4059_v22  ;;  %v9677_v47 = vld [vmem:[#allocation40_spill] sm:$0xff] }
 0x535   :  { %3362 = vmatmul.f32.gmra.mxu1 %v9675_v45  ;;  %v3107_v39 = vadd.f32 %v7663_v28, %v9677_v47  ;;  %v3572_v45 = vadd.f32 %v7867_v9, %v3504_v31  ;;  %v9681_v31 = vld [vmem:[#allocation39_spill] sm:$0xff] }
 0x536   :  { %v3932_v6 = vadd.f32 %v7872_v35, %v3864_v7  ;;  %3198 = vmatmul.f32.gmra.mxu0 %v9676_v48  ;;  %v9678_v7 = vld [vmem:[#allocation62_spill] sm:$0xff]  ;;  %v7920_v47 = vpop.f32.mrf.mxu3 }
 0x537   :  { %v3316_v54 = vadd.f32 %v3315_v2, %v3107_v39  ;;  %9680 = vst [vmem:[#allocation163_spill] sm:$0xff] %v7920_v47  ;;  %v3110_v39 = vadd.f32 %v7675_v18, %v9681_v31 }
 0x538   :  { %4905 = vmatmul.msk.f32.gmra.mxu2 %vm125_vm0, %v4988_v36  ;;  %v3996_v37 = vadd.f32 %v3932_v6, %v3571_v0  ;;  %v9679_v6 = vld [vmem:[#allocation113_spill] sm:$0xff]  ;;  %v7917_v28 = vpop.f32.mrf.mxu0 }
 0x53a   :  { %v3318_v22 = vpop.f32.mrf.mxu1  ;;  %v4060_v27 = vmax.f32 %v3996_v37, 0.0  ;;  %v3505_v37 = vmul.f32 %v7851_v57, %v3316_v54  ;;  %v4990_v54 = vld [vmem:[%s8825_s0 + $0xa0] sm:$0xff] }
 0x53b   :  { %v3673_v30 = vpop.f32.mrf.mxu2 }
 0x53c   :  { %v3865_v48 = vmul.f32 %v7861_v32, %v3673_v30  ;;  %4158 = vmatmul.f32.gmra.mxu3 %v4060_v27 }
 0x53d   :  { %3365 = vmatmul.f32.gmra.mxu1 %v9678_v7  ;;  %v9682_v7 = vld [vmem:[#allocation66_spill] sm:$0xff] }
 0x53e   :  { %v3933_v0 = vadd.f32 %v7872_v35, %v3865_v48  ;;  %3201 = vmatmul.f32.gmra.mxu0 %v9679_v6  ;;  %v3573_v6 = vadd.f32 %v7867_v9, %v3505_v37 }
 0x540   :  { %4906 = vmatmul.msk.f32.gmra.mxu2 %vm125_vm0, %v4989_v46  ;;  %v3997_v36 = vadd.f32 %v3933_v0, %v3572_v45  ;;  %v3319_v45 = vadd.f32 %v3318_v22, %v3110_v39  ;;  %v9683_v46 = vld [vmem:[#allocation117_spill] sm:$0xff]  ;;  %v7936_v22 = vpop.f32.mrf.mxu0 }
 0x542   :  { %v3321_v27 = vpop.f32.mrf.mxu1  ;;  %v4061_v30 = vmax.f32 %v3997_v36, 0.0  ;;  %v3506_v18 = vmul.f32 %v7851_v57, %v3319_v45 }
 0x543   :  { %v3676_v2 = vpop.f32.mrf.mxu2 }
 0x544   :  { %v3866_v48 = vmul.f32 %v7861_v32, %v3676_v2  ;;  %4161 = vmatmul.f32.gmra.mxu3 %v4061_v30 }
 0x545   :  { %3368 = vmatmul.f32.gmra.mxu1 %v9682_v7  ;;  %v9684_v7 = vld [vmem:[#allocation91_spill] sm:$0xff] }
 0x546   :  { %v3934_v0 = vadd.f32 %v7872_v35, %v3866_v48  ;;  %3204 = vmatmul.f32.gmra.mxu0 %v9683_v46  ;;  %v3113_v37 = vadd.f32 %v7689_v34, %v9684_v7  ;;  %v7939_v48 = vpop.f32.mrf.mxu3  ;;  %v9686_v46 = vld [vmem:[#allocation70_spill] sm:$0xff]  ;;  %v4991_v34 = vld [vmem:[%s8825_s0 + $0xa8] sm:$0xff] }
 0x547   :  { %9685 = vst [vmem:[#allocation170_spill] sm:$0xff] %v7939_v48 }
 0x548   :  { %4907 = vmatmul.msk.f32.gmra.mxu2 %vm125_vm0, %v4990_v54  ;;  %v3998_v36 = vadd.f32 %v3934_v0, %v3573_v6  ;;  %v3574_v54 = vadd.f32 %v7867_v9, %v3506_v18  ;;  %v3322_v6 = vadd.f32 %v3321_v27, %v3113_v37  ;;  %v9687_v0 = vld [vmem:[#allocation121_spill] sm:$0xff]  ;;  %v9689_v37 = vld [vmem:[#allocation74_spill] sm:$0xff] }
 0x54a   :  { %v3324_v2 = vpop.f32.mrf.mxu1  ;;  %v4062_v30 = vmax.f32 %v3998_v36, 0.0 }
 0x54b   :  { %v3679_v31 = vpop.f32.mrf.mxu2 }
 0x54c   :  { %v3867_v39 = vmul.f32 %v7861_v32, %v3679_v31  ;;  %4164 = vmatmul.f32.gmra.mxu3 %v4062_v30  ;;  %v3507_v30 = vmul.f32 %v7851_v57, %v3322_v6 }
 0x54d   :  { %3371 = vmatmul.f32.gmra.mxu1 %v9686_v46  ;;  %v9688_v46 = vld [vmem:[#allocation50_spill] sm:$0xff] }
 0x54e   :  { %v3935_v45 = vadd.f32 %v7872_v35, %v3867_v39  ;;  %3207 = vmatmul.f32.gmra.mxu0 %v9687_v0  ;;  %v3116_v18 = vadd.f32 %v7703_v49, %v9688_v46  ;;  %v7954_v39 = vpop.f32.mrf.mxu0  ;;  %v3575_v0 = vadd.f32 %v7867_v9, %v3507_v30  ;;  %v7959_v6 = vpop.f32.mrf.mxu3  ;;  %v4992_v49 = vld [vmem:[%s8825_s0 + $0xb0] sm:$0xff]  ;;  %v9690_v30 = vld [vmem:[#allocation95_spill] sm:$0xff] }
 0x550   :  { %4908 = vmatmul.msk.f32.gmra.mxu2 %vm125_vm0, %v4991_v34  ;;  %v3999_v36 = vadd.f32 %v3935_v45, %v3574_v54  ;;  %v3325_v47 = vadd.f32 %v3324_v2, %v3116_v18  ;;  %v3119_v2 = vadd.f32 %v7721_v10, %v9690_v30 }
 0x552   :  { %v3327_v31 = vpop.f32.mrf.mxu1  ;;  %v4063_v7 = vmax.f32 %v3999_v36, 0.0  ;;  %v3508_v45 = vmul.f32 %v7851_v57, %v3325_v47  ;;  %v4993_v47 = vld [vmem:[%s8825_s0 + $0xb8] sm:$0xff] }
 0x553   :  { %v3682_v48 = vpop.f32.mrf.mxu2 }
 0x554   :  { %v3868_v27 = vmul.f32 %v7861_v32, %v3682_v48  ;;  %4167 = vmatmul.f32.gmra.mxu3 %v4063_v7  ;;  %v3576_v18 = vadd.f32 %v7867_v9, %v3508_v45 }
 0x555   :  { %3374 = vmatmul.f32.gmra.mxu1 %v9689_v37 }
 0x556   :  { %v3936_v54 = vadd.f32 %v7872_v35, %v3868_v27  ;;  %3210 = vmatmul.f32.gmra.mxu0 %v9485_v52  ;;  %v9691_v52 = vld [vmem:[#allocation78_spill] sm:$0xff]  ;;  %v3328_v27 = vadd.f32 %v3327_v31, %v3119_v2 }
 0x558   :  { %4909 = vmatmul.msk.f32.gmra.mxu2 %vm125_vm0, %v4992_v49  ;;  %v4000_v48 = vadd.f32 %v3936_v54, %v3575_v0  ;;  %v9692_v49 = vld [vmem:[#allocation128_spill] sm:$0xff]  ;;  %v7973_v0 = vpop.f32.mrf.mxu0  ;;  %v7979_v54 = vpop.f32.mrf.mxu3 }
 0x55a   :  { %v3330_v34 = vpop.f32.mrf.mxu1  ;;  %v4064_v36 = vmax.f32 %v4000_v48, 0.0  ;;  %v3509_v48 = vmul.f32 %v7851_v57, %v3328_v27  ;;  %v4994_v27 = vld [vmem:[%s8825_s0 + $0xc0] sm:$0xff] }
 0x55b   :  { %v3685_v7 = vpop.f32.mrf.mxu2 }
 0x55c   :  { %v3869_v46 = vmul.f32 %v7861_v32, %v3685_v7  ;;  %4170 = vmatmul.f32.gmra.mxu3 %v4064_v36  ;;  %v9693_v7 = vld [vmem:[#allocation43_spill] sm:$0xff] }
 0x55d   :  { %3377 = vmatmul.f32.gmra.mxu1 %v9691_v52  ;;  %v3122_v30 = vadd.f32 %v7738_v12, %v9693_v7  ;;  %v3577_v52 = vadd.f32 %v7867_v9, %v3509_v48  ;;  %v9697_v48 = vld [vmem:[#allocation53_spill] sm:$0xff] }
 0x55e   :  { %v3937_v37 = vadd.f32 %v7872_v35, %v3869_v46  ;;  %3213 = vmatmul.f32.gmra.mxu0 %v9692_v49  ;;  %v9694_v46 = vld [vmem:[#allocation81_spill] sm:$0xff] }
 0x55f   :  { %v3331_v49 = vadd.f32 %v3330_v34, %v3122_v30  ;;  %v3125_v30 = vadd.f32 %v7756_v3, %v9697_v48 }
 0x560   :  { %4910 = vmatmul.msk.f32.gmra.mxu2 %vm125_vm0, %v4993_v47  ;;  %v4001_v10 = vadd.f32 %v3937_v37, %v3576_v18  ;;  %v9695_v37 = vld [vmem:[#allocation132_spill] sm:$0xff]  ;;  %v7993_v12 = vpop.f32.mrf.mxu0  ;;  %v7996_v7 = vpop.f32.mrf.mxu3 }
 0x561   :  { %9696 = vst [vmem:[#allocation161_spill] sm:$0xff] %v7996_v7 }
 0x562   :  { %v3333_v36 = vpop.f32.mrf.mxu1  ;;  %v4065_v45 = vmax.f32 %v4001_v10, 0.0  ;;  %v3510_v10 = vmul.f32 %v7851_v57, %v3331_v49  ;;  %v4995_v49 = vld [vmem:[%s8825_s0 + $0xc8] sm:$0xff] }
 0x563   :  { %v3688_v31 = vpop.f32.mrf.mxu2 }
 0x564   :  { %v3870_v2 = vmul.f32 %v7861_v32, %v3688_v31  ;;  %4173 = vmatmul.f32.gmra.mxu3 %v4065_v45 }
 0x565   :  { %3380 = vmatmul.f32.gmra.mxu1 %v9694_v46  ;;  %v9698_v46 = vld [vmem:[#allocation85_spill] sm:$0xff] }
 0x566   :  { %v3938_v18 = vadd.f32 %v7872_v35, %v3870_v2  ;;  %3216 = vmatmul.f32.gmra.mxu0 %v9695_v37  ;;  %v3578_v37 = vadd.f32 %v7867_v9, %v3510_v10 }
 0x568   :  { %4911 = vmatmul.msk.f32.gmra.mxu2 %vm125_vm0, %v4994_v27  ;;  %v4002_v47 = vadd.f32 %v3938_v18, %v3577_v52  ;;  %v3334_v52 = vadd.f32 %v3333_v36, %v3125_v30  ;;  %v9699_v27 = vld [vmem:[#allocation136_spill] sm:$0xff]  ;;  %v8012_v36 = vpop.f32.mrf.mxu0 }
 0x56a   :  { %v3336_v45 = vpop.f32.mrf.mxu1  ;;  %v4066_v31 = vmax.f32 %v4002_v47, 0.0  ;;  %v3511_v3 = vmul.f32 %v7851_v57, %v3334_v52 }
 0x56b   :  { %v3691_v34 = vpop.f32.mrf.mxu2 }
 0x56c   :  { %v3871_v2 = vmul.f32 %v7861_v32, %v3691_v34  ;;  %4176 = vmatmul.f32.gmra.mxu3 %v4066_v31 }
 0x56d   :  { %3383 = vmatmul.f32.gmra.mxu1 %v9698_v46  ;;  %v9700_v46 = vld [vmem:[#allocation99_spill] sm:$0xff] }
 0x56e   :  { %v3939_v18 = vadd.f32 %v7872_v35, %v3871_v2  ;;  %3219 = vmatmul.f32.gmra.mxu0 %v9699_v27  ;;  %v3128_v10 = vadd.f32 %v7773_v24, %v9700_v46  ;;  %v8015_v2 = vpop.f32.mrf.mxu3  ;;  %v9702_v27 = vld [vmem:[#allocation88_spill] sm:$0xff]  ;;  %v4996_v24 = vld [vmem:[%s8825_s0 + $0xd0] sm:$0xff] }
 0x56f   :  { %9701 = vst [vmem:[#allocation167_spill] sm:$0xff] %v8015_v2 }
 0x570   :  { %4912 = vmatmul.msk.f32.gmra.mxu2 %vm125_vm0, %v4995_v49  ;;  %v4003_v47 = vadd.f32 %v3939_v18, %v3578_v37  ;;  %v3579_v49 = vadd.f32 %v7867_v9, %v3511_v3  ;;  %v3337_v37 = vadd.f32 %v3336_v45, %v3128_v10  ;;  %v9703_v18 = vld [vmem:[#allocation139_spill] sm:$0xff] }
 0x571   :  { %v9705_v10 = vld [vmem:[#allocation111_spill] sm:$0xff] }
 0x572   :  { %v3339_v34 = vpop.f32.mrf.mxu1  ;;  %v4067_v31 = vmax.f32 %v4003_v47, 0.0 }
 0x573   :  { %v3694_v48 = vpop.f32.mrf.mxu2 }
 0x574   :  { %v3872_v30 = vmul.f32 %v7861_v32, %v3694_v48  ;;  %4179 = vmatmul.f32.gmra.mxu3 %v4067_v31  ;;  %v3512_v31 = vmul.f32 %v7851_v57, %v3337_v37 }
 0x575   :  { %3386 = vmatmul.f32.gmra.mxu1 %v9702_v27  ;;  %v9704_v27 = vld [vmem:[#allocation46_spill] sm:$0xff] }
 0x576   :  { %v3940_v52 = vadd.f32 %v7872_v35, %v3872_v30  ;;  %3222 = vmatmul.f32.gmra.mxu0 %v9703_v18  ;;  %v3131_v3 = vadd.f32 %v7790_v61, %v9704_v27  ;;  %v8030_v30 = vpop.f32.mrf.mxu0  ;;  %v3580_v18 = vadd.f32 %v7867_v9, %v3512_v31  ;;  %v8035_v37 = vpop.f32.mrf.mxu3  ;;  %v4997_v61 = vld [vmem:[%s8825_s0 + $0xd8] sm:$0xff]  ;;  %v9708_v31 = vld [vmem:[#allocation49_spill] sm:$0xff] }
 0x577   :  { %9707 = vst [vmem:[#allocation174_spill] sm:$0xff] %v8035_v37 }
 0x578   :  { %4913 = vmatmul.msk.f32.gmra.mxu2 %vm125_vm0, %v4996_v24  ;;  %v4004_v47 = vadd.f32 %v3940_v52, %v3579_v49  ;;  %v3340_v7 = vadd.f32 %v3339_v34, %v3131_v3  ;;  %v9706_v52 = vld [vmem:[#allocation142_spill] sm:$0xff]  ;;  %v3134_v34 = vadd.f32 %v7807_v58, %v9708_v31 }
 0x57a   :  { %v3342_v48 = vpop.f32.mrf.mxu1  ;;  %v4068_v46 = vmax.f32 %v4004_v47, 0.0  ;;  %v3513_v24 = vmul.f32 %v7851_v57, %v3340_v7  ;;  %v4998_v7 = vld [vmem:[%s8825_s0 + $0xe0] sm:$0xff] }
 0x57b   :  { %v3697_v2 = vpop.f32.mrf.mxu2 }
 0x57c   :  { %v3873_v45 = vmul.f32 %v7861_v32, %v3697_v2  ;;  %4182 = vmatmul.f32.gmra.mxu3 %v4068_v46 }
 0x57d   :  { %3389 = vmatmul.f32.gmra.mxu1 %v9705_v10  ;;  %v3581_v10 = vadd.f32 %v7867_v9, %v3513_v24 }
 0x57e   :  { %v3941_v49 = vadd.f32 %v7872_v35, %v3873_v45  ;;  %3225 = vmatmul.f32.gmra.mxu0 %v9706_v52  ;;  %v9709_v45 = vld [vmem:[#allocation69_spill] sm:$0xff]  ;;  %v3343_v52 = vadd.f32 %v3342_v48, %v3134_v34 }
 0x580   :  { %4914 = vmatmul.msk.f32.gmra.mxu2 %vm125_vm0, %v4997_v61  ;;  %v4005_v2 = vadd.f32 %v3941_v49, %v3580_v18  ;;  %v9710_v61 = vld [vmem:[#allocation146_spill] sm:$0xff]  ;;  %v8049_v18 = vpop.f32.mrf.mxu0  ;;  %v8055_v49 = vpop.f32.mrf.mxu3 }
 0x582   :  { %v3345_v47 = vpop.f32.mrf.mxu1  ;;  %v4069_v46 = vmax.f32 %v4005_v2, 0.0  ;;  %v3514_v2 = vmul.f32 %v7851_v57, %v3343_v52 }
 0x583   :  { %v3700_v27 = vpop.f32.mrf.mxu2 }
 0x584   :  { %v3874_v3 = vmul.f32 %v7861_v32, %v3700_v27  ;;  %4185 = vmatmul.f32.gmra.mxu3 %v4069_v46  ;;  %v9711_v27 = vld [vmem:[#allocation52_spill] sm:$0xff] }
 0x585   :  { %3392 = vmatmul.f32.gmra.mxu1 %v9709_v45  ;;  %v3137_v31 = vadd.f32 %v7825_v15, %v9711_v27  ;;  %v3582_v45 = vadd.f32 %v7867_v9, %v3514_v2  ;;  %v9713_v2 = vld [vmem:[#allocation56_spill] sm:$0xff] }
 0x586   :  { %v3942_v37 = vadd.f32 %v7872_v35, %v3874_v3  ;;  %3228 = vmatmul.f32.gmra.mxu0 %v9710_v61  ;;  %v9712_v3 = vld [vmem:[#allocation10_spill] sm:$0xff]  ;;  %v3140_v27 = vadd.f32 %v7841_v56, %v9713_v2  ;;  %v9715_v2 = vld [vmem:[#allocation115_spill] sm:$0xff] }
 0x587   :  { %v3346_v61 = vadd.f32 %v3345_v47, %v3137_v31  ;;  %v9714_v31 = vld [vmem:[#allocation12_spill] sm:$0xff] }
 0x588   :  { %4915 = vmatmul.msk.f32.gmra.mxu2 %vm125_vm0, %v4998_v7  ;;  %v4006_v58 = vadd.f32 %v3942_v37, %v3581_v10  ;;  %v4999_v10 = vld [vmem:[%s8825_s0 + $0xe8] sm:$0xff]  ;;  %v8069_v15 = vpop.f32.mrf.mxu0 }
 0x589   :  { %v3515_v7 = vmul.f32 %v7851_v57, %v3346_v61  ;;  %v5000_v61 = vld [vmem:[%s8825_s0 + $0xf0] sm:$0xff] }
 0x58a   :  { %v3348_v46 = vpop.f32.mrf.mxu1  ;;  %v4070_v24 = vmax.f32 %v4006_v58, 0.0 }
 0x58b   :  { %v3703_v48 = vpop.f32.mrf.mxu2 }
 0x58c   :  { %v3875_v34 = vmul.f32 %v7861_v32, %v3703_v48  ;;  %4188 = vmatmul.f32.gmra.mxu3 %v4070_v24  ;;  %v8072_v48 = vpop.f32.mrf.mxu3 }
 0x58d   :  { %3395 = vmatmul.f32.gmra.mxu1 %v9712_v3 }
 0x58e   :  { %v3943_v37 = vadd.f32 %v7872_v35, %v3875_v34  ;;  %3231 = vmatmul.f32.gmra.mxu0 %v9518_v23  ;;  %v3583_v34 = vadd.f32 %v7867_v9, %v3515_v7  ;;  %v3143_v7 = vadd.f32 %v7879_v16, %v9715_v2  ;;  %v5001_v16 = vld [vmem:[%s8825_s0 + $0xf8] sm:$0xff] }
 0x590   :  { %4916 = vmatmul.msk.f32.gmra.mxu2 %vm125_vm0, %v4999_v10  ;;  %v4007_v52 = vadd.f32 %v3943_v37, %v3582_v45  ;;  %v3349_v45 = vadd.f32 %v3348_v46, %v3140_v27  ;;  %v8088_v46 = vpop.f32.mrf.mxu0 }
 0x592   :  { %v3351_v58 = vpop.f32.mrf.mxu1  ;;  %v4071_v24 = vmax.f32 %v4007_v52, 0.0  ;;  %v3516_v56 = vmul.f32 %v7851_v57, %v3349_v45 }
 0x593   :  { %v3706_v47 = vpop.f32.mrf.mxu2 }
 0x594   :  { %v3876_v23 = vmul.f32 %v7861_v32, %v3706_v47  ;;  %4191 = vmatmul.f32.gmra.mxu3 %v4071_v24 }
 0x595   :  { %3398 = vmatmul.f32.gmra.mxu1 %v9714_v31 }
 0x596   :  { %v3944_v37 = vadd.f32 %v7872_v35, %v3876_v23  ;;  %3234 = vmatmul.f32.gmra.mxu0 %v9522_v1  ;;  %v8091_v1 = vpop.f32.mrf.mxu3  ;;  %v9716_v23 = vld [vmem:[#allocation102_spill] sm:$0xff] }
 0x598   :  { %4917 = vmatmul.msk.f32.gmra.mxu2 %vm125_vm0, %v5000_v61  ;;  %v4008_v10 = vadd.f32 %v3944_v37, %v3583_v34  ;;  %v3584_v61 = vadd.f32 %v7867_v9, %v3516_v56  ;;  %v3352_v34 = vadd.f32 %v3351_v58, %v3143_v7 }
 0x59a   :  { %v3354_v52 = vpop.f32.mrf.mxu1  ;;  %v4072_v24 = vmax.f32 %v4008_v10, 0.0  ;;  %v3517_v10 = vmul.f32 %v7851_v57, %v3352_v34 }
 0x59b   :  { %v3709_v47 = vpop.f32.mrf.mxu2 }
 0x59c   :  { %v3877_v27 = vmul.f32 %v7861_v32, %v3709_v47  ;;  %4194 = vmatmul.f32.gmra.mxu3 %v4072_v24 }
 0x59d   :  { %3401 = vmatmul.f32.gmra.mxu1 %v9716_v23  ;;  %v9717_v23 = vld [vmem:[#allocation60_spill] sm:$0xff] }
 0x59e   :  { %v3945_v45 = vadd.f32 %v7872_v35, %v3877_v27  ;;  %3237 = vmatmul.f32.gmra.mxu0 %v9526_v63  ;;  %v3146_v56 = vadd.f32 %v7897_v51, %v9717_v23  ;;  %v8105_v7 = vpop.f32.mrf.mxu3  ;;  %v9719_v63 = vld [vmem:[#allocation106_spill] sm:$0xff]  ;;  %v8108_v27 = vpop.f32.mrf.mxu0  ;;  %v5002_v51 = vld [vmem:[%s8825_s0 + $0x100] sm:$0xff] }
 0x59f   :  { %9718 = vst [vmem:[#allocation165_spill] sm:$0xff] %v8105_v7 }
 0x5a0   :  { %4918 = vmatmul.msk.f32.gmra.mxu2 %vm125_vm0, %v5001_v16  ;;  %v4009_v37 = vadd.f32 %v3945_v45, %v3584_v61  ;;  %v3585_v16 = vadd.f32 %v7867_v9, %v3517_v10  ;;  %v3355_v61 = vadd.f32 %v3354_v52, %v3146_v56  ;;  %v9721_v56 = vld [vmem:[#allocation110_spill] sm:$0xff] }
 0x5a2   :  { %v3357_v24 = vpop.f32.mrf.mxu1  ;;  %v4073_v47 = vmax.f32 %v4009_v37, 0.0  ;;  %v3518_v37 = vmul.f32 %v7851_v57, %v3355_v61 }
 0x5a3   :  { %v3712_v2 = vpop.f32.mrf.mxu2 }
 0x5a4   :  { %v3878_v58 = vmul.f32 %v7861_v32, %v3712_v2  ;;  %4197 = vmatmul.f32.gmra.mxu3 %v4073_v47 }
 0x5a5   :  { %3404 = vmatmul.f32.gmra.mxu1 %v9719_v63  ;;  %v9720_v63 = vld [vmem:[#allocation119_spill] sm:$0xff] }
 0x5a6   :  { %v3946_v34 = vadd.f32 %v7872_v35, %v3878_v58  ;;  %3240 = vmatmul.f32.gmra.mxu0 %v9530_v53  ;;  %v3149_v10 = vadd.f32 %v7917_v28, %v9720_v63  ;;  %v3586_v53 = vadd.f32 %v7867_v9, %v3518_v37  ;;  %v8127_v61 = vpop.f32.mrf.mxu0  ;;  %v5003_v28 = vld [vmem:[%s8825_s0 + $0x108] sm:$0xff]  ;;  %v8140_v63 = vld [vmem:[%s8836_s11] ss:$0 sm:$0xff] }
 0x5a8   :  { %4919 = vmatmul.msk.f32.gmra.mxu2 %vm125_vm0, %v5002_v51  ;;  %v4010_v45 = vadd.f32 %v3946_v34, %v3585_v16  ;;  %v3358_v58 = vadd.f32 %v3357_v24, %v3149_v10  ;;  %v8125_v16 = vpop.f32.mrf.mxu3  ;;  %v9724_v10 = vld [vmem:[#allocation114_spill] sm:$0xff] }
 0x5a9   :  { %9722 = vst [vmem:[#allocation171_spill] sm:$0xff] %v8125_v16  ;;  %v9726_v16 = vld [vmem:[#allocation118_spill] sm:$0xff] }
 0x5aa   :  { %v3360_v47 = vpop.f32.mrf.mxu1  ;;  %v4074_v2 = vmax.f32 %v4010_v45, 0.0  ;;  %v3519_v51 = vmul.f32 %v7851_v57, %v3358_v58 }
 0x5ab   :  { %v3715_v23 = vpop.f32.mrf.mxu2 }
 0x5ac   :  { %v3879_v52 = vmul.f32 %v7861_v32, %v3715_v23  ;;  %4200 = vmatmul.f32.gmra.mxu3 %v4074_v2  ;;  %v9723_v2 = vld [vmem:[#allocation64_spill] sm:$0xff] }
 0x5ad   :  { %3407 = vmatmul.f32.gmra.mxu1 %v9721_v56  ;;  %v3152_v23 = vadd.f32 %v7936_v22, %v9723_v2  ;;  %v8149_v22 = vld [vmem:[%s8837_s12] ss:$0 sm:$0xff] }
 0x5ae   :  { %v3947_v7 = vadd.f32 %v7872_v35, %v3879_v52  ;;  %3243 = vmatmul.f32.gmra.mxu0 %v9534_v26 }
 0x5af   :  { %v3361_v52 = vadd.f32 %v3360_v47, %v3152_v23  ;;  %v8156_v47 = vpop.f32.mrf.mxu0  ;;  %v9725_v23 = vld [vmem:[#allocation123_spill] sm:$0xff] }
 0x5b0   :  { %4920 = vmatmul.msk.f32.gmra.mxu2 %vm125_vm0, %v5003_v28  ;;  %v4011_v34 = vadd.f32 %v3947_v7, %v3586_v53  ;;  %v3587_v7 = vadd.f32 %v7867_v9, %v3519_v51  ;;  %v5004_v28 = vld [vmem:[%s8825_s0 + $0x110] sm:$0xff] }
 0x5b1   :  { %v3520_v51 = vmul.f32 %v7851_v57, %v3361_v52 }
 0x5b2   :  { %v3363_v45 = vpop.f32.mrf.mxu1  ;;  %v4075_v37 = vmax.f32 %v4011_v34, 0.0 }
 0x5b3   :  { %v3718_v24 = vpop.f32.mrf.mxu2 }
 0x5b4   :  { %v3880_v26 = vmul.f32 %v7861_v32, %v3718_v24  ;;  %4203 = vmatmul.f32.gmra.mxu3 %v4075_v37 }
 0x5b5   :  { %3410 = vmatmul.f32.gmra.mxu1 %v9724_v10 }
 0x5b6   :  { %v3948_v56 = vadd.f32 %v7872_v35, %v3880_v26  ;;  %3246 = vmatmul.f32.gmra.mxu0 %v9538_v59  ;;  %v3155_v26 = vadd.f32 %v7954_v39, %v9725_v23  ;;  %v5005_v39 = vld [vmem:[%s8825_s0 + $0x118] sm:$0xff] }
 0x5b7   :  { %v4156_v53 = vpop.f32.mrf.mxu3  ;;  %v8176_v23 = vpop.f32.mrf.mxu0 }
 0x5b8   :  { %v4352_v58 = vmul.f32 %v8140_v63, %v4156_v53  ;;  %4921 = vmatmul.msk.f32.gmra.mxu2 %vm125_vm0, %v5004_v28  ;;  %v4012_v34 = vadd.f32 %v3948_v56, %v3587_v7  ;;  %v3588_v7 = vadd.f32 %v7867_v9, %v3520_v51  ;;  %v3364_v56 = vadd.f32 %v3363_v45, %v3155_v26 }
 0x5ba   :  { %v4420_v59 = vadd.f32 %v8149_v22, %v4352_v58  ;;  %v3366_v37 = vpop.f32.mrf.mxu1  ;;  %v4076_v24 = vmax.f32 %v4012_v34, 0.0 }
 0x5bb   :  { %v3721_v2 = vpop.f32.mrf.mxu2 }
 0x5bc   :  { %v4484_v10 = vmax.f32 %v4420_v59, 0.0  ;;  %v3881_v53 = vmul.f32 %v7861_v32, %v3721_v2  ;;  %4206 = vmatmul.f32.gmra.mxu3 %v4076_v24  ;;  %v9727_v2 = vld [vmem:[#allocation68_spill] sm:$0xff] }
 0x5bd   :  { %3413 = vmatmul.f32.gmra.mxu1 %v9726_v16  ;;  %v3521_v16 = vmul.f32 %v7851_v57, %v3364_v56 }
 0x5be   :  { %4548 = vst [vmem:[#allocation5] sm:$0xff] %v4484_v10  ;;  %v3949_v52 = vadd.f32 %v7872_v35, %v3881_v53  ;;  %3249 = vmatmul.f32.gmra.mxu0 %v9542_v40  ;;  %v3158_v40 = vadd.f32 %v7973_v0, %v9727_v2  ;;  %v9728_v53 = vld [vmem:[#allocation122_spill] sm:$0xff]  ;;  %v5006_v0 = vld [vmem:[%s8825_s0 + $0x120] sm:$0xff] }
 0x5bf   :  { %v4159_v58 = vpop.f32.mrf.mxu3 }
 0x5c0   :  { %v4353_v28 = vmul.f32 %v8140_v63, %v4159_v58  ;;  %4922 = vmatmul.msk.f32.gmra.mxu2 %vm125_vm0, %v5005_v39  ;;  %v4013_v34 = vadd.f32 %v3949_v52, %v3588_v7  ;;  %v3589_v7 = vadd.f32 %v7867_v9, %v3521_v16  ;;  %v3367_v52 = vadd.f32 %v3366_v37, %v3158_v40 }
 0x5c2   :  { %v4421_v51 = vadd.f32 %v8149_v22, %v4353_v28  ;;  %v3369_v45 = vpop.f32.mrf.mxu1  ;;  %v4077_v59 = vmax.f32 %v4013_v34, 0.0  ;;  %v3522_v34 = vmul.f32 %v7851_v57, %v3367_v52 }
 0x5c3   :  { %v3724_v24 = vpop.f32.mrf.mxu2 }
 0x5c4   :  { %v4485_v26 = vmax.f32 %v4421_v51, 0.0  ;;  %v3882_v10 = vmul.f32 %v7861_v32, %v3724_v24  ;;  %4209 = vmatmul.f32.gmra.mxu3 %v4077_v59  ;;  %v9729_v24 = vld [vmem:[#allocation72_spill] sm:$0xff] }
 0x5c5   :  { %3416 = vmatmul.f32.gmra.mxu1 %v9728_v53  ;;  %v3590_v53 = vadd.f32 %v7867_v9, %v3522_v34 }
 0x5c6   :  { %4549 = vst [vmem:[#allocation5 + $0x8] sm:$0xff] %v4485_v26  ;;  %v3950_v56 = vadd.f32 %v7872_v35, %v3882_v10  ;;  %3252 = vmatmul.f32.gmra.mxu0 %v9546_v11  ;;  %v3161_v11 = vadd.f32 %v7993_v12, %v9729_v24  ;;  %v9730_v26 = vld [vmem:[#allocation126_spill] sm:$0xff]  ;;  %v8194_v10 = vpop.f32.mrf.mxu0  ;;  %v5007_v12 = vld [vmem:[%s8825_s0 + $0x128] sm:$0xff] }
 0x5c7   :  { %v4162_v58 = vpop.f32.mrf.mxu3 }
 0x5c8   :  { %v4354_v28 = vmul.f32 %v8140_v63, %v4162_v58  ;;  %4923 = vmatmul.msk.f32.gmra.mxu2 %vm125_vm0, %v5006_v0  ;;  %v4014_v39 = vadd.f32 %v3950_v56, %v3589_v7  ;;  %v3370_v7 = vadd.f32 %v3369_v45, %v3161_v11  ;;  %v9732_v11 = vld [vmem:[#allocation129_spill] sm:$0xff] }
 0x5ca   :  { %v4422_v16 = vadd.f32 %v8149_v22, %v4354_v28  ;;  %v3372_v37 = vpop.f32.mrf.mxu1  ;;  %v4078_v51 = vmax.f32 %v4014_v39, 0.0  ;;  %v3523_v0 = vmul.f32 %v7851_v57, %v3370_v7 }
 0x5cb   :  { %v3727_v59 = vpop.f32.mrf.mxu2 }
 0x5cc   :  { %v4486_v2 = vmax.f32 %v4422_v16, 0.0  ;;  %v3883_v40 = vmul.f32 %v7861_v32, %v3727_v59  ;;  %4212 = vmatmul.f32.gmra.mxu3 %v4078_v51  ;;  %v9731_v51 = vld [vmem:[#allocation130_spill] sm:$0xff] }
 0x5cd   :  { %3419 = vmatmul.f32.gmra.mxu1 %v9730_v26 }
 0x5ce   :  { %4550 = vst [vmem:[#allocation5 + $0x10] sm:$0xff] %v4486_v2  ;;  %v3951_v52 = vadd.f32 %v7872_v35, %v3883_v40  ;;  %3255 = vmatmul.f32.gmra.mxu0 %v9550_v38  ;;  %v3164_v38 = vadd.f32 %v8012_v36, %v9731_v51  ;;  %v3591_v2 = vadd.f32 %v7867_v9, %v3523_v0  ;;  %v8213_v7 = vpop.f32.mrf.mxu0  ;;  %v5008_v36 = vld [vmem:[%s8825_s0 + $0x130] sm:$0xff]  ;;  %v9734_v51 = vld [vmem:[#allocation133_spill] sm:$0xff] }
 0x5cf   :  { %v4165_v56 = vpop.f32.mrf.mxu3 }
 0x5d0   :  { %v4355_v58 = vmul.f32 %v8140_v63, %v4165_v56  ;;  %4924 = vmatmul.msk.f32.gmra.mxu2 %vm125_vm0, %v5007_v12  ;;  %v4015_v28 = vadd.f32 %v3951_v52, %v3590_v53  ;;  %v3373_v40 = vadd.f32 %v3372_v37, %v3164_v38 }
 0x5d2   :  { %v4423_v39 = vadd.f32 %v8149_v22, %v4355_v58  ;;  %v3375_v45 = vpop.f32.mrf.mxu1  ;;  %v4079_v34 = vmax.f32 %v4015_v28, 0.0  ;;  %v3524_v58 = vmul.f32 %v7851_v57, %v3373_v40 }
 0x5d3   :  { %v3730_v16 = vpop.f32.mrf.mxu2 }
 0x5d4   :  { %v4487_v59 = vmax.f32 %v4423_v39, 0.0  ;;  %v3884_v24 = vmul.f32 %v7861_v32, %v3730_v16  ;;  %4215 = vmatmul.f32.gmra.mxu3 %v4079_v34  ;;  %v3592_v38 = vadd.f32 %v7867_v9, %v3524_v58 }
 0x5d5   :  { %3422 = vmatmul.f32.gmra.mxu1 %v9732_v11 }
 0x5d6   :  { %4551 = vst [vmem:[#allocation5 + $0x18] sm:$0xff] %v4487_v59  ;;  %v3952_v26 = vadd.f32 %v7872_v35, %v3884_v24  ;;  %3258 = vmatmul.f32.gmra.mxu0 %v9554_v21  ;;  %v9733_v21 = vld [vmem:[#allocation76_spill] sm:$0xff] }
 0x5d7   :  { %v4168_v53 = vpop.f32.mrf.mxu3  ;;  %v3167_v39 = vadd.f32 %v8030_v30, %v9733_v21  ;;  %v5009_v30 = vld [vmem:[%s8825_s0 + $0x138] sm:$0xff] }
 0x5d8   :  { %v4356_v52 = vmul.f32 %v8140_v63, %v4168_v53  ;;  %4925 = vmatmul.msk.f32.gmra.mxu2 %vm125_vm0, %v5008_v36  ;;  %v4016_v56 = vadd.f32 %v3952_v26, %v3591_v2  ;;  %v8234_v26 = vpop.f32.mrf.mxu0 }
 0x5d9   :  { %v3376_v59 = vadd.f32 %v3375_v45, %v3167_v39 }
 0x5da   :  { %v4424_v37 = vadd.f32 %v8149_v22, %v4356_v52  ;;  %v3378_v12 = vpop.f32.mrf.mxu1  ;;  %v4080_v28 = vmax.f32 %v4016_v56, 0.0 }
 0x5db   :  { %v3733_v0 = vpop.f32.mrf.mxu2  ;;  %v3525_v53 = vmul.f32 %v7851_v57, %v3376_v59 }
 0x5dc   :  { %v4488_v34 = vmax.f32 %v4424_v37, 0.0  ;;  %v3885_v16 = vmul.f32 %v7861_v32, %v3733_v0  ;;  %4218 = vmatmul.f32.gmra.mxu3 %v4080_v28  ;;  %v9736_v0 = vld [vmem:[#allocation137_spill] sm:$0xff] }
 0x5dd   :  { %3425 = vmatmul.f32.gmra.mxu1 %v9734_v51  ;;  %v3593_v21 = vadd.f32 %v7867_v9, %v3525_v53 }
 0x5de   :  { %4552 = vst [vmem:[#allocation5 + $0x20] sm:$0xff] %v4488_v34  ;;  %v3953_v24 = vadd.f32 %v7872_v35, %v3885_v16  ;;  %3261 = vmatmul.f32.gmra.mxu0 %v9559_v50  ;;  %v9735_v50 = vld [vmem:[#allocation134_spill] sm:$0xff] }
 0x5df   :  { %v4171_v11 = vpop.f32.mrf.mxu3  ;;  %v3170_v58 = vadd.f32 %v8049_v18, %v9735_v50  ;;  %v5010_v18 = vld [vmem:[%s8825_s0 + $0x140] sm:$0xff] }
 0x5e0   :  { %v4357_v2 = vmul.f32 %v8140_v63, %v4171_v11  ;;  %4926 = vmatmul.msk.f32.gmra.mxu2 %vm125_vm0, %v5009_v30  ;;  %v4017_v40 = vadd.f32 %v3953_v24, %v3592_v38  ;;  %v9737_v30 = vld [vmem:[#allocation79_spill] sm:$0xff] }
 0x5e1   :  { %v3379_v39 = vadd.f32 %v3378_v12, %v3170_v58 }
 0x5e2   :  { %v4425_v45 = vadd.f32 %v8149_v22, %v4357_v2  ;;  %v3381_v52 = vpop.f32.mrf.mxu1  ;;  %v4081_v36 = vmax.f32 %v4017_v40, 0.0  ;;  %v8254_v40 = vpop.f32.mrf.mxu0 }
 0x5e3   :  { %v3736_v56 = vpop.f32.mrf.mxu2  ;;  %v3526_v59 = vmul.f32 %v7851_v57, %v3379_v39 }
 0x5e4   :  { %v4489_v37 = vmax.f32 %v4425_v45, 0.0  ;;  %v3886_v28 = vmul.f32 %v7861_v32, %v3736_v56  ;;  %4221 = vmatmul.f32.gmra.mxu3 %v4081_v36  ;;  %v9738_v36 = vld [vmem:[#allocation140_spill] sm:$0xff] }
 0x5e5   :  { %3428 = vmatmul.f32.gmra.mxu1 %v9736_v0  ;;  %v3594_v56 = vadd.f32 %v7867_v9, %v3526_v59 }
 0x5e6   :  { %4553 = vst [vmem:[#allocation5 + $0x28] sm:$0xff] %v4489_v37  ;;  %v3954_v34 = vadd.f32 %v7872_v35, %v3886_v28  ;;  %3264 = vmatmul.f32.gmra.mxu0 %v9565_v14  ;;  %v3173_v14 = vadd.f32 %v8069_v15, %v9737_v30  ;;  %v5011_v15 = vld [vmem:[%s8825_s0 + $0x148] sm:$0xff] }
 0x5e7   :  { %v4174_v16 = vpop.f32.mrf.mxu3 }
 0x5e8   :  { %v4358_v51 = vmul.f32 %v8140_v63, %v4174_v16  ;;  %4927 = vmatmul.msk.f32.gmra.mxu2 %vm125_vm0, %v5010_v18  ;;  %v4018_v38 = vadd.f32 %v3954_v34, %v3593_v21  ;;  %v3382_v50 = vadd.f32 %v3381_v52, %v3173_v14 }
 0x5ea   :  { %v4426_v24 = vadd.f32 %v8149_v22, %v4358_v51  ;;  %v3384_v12 = vpop.f32.mrf.mxu1  ;;  %v4082_v11 = vmax.f32 %v4018_v38, 0.0  ;;  %v3527_v21 = vmul.f32 %v7851_v57, %v3382_v50  ;;  %v9739_v51 = vld [vmem:[#allocation83_spill] sm:$0xff]  ;;  %v8272_v59 = vpop.f32.mrf.mxu0  ;;  %v9740_v50 = vld [vmem:[#allocation86_spill] sm:$0xff] }
 0x5eb   :  { %v3739_v2 = vpop.f32.mrf.mxu2 }
 0x5ec   :  { %v4490_v53 = vmax.f32 %v4426_v24, 0.0  ;;  %v3887_v45 = vmul.f32 %v7861_v32, %v3739_v2  ;;  %4224 = vmatmul.f32.gmra.mxu3 %v4082_v11  ;;  %v3595_v24 = vadd.f32 %v7867_v9, %v3527_v21 }
 0x5ed   :  { %3431 = vmatmul.f32.gmra.mxu1 %v9738_v36 }
 0x5ee   :  { %4554 = vst [vmem:[#allocation5 + $0x30] sm:$0xff] %v4490_v53  ;;  %v3955_v58 = vadd.f32 %v7872_v35, %v3887_v45  ;;  %3267 = vmatmul.f32.gmra.mxu0 %v9570_v29  ;;  %v3176_v29 = vadd.f32 %v8088_v46, %v9739_v51  ;;  %v5012_v46 = vld [vmem:[%s8825_s0 + $0x150] sm:$0xff] }
 0x5ef   :  { %v4177_v37 = vpop.f32.mrf.mxu3 }
 0x5f0   :  { %v4359_v28 = vmul.f32 %v8140_v63, %v4177_v37  ;;  %4928 = vmatmul.msk.f32.gmra.mxu2 %vm125_vm0, %v5011_v15  ;;  %v4019_v0 = vadd.f32 %v3955_v58, %v3594_v56  ;;  %v3385_v11 = vadd.f32 %v3384_v12, %v3176_v29 }
 0x5f2   :  { %v4427_v39 = vadd.f32 %v8149_v22, %v4359_v28  ;;  %v3387_v52 = vpop.f32.mrf.mxu1  ;;  %v4083_v34 = vmax.f32 %v4019_v0, 0.0  ;;  %v3528_v53 = vmul.f32 %v7851_v57, %v3385_v11  ;;  %v9741_v28 = vld [vmem:[#allocation147_spill] sm:$0xff] }
 0x5f3   :  { %v3742_v16 = vpop.f32.mrf.mxu2 }
 0x5f4   :  { %v4491_v18 = vmax.f32 %v4427_v39, 0.0  ;;  %v3888_v38 = vmul.f32 %v7861_v32, %v3742_v16  ;;  %4227 = vmatmul.f32.gmra.mxu3 %v4083_v34  ;;  %v3596_v15 = vadd.f32 %v7867_v9, %v3528_v53  ;;  %v8291_v34 = vpop.f32.mrf.mxu0 }
 0x5f5   :  { %3434 = vmatmul.f32.gmra.mxu1 %v9517_v8 }
 0x5f6   :  { %4555 = vst [vmem:[#allocation5 + $0x38] sm:$0xff] %v4491_v18  ;;  %v3956_v2 = vadd.f32 %v7872_v35, %v3888_v38  ;;  %3270 = vmatmul.f32.gmra.mxu0 %v9575_v55  ;;  %v3179_v55 = vadd.f32 %v8108_v27, %v9740_v50  ;;  %v5013_v27 = vld [vmem:[%s8825_s0 + $0x158] sm:$0xff] }
 0x5f7   :  { %v4180_v30 = vpop.f32.mrf.mxu3 }
 0x5f8   :  { %v4360_v14 = vmul.f32 %v8140_v63, %v4180_v30  ;;  %4929 = vmatmul.msk.f32.gmra.mxu2 %vm125_vm0, %v5012_v46  ;;  %v4020_v8 = vadd.f32 %v3956_v2, %v3595_v24  ;;  %v3388_v0 = vadd.f32 %v3387_v52, %v3179_v55 }
 0x5fa   :  { %v4428_v45 = vadd.f32 %v8149_v22, %v4360_v14  ;;  %v3390_v12 = vpop.f32.mrf.mxu1  ;;  %v4084_v36 = vmax.f32 %v4020_v8, 0.0  ;;  %v3529_v29 = vmul.f32 %v7851_v57, %v3388_v0  ;;  %v9744_v0 = vld [vmem:[#allocation155_spill] sm:$0xff] }
 0x5fb   :  { %v3745_v56 = vpop.f32.mrf.mxu2 }
 0x5fc   :  { %v4492_v58 = vmax.f32 %v4428_v45, 0.0  ;;  %v3889_v37 = vmul.f32 %v7861_v32, %v3745_v56  ;;  %4230 = vmatmul.f32.gmra.mxu3 %v4084_v36  ;;  %v3597_v14 = vadd.f32 %v7867_v9, %v3529_v29  ;;  %v8312_v56 = vpop.f32.mrf.mxu0 }
 0x5fd   :  { %3437 = vmatmul.f32.gmra.mxu1 %v9741_v28 }
 0x5fe   :  { %4556 = vst [vmem:[#allocation5 + $0x40] sm:$0xff] %v4492_v58  ;;  %v3957_v21 = vadd.f32 %v7872_v35, %v3889_v37  ;;  %3273 = vmatmul.f32.gmra.mxu0 %v9580_v44  ;;  %v9742_v44 = vld [vmem:[#allocation8_spill] sm:$0xff] }
 0x5ff   :  { %v4183_v39 = vpop.f32.mrf.mxu3  ;;  %v3182_v11 = vadd.f32 %v8127_v61, %v9742_v44  ;;  %v5014_v61 = vld [vmem:[%s8825_s0 + $0x160] sm:$0xff] }
 0x600   :  { %v4361_v16 = vmul.f32 %v8140_v63, %v4183_v39  ;;  %4930 = vmatmul.msk.f32.gmra.mxu2 %vm125_vm0, %v5013_v27  ;;  %v4021_v51 = vadd.f32 %v3957_v21, %v3596_v15 }
 0x601   :  { %v3391_v46 = vadd.f32 %v3390_v12, %v3182_v11 }
 0x602   :  { %v4429_v52 = vadd.f32 %v8149_v22, %v4361_v16  ;;  %v3393_v18 = vpop.f32.mrf.mxu1  ;;  %v4085_v38 = vmax.f32 %v4021_v51, 0.0 }
 0x603   :  { %v3748_v24 = vpop.f32.mrf.mxu2 }
 0x604   :  { %v4493_v2 = vmax.f32 %v4429_v52, 0.0  ;;  %v3890_v30 = vmul.f32 %v7861_v32, %v3748_v24  ;;  %4233 = vmatmul.f32.gmra.mxu3 %v4085_v38  ;;  %v8332_v44 = vpop.f32.mrf.mxu0 }
 0x605   :  { %3440 = vmatmul.f32.gmra.mxu1 %v9525_v17  ;;  %v3530_v17 = vmul.f32 %v7851_v57, %v3391_v46 }
 0x606   :  { %4557 = vst [vmem:[#allocation5 + $0x48] sm:$0xff] %v4493_v2  ;;  %v3958_v8 = vadd.f32 %v7872_v35, %v3890_v30  ;;  %3276 = vmatmul.f32.gmra.mxu0 %v7579_v43  ;;  %v9743_v43 = vld [vmem:[#allocation93_spill] sm:$0xff] }
 0x607   :  { %v4186_v53 = vpop.f32.mrf.mxu3  ;;  %v3185_v37 = vadd.f32 %v8156_v47, %v9743_v43  ;;  %v3598_v21 = vadd.f32 %v7867_v9, %v3530_v17  ;;  %v5015_v47 = vld [vmem:[%s8825_s0 + $0x168] sm:$0xff]  ;;  %v8366_v43 = vld [vmem:[%s8833_s8] ss:$0 sm:$0xff] }
 0x608   :  { %v4362_v45 = vmul.f32 %v8140_v63, %v4186_v53  ;;  %4931 = vmatmul.msk.f32.gmra.mxu2 %vm125_vm0, %v5014_v61  ;;  %v4022_v36 = vadd.f32 %v3958_v8, %v3597_v14  ;;  %v5018_v8 = vld [vmem:[%s8825_s0 + $0x170] sm:$0xff] }
 0x609   :  { %v3394_v39 = vadd.f32 %v3393_v18, %v3185_v37 }
 0x60a   :  { %v4430_v12 = vadd.f32 %v8149_v22, %v4362_v45  ;;  %v3396_v50 = vpop.f32.mrf.mxu1  ;;  %v4086_v55 = vmax.f32 %v4022_v36, 0.0  ;;  %v8357_v45 = vld [vmem:[%s8830_s5] ss:$0 sm:$0xff] }
 0x60b   :  { %v3751_v58 = vpop.f32.mrf.mxu2  ;;  %v3531_v52 = vmul.f32 %v7851_v57, %v3394_v39  ;;  %v8339_v57 = vld [vmem:[%s8831_s6] ss:$0 sm:$0xff] }
 0x60c   :  { %v4494_v28 = vmax.f32 %v4430_v12, 0.0  ;;  %v3891_v15 = vmul.f32 %v7861_v32, %v3751_v58  ;;  %4236 = vmatmul.f32.gmra.mxu3 %v4086_v55 }
 0x60d   :  { %3443 = vmatmul.f32.gmra.mxu1 %v9744_v0  ;;  %v3599_v30 = vadd.f32 %v8339_v57, %v3531_v52 }
 0x60e   :  { %4558 = vst [vmem:[#allocation5 + $0x50] sm:$0xff] %v4494_v28  ;;  %v3959_v16 = vadd.f32 %v7872_v35, %v3891_v15  ;;  %3279 = vmatmul.f32.gmra.mxu0 %v7595_v20  ;;  %v9745_v35 = vld [vmem:[#allocation144_spill] sm:$0xff]  ;;  %v8370_v28 = vpop.f32.mrf.mxu0 }
 0x60f   :  { %v4189_v27 = vpop.f32.mrf.mxu3  ;;  %v3188_v20 = vadd.f32 %v8176_v23, %v9745_v35  ;;  %v8345_v23 = vld [vmem:[%s8834_s9] ss:$0 sm:$0xff] }
 0x610   :  { %v4363_v51 = vmul.f32 %v8140_v63, %v4189_v27  ;;  %4932 = vmatmul.msk.f32.gmra.mxu2 %vm125_vm0, %v5015_v47  ;;  %v4023_v29 = vadd.f32 %v3959_v16, %v3598_v21  ;;  %v5021_v16 = vld [vmem:[%s8825_s0 + $0x178] sm:$0xff] }
 0x611   :  { %v3397_v14 = vadd.f32 %v3396_v50, %v3188_v20  ;;  %v9746_v50 = vld [vmem:[#allocation89_spill] sm:$0xff] }
 0x612   :  { %v4431_v9 = vadd.f32 %v8149_v22, %v4363_v51  ;;  %v3399_v18 = vpop.f32.mrf.mxu1  ;;  %v4087_v38 = vmax.f32 %v4023_v29, 0.0  ;;  %v3191_v55 = vadd.f32 %v8194_v10, %v9746_v50 }
 0x613   :  { %v3754_v24 = vpop.f32.mrf.mxu2  ;;  %v3532_v61 = vmul.f32 %v8357_v45, %v3397_v14 }
 0x614   :  { %v4495_v11 = vmax.f32 %v4431_v9, 0.0  ;;  %v3892_v2 = vmul.f32 %v7861_v32, %v3754_v24  ;;  %4239 = vmatmul.f32.gmra.mxu3 %v4087_v38  ;;  %v3400_v0 = vadd.f32 %v3399_v18, %v3191_v55  ;;  %v9747_v9 = vld [vmem:[#allocation97_spill] sm:$0xff] }
 0x615   :  { %3446 = vmatmul.f32.gmra.mxu1 %v9533_v42  ;;  %v3600_v15 = vadd.f32 %v8339_v57, %v3532_v61 }
 0x616   :  { %4559 = vst [vmem:[#allocation5 + $0x58] sm:$0xff] %v4495_v11  ;;  %v3960_v46 = vadd.f32 %v8345_v23, %v3892_v2  ;;  %3282 = vmatmul.f32.gmra.mxu0 %v9658_v25  ;;  %v3533_v27 = vmul.f32 %v8357_v45, %v3400_v0 }
 0x617   :  { %v4192_v32 = vpop.f32.mrf.mxu3 }
 0x618   :  { %v4364_v42 = vmul.f32 %v8140_v63, %v4192_v32  ;;  %4933 = vmatmul.msk.f32.gmra.mxu2 %vm125_vm0, %v5018_v8  ;;  %v4024_v53 = vadd.f32 %v3960_v46, %v3599_v30  ;;  %v3601_v24 = vadd.f32 %v8339_v57, %v3533_v27  ;;  %v5022_v30 = vld [vmem:[%s8825_s0 + $0x180] sm:$0xff] }
 0x619   :  { %v9748_v8 = vld [vmem:[#allocation148_spill] sm:$0xff] }
 0x61a   :  { %v4432_v36 = vadd.f32 %v8149_v22, %v4364_v42  ;;  %v3402_v25 = vpop.f32.mrf.mxu1  ;;  %v4088_v17 = vmax.f32 %v4024_v53, 0.0  ;;  %v3197_v53 = vadd.f32 %v8234_v26, %v9748_v8 }
 0x61b   :  { %v3757_v12 = vpop.f32.mrf.mxu2 }
 0x61c   :  { %v4496_v58 = vmax.f32 %v4432_v36, 0.0  ;;  %v3893_v37 = vmul.f32 %v8366_v43, %v3757_v12  ;;  %4242 = vmatmul.f32.gmra.mxu3 %v4088_v17 }
 0x61d   :  { %3449 = vmatmul.f32.gmra.mxu1 %v9537_v5 }
 0x61e   :  { %4560 = vst [vmem:[#allocation5 + $0x60] sm:$0xff] %v4496_v58  ;;  %v3961_v21 = vadd.f32 %v8345_v23, %v3893_v37  ;;  %3285 = vmatmul.f32.gmra.mxu0 %v9663_v19  ;;  %v3194_v19 = vadd.f32 %v8213_v7, %v9747_v9  ;;  %v5023_v58 = vld [vmem:[%s8825_s0 + $0x188] sm:$0xff] }
 0x61f   :  { %v4195_v10 = vpop.f32.mrf.mxu3 }
 0x620   :  { %v4365_v39 = vmul.f32 %v8140_v63, %v4195_v10  ;;  %4934 = vmatmul.msk.f32.gmra.mxu2 %vm125_vm0, %v5021_v16  ;;  %v4025_v5 = vadd.f32 %v3961_v21, %v3600_v15  ;;  %v3403_v35 = vadd.f32 %v3402_v25, %v3194_v19  ;;  %v8408_v21 = vpop.f32.mrf.mxu0  ;;  %v5024_v19 = vld [vmem:[%s8825_s0 + $0x190] sm:$0xff] }
 0x622   :  { %v4433_v51 = vadd.f32 %v8149_v22, %v4365_v39  ;;  %v3405_v47 = vpop.f32.mrf.mxu1  ;;  %v4089_v29 = vmax.f32 %v4025_v5, 0.0  ;;  %v3534_v14 = vmul.f32 %v8357_v45, %v3403_v35  ;;  %v9749_v39 = vld [vmem:[#allocation90_spill] sm:$0xff] }
 0x623   :  { %v3760_v52 = vpop.f32.mrf.mxu2  ;;  %v3406_v17 = vadd.f32 %v3405_v47, %v3197_v53  ;;  %v3200_v16 = vadd.f32 %v8254_v40, %v9749_v39 }
 0x624   :  { %v4497_v18 = vmax.f32 %v4433_v51, 0.0  ;;  %v3894_v38 = vmul.f32 %v8366_v43, %v3760_v52  ;;  %4245 = vmatmul.f32.gmra.mxu3 %v4089_v29  ;;  %v3602_v25 = vadd.f32 %v8339_v57, %v3534_v14  ;;  %v9751_v14 = vld [vmem:[#allocation179_spill] sm:$0xff] }
 0x625   :  { %3452 = vmatmul.f32.gmra.mxu1 %v9541_v4  ;;  %v3535_v37 = vmul.f32 %v8357_v45, %v3406_v17 }
 0x626   :  { %4561 = vst [vmem:[#allocation5 + $0x68] sm:$0xff] %v4497_v18  ;;  %v3962_v20 = vadd.f32 %v8345_v23, %v3894_v38 }
 0x627   :  { %v4198_v11 = vpop.f32.mrf.mxu3  ;;  %v3603_v51 = vadd.f32 %v8339_v57, %v3535_v37  ;;  %v9753_v37 = vld [vmem:[#allocation183_spill] sm:$0xff] }
 0x628   :  { %v4366_v2 = vmul.f32 %v8140_v63, %v4198_v11  ;;  %4935 = vmatmul.msk.f32.gmra.mxu2 %vm125_vm0, %v5022_v30  ;;  %v4026_v7 = vadd.f32 %v3962_v20, %v3601_v24  ;;  %v9750_v20 = vld [vmem:[#allocation94_spill] sm:$0xff] }
 0x629   :  { %v3203_v11 = vadd.f32 %v8272_v59, %v9750_v20  ;;  %v5025_v59 = vld [vmem:[%s8825_s0 + $0x198] sm:$0xff] }
 0x62a   :  { %v4434_v4 = vadd.f32 %v8149_v22, %v4366_v2  ;;  %v3408_v46 = vpop.f32.mrf.mxu1  ;;  %v4090_v32 = vmax.f32 %v4026_v7, 0.0  ;;  %v8426_v7 = vpop.f32.mrf.mxu0 }
 0x62b   :  { %v3763_v42 = vpop.f32.mrf.mxu2  ;;  %v3409_v47 = vadd.f32 %v3408_v46, %v3200_v16 }
 0x62c   :  { %v4498_v61 = vmax.f32 %v4434_v4, 0.0  ;;  %v3895_v36 = vmul.f32 %v8366_v43, %v3763_v42  ;;  %4248 = vmatmul.f32.gmra.mxu3 %v4090_v32 }
 0x62d   :  { %3455 = vmatmul.f32.gmra.mxu1 %v9545_v41  ;;  %v3536_v18 = vmul.f32 %v8357_v45, %v3409_v47 }
 0x62e   :  { %4562 = vst [vmem:[#allocation5 + $0x70] sm:$0xff] %v4498_v61  ;;  %v3963_v12 = vadd.f32 %v8345_v23, %v3895_v36 }
 0x62f   :  { %v4201_v50 = vpop.f32.mrf.mxu3  ;;  %v3604_v4 = vadd.f32 %v8339_v57, %v3536_v18 }
 0x630   :  { %v4367_v55 = vmul.f32 %v8140_v63, %v4201_v50  ;;  %4936 = vmatmul.msk.f32.gmra.mxu2 %vm125_vm0, %v5023_v58  ;;  %v4027_v26 = vadd.f32 %v3963_v12, %v3602_v25  ;;  %v9752_v50 = vld [vmem:[#allocation152_spill] sm:$0xff] }
 0x632   :  { %v4435_v41 = vadd.f32 %v8149_v22, %v4367_v55  ;;  %v3411_v15 = vpop.f32.mrf.mxu1  ;;  %v4091_v0 = vmax.f32 %v4027_v26, 0.0  ;;  %v3206_v55 = vadd.f32 %v8291_v34, %v9752_v50  ;;  %v5026_v34 = vld [vmem:[%s8825_s0 + $0x1a0] sm:$0xff] }
 0x633   :  { %v3766_v10 = vpop.f32.mrf.mxu2  ;;  %v3412_v46 = vadd.f32 %v3411_v15, %v3203_v11 }
 0x634   :  { %v4499_v5 = vmax.f32 %v4435_v41, 0.0  ;;  %v3896_v27 = vmul.f32 %v8366_v43, %v3766_v10  ;;  %4251 = vmatmul.f32.gmra.mxu3 %v4091_v0  ;;  %v8444_v10 = vpop.f32.mrf.mxu0 }
 0x635   :  { %3458 = vmatmul.f32.gmra.mxu1 %v9549_v60  ;;  %v3537_v61 = vmul.f32 %v8357_v45, %v3412_v46 }
 0x636   :  { %4563 = vst [vmem:[#allocation5 + $0x78] sm:$0xff] %v4499_v5  ;;  %v3964_v29 = vadd.f32 %v8345_v23, %v3896_v27 }
 0x637   :  { %v4204_v52 = vpop.f32.mrf.mxu3  ;;  %v3605_v41 = vadd.f32 %v8339_v57, %v3537_v61 }
 0x638   :  { %v4368_v9 = vmul.f32 %v8140_v63, %v4204_v52  ;;  %4937 = vmatmul.msk.f32.gmra.mxu2 %vm125_vm0, %v5024_v19  ;;  %v4028_v40 = vadd.f32 %v3964_v29, %v3603_v51 }
 0x63a   :  { %v4436_v60 = vadd.f32 %v8149_v22, %v4368_v9  ;;  %v3414_v38 = vpop.f32.mrf.mxu1  ;;  %v4092_v24 = vmax.f32 %v4028_v40, 0.0  ;;  %v9754_v9 = vld [vmem:[#allocation92_spill] sm:$0xff] }
 0x63b   :  { %v3769_v35 = vpop.f32.mrf.mxu2  ;;  %v3415_v15 = vadd.f32 %v3414_v38, %v3206_v55  ;;  %v3209_v19 = vadd.f32 %v8312_v56, %v9754_v9 }
 0x63c   :  { %v4500_v2 = vmax.f32 %v4436_v60, 0.0  ;;  %v3897_v30 = vmul.f32 %v8366_v43, %v3769_v35  ;;  %4254 = vmatmul.f32.gmra.mxu3 %v4092_v24  ;;  %v9755_v60 = vld [vmem:[#allocation187_spill] sm:$0xff] }
 0x63d   :  { %3461 = vmatmul.f32.gmra.mxu1 %v9751_v14  ;;  %v3538_v27 = vmul.f32 %v8357_v45, %v3415_v15 }
 0x63e   :  { %4564 = vst [vmem:[#allocation5 + $0x80] sm:$0xff] %v4500_v2  ;;  %v3965_v32 = vadd.f32 %v8345_v23, %v3897_v30  ;;  %v5027_v2 = vld [vmem:[%s8825_s0 + $0x1a8] sm:$0xff]  ;;  %v8464_v30 = vpop.f32.mrf.mxu0 }
 0x63f   :  { %v4207_v42 = vpop.f32.mrf.mxu3  ;;  %v3606_v38 = vadd.f32 %v8339_v57, %v3538_v27 }
 0x640   :  { %v4369_v8 = vmul.f32 %v8140_v63, %v4207_v42  ;;  %4938 = vmatmul.msk.f32.gmra.mxu2 %vm125_vm0, %v5025_v59  ;;  %v4029_v53 = vadd.f32 %v3965_v32, %v3604_v4 }
 0x642   :  { %v4437_v36 = vadd.f32 %v8149_v22, %v4369_v8  ;;  %v3417_v25 = vpop.f32.mrf.mxu1  ;;  %v4093_v17 = vmax.f32 %v4029_v53, 0.0  ;;  %v9756_v8 = vld [vmem:[#allocation98_spill] sm:$0xff] }
 0x643   :  { %v3772_v12 = vpop.f32.mrf.mxu2  ;;  %v3418_v24 = vadd.f32 %v3417_v25, %v3209_v19  ;;  %v3212_v59 = vadd.f32 %v8332_v44, %v9756_v8 }
 0x644   :  { %v4501_v58 = vmax.f32 %v4437_v36, 0.0  ;;  %v3898_v26 = vmul.f32 %v8366_v43, %v3772_v12  ;;  %4257 = vmatmul.f32.gmra.mxu3 %v4093_v17  ;;  %v9757_v36 = vld [vmem:[#allocation190_spill] sm:$0xff] }
 0x645   :  { %3464 = vmatmul.f32.gmra.mxu1 %v9753_v37  ;;  %v3539_v14 = vmul.f32 %v8357_v45, %v3418_v24 }
 0x646   :  { %4565 = vst [vmem:[#allocation5 + $0x88] sm:$0xff] %v4501_v58  ;;  %v3966_v0 = vadd.f32 %v8345_v23, %v3898_v26  ;;  %v5028_v58 = vld [vmem:[%s8825_s0 + $0x1b0] sm:$0xff] }
 0x647   :  { %v4210_v39 = vpop.f32.mrf.mxu3  ;;  %v3607_v25 = vadd.f32 %v8339_v57, %v3539_v14 }
 0x648   :  { %v4370_v16 = vmul.f32 %v8140_v63, %v4210_v39  ;;  %4939 = vmatmul.msk.f32.gmra.mxu2 %vm125_vm0, %v5026_v34  ;;  %v4030_v5 = vadd.f32 %v3966_v0, %v3605_v41  ;;  %v8481_v0 = vpop.f32.mrf.mxu0 }
 0x64a   :  { %v4438_v51 = vadd.f32 %v8149_v22, %v4370_v16  ;;  %v3420_v47 = vpop.f32.mrf.mxu1  ;;  %v4094_v29 = vmax.f32 %v4030_v5, 0.0  ;;  %v9758_v16 = vld [vmem:[#allocation156_spill] sm:$0xff] }
 0x64b   :  { %v3775_v52 = vpop.f32.mrf.mxu2  ;;  %v3421_v17 = vadd.f32 %v3420_v47, %v3212_v59  ;;  %v3215_v34 = vadd.f32 %v8370_v28, %v9758_v16 }
 0x64c   :  { %v4502_v40 = vmax.f32 %v4438_v51, 0.0  ;;  %v3899_v18 = vmul.f32 %v8366_v43, %v3775_v52  ;;  %4260 = vmatmul.f32.gmra.mxu3 %v4094_v29  ;;  %v9759_v51 = vld [vmem:[#allocation194_spill] sm:$0xff] }
 0x64d   :  { %3467 = vmatmul.f32.gmra.mxu1 %v9755_v60  ;;  %v3540_v26 = vmul.f32 %v8357_v45, %v3421_v17 }
 0x64e   :  { %4566 = vst [vmem:[#allocation5 + $0x90] sm:$0xff] %v4502_v40  ;;  %v3967_v35 = vadd.f32 %v8345_v23, %v3899_v18  ;;  %v5029_v40 = vld [vmem:[%s8825_s0 + $0x1b8] sm:$0xff]  ;;  %v9760_v18 = vld [vmem:[#allocation96_spill] sm:$0xff] }
 0x64f   :  { %v4213_v20 = vpop.f32.mrf.mxu3  ;;  %v3608_v47 = vadd.f32 %v8339_v57, %v3540_v26  ;;  %v3009_v60 = vadd.f32 %v7687_v13, %v9760_v18 }
 0x650   :  { %v4371_v11 = vmul.f32 %v8140_v63, %v4213_v20  ;;  %4940 = vmatmul.msk.f32.gmra.mxu2 %vm125_vm0, %v5027_v2  ;;  %v4031_v56 = vadd.f32 %v3967_v35, %v3606_v38 }
 0x651   :  { %v3218_v2 = vadd.f32 %v8408_v21, %v3009_v60  ;;  %v5030_v21 = vld [vmem:[%s8825_s0 + $0x1c0] sm:$0xff] }
 0x652   :  { %v4439_v4 = vadd.f32 %v8149_v22, %v4371_v11  ;;  %v3423_v46 = vpop.f32.mrf.mxu1  ;;  %v4095_v32 = vmax.f32 %v4031_v56, 0.0 }
 0x653   :  { %v3778_v42 = vpop.f32.mrf.mxu2  ;;  %v3424_v29 = vadd.f32 %v3423_v46, %v3215_v34  ;;  %v9761_v46 = vld [vmem:[#allocation197_spill] sm:$0xff] }
 0x654   :  { %v4503_v53 = vmax.f32 %v4439_v4, 0.0  ;;  %v3900_v61 = vmul.f32 %v8366_v43, %v3778_v42  ;;  %4263 = vmatmul.f32.gmra.mxu3 %v4095_v32  ;;  %v8500_v4 = vpop.f32.mrf.mxu0 }
 0x655   :  { %3470 = vmatmul.f32.gmra.mxu1 %v9757_v36  ;;  %v3541_v38 = vmul.f32 %v8357_v45, %v3424_v29 }
 0x656   :  { %4567 = vst [vmem:[#allocation5 + $0x98] sm:$0xff] %v4503_v53  ;;  %v3968_v12 = vadd.f32 %v8345_v23, %v3900_v61  ;;  %v9762_v61 = vld [vmem:[#allocation160_spill] sm:$0xff] }
 0x657   :  { %v4216_v50 = vpop.f32.mrf.mxu3  ;;  %v3609_v32 = vadd.f32 %v8339_v57, %v3541_v38  ;;  %v3012_v36 = vadd.f32 %v7705_v33, %v9762_v61  ;;  %v9766_v38 = vld [vmem:[#allocation204_spill] sm:$0xff] }
 0x658   :  { %v4372_v55 = vmul.f32 %v8140_v63, %v4216_v50  ;;  %4941 = vmatmul.msk.f32.gmra.mxu2 %vm125_vm0, %v5028_v58  ;;  %v4032_v44 = vadd.f32 %v3968_v12, %v3607_v25 }
 0x659   :  { %v3221_v58 = vadd.f32 %v8426_v7, %v3012_v36  ;;  %v5031_v7 = vld [vmem:[%s8825_s0 + $0x1c8] sm:$0xff] }
 0x65a   :  { %v4440_v37 = vadd.f32 %v8149_v22, %v4372_v55  ;;  %v3426_v41 = vpop.f32.mrf.mxu1  ;;  %v4096_v15 = vmax.f32 %v4032_v44, 0.0 }
 0x65b   :  { %v3781_v39 = vpop.f32.mrf.mxu2  ;;  %v3427_v13 = vadd.f32 %v3426_v41, %v3218_v2 }
 0x65c   :  { %v4504_v5 = vmax.f32 %v4440_v37, 0.0  ;;  %v3901_v27 = vmul.f32 %v8366_v43, %v3781_v39  ;;  %4266 = vmatmul.f32.gmra.mxu3 %v4096_v15  ;;  %v9763_v37 = vld [vmem:[#allocation201_spill] sm:$0xff]  ;;  %v8519_v39 = vpop.f32.mrf.mxu0 }
 0x65d   :  { %3473 = vmatmul.f32.gmra.mxu1 %v9759_v51  ;;  %v3542_v25 = vmul.f32 %v8357_v45, %v3427_v13  ;;  %v9765_v51 = vld [vmem:[#allocation191_spill] sm:$0xff] }
 0x65e   :  { %4568 = vst [vmem:[#allocation5 + $0xa0] sm:$0xff] %v4504_v5  ;;  %v3969_v52 = vadd.f32 %v8345_v23, %v3901_v27  ;;  %v9764_v27 = vld [vmem:[#allocation100_spill] sm:$0xff] }
 0x65f   :  { %v4219_v9 = vpop.f32.mrf.mxu3  ;;  %v3610_v41 = vadd.f32 %v8339_v57, %v3542_v25 }
 0x660   :  { %v4373_v19 = vmul.f32 %v8140_v63, %v4219_v9  ;;  %4942 = vmatmul.msk.f32.gmra.mxu2 %vm125_vm0, %v5029_v40  ;;  %v4033_v28 = vadd.f32 %v3969_v52, %v3608_v47  ;;  %v3015_v47 = vadd.f32 %v9765_v51, %v9764_v27 }
 0x662   :  { %v4441_v24 = vadd.f32 %v8149_v22, %v4373_v19  ;;  %v3429_v35 = vpop.f32.mrf.mxu1  ;;  %v4097_v20 = vmax.f32 %v4033_v28, 0.0  ;;  %v3224_v28 = vadd.f32 %v8444_v10, %v3015_v47 }
 0x663   :  { %v3784_v11 = vpop.f32.mrf.mxu2  ;;  %v3430_v15 = vadd.f32 %v3429_v35, %v3221_v58 }
 0x664   :  { %v4505_v56 = vmax.f32 %v4441_v24, 0.0  ;;  %v3902_v14 = vmul.f32 %v8366_v43, %v3784_v11  ;;  %4269 = vmatmul.f32.gmra.mxu3 %v4097_v20 }
 0x665   :  { %3476 = vmatmul.f32.gmra.mxu1 %v9761_v46  ;;  %v3543_v29 = vmul.f32 %v8357_v45, %v3430_v15  ;;  %v9767_v46 = vld [vmem:[#allocation164_spill] sm:$0xff] }
 0x666   :  { %4569 = vst [vmem:[#allocation5 + $0xa8] sm:$0xff] %v4505_v56  ;;  %v3970_v42 = vadd.f32 %v8345_v23, %v3902_v14  ;;  %v5032_v56 = vld [vmem:[%s8825_s0 + $0x1d0] sm:$0xff]  ;;  %v8540_v14 = vpop.f32.mrf.mxu0 }
 0x667   :  { %v4222_v8 = vpop.f32.mrf.mxu3  ;;  %v3611_v24 = vadd.f32 %v8339_v57, %v3543_v29  ;;  %v9772_v29 = vld [vmem:[#allocation112_spill] sm:$0xff] }
 0x668   :  { %v4374_v59 = vmul.f32 %v8140_v63, %v4222_v8  ;;  %4943 = vmatmul.msk.f32.gmra.mxu2 %vm125_vm0, %v5030_v21  ;;  %v4034_v53 = vadd.f32 %v3970_v42, %v3609_v32  ;;  %v9768_v32 = vld [vmem:[#allocation135_spill] sm:$0xff] }
 0x669   :  { %v3018_v13 = vadd.f32 %v9768_v32, %v9767_v46 }
 0x66a   :  { %v4442_v17 = vadd.f32 %v8149_v22, %v4374_v59  ;;  %v3432_v12 = vpop.f32.mrf.mxu1  ;;  %v4098_v50 = vmax.f32 %v4034_v53, 0.0 }
 0x66b   :  { %v3787_v55 = vpop.f32.mrf.mxu2  ;;  %v3433_v35 = vadd.f32 %v3432_v12, %v3224_v28  ;;  %v3227_v61 = vadd.f32 %v8464_v30, %v3018_v13  ;;  %v5035_v28 = vld [vmem:[%s8825_s0 + $0x1e0] sm:$0xff] }
 0x66c   :  { %v4506_v44 = vmax.f32 %v4442_v17, 0.0  ;;  %v3903_v26 = vmul.f32 %v8366_v43, %v3787_v55  ;;  %4272 = vmatmul.f32.gmra.mxu3 %v4098_v50  ;;  %v9769_v17 = vld [vmem:[#allocation108_spill] sm:$0xff] }
 0x66d   :  { %3479 = vmatmul.f32.gmra.mxu1 %v9763_v37  ;;  %v3544_v42 = vmul.f32 %v8357_v45, %v3433_v35  ;;  %v9770_v37 = vld [vmem:[#allocation104_spill] sm:$0xff] }
 0x66e   :  { %4570 = vst [vmem:[#allocation5 + $0xb0] sm:$0xff] %v4506_v44  ;;  %v3971_v33 = vadd.f32 %v8345_v23, %v3903_v26  ;;  %v5033_v26 = vld [vmem:[%s8825_s0 + $0x1d8] sm:$0xff] }
 0x66f   :  { %v4225_v16 = vpop.f32.mrf.mxu3  ;;  %v3612_v12 = vadd.f32 %v8339_v57, %v3544_v42 }
 0x670   :  { %v4375_v34 = vmul.f32 %v8140_v63, %v4225_v16  ;;  %4944 = vmatmul.msk.f32.gmra.mxu2 %vm125_vm0, %v5031_v7  ;;  %v4035_v5 = vadd.f32 %v3971_v33, %v3610_v41  ;;  %v9771_v41 = vld [vmem:[#allocation138_spill] sm:$0xff] }
 0x671   :  { %v3021_v15 = vadd.f32 %v9771_v41, %v9770_v37 }
 0x672   :  { %v4443_v52 = vadd.f32 %v8149_v22, %v4375_v34  ;;  %v3435_v9 = vpop.f32.mrf.mxu1  ;;  %v4099_v19 = vmax.f32 %v4035_v5, 0.0  ;;  %v8560_v5 = vpop.f32.mrf.mxu0 }
 0x673   :  { %v3790_v40 = vpop.f32.mrf.mxu2  ;;  %v3436_v50 = vadd.f32 %v3435_v9, %v3227_v61 }
 0x674   :  { %v4507_v18 = vmax.f32 %v4443_v52, 0.0  ;;  %v3904_v60 = vmul.f32 %v8366_v43, %v3790_v40  ;;  %4275 = vmatmul.f32.gmra.mxu3 %v4099_v19  ;;  %v8570_v40 = vld [vmem:[%s8836_s11] ss:$0 sm:$0xff] }
 0x675   :  { %3482 = vmatmul.f32.gmra.mxu1 %v9766_v38  ;;  %v3545_v33 = vmul.f32 %v8357_v45, %v3436_v50  ;;  %v9774_v38 = vld [vmem:[#allocation141_spill] sm:$0xff] }
 0x676   :  { %4571 = vst [vmem:[#allocation5 + $0xb8] sm:$0xff] %v4507_v18  ;;  %v3972_v20 = vadd.f32 %v8345_v23, %v3904_v60  ;;  %v9773_v60 = vld [vmem:[#allocation168_spill] sm:$0xff] }
 0x677   :  { %v4228_v11 = vpop.f32.mrf.mxu3  ;;  %v3613_v52 = vadd.f32 %v8339_v57, %v3545_v33 }
 0x678   :  { %v4376_v2 = vmul.f32 %v8140_v63, %v4228_v11  ;;  %4945 = vmatmul.msk.f32.gmra.mxu2 %vm125_vm0, %v5032_v56  ;;  %v4036_v10 = vadd.f32 %v3972_v20, %v3611_v24  ;;  %v3024_v24 = vadd.f32 %v9774_v38, %v9773_v60  ;;  %v8583_v20 = vld [vmem:[%s8837_s12] ss:$0 sm:$0xff] }
 0x67a   :  { %v4444_v8 = vadd.f32 %v8149_v22, %v4376_v2  ;;  %v3438_v59 = vpop.f32.mrf.mxu1  ;;  %v4100_v21 = vmax.f32 %v4036_v10, 0.0  ;;  %v3233_v46 = vadd.f32 %v8500_v4, %v3024_v24  ;;  %v8588_v42 = vpop.f32.mrf.mxu0  ;;  %v5037_v4 = vld [vmem:[%s8825_s0 + $0x1e8] sm:$0xff] }
 0x67b   :  { %v3793_v53 = vpop.f32.mrf.mxu2 }
 0x67c   :  { %v4508_v36 = vmax.f32 %v4444_v8, 0.0  ;;  %v3905_v25 = vmul.f32 %v8366_v43, %v3793_v53  ;;  %4278 = vmatmul.f32.gmra.mxu3 %v4100_v21 }
 0x67d   :  { %3485 = vmatmul.f32.gmra.mxu1 %v9769_v17  ;;  %v9776_v17 = vld [vmem:[#allocation145_spill] sm:$0xff] }
 0x67e   :  { %4572 = vst [vmem:[#allocation5 + $0xc0] sm:$0xff] %v4508_v36  ;;  %v3973_v55 = vadd.f32 %v8345_v23, %v3905_v25  ;;  %v9775_v25 = vld [vmem:[#allocation172_spill] sm:$0xff] }
 0x67f   :  { %v4231_v58 = vpop.f32.mrf.mxu3 }
 0x680   :  { %v4377_v44 = vmul.f32 %v8140_v63, %v4231_v58  ;;  %4946 = vmatmul.msk.f32.gmra.mxu2 %vm125_vm0, %v5033_v26  ;;  %v4037_v30 = vadd.f32 %v3973_v55, %v3612_v12  ;;  %v3230_v63 = vadd.f32 %v8481_v0, %v3021_v15  ;;  %v3027_v12 = vadd.f32 %v9776_v17, %v9775_v25 }
 0x682   :  { %v4445_v16 = vadd.f32 %v8149_v22, %v4377_v44  ;;  %v3441_v34 = vpop.f32.mrf.mxu1  ;;  %v4101_v7 = vmax.f32 %v4037_v30, 0.0  ;;  %v3439_v9 = vadd.f32 %v3438_v59, %v3230_v63  ;;  %v3236_v26 = vadd.f32 %v8519_v39, %v3027_v12  ;;  %v5038_v39 = vld [vmem:[%s8825_s0 + $0x1f0] sm:$0xff]  ;;  %v9777_v63 = vld [vmem:[#allocation125_spill] sm:$0xff] }
 0x683   :  { %v3796_v27 = vpop.f32.mrf.mxu2  ;;  %v3442_v59 = vadd.f32 %v3441_v34, %v3233_v46 }
 0x684   :  { %v4509_v51 = vmax.f32 %v4445_v16, 0.0  ;;  %v3906_v47 = vmul.f32 %v8366_v43, %v3796_v27  ;;  %4281 = vmatmul.f32.gmra.mxu3 %v4101_v7  ;;  %v3546_v35 = vmul.f32 %v8357_v45, %v3439_v9  ;;  %v8607_v16 = vpop.f32.mrf.mxu0 }
 0x685   :  { %3488 = vmatmul.f32.gmra.mxu1 %v9772_v29 }
 0x686   :  { %4573 = vst [vmem:[#allocation5 + $0xc8] sm:$0xff] %v4509_v51  ;;  %v3974_v19 = vadd.f32 %v8345_v23, %v3906_v47  ;;  %v3614_v8 = vadd.f32 %v8339_v57, %v3546_v35 }
 0x687   :  { %v4234_v22 = vpop.f32.mrf.mxu3 }
 0x688   :  { %v4378_v0 = vmul.f32 %v8570_v40, %v4234_v22  ;;  %4947 = vmatmul.msk.f32.gmra.mxu2 %vm125_vm0, %v5035_v28  ;;  %v4038_v18 = vadd.f32 %v3974_v19, %v3613_v52 }
 0x68a   :  { %v4446_v11 = vadd.f32 %v8583_v20, %v4378_v0  ;;  %v3444_v2 = vpop.f32.mrf.mxu1  ;;  %v4102_v56 = vmax.f32 %v4038_v18, 0.0 }
 0x68b   :  { %v3799_v10 = vpop.f32.mrf.mxu2  ;;  %v3445_v15 = vadd.f32 %v3444_v2, %v3236_v26 }
 0x68c   :  { %v4510_v32 = vmax.f32 %v4446_v11, 0.0  ;;  %v3907_v13 = vmul.f32 %v8366_v43, %v3799_v10  ;;  %4284 = vmatmul.f32.gmra.mxu3 %v4102_v56  ;;  %v5039_v11 = vld [vmem:[%s8825_s0 + $0x1f8] sm:$0xff]  ;;  %v3250_v2 = vpop.f32.mrf.mxu0  ;;  %v9779_v56 = vld [vmem:[#allocation176_spill] sm:$0xff]  ;;  %v9780_v10 = vld [vmem:[#allocation162_spill] sm:$0xff] }
 0x68d   :  { %3491 = vmatmul.f32.gmra.mxu1 %v9712_v3  ;;  %v3547_v3 = vmul.f32 %v8357_v45, %v3442_v59  ;;  %v3548_v47 = vmul.f32 %v8357_v45, %v3445_v15  ;;  %v3033_v46 = vadd.f32 %v9780_v10, %v9779_v56 }
 0x68e   :  { %4574 = vst [vmem:[#allocation5 + $0xd0] sm:$0xff] %v4510_v32  ;;  %v3975_v21 = vadd.f32 %v8345_v23, %v3907_v13 }
 0x68f   :  { %v4237_v53 = vpop.f32.mrf.mxu3  ;;  %v3615_v41 = vadd.f32 %v8339_v57, %v3547_v3  ;;  %v3616_v18 = vadd.f32 %v8339_v57, %v3548_v47 }
 0x690   :  { %v4379_v61 = vmul.f32 %v8570_v40, %v4237_v53  ;;  %4948 = vmatmul.msk.f32.gmra.mxu2 %vm125_vm0, %v5037_v4  ;;  %v4039_v36 = vadd.f32 %v3975_v21, %v3614_v8  ;;  %v3242_v53 = vadd.f32 %v8560_v5, %v3033_v46 }
 0x692   :  { %v4447_v50 = vadd.f32 %v8583_v20, %v4379_v61  ;;  %v3447_v55 = vpop.f32.mrf.mxu1  ;;  %v4103_v58 = vmax.f32 %v4039_v36, 0.0 }
 0x693   :  { %v3802_v44 = vpop.f32.mrf.mxu2 }
 0x694   :  { %v4511_v30 = vmax.f32 %v4447_v50, 0.0  ;;  %v3908_v37 = vmul.f32 %v8366_v43, %v3802_v44  ;;  %4287 = vmatmul.f32.gmra.mxu3 %v4103_v58  ;;  %v9782_v58 = vld [vmem:[#allocation166_spill] sm:$0xff] }
 0x695   :  { %3494 = vmatmul.f32.gmra.mxu1 %v9714_v31  ;;  %v9778_v31 = vld [vmem:[#allocation158_spill] sm:$0xff] }
 0x696   :  { %4575 = vst [vmem:[#allocation5 + $0xd8] sm:$0xff] %v4511_v30  ;;  %v3976_v33 = vadd.f32 %v8345_v23, %v3908_v37  ;;  %v3030_v51 = vadd.f32 %v9778_v31, %v9777_v63 }
 0x697   :  { %v4240_v34 = vpop.f32.mrf.mxu3 }
 0x698   :  { %v4380_v7 = vmul.f32 %v8570_v40, %v4240_v34  ;;  %4949 = vmatmul.msk.f32.gmra.mxu2 %vm125_vm0, %v5038_v39  ;;  %v4040_v27 = vadd.f32 %v3976_v33, %v3615_v41  ;;  %v3239_v22 = vadd.f32 %v8540_v14, %v3030_v51  ;;  %v3253_v41 = vpop.f32.mrf.mxu0 }
 0x69a   :  { %v4448_v29 = vadd.f32 %v8583_v20, %v4380_v7  ;;  %v3450_v52 = vpop.f32.mrf.mxu1  ;;  %v4104_v9 = vmax.f32 %v4040_v27, 0.0  ;;  %v3448_v60 = vadd.f32 %v3447_v55, %v3239_v22  ;;  %v9781_v55 = vld [vmem:[#allocation116_spill] sm:$0xff] }
 0x69b   :  { %v3805_v19 = vpop.f32.mrf.mxu2  ;;  %v3451_v25 = vadd.f32 %v3450_v52, %v3242_v53  ;;  %v3036_v44 = vadd.f32 %v9782_v58, %v9781_v55  ;;  %v9784_v52 = vld [vmem:[#allocation157_spill] sm:$0xff]  ;;  %v9786_v58 = vld [vmem:[#allocation184_spill] sm:$0xff] }
 0x69c   :  { %v4512_v0 = vmax.f32 %v4448_v29, 0.0  ;;  %v3909_v28 = vmul.f32 %v8366_v43, %v3805_v19  ;;  %4290 = vmatmul.f32.gmra.mxu3 %v4104_v9  ;;  %v3549_v32 = vmul.f32 %v8357_v45, %v3448_v60  ;;  %v9783_v29 = vld [vmem:[#allocation180_spill] sm:$0xff] }
 0x69d   :  { %v3550_v26 = vmul.f32 %v8357_v45, %v3451_v25  ;;  %v3245_v33 = vadd.f32 %v8588_v42, %v3036_v44  ;;  %v3039_v9 = vadd.f32 %v9784_v52, %v9783_v29  ;;  %v9787_v44 = vld [vmem:[#allocation163_spill] sm:$0xff]  ;;  %v9788_v52 = vld [vmem:[#allocation124_spill] sm:$0xff] }
 0x69e   :  { %4576 = vst [vmem:[#allocation5 + $0xe0] sm:$0xff] %v4512_v0  ;;  %v3977_v38 = vadd.f32 %v8345_v23, %v3909_v28  ;;  %v3617_v36 = vadd.f32 %v8339_v57, %v3549_v32  ;;  %v9785_v32 = vld [vmem:[#allocation120_spill] sm:$0xff] }
 0x69f   :  { %v4243_v24 = vpop.f32.mrf.mxu3  ;;  %v3618_v39 = vadd.f32 %v8339_v57, %v3550_v26  ;;  %v3045_v26 = vadd.f32 %v9787_v44, %v9786_v58 }
 0x6a0   :  { %v4381_v35 = vmul.f32 %v8570_v40, %v4243_v24  ;;  %4950 = vmatmul.msk.f32.gmra.mxu2 %vm125_vm0, %v5039_v11  ;;  %v4041_v14 = vadd.f32 %v3977_v38, %v3616_v18  ;;  %v3248_v18 = vadd.f32 %v8607_v16, %v3039_v9  ;;  %v3256_v24 = vpop.f32.mrf.mxu0  ;;  %v9789_v9 = vld [vmem:[#allocation170_spill] sm:$0xff] }
 0x6a2   :  { %v4449_v13 = vadd.f32 %v8583_v20, %v4381_v35  ;;  %v3453_v8 = vpop.f32.mrf.mxu1  ;;  %v4105_v59 = vmax.f32 %v4041_v14, 0.0 }
 0x6a3   :  { %v3808_v21 = vpop.f32.mrf.mxu2  ;;  %v3454_v27 = vadd.f32 %v3453_v8, %v3245_v33  ;;  %v3254_v33 = vadd.f32 %v3253_v41, %v3045_v26 }
 0x6a4   :  { %v4513_v61 = vmax.f32 %v4449_v13, 0.0  ;;  %v3910_v4 = vmul.f32 %v8366_v43, %v3808_v21  ;;  %4293 = vmatmul.f32.gmra.mxu3 %v4105_v59  ;;  %v3042_v13 = vadd.f32 %v7903_v62, %v9785_v32  ;;  %v9790_v32 = vld [vmem:[#allocation127_spill] sm:$0xff] }
 0x6a5   :  { %v3551_v19 = vmul.f32 %v8357_v45, %v3454_v27 }
 0x6a6   :  { %4577 = vst [vmem:[#allocation5 + $0xe8] sm:$0xff] %v4513_v61  ;;  %v3978_v17 = vadd.f32 %v8345_v23, %v3910_v4  ;;  %v3251_v61 = vadd.f32 %v3250_v2, %v3042_v13  ;;  %v3051_v13 = vadd.f32 %v7959_v6, %v9790_v32 }
 0x6a7   :  { %v4246_v12 = vpop.f32.mrf.mxu3  ;;  %v3619_v35 = vadd.f32 %v8339_v57, %v3551_v19  ;;  %v3048_v19 = vadd.f32 %v9789_v9, %v9788_v52 }
 0x6a8   :  { %v4382_v3 = vmul.f32 %v8570_v40, %v4246_v12  ;;  %v4042_v50 = vadd.f32 %v3978_v17, %v3617_v36 }
 0x6aa   :  { %v4450_v5 = vadd.f32 %v8583_v20, %v4382_v3  ;;  %v3456_v30 = vpop.f32.mrf.mxu1  ;;  %v4106_v37 = vmax.f32 %v4042_v50, 0.0  ;;  %v3259_v3 = vpop.f32.mrf.mxu0 }
 0x6ab   :  { %v3811_v15 = vpop.f32.mrf.mxu2  ;;  %v3457_v11 = vadd.f32 %v3456_v30, %v3248_v18  ;;  %v3257_v18 = vadd.f32 %v3256_v24, %v3048_v19 }
 0x6ac   :  { %v4514_v34 = vmax.f32 %v4450_v5, 0.0  ;;  %v3911_v7 = vmul.f32 %v8366_v43, %v3811_v15  ;;  %4296 = vmatmul.f32.gmra.mxu3 %v4106_v37 }
 0x6ad   :  { %v3552_v16 = vmul.f32 %v8357_v45, %v3457_v11 }
 0x6ae   :  { %4578 = vst [vmem:[#allocation5 + $0xf0] sm:$0xff] %v4514_v34  ;;  %v3979_v63 = vadd.f32 %v8345_v23, %v3911_v7 }
 0x6af   :  { %v4249_v31 = vpop.f32.mrf.mxu3  ;;  %v3620_v25 = vadd.f32 %v8339_v57, %v3552_v16 }
 0x6b0   :  { %v4383_v51 = vmul.f32 %v8570_v40, %v4249_v31  ;;  %v4043_v47 = vadd.f32 %v3979_v63, %v3618_v39 }
 0x6b2   :  { %v4451_v42 = vadd.f32 %v8583_v20, %v4383_v51  ;;  %v3459_v22 = vpop.f32.mrf.mxu1  ;;  %v4107_v0 = vmax.f32 %v4043_v47, 0.0  ;;  %v3262_v29 = vpop.f32.mrf.mxu0 }
 0x6b3   :  { %v3814_v28 = vpop.f32.mrf.mxu2  ;;  %v3460_v17 = vadd.f32 %v3459_v22, %v3251_v61  ;;  %v3260_v61 = vadd.f32 %v3259_v3, %v3051_v13 }
 0x6b4   :  { %v4515_v60 = vmax.f32 %v4451_v42, 0.0  ;;  %v3912_v38 = vmul.f32 %v8366_v43, %v3814_v28  ;;  %4299 = vmatmul.f32.gmra.mxu3 %v4107_v0 }
 0x6b5   :  { %v3553_v2 = vmul.f32 %v8357_v45, %v3460_v17 }
 0x6b6   :  { %4579 = vst [vmem:[#allocation5 + $0xf8] sm:$0xff] %v4515_v60  ;;  %v3980_v14 = vadd.f32 %v8345_v23, %v3912_v38 }
 0x6b7   :  { %v4252_v56 = vpop.f32.mrf.mxu3  ;;  %v3621_v39 = vadd.f32 %v8339_v57, %v3553_v2 }
 0x6b8   :  { %v4384_v10 = vmul.f32 %v8570_v40, %v4252_v56  ;;  %v4044_v46 = vadd.f32 %v3980_v14, %v3619_v35 }
 0x6ba   :  { %v4452_v8 = vadd.f32 %v8583_v20, %v4384_v10  ;;  %v3462_v59 = vpop.f32.mrf.mxu1  ;;  %v4108_v21 = vmax.f32 %v4044_v46, 0.0 }
 0x6bb   :  { %v3817_v53 = vpop.f32.mrf.mxu2  ;;  %v3463_v27 = vadd.f32 %v3462_v59, %v3254_v33 }
 0x6bc   :  { %v4516_v4 = vmax.f32 %v4452_v8, 0.0  ;;  %v3913_v36 = vmul.f32 %v8366_v43, %v3817_v53  ;;  %4302 = vmatmul.f32.gmra.mxu3 %v4108_v21  ;;  %v3265_v21 = vpop.f32.mrf.mxu0 }
 0x6bd   :  { %v3554_v41 = vmul.f32 %v8357_v45, %v3463_v27 }
 0x6be   :  { %4580 = vst [vmem:[#allocation5 + $0x100] sm:$0xff] %v4516_v4  ;;  %v3981_v12 = vadd.f32 %v8345_v23, %v3913_v36 }
 0x6bf   :  { %v4255_v62 = vpop.f32.mrf.mxu3  ;;  %v3622_v35 = vadd.f32 %v8339_v57, %v3554_v41 }
 0x6c0   :  { %v4385_v50 = vmul.f32 %v8570_v40, %v4255_v62  ;;  %v4045_v55 = vadd.f32 %v3981_v12, %v3620_v25 }
 0x6c2   :  { %v4453_v5 = vadd.f32 %v8583_v20, %v4385_v50  ;;  %v3465_v30 = vpop.f32.mrf.mxu1  ;;  %v4109_v37 = vmax.f32 %v4045_v55, 0.0  ;;  %v9791_v55 = vld [vmem:[#allocation131_spill] sm:$0xff] }
 0x6c3   :  { %v3820_v15 = vpop.f32.mrf.mxu2  ;;  %v3466_v11 = vadd.f32 %v3465_v30, %v3257_v18  ;;  %v3054_v58 = vadd.f32 %v7979_v54, %v9791_v55 }
 0x6c4   :  { %v4517_v34 = vmax.f32 %v4453_v5, 0.0  ;;  %v3914_v7 = vmul.f32 %v8366_v43, %v3820_v15  ;;  %4305 = vmatmul.f32.gmra.mxu3 %v4109_v37  ;;  %v3268_v33 = vpop.f32.mrf.mxu0 }
 0x6c5   :  { %v3555_v16 = vmul.f32 %v8357_v45, %v3466_v11  ;;  %v3263_v30 = vadd.f32 %v3262_v29, %v3054_v58 }
 0x6c6   :  { %4581 = vst [vmem:[#allocation5 + $0x108] sm:$0xff] %v4517_v34  ;;  %v3982_v63 = vadd.f32 %v8345_v23, %v3914_v7 }
 0x6c7   :  { %v4258_v31 = vpop.f32.mrf.mxu3  ;;  %v3623_v25 = vadd.f32 %v8339_v57, %v3555_v16 }
 0x6c8   :  { %v4386_v51 = vmul.f32 %v8570_v40, %v4258_v31  ;;  %v4046_v47 = vadd.f32 %v3982_v63, %v3621_v39  ;;  %v9792_v31 = vld [vmem:[#allocation198_spill] sm:$0xff] }
 0x6ca   :  { %v4454_v42 = vadd.f32 %v8583_v20, %v4386_v51  ;;  %v3468_v22 = vpop.f32.mrf.mxu1  ;;  %v4110_v0 = vmax.f32 %v4046_v47, 0.0  ;;  %v9793_v51 = vld [vmem:[#allocation161_spill] sm:$0xff] }
 0x6cb   :  { %v3823_v28 = vpop.f32.mrf.mxu2  ;;  %v3469_v17 = vadd.f32 %v3468_v22, %v3260_v61  ;;  %v3057_v47 = vadd.f32 %v9793_v51, %v9792_v31 }
 0x6cc   :  { %v4518_v60 = vmax.f32 %v4454_v42, 0.0  ;;  %v3915_v38 = vmul.f32 %v8366_v43, %v3823_v28  ;;  %4308 = vmatmul.f32.gmra.mxu3 %v4110_v0 }
 0x6cd   :  { %v3556_v44 = vmul.f32 %v8357_v45, %v3469_v17  ;;  %v3266_v42 = vadd.f32 %v3265_v21, %v3057_v47 }
 0x6ce   :  { %4582 = vst [vmem:[#allocation5 + $0x110] sm:$0xff] %v4518_v60  ;;  %v3983_v14 = vadd.f32 %v8345_v23, %v3915_v38  ;;  %v3271_v38 = vpop.f32.mrf.mxu0 }
 0x6cf   :  { %v4261_v56 = vpop.f32.mrf.mxu3  ;;  %v3624_v34 = vadd.f32 %v8339_v57, %v3556_v44 }
 0x6d0   :  { %v4387_v10 = vmul.f32 %v8570_v40, %v4261_v56  ;;  %v4047_v46 = vadd.f32 %v3983_v14, %v3622_v35  ;;  %v9794_v56 = vld [vmem:[#allocation143_spill] sm:$0xff] }
 0x6d2   :  { %v4455_v24 = vadd.f32 %v8583_v20, %v4387_v10  ;;  %v3471_v8 = vpop.f32.mrf.mxu1  ;;  %v4111_v59 = vmax.f32 %v4047_v46, 0.0  ;;  %v9795_v10 = vld [vmem:[#allocation167_spill] sm:$0xff] }
 0x6d3   :  { %v3826_v53 = vpop.f32.mrf.mxu2  ;;  %v3472_v7 = vadd.f32 %v3471_v8, %v3263_v30  ;;  %v3060_v46 = vadd.f32 %v9795_v10, %v9794_v56 }
 0x6d4   :  { %v4519_v4 = vmax.f32 %v4455_v24, 0.0  ;;  %v3916_v36 = vmul.f32 %v8366_v43, %v3826_v53  ;;  %4311 = vmatmul.f32.gmra.mxu3 %v4111_v59 }
 0x6d5   :  { %v3557_v29 = vmul.f32 %v8357_v45, %v3472_v7  ;;  %v3269_v59 = vadd.f32 %v3268_v33, %v3060_v46 }
 0x6d6   :  { %4583 = vst [vmem:[#allocation5 + $0x118] sm:$0xff] %v4519_v4  ;;  %v3984_v12 = vadd.f32 %v8345_v23, %v3916_v36 }
 0x6d7   :  { %v4264_v6 = vpop.f32.mrf.mxu3  ;;  %v3625_v28 = vadd.f32 %v8339_v57, %v3557_v29 }
 0x6d8   :  { %v4388_v62 = vmul.f32 %v8570_v40, %v4264_v6  ;;  %v4048_v50 = vadd.f32 %v3984_v12, %v3623_v25  ;;  %v3274_v6 = vpop.f32.mrf.mxu0 }
 0x6da   :  { %v4456_v3 = vadd.f32 %v8583_v20, %v4388_v62  ;;  %v3474_v26 = vpop.f32.mrf.mxu1  ;;  %v4112_v2 = vmax.f32 %v4048_v50, 0.0  ;;  %v9796_v62 = vld [vmem:[#allocation150_spill] sm:$0xff] }
 0x6db   :  { %v3829_v5 = vpop.f32.mrf.mxu2  ;;  %v3475_v18 = vadd.f32 %v3474_v26, %v3266_v42  ;;  %v9797_v50 = vld [vmem:[#allocation174_spill] sm:$0xff] }
 0x6dc   :  { %v4520_v37 = vmax.f32 %v4456_v3, 0.0  ;;  %v3917_v15 = vmul.f32 %v8366_v43, %v3829_v5  ;;  %4314 = vmatmul.f32.gmra.mxu3 %v4112_v2  ;;  %v3063_v55 = vadd.f32 %v9797_v50, %v9796_v62 }
 0x6dd   :  { %v3558_v32 = vmul.f32 %v8357_v45, %v3475_v18 }
 0x6de   :  { %4584 = vst [vmem:[#allocation5 + $0x120] sm:$0xff] %v4520_v37  ;;  %v3985_v39 = vadd.f32 %v8345_v23, %v3917_v15 }
 0x6df   :  { %v4267_v54 = vpop.f32.mrf.mxu3  ;;  %v3626_v61 = vadd.f32 %v8339_v57, %v3558_v32  ;;  %v3272_v57 = vadd.f32 %v3271_v38, %v3063_v55  ;;  %v9799_v38 = vld [vmem:[#allocation151_spill] sm:$0xff] }
 0x6e0   :  { %v4389_v27 = vmul.f32 %v8570_v40, %v4267_v54  ;;  %v4049_v63 = vadd.f32 %v3985_v39, %v3624_v34  ;;  %v9798_v39 = vld [vmem:[#allocation154_spill] sm:$0xff]  ;;  %v3277_v47 = vpop.f32.mrf.mxu0 }
 0x6e1   :  { %v3066_v54 = vadd.f32 %v8055_v49, %v9798_v39 }
 0x6e2   :  { %v4457_v52 = vadd.f32 %v8583_v20, %v4389_v27  ;;  %v3477_v9 = vpop.f32.mrf.mxu1  ;;  %v4113_v19 = vmax.f32 %v4049_v63, 0.0  ;;  %v8733_v27 = vld [vmem:[%s8830_s5] ss:$0 sm:$0xff]  ;;  %s5100_s5 = smov [#allocation5]  }
 0x6e3   :  { %v3832_v41 = vpop.f32.mrf.mxu2  ;;  %v3478_v4 = vadd.f32 %v3477_v9, %v3269_v59 }
 0x6e4   :  { %v4521_v22 = vmax.f32 %v4457_v52, 0.0  ;;  %v3918_v0 = vmul.f32 %v8366_v43, %v3832_v41  ;;  %4317 = vmatmul.f32.gmra.mxu3 %v4113_v19  ;;  %v3275_v52 = vadd.f32 %v3274_v6, %v3066_v54  ;;  %v8740_v19 = vld [vmem:[%s8833_s8] ss:$0 sm:$0xff]  ;;  %s4616_s8 = sshll.u32 %s5100_s5, 4  ;;  %s4617_s8 = int_to_ptr.vmem [resolvable:$true] %s4616_s8 }
 0x6e5   :  { %v3559_v58 = vmul.f32 %v8357_v45, %v3478_v4  ;;  %v8724_v45 = vld [vmem:[%s8834_s9] ss:$0 sm:$0xff]  ;;  %v9800_v4 = vld [vmem:[#allocation149_spill] sm:$0xff] }
 0x6e6   :  { %4585 = vst [vmem:[#allocation5 + $0x128] sm:$0xff] %v4521_v22  ;;  %v3986_v60 = vadd.f32 %v8345_v23, %v3918_v0 }
 0x6e7   :  { %v4270_v35 = vpop.f32.mrf.mxu3 }
 0x6e8   :  { %v4390_v11 = vmul.f32 %v8570_v40, %v4270_v35  ;;  %v4050_v14 = vadd.f32 %v3986_v60, %v3625_v28  ;;  %v3069_v35 = vadd.f32 %v8072_v48, %v9799_v38 }
 0x6ea   :  { %v4458_v13 = vadd.f32 %v8583_v20, %v4390_v11  ;;  %v3480_v16 = vpop.f32.mrf.mxu1  ;;  %v4114_v24 = vmax.f32 %v4050_v14, 0.0  ;;  %v3278_v46 = vadd.f32 %v3277_v47, %v3069_v35 }
 0x6eb   :  { %v3835_v8 = vpop.f32.mrf.mxu2  ;;  %v3481_v15 = vadd.f32 %v3480_v16, %v3272_v57  ;;  %v3280_v16 = vpop.f32.mrf.mxu0 }
 0x6ec   :  { %v4522_v21 = vmax.f32 %v4458_v13, 0.0  ;;  %v3919_v53 = vmul.f32 %v8366_v43, %v3835_v8  ;;  %4320 = vmatmul.f32.gmra.mxu3 %v4114_v24 }
 0x6ed   :  { %v3560_v63 = vmul.f32 %v8733_v27, %v3481_v15 }
 0x6ee   :  { %4586 = vst [vmem:[#allocation5 + $0x130] sm:$0xff] %v4522_v21  ;;  %v3987_v36 = vadd.f32 %v8345_v23, %v3919_v53  ;;  %v8718_v23 = vld [vmem:[%s8831_s6] ss:$0 sm:$0xff] }
 0x6ef   :  { %v4273_v25 = vpop.f32.mrf.mxu3  ;;  %v3627_v37 = vadd.f32 %v8718_v23, %v3559_v58  ;;  %v3628_v42 = vadd.f32 %v8718_v23, %v3560_v63 }
 0x6f0   :  { %v4391_v17 = vmul.f32 %v8570_v40, %v4273_v25  ;;  %v4051_v12 = vadd.f32 %v3987_v36, %v3626_v61  ;;  %v3072_v36 = vadd.f32 %v8091_v1, %v9800_v4 }
 0x6f2   :  { %v4459_v44 = vadd.f32 %v8583_v20, %v4391_v17  ;;  %v4115_v3 = vmax.f32 %v4051_v12, 0.0  ;;  %v3483_v26 = vpop.f32.mrf.mxu1  ;;  %v3281_v62 = vadd.f32 %v3280_v16, %v3072_v36 }
 0x6f3   :  { %v3838_v2 = vpop.f32.mrf.mxu2  ;;  %v3484_v22 = vadd.f32 %v3483_v26, %v3275_v52  ;;  %v3283_v26 = vpop.f32.mrf.mxu0 }
 0x6f4   :  { %v4523_v5 = vmax.f32 %v4459_v44, 0.0  ;;  %v3920_v30 = vmul.f32 %v8366_v43, %v3838_v2  ;;  %4323 = vmatmul.f32.gmra.mxu3 %v4115_v3 }
 0x6f5   :  { %v3561_v11 = vmul.f32 %v8733_v27, %v3484_v22 }
 0x6f6   :  { %4587 = vst [vmem:[#allocation5 + $0x138] sm:$0xff] %v4523_v5  ;;  %v3988_v33 = vadd.f32 %v8724_v45, %v3920_v30  ;;  %v9801_v30 = vld [vmem:[#allocation153_spill] sm:$0xff] }
 0x6f7   :  { %v4276_v34 = vpop.f32.mrf.mxu3  ;;  %v3629_v24 = vadd.f32 %v8718_v23, %v3561_v11 }
 0x6f8   :  { %v4392_v43 = vmul.f32 %v8570_v40, %v4276_v34  ;;  %v4052_v7 = vadd.f32 %v3988_v33, %v3627_v37  ;;  %v9802_v37 = vld [vmem:[#allocation165_spill] sm:$0xff] }
 0x6f9   :  { %v3075_v15 = vadd.f32 %v9802_v37, %v9801_v30 }
 0x6fa   :  { %v4460_v31 = vadd.f32 %v8583_v20, %v4392_v43  ;;  %v4116_v51 = vmax.f32 %v4052_v7, 0.0  ;;  %v3486_v41 = vpop.f32.mrf.mxu1 }
 0x6fb   :  { %v3841_v29 = vpop.f32.mrf.mxu2  ;;  %v3487_v8 = vadd.f32 %v3486_v41, %v3278_v46  ;;  %v3284_v39 = vadd.f32 %v3283_v26, %v3075_v15  ;;  %v9803_v41 = vld [vmem:[#allocation159_spill] sm:$0xff] }
 0x6fc   :  { %v4524_v9 = vmax.f32 %v4460_v31, 0.0  ;;  %v3921_v49 = vmul.f32 %v8740_v19, %v3841_v29  ;;  %4326 = vmatmul.f32.gmra.mxu3 %v4116_v51 }
 0x6fd   :  { %v3562_v25 = vmul.f32 %v8733_v27, %v3487_v8 }
 0x6fe   :  { %4588 = vst [vmem:[#allocation5 + $0x140] sm:$0xff] %v4524_v9  ;;  %v3989_v0 = vadd.f32 %v8724_v45, %v3921_v49  ;;  %v3286_v49 = vpop.f32.mrf.mxu0 }
 0x6ff   :  { %v4279_v28 = vpop.f32.mrf.mxu3  ;;  %v3630_v58 = vadd.f32 %v8718_v23, %v3562_v25 }
 0x700   :  { %v4393_v18 = vmul.f32 %v8570_v40, %v4279_v28  ;;  %v4053_v60 = vadd.f32 %v3989_v0, %v3628_v42  ;;  %v9804_v42 = vld [vmem:[#allocation171_spill] sm:$0xff] }
 0x701   :  { %v3078_v22 = vadd.f32 %v9804_v42, %v9803_v41 }
 0x702   :  { %v4461_v14 = vadd.f32 %v8583_v20, %v4393_v18  ;;  %v4117_v56 = vmax.f32 %v4053_v60, 0.0  ;;  %v3489_v21 = vpop.f32.mrf.mxu1 }
 0x703   :  { %v3844_v10 = vpop.f32.mrf.mxu2  ;;  %v3490_v44 = vadd.f32 %v3489_v21, %v3281_v62  ;;  %v3287_v35 = vadd.f32 %v3286_v49, %v3078_v22 }
 0x704   :  { %v4525_v32 = vmax.f32 %v4461_v14, 0.0  ;;  %v3922_v13 = vmul.f32 %v8740_v19, %v3844_v10  ;;  %4329 = vmatmul.f32.gmra.mxu3 %v4117_v56 }
 0x705   :  { %v3563_v33 = vmul.f32 %v8733_v27, %v3490_v44 }
 0x706   :  { %4589 = vst [vmem:[#allocation5 + $0x148] sm:$0xff] %v4525_v32  ;;  %v3990_v59 = vadd.f32 %v8724_v45, %v3922_v13 }
 0x707   :  { %v4282_v48 = vpop.f32.mrf.mxu3  ;;  %v3631_v31 = vadd.f32 %v8718_v23, %v3563_v33 }
 0x708   :  { %v4394_v53 = vmul.f32 %v8570_v40, %v4282_v48  ;;  %v4054_v61 = vadd.f32 %v3990_v59, %v3629_v24 }
 0x70a   :  { %v4462_v17 = vadd.f32 %v8583_v20, %v4394_v53  ;;  %v4118_v12 = vmax.f32 %v4054_v61, 0.0  ;;  %v3492_v5 = vpop.f32.mrf.mxu1 }
 0x70b   :  { %v3847_v6 = vpop.f32.mrf.mxu2  ;;  %v3493_v51 = vadd.f32 %v3492_v5, %v3284_v39 }
 0x70c   :  { %v4526_v50 = vmax.f32 %v4462_v17, 0.0  ;;  %v3923_v55 = vmul.f32 %v8740_v19, %v3847_v6  ;;  %4332 = vmatmul.f32.gmra.mxu3 %v4118_v12 }
 0x70d   :  { %v3564_v0 = vmul.f32 %v8733_v27, %v3493_v51 }
 0x70e   :  { %4590 = vst [vmem:[#allocation5 + $0x150] sm:$0xff] %v4526_v50  ;;  %v3991_v3 = vadd.f32 %v8724_v45, %v3923_v55 }
 0x70f   :  { %v4285_v2 = vpop.f32.mrf.mxu3  ;;  %v3632_v56 = vadd.f32 %v8718_v23, %v3564_v0 }
 0x710   :  { %v4395_v1 = vmul.f32 %v8570_v40, %v4285_v2  ;;  %v4055_v57 = vadd.f32 %v3991_v3, %v3630_v58 }
 0x712   :  { %v4463_v34 = vadd.f32 %v8583_v20, %v4395_v1  ;;  %v4119_v43 = vmax.f32 %v4055_v57, 0.0  ;;  %v3495_v60 = vpop.f32.mrf.mxu1 }
 0x713   :  { %v3850_v7 = vpop.f32.mrf.mxu2  ;;  %v3496_v10 = vadd.f32 %v3495_v60, %v3287_v35 }
 0x714   :  { %v4527_v54 = vmax.f32 %v4463_v34, 0.0  ;;  %v3924_v63 = vmul.f32 %v8740_v19, %v3850_v7  ;;  %4335 = vmatmul.f32.gmra.mxu3 %v4119_v43 }
 0x715   :  { %v3565_v24 = vmul.f32 %v8733_v27, %v3496_v10 }
 0x716   :  { %4591 = vst [vmem:[#allocation5 + $0x158] sm:$0xff] %v4527_v54  ;;  %v3992_v47 = vadd.f32 %v8724_v45, %v3924_v63 }
 0x717   :  { %v4288_v29 = vpop.f32.mrf.mxu3  ;;  %v3633_v61 = vadd.f32 %v8718_v23, %v3565_v24 }
 0x718   :  { %v4396_v52 = vmul.f32 %v8570_v40, %v4288_v29  ;;  %v4056_v9 = vadd.f32 %v3992_v47, %v3631_v31 }
 0x71a   :  { %v4464_v28 = vadd.f32 %v8583_v20, %v4396_v52  ;;  %v4120_v18 = vmax.f32 %v4056_v9, 0.0 }
 0x71b   :  { %v3853_v38 = vpop.f32.mrf.mxu2 }
 0x71c   :  { %v4528_v11 = vmax.f32 %v4464_v28, 0.0  ;;  %v3925_v14 = vmul.f32 %v8740_v19, %v3853_v38  ;;  %4338 = vmatmul.f32.gmra.mxu3 %v4120_v18 }
 0x71e   :  { %4592 = vst [vmem:[#allocation5 + $0x160] sm:$0xff] %v4528_v11  ;;  %v3993_v46 = vadd.f32 %v8724_v45, %v3925_v14 }
 0x71f   :  { %v4291_v32 = vpop.f32.mrf.mxu3 }
 0x720   :  { %v4397_v13 = vmul.f32 %v8570_v40, %v4291_v32  ;;  %v4057_v16 = vadd.f32 %v3993_v46, %v3632_v56 }
 0x722   :  { %v4465_v8 = vadd.f32 %v8583_v20, %v4397_v13  ;;  %v4121_v59 = vmax.f32 %v4057_v16, 0.0 }
 0x723   :  { %v3856_v21 = vpop.f32.mrf.mxu2 }
 0x724   :  { %v4529_v48 = vmax.f32 %v4465_v8, 0.0  ;;  %v3926_v53 = vmul.f32 %v8740_v19, %v3856_v21  ;;  %4341 = vmatmul.f32.gmra.mxu3 %v4121_v59 }
 0x726   :  { %4593 = vst [vmem:[#allocation5 + $0x168] sm:$0xff] %v4529_v48  ;;  %v3994_v4 = vadd.f32 %v8724_v45, %v3926_v53 }
 0x727   :  { %v4294_v36 = vpop.f32.mrf.mxu3 }
 0x728   :  { %v4398_v25 = vmul.f32 %v8570_v40, %v4294_v36  ;;  %v4058_v17 = vadd.f32 %v3994_v4, %v3633_v61 }
 0x72a   :  { %v4466_v12 = vadd.f32 %v8583_v20, %v4398_v25  ;;  %v4122_v27 = vmax.f32 %v4058_v17, 0.0 }
 0x72c   :  { %v4530_v6 = vmax.f32 %v4466_v12, 0.0  ;;  %4344 = vmatmul.f32.gmra.mxu3 %v4122_v27 }
 0x72e   :  { %4594 = vst [vmem:[#allocation5 + $0x170] sm:$0xff] %v4530_v6 }
 0x72f   :  { %v4297_v62 = vpop.f32.mrf.mxu3 }
 0x730   :  { %v4399_v50 = vmul.f32 %v8570_v40, %v4297_v62 }
 0x732   :  { %v4467_v19 = vadd.f32 %v8583_v20, %v4399_v50 }
 0x734   :  { %v4531_v55 = vmax.f32 %v4467_v19, 0.0 }
 0x736   :  { %4595 = vst [vmem:[#allocation5 + $0x178] sm:$0xff] %v4531_v55 }
 0x737   :  { %v4300_v23 = vpop.f32.mrf.mxu3 }
 0x738   :  { %v4400_v45 = vmul.f32 %v8570_v40, %v4300_v23 }
 0x73a   :  { %v4468_v58 = vadd.f32 %v8583_v20, %v4400_v45 }
 0x73c   :  { %v4532_v44 = vmax.f32 %v4468_v58, 0.0 }
 0x73e   :  { %4596 = vst [vmem:[#allocation5 + $0x180] sm:$0xff] %v4532_v44 }
 0x73f   :  { %v4303_v3 = vpop.f32.mrf.mxu3 }
 0x740   :  { %v4401_v26 = vmul.f32 %v8570_v40, %v4303_v3 }
 0x742   :  { %v4469_v2 = vadd.f32 %v8583_v20, %v4401_v26 }
 0x744   :  { %v4533_v1 = vmax.f32 %v4469_v2, 0.0 }
 0x746   :  { %4597 = vst [vmem:[#allocation5 + $0x188] sm:$0xff] %v4533_v1 }
 0x747   :  { %v4306_v57 = vpop.f32.mrf.mxu3 }
 0x748   :  { %v4402_v5 = vmul.f32 %v8570_v40, %v4306_v57 }
 0x74a   :  { %v4470_v30 = vadd.f32 %v8583_v20, %v4402_v5 }
 0x74c   :  { %v4534_v37 = vmax.f32 %v4470_v30, 0.0 }
 0x74e   :  { %4598 = vst [vmem:[#allocation5 + $0x190] sm:$0xff] %v4534_v37 }
 0x74f   :  { %v4309_v15 = vpop.f32.mrf.mxu3 }
 0x750   :  { %v4403_v33 = vmul.f32 %v8570_v40, %v4309_v15 }
 0x752   :  { %v4471_v34 = vadd.f32 %v8583_v20, %v4403_v33 }
 0x754   :  { %v4535_v43 = vmax.f32 %v4471_v34, 0.0 }
 0x756   :  { %4599 = vst [vmem:[#allocation5 + $0x198] sm:$0xff] %v4535_v43 }
 0x757   :  { %v4312_v7 = vpop.f32.mrf.mxu3 }
 0x758   :  { %v4404_v39 = vmul.f32 %v8570_v40, %v4312_v7 }
 0x75a   :  { %v4472_v54 = vadd.f32 %v8583_v20, %v4404_v39 }
 0x75c   :  { %v4536_v63 = vmax.f32 %v4472_v54, 0.0 }
 0x75e   :  { %4600 = vst [vmem:[#allocation5 + $0x1a0] sm:$0xff] %v4536_v63 }
 0x75f   :  { %v4315_v31 = vpop.f32.mrf.mxu3 }
 0x760   :  { %v4405_v51 = vmul.f32 %v8570_v40, %v4315_v31 }
 0x762   :  { %v4473_v47 = vadd.f32 %v8583_v20, %v4405_v51 }
 0x764   :  { %v4537_v29 = vmax.f32 %v4473_v47, 0.0 }
 0x766   :  { %4601 = vst [vmem:[#allocation5 + $0x1a8] sm:$0xff] %v4537_v29 }
 0x767   :  { %v4318_v52 = vpop.f32.mrf.mxu3 }
 0x768   :  { %v4406_v9 = vmul.f32 %v8570_v40, %v4318_v52 }
 0x76a   :  { %v4474_v49 = vadd.f32 %v8583_v20, %v4406_v9 }
 0x76c   :  { %v4538_v41 = vmax.f32 %v4474_v49, 0.0 }
 0x76e   :  { %4602 = vst [vmem:[#allocation5 + $0x1b0] sm:$0xff] %v4538_v41 }
 0x76f   :  { %v4321_v42 = vpop.f32.mrf.mxu3 }
 0x770   :  { %v4407_v22 = vmul.f32 %v8570_v40, %v4321_v42 }
 0x772   :  { %v4475_v0 = vadd.f32 %v8583_v20, %v4407_v22 }
 0x774   :  { %v4539_v28 = vmax.f32 %v4475_v0, 0.0 }
 0x776   :  { %4603 = vst [vmem:[#allocation5 + $0x1b8] sm:$0xff] %v4539_v28 }
 0x777   :  { %v4324_v18 = vpop.f32.mrf.mxu3 }
 0x778   :  { %v4408_v60 = vmul.f32 %v8570_v40, %v4324_v18 }
 0x77a   :  { %v4476_v38 = vadd.f32 %v8583_v20, %v4408_v60 }
 0x77c   :  { %v4540_v35 = vmax.f32 %v4476_v38, 0.0 }
 0x77e   :  { %4604 = vst [vmem:[#allocation5 + $0x1c0] sm:$0xff] %v4540_v35 }
 0x77f   :  { %v4327_v11 = vpop.f32.mrf.mxu3 }
 0x780   :  { %v4409_v14 = vmul.f32 %v8570_v40, %v4327_v11 }
 0x782   :  { %v4477_v56 = vadd.f32 %v8583_v20, %v4409_v14 }
 0x784   :  { %v4541_v10 = vmax.f32 %v4477_v56, 0.0 }
 0x786   :  { %4605 = vst [vmem:[#allocation5 + $0x1c8] sm:$0xff] %v4541_v10 }
 0x787   :  { %v4330_v46 = vpop.f32.mrf.mxu3 }
 0x788   :  { %v4410_v32 = vmul.f32 %v8570_v40, %v4330_v46 }
 0x78a   :  { %v4478_v13 = vadd.f32 %v8583_v20, %v4410_v32 }
 0x78c   :  { %v4542_v16 = vmax.f32 %v4478_v13, 0.0 }
 0x78e   :  { %4606 = vst [vmem:[#allocation5 + $0x1d0] sm:$0xff] %v4542_v16 }
 0x78f   :  { %v4333_v24 = vpop.f32.mrf.mxu3 }
 0x790   :  { %v4411_v8 = vmul.f32 %v8570_v40, %v4333_v24 }
 0x792   :  { %v4479_v59 = vadd.f32 %v8583_v20, %v4411_v8 }
 0x794   :  { %v4543_v21 = vmax.f32 %v4479_v59, 0.0 }
 0x796   :  { %4607 = vst [vmem:[#allocation5 + $0x1d8] sm:$0xff] %v4543_v21 }
 0x797   :  { %v4336_v48 = vpop.f32.mrf.mxu3 }
 0x798   :  { %v4412_v53 = vmul.f32 %v8570_v40, %v4336_v48 }
 0x79a   :  { %v4480_v61 = vadd.f32 %v8583_v20, %v4412_v53 }
 0x79c   :  { %v4544_v4 = vmax.f32 %v4480_v61, 0.0 }
 0x79e   :  { %4608 = vst [vmem:[#allocation5 + $0x1e0] sm:$0xff] %v4544_v4 }
 0x79f   :  { %v4339_v36 = vpop.f32.mrf.mxu3 }
 0x7a0   :  { %v4413_v25 = vmul.f32 %v8570_v40, %v4339_v36 }
 0x7a2   :  { %v4481_v17 = vadd.f32 %v8583_v20, %v4413_v25 }
 0x7a4   :  { %v4545_v12 = vmax.f32 %v4481_v17, 0.0 }
 0x7a6   :  { %4609 = vst [vmem:[#allocation5 + $0x1e8] sm:$0xff] %v4545_v12 }
 0x7a7   :  { %v4342_v27 = vpop.f32.mrf.mxu3 }
 0x7a8   :  { %v4414_v6 = vmul.f32 %v8570_v40, %v4342_v27 }
 0x7aa   :  { %v4482_v62 = vadd.f32 %v8583_v20, %v4414_v6 }
 0x7ac   :  { %v4546_v50 = vmax.f32 %v4482_v62, 0.0 }
 0x7ae   :  { %4610 = vst [vmem:[#allocation5 + $0x1f0] sm:$0xff] %v4546_v50 }
 0x7af   :  { %v4345_v19 = vpop.f32.mrf.mxu3 }
 0x7b0   :  { %v4415_v55 = vmul.f32 %v8570_v40, %v4345_v19 }
 0x7b2   :  { %v4483_v23 = vadd.f32 %v8583_v20, %v4415_v55 }
 0x7b4   :  { %v4547_v45 = vmax.f32 %v4483_v23, 0.0 }
 0x7b6   :  { %4611 = vst [vmem:[#allocation5 + $0x1f8] sm:$0xff] %v4547_v45 }
 0x7b7   :  { %4624 = dma.vmem_to_hbm [thread:$0]  %s4617_s8, 8192, %s4619_s7, [#allocation4], %s5097_s30, %s5097_s30, %s5098_s14  }
 0x7b8   :  { %5094 = dma.done.wait [#allocation4], 8192  }
 0x7b9   :  { %5095 = vsyncadd [#allocation4], 4294959104 }
 0x7ba   :  { %4629 = vsyncpa [#allocation3], 1 }
 0x7bb   :  { %4630 = vsyncpa [#allocation4], 1 }

</bundles_post_ra>
